<compile_context>
chip_gen: v5e
topology: v5e:2x2
jax: 0.10.0
libtpu: 0.0.40
codegen_flags: <defaults>
</compile_context>

<pallas_src>
import functools
import math

import jax
import jax.numpy as jnp
from jax import lax
from jax.experimental import pallas as pl
from jax.experimental.pallas import tpu as pltpu

_F32 = jnp.float32
_BF16 = jnp.bfloat16


def _cdiv(a, b):
    return -(-a // b)


# ----------------------------------------------------------------------------
# In-kernel helpers (also used by the mixed-precision reference)
# ----------------------------------------------------------------------------
def _layer_norm(x, gamma, beta, eps):
    mean = jnp.mean(x, axis=-1, keepdims=True)
    xc = x - mean
    var = jnp.mean(xc * xc, axis=-1, keepdims=True)
    return xc * lax.rsqrt(var + eps) * gamma + beta


def _gelu_tanh(x):
    # TODO(synk): torch.nn.GELU() uses exact erf; the tanh approximation (max
    # abs err ~5e-4 over the relevant range, far below the bf16 matmul noise)
    # keeps the FFN elementwise path on the EUP (one tanh) instead of a long
    # VALU erf polynomial.
    c = math.sqrt(2.0 / math.pi)
    return 0.5 * x * (1.0 + jnp.tanh(c * (x + 0.044715 * (x * x * x))))


# ----------------------------------------------------------------------------
# Fused encoder kernel: one grid step = (batch chunk b, encoder layer l)
# ----------------------------------------------------------------------------
def _detr_encoder_kernel(
    h0_ref, pos_ref, mask_ref,
    wq_ref, bq_ref, wk_ref, bk_ref, wv_ref, bv_ref, wo_ref, bo_ref,
    g1_ref, be1_ref, w1_ref, b1_ref, w2_ref, b2_ref, g2_ref, be2_ref,
    out_ref, ctx_ref, *, num_heads, head_dim, ln_eps, ff_block):
    layer = pl.program_id(1)

    @pl.when(layer == 0)
    def _init():
        # Encoder input (nn.functional.dropout is identity in eval mode).
        out_ref[...] = h0_ref[...]

    h3 = out_ref[...]                    # (Bt, S, D) resident f32 hidden state
    pos3 = pos_ref[...]                  # (Bt, S, D) position embeddings
    Bt, S, D = h3.shape
    H, Hd = num_heads, head_dim
    scaling = float(Hd) ** -0.5

    h = h3.reshape(Bt * S, D)            # lane dim D preserved -> free reshape
    hp_bf = (h3 + pos3).reshape(Bt * S, D).astype(_BF16)
    h_bf = h.astype(_BF16)

    # ---------------- QKV projections: bf16 MXU, f32 accumulation -----------
    q = (jnp.dot(hp_bf, wq_ref[0], preferred_element_type=_F32)
         + bq_ref[0]) * scaling
    k = jnp.dot(hp_bf, wk_ref[0], preferred_element_type=_F32) + bk_ref[0]
    v = jnp.dot(h_bf, wv_ref[0], preferred_element_type=_F32) + bv_ref[0]
    qb = q.reshape(Bt, S, D).astype(_BF16)
    kb = k.reshape(Bt, S, D).astype(_BF16)
    vb = v.reshape(Bt, S, D).astype(_BF16)

    # ---------------- per (batch, head) attention ----------------------------
    # Each head's context lands at its lane offset in the VMEM ctx scratch so
    # the out-projection below is a single full-D-contraction matmul.
    for b in range(Bt):
        mask_b = jnp.broadcast_to(mask_ref[b], (S, S))  # hoisted out of head loop
        for hh in range(H):                              # static unroll over heads
            sl = slice(hh * Hd, (hh + 1) * Hd)
            logits = lax.dot_general(
                qb[b, :, sl], kb[b, :, sl], (((1,), (1,)), ((), ())),
                preferred_element_type=_F32) + mask_b           # (S, S) f32
            m = jnp.max(logits, axis=-1, keepdims=True)
            e = jnp.exp(logits - m)
            denom = jnp.sum(e, axis=-1, keepdims=True)
            inv = pl.reciprocal(denom, approx=True)     # EUP vrcp ...
            inv = inv * (2.0 - denom * inv)             # ... + Newton -> ~f32 exact
            p = (e * inv).astype(_BF16)
            ctx_ref[b, :, sl] = jnp.dot(p, vb[b, :, sl],
                                        preferred_element_type=_F32)

    # ---------------- ONE full-D out-projection over all heads ---------------
    attn = jnp.dot(ctx_ref[...].reshape(Bt * S, D).astype(_BF16), wo_ref[0],
                   preferred_element_type=_F32) + bo_ref[0]
    h = _layer_norm(h + attn, g1_ref[0], be1_ref[0], ln_eps)

    # ---------------- feed-forward, tiled over the intermediate dim ----------
    h_bf = h.astype(_BF16)
    inter = w1_ref.shape[-1]
    ffo = None
    for c in range(inter // ff_block):
        cs = slice(c * ff_block, (c + 1) * ff_block)
        ff = (jnp.dot(h_bf, w1_ref[0, :, cs], preferred_element_type=_F32)
              + b1_ref[0, :, cs])
        ff = _gelu_tanh(ff).astype(_BF16)
        part = jnp.dot(ff, w2_ref[0, cs, :], preferred_element_type=_F32)
        ffo = part if ffo is None else ffo + part
    ffo = ffo + b2_ref[0]
    h = _layer_norm(h + ffo, g2_ref[0], be2_ref[0], ln_eps)

    out_ref[...] = h.reshape(Bt, S, D)


# ----------------------------------------------------------------------------
# Wrapper
# ----------------------------------------------------------------------------
def detr_encoder_forward(inputs_embeds, attention_mask, position_embeddings,
                         params, *, num_heads, layer_norm_eps=1e-5,
                         batch_block=None, ff_block=None, seq_align=128):
    """Pallas TPU implementation of DetrEncoder.forward (eval mode).

    params: list (one entry per layer) of dicts with weights already in
    (in, out) layout: wq,bq,wk,bk,wv,bv,wo,bo,g1,be1,w1,b1,w2,b2,g2,be2.
    Returns last_hidden_state of shape (B, S, D) in float32.
    """
    B, S, D = inputs_embeds.shape
    L = len(params)
    if D % num_heads != 0:
        raise ValueError(f"embed_dim {D} not divisible by num_heads {num_heads}")
    head_dim = D // num_heads
    inter = params[0]["w1"].shape[1]

    # ---- parameters: matmul weights bf16 (halve DMA, bf16 MXU); vectors f32 -
    stack_w = lambda n: jnp.stack([p[n].astype(_BF16) for p in params], 0)
    stack_v = lambda n: jnp.stack([p[n].astype(_F32) for p in params], 0)[:, None, :]
    wq, wk, wv, wo = stack_w("wq"), stack_w("wk"), stack_w("wv"), stack_w("wo")
    w1, w2 = stack_w("w1"), stack_w("w2")
    bq, bk, bv, bo = stack_v("bq"), stack_v("bk"), stack_v("bv"), stack_v("bo")
    b1, b2 = stack_v("b1"), stack_v("b2")
    g1, be1, g2, be2 = stack_v("g1"), stack_v("be1"), stack_v("g2"), stack_v("be2")

    # ---- sequence padding: lane-dense (Sp,Sp) logits / stores, full MXU tiles
    seq_align = max(8, int(seq_align))
    Sp = _cdiv(S, seq_align) * seq_align

    # ---- batch blocking: amortize per-layer weight DMA by Bt ----------------
    if batch_block is None:
        # Two chunks on the "parallel" axis keep both v7x TensorCores busy.
        # On 1-TC chips (v5e/v6e), pass batch_block=B to stream weights once.
        batch_block = max(1, _cdiv(B, 2))
    batch_block = min(batch_block, max(B, 1))
    Bp = _cdiv(B, batch_block) * batch_block
    nb = Bp // batch_block

    # ---- FFN intermediate tiling: bound the (rows, ff_block) f32 GELU temp --
    if ff_block is None:
        ff_block = inter
        while (ff_block % 2 == 0 and ff_block > 512
               and batch_block * Sp * ff_block * 4 > (4 << 20)):
            ff_block //= 2
    if inter % ff_block != 0:
        ff_block = inter

    # ---- pad inputs; additive key mask (== _expand_mask, pads are masked) ---
    h0 = jnp.pad(inputs_embeds.astype(_F32), ((0, Bp - B), (0, Sp - S), (0, 0)))
    pos = jnp.pad(position_embeddings.astype(_F32),
                  ((0, Bp - B), (0, Sp - S), (0, 0)))
    mask01 = jnp.pad(attention_mask.astype(_F32), ((0, Bp - B), (0, Sp - S)))
    neg = jnp.finfo(_F32).min
    mask_add = jnp.where(mask01[:, None, :] == 0, neg, 0.0).astype(_F32)

    bsd_spec = pl.BlockSpec((batch_block, Sp, D), lambda b, l: (b, 0, 0))
    mask_spec = pl.BlockSpec((batch_block, 1, Sp), lambda b, l: (b, 0, 0))

    def wspec(x, y):
        return pl.BlockSpec((1, x, y), lambda b, l: (l, 0, 0))

    in_specs = [
        bsd_spec, bsd_spec, mask_spec,
        wspec(D, D), wspec(1, D),          # wq, bq
        wspec(D, D), wspec(1, D),          # wk, bk
        wspec(D, D), wspec(1, D),          # wv, bv
        wspec(D, D), wspec(1, D),          # wo, bo
        wspec(1, D), wspec(1, D),          # ln1 gamma, beta
        wspec(D, inter), wspec(1, inter),  # w1, b1
        wspec(inter, D), wspec(1, D),      # w2, b2
        wspec(1, D), wspec(1, D),          # ln2 gamma, beta
    ]

    # ---- explicit VMEM budget (double-buffered weights + resident activations)
    weight_bytes = (4 * D * D + 2 * D * inter) * 2 + (10 * D + inter) * 4
    act_bytes = batch_block * Sp * D * 4
    ff_tmp = batch_block * Sp * max(ff_block, D) * 4
    est = 2 * weight_bytes + 9 * act_bytes + 3 * ff_tmp + 3 * Sp * Sp * 4
    vmem_limit = int(min(max(est + (8 << 20), 32 << 20), 64 << 20))

    kernel = functools.partial(
        _detr_encoder_kernel, num_heads=num_heads, head_dim=head_dim,
        ln_eps=float(layer_norm_eps), ff_block=ff_block)

    out = pl.pallas_call(
        kernel,
        out_shape=jax.ShapeDtypeStruct((Bp, Sp, D), _F32),
        grid_spec=pltpu.PrefetchScalarGridSpec(
            num_scalar_prefetch=0,
            grid=(nb, L),
            in_specs=in_specs,
            out_specs=bsd_spec,
            scratch_shapes=[pltpu.VMEM((batch_block, Sp, D), _F32)]),
        compiler_params=pltpu.CompilerParams(
            dimension_semantics=("parallel", "arbitrary"),
            vmem_limit_bytes=vmem_limit),
    )(h0, pos, mask_add, wq, bq, wk, bk, wv, bv, wo, bo,
      g1, be1, w1, b1, w2, b2, g2, be2)
    return out[:B, :S, :]


# ----------------------------------------------------------------------------
# Pure-JAX references
# ----------------------------------------------------------------------------
def _reference_f32(inputs_embeds, attention_mask, position_embeddings, params,
                   *, num_heads, layer_norm_eps=1e-5):
    """Exact mirror of the PyTorch module in float32 (exact-erf GELU)."""
    B, S, D = inputs_embeds.shape
    Hd = D // num_heads
    scaling = Hd ** -0.5
    neg = jnp.finfo(jnp.float32).min
    mask4 = jnp.where(attention_mask[:, None, None, :] == 0, neg, 0.0)

    def ln(x, g, b):
        mu = jnp.mean(x, -1, keepdims=True)
        xc = x - mu
        var = jnp.mean(xc * xc, -1, keepdims=True)
        return xc * lax.rsqrt(var + layer_norm_eps) * g + b

    h = inputs_embeds.astype(jnp.float32)
    pos = position_embeddings.astype(jnp.float32)
    for p_ in params:
        hp = h + pos
        q = (hp @ p_["wq"] + p_["bq"]) * scaling
        k = hp @ p_["wk"] + p_["bk"]
        v = h @ p_["wv"] + p_["bv"]
        split = lambda x: x.reshape(B, S, num_heads, Hd).transpose(0, 2, 1, 3)
        qh, kh, vh = split(q), split(k), split(v)
        logits = jnp.einsum("bhqd,bhkd->bhqk", qh, kh) + mask4
        w = jax.nn.softmax(logits, axis=-1)
        ctx = jnp.einsum("bhqk,bhkd->bhqd", w, vh)
        ctx = ctx.transpose(0, 2, 1, 3).reshape(B, S, D)
        attn = ctx @ p_["wo"] + p_["bo"]
        h = ln(h + attn, p_["g1"], p_["be1"])
        ff = jax.nn.gelu(h @ p_["w1"] + p_["b1"], approximate=False)
        ff = ff @ p_["w2"] + p_["b2"]
        h = ln(h + ff, p_["g2"], p_["be2"])
    return h


def _reference_mixed(inputs_embeds, attention_mask, position_embeddings, params,
                     *, num_heads, layer_norm_eps=1e-5):
    """Mirrors the kernel's numerics: bf16 matmul operands, f32 accumulation,
    f32 LayerNorm/softmax, tanh GELU."""
    B, S, D = inputs_embeds.shape
    Hd = D // num_heads
    scaling = Hd ** -0.5
    neg = jnp.finfo(_F32).min
    mask4 = jnp.where(attention_mask[:, None, None, :] == 0, neg, 0.0).astype(_F32)

    def mm(a, b):
        return jnp.dot(a.astype(_BF16), b.astype(_BF16),
                       preferred_element_type=_F32)

    def ln(x, g, b):
        mu = jnp.mean(x, -1, keepdims=True)
        xc = x - mu
        var = jnp.mean(xc * xc, -1, keepdims=True)
        return xc * lax.rsqrt(var + layer_norm_eps) * g + b

    h = inputs_embeds.astype(_F32)
    pos = position_embeddings.astype(_F32)
    for p_ in params:
        hp = h + pos
        q = (mm(hp, p_["wq"]) + p_["bq"]) * scaling
        k = mm(hp, p_["wk"]) + p_["bk"]
        v = mm(h, p_["wv"]) + p_["bv"]
        split = lambda x: x.reshape(B, S, num_heads, Hd).transpose(0, 2, 1, 3)
        qh, kh, vh = (split(q).astype(_BF16), split(k).astype(_BF16),
                      split(v).astype(_BF16))
        logits = jnp.einsum("bhqd,bhkd->bhqk", qh, kh,
                            preferred_element_type=_F32) + mask4
        w = jax.nn.softmax(logits, axis=-1)
        ctx = jnp.einsum("bhqk,bhkd->bhqd", w.astype(_BF16), vh,
                         preferred_element_type=_F32)
        ctx = ctx.transpose(0, 2, 1, 3).reshape(B, S, D)
        attn = mm(ctx, p_["wo"]) + p_["bo"]
        h = ln(h + attn, p_["g1"], p_["be1"])
        ff = _gelu_tanh(mm(h, p_["w1"]) + p_["b1"])
        ff = mm(ff, p_["w2"]) + p_["b2"]
        h = ln(h + ff, p_["g2"], p_["be2"])
    return h


def _init_params(key, num_layers, hidden, intermediate):
    params = []
    for _ in range(num_layers):
        key, *ks = jax.random.split(key, 17)
        w = lambda k, shape: 0.02 * jax.random.normal(k, shape, jnp.float32)
        params.append(dict(
            wq=w(ks[0], (hidden, hidden)), bq=w(ks[1], (hidden,)),
            wk=w(ks[2], (hidden, hidden)), bk=w(ks[3], (hidden,)),
            wv=w(ks[4], (hidden, hidden)), bv=w(ks[5], (hidden,)),
            wo=w(ks[6], (hidden, hidden)), bo=w(ks[7], (hidden,)),
            g1=1.0 + w(ks[8], (hidden,)), be1=w(ks[9], (hidden,)),
            w1=w(ks[10], (hidden, intermediate)), b1=w(ks[11], (intermediate,)),
            w2=w(ks[12], (intermediate, hidden)), b2=w(ks[13], (hidden,)),
            g2=1.0 + w(ks[14], (hidden,)), be2=w(ks[15], (hidden,)),
        ))
    return params


if __name__ == "__main__":
    key = jax.random.PRNGKey(0)
    # Small DETR-like config: batch=2, seq=16, hidden=128 (lane-dense),
    # 8 heads, intermediate=256, 2 encoder layers.
    B, S, D, H, I, L = 2, 16, 128, 8, 256, 2

    k_embed, k_pos, k_par = jax.random.split(key, 3)
    inputs_embeds = jax.random.normal(k_embed, (B, S, D), jnp.float32)
    position_embeddings = jax.random.normal(k_pos, (B, S, D), jnp.float32)
    attention_mask = jnp.ones((B, S), jnp.float32)
    attention_mask = attention_mask.at[1, S - 4:].set(0.0)   # pad tail of batch 1

    params = _init_params(k_par, L, D, I)

    out = detr_encoder_forward(inputs_embeds, attention_mask,
                               position_embeddings, params, num_heads=H)
    out = jax.block_until_ready(out)

    ref_mixed = _reference_mixed(inputs_embeds, attention_mask,
                                 position_embeddings, params, num_heads=H)
    ref_f32 = _reference_f32(inputs_embeds, attention_mask,
                             position_embeddings, params, num_heads=H)

    assert out.shape == (B, S, D), out.shape
    assert bool(jnp.all(jnp.isfinite(out))), "non-finite output"
    err_mixed = float(jnp.max(jnp.abs(out - ref_mixed)))
    err_f32 = float(jnp.max(jnp.abs(out - ref_f32)))
    # Exactness vs a reference mirroring the kernel's mixed-precision recipe.
    assert jnp.allclose(out, ref_mixed, atol=5e-3, rtol=5e-3), \
        f"mixed-precision mismatch: {err_mixed}"
    # Fidelity vs the full-f32 PyTorch-equivalent module (bf16 matmul noise).
    assert jnp.allclose(out, ref_f32, atol=2.5e-2, rtol=2.5e-2), \
        f"f32 reference mismatch: {err_f32}"

    print("KERNEL_OK")
</pallas_src>

<mosaic_0001>
module attributes {stable_mosaic.version = 11 : i64} {
  func.func @_detr_encoder_kernel(%arg0: i32, %arg1: i32, %arg2: memref<1x128x128xf32, #tpu.memory_space<vmem>>, %arg3: memref<1x128x128xf32, #tpu.memory_space<vmem>>, %arg4: memref<1x1x128xf32, #tpu.memory_space<vmem>>, %arg5: memref<1x128x128xbf16, #tpu.memory_space<vmem>>, %arg6: memref<1x1x128xf32, #tpu.memory_space<vmem>>, %arg7: memref<1x128x128xbf16, #tpu.memory_space<vmem>>, %arg8: memref<1x1x128xf32, #tpu.memory_space<vmem>>, %arg9: memref<1x128x128xbf16, #tpu.memory_space<vmem>>, %arg10: memref<1x1x128xf32, #tpu.memory_space<vmem>>, %arg11: memref<1x128x128xbf16, #tpu.memory_space<vmem>>, %arg12: memref<1x1x128xf32, #tpu.memory_space<vmem>>, %arg13: memref<1x1x128xf32, #tpu.memory_space<vmem>>, %arg14: memref<1x1x128xf32, #tpu.memory_space<vmem>>, %arg15: memref<1x128x256xbf16, #tpu.memory_space<vmem>>, %arg16: memref<1x1x256xf32, #tpu.memory_space<vmem>>, %arg17: memref<1x256x128xbf16, #tpu.memory_space<vmem>>, %arg18: memref<1x1x128xf32, #tpu.memory_space<vmem>>, %arg19: memref<1x1x128xf32, #tpu.memory_space<vmem>>, %arg20: memref<1x1x128xf32, #tpu.memory_space<vmem>>, %arg21: memref<1x128x128xf32, #tpu.memory_space<vmem>>, %arg22: memref<1x128x128xf32, #tpu.memory_space<vmem>>) attributes {dimension_semantics = [#tpu.dimension_semantics<parallel>, #tpu.dimension_semantics<arbitrary>], iteration_bounds = array<i64: 2, 2>, scalar_prefetch = 0 : i64, scratch_operands = 1 : i64, tpu.core_type = #tpu.core_type<tc>, window_params = [{transform_indices = @transform_0, window_bounds = array<i64: 1, 128, 128>}, {transform_indices = @transform_1, window_bounds = array<i64: 1, 128, 128>}, {transform_indices = @transform_2, window_bounds = array<i64: 1, 1, 128>}, {transform_indices = @transform_3, window_bounds = array<i64: 1, 128, 128>}, {transform_indices = @transform_4, window_bounds = array<i64: 1, 1, 128>}, {transform_indices = @transform_5, window_bounds = array<i64: 1, 128, 128>}, {transform_indices = @transform_6, window_bounds = array<i64: 1, 1, 128>}, {transform_indices = @transform_7, window_bounds = array<i64: 1, 128, 128>}, {transform_indices = @transform_8, window_bounds = array<i64: 1, 1, 128>}, {transform_indices = @transform_9, window_bounds = array<i64: 1, 128, 128>}, {transform_indices = @transform_10, window_bounds = array<i64: 1, 1, 128>}, {transform_indices = @transform_11, window_bounds = array<i64: 1, 1, 128>}, {transform_indices = @transform_12, window_bounds = array<i64: 1, 1, 128>}, {transform_indices = @transform_13, window_bounds = array<i64: 1, 128, 256>}, {transform_indices = @transform_14, window_bounds = array<i64: 1, 1, 256>}, {transform_indices = @transform_15, window_bounds = array<i64: 1, 256, 128>}, {transform_indices = @transform_16, window_bounds = array<i64: 1, 1, 128>}, {transform_indices = @transform_17, window_bounds = array<i64: 1, 1, 128>}, {transform_indices = @transform_18, window_bounds = array<i64: 1, 1, 128>}, {transform_indices = @transform_19, window_bounds = array<i64: 1, 128, 128>}]} {
    %c0_i32 = arith.constant 0 : i32
    %0 = arith.cmpi eq, %arg1, %c0_i32 : i32
    %1 = arith.extui %0 : i1 to i32
    %c0_i32_0 = arith.constant 0 : i32
    %2 = arith.cmpi ne, %1, %c0_i32_0 : i32
    scf.if %2 {
      %c0_140 = arith.constant 0 : index
      %c0_141 = arith.constant 0 : index
      %c0_142 = arith.constant 0 : index
      %350 = vector.load %arg2[%c0_140, %c0_141, %c0_142] : memref<1x128x128xf32, #tpu.memory_space<vmem>>, vector<1x128x128xf32>
      %c0_143 = arith.constant 0 : index
      %c0_144 = arith.constant 0 : index
      %c0_145 = arith.constant 0 : index
      %351 = vector.load %arg21[%c0_143, %c0_144, %c0_145] : memref<1x128x128xf32, #tpu.memory_space<vmem>>, vector<1x128x128xf32>
      tpu.vector_store %arg21[%c0_143, %c0_144, %c0_145], %350 {strides = array<i32>} : memref<1x128x128xf32, #tpu.memory_space<vmem>>, vector<1x128x128xf32>,
    } else {
    }
    %c0 = arith.constant 0 : index
    %c0_1 = arith.constant 0 : index
    %c0_2 = arith.constant 0 : index
    %3 = vector.load %arg21[%c0, %c0_1, %c0_2] : memref<1x128x128xf32, #tpu.memory_space<vmem>>, vector<1x128x128xf32>
    %c0_3 = arith.constant 0 : index
    %c0_4 = arith.constant 0 : index
    %c0_5 = arith.constant 0 : index
    %4 = vector.load %arg3[%c0_3, %c0_4, %c0_5] : memref<1x128x128xf32, #tpu.memory_space<vmem>>, vector<1x128x128xf32>
    %5 = vector.shape_cast %3 : vector<1x128x128xf32> to vector<128x128xf32>
    %6 = arith.addf %3, %4 : vector<1x128x128xf32>
    %7 = vector.shape_cast %6 : vector<1x128x128xf32> to vector<128x128xf32>
    %8 = arith.truncf %7 : vector<128x128xf32> to vector<128x128xbf16>
    %9 = arith.truncf %5 : vector<128x128xf32> to vector<128x128xbf16>
    %c0_6 = arith.constant 0 : index
    %c0_7 = arith.constant 0 : index
    %c0_8 = arith.constant 0 : index
    %10 = vector.load %arg5[%c0_6, %c0_7, %c0_8] : memref<1x128x128xbf16, #tpu.memory_space<vmem>>, vector<1x128x128xbf16>
    %11 = vector.shape_cast %10 : vector<1x128x128xbf16> to vector<128x128xbf16>
    %cst = arith.constant dense<0.000000e+00> : vector<128x128xf32>
    %12 = tpu.matmul %8, %11, %cst {dimension_numbers = #tpu.dot_dimension_numbers<[1], [0], [0], [1], [0, 0, 1, 1], [], []>} : vector<128x128xbf16>, vector<128x128xbf16>, vector<128x128xf32> -> vector<128x128xf32>
    %c0_9 = arith.constant 0 : index
    %c0_10 = arith.constant 0 : index
    %c0_11 = arith.constant 0 : index
    %13 = vector.load %arg6[%c0_9, %c0_10, %c0_11] : memref<1x1x128xf32, #tpu.memory_space<vmem>>, vector<1x1x128xf32>
    %14 = vector.shape_cast %13 : vector<1x1x128xf32> to vector<1x128xf32>
    %15 = vector.broadcast %14 : vector<1x128xf32> to vector<128x128xf32>
    %16 = arith.addf %12, %15 : vector<128x128xf32>
    %cst_12 = arith.constant 2.500000e-01 : f32
    %17 = vector.broadcast %cst_12 : f32 to vector<128x128xf32>
    %18 = arith.mulf %16, %17 : vector<128x128xf32>
    %c0_13 = arith.constant 0 : index
    %c0_14 = arith.constant 0 : index
    %c0_15 = arith.constant 0 : index
    %19 = vector.load %arg7[%c0_13, %c0_14, %c0_15] : memref<1x128x128xbf16, #tpu.memory_space<vmem>>, vector<1x128x128xbf16>
    %20 = vector.shape_cast %19 : vector<1x128x128xbf16> to vector<128x128xbf16>
    %cst_16 = arith.constant dense<0.000000e+00> : vector<128x128xf32>
    %21 = tpu.matmul %8, %20, %cst_16 {dimension_numbers = #tpu.dot_dimension_numbers<[1], [0], [0], [1], [0, 0, 1, 1], [], []>} : vector<128x128xbf16>, vector<128x128xbf16>, vector<128x128xf32> -> vector<128x128xf32>
    %c0_17 = arith.constant 0 : index
    %c0_18 = arith.constant 0 : index
    %c0_19 = arith.constant 0 : index
    %22 = vector.load %arg8[%c0_17, %c0_18, %c0_19] : memref<1x1x128xf32, #tpu.memory_space<vmem>>, vector<1x1x128xf32>
    %23 = vector.shape_cast %22 : vector<1x1x128xf32> to vector<1x128xf32>
    %24 = vector.broadcast %23 : vector<1x128xf32> to vector<128x128xf32>
    %25 = arith.addf %21, %24 : vector<128x128xf32>
    %c0_20 = arith.constant 0 : index
    %c0_21 = arith.constant 0 : index
    %c0_22 = arith.constant 0 : index
    %26 = vector.load %arg9[%c0_20, %c0_21, %c0_22] : memref<1x128x128xbf16, #tpu.memory_space<vmem>>, vector<1x128x128xbf16>
    %27 = vector.shape_cast %26 : vector<1x128x128xbf16> to vector<128x128xbf16>
    %cst_23 = arith.constant dense<0.000000e+00> : vector<128x128xf32>
    %28 = tpu.matmul %9, %27, %cst_23 {dimension_numbers = #tpu.dot_dimension_numbers<[1], [0], [0], [1], [0, 0, 1, 1], [], []>} : vector<128x128xbf16>, vector<128x128xbf16>, vector<128x128xf32> -> vector<128x128xf32>
    %c0_24 = arith.constant 0 : index
    %c0_25 = arith.constant 0 : index
    %c0_26 = arith.constant 0 : index
    %29 = vector.load %arg10[%c0_24, %c0_25, %c0_26] : memref<1x1x128xf32, #tpu.memory_space<vmem>>, vector<1x1x128xf32>
    %30 = vector.shape_cast %29 : vector<1x1x128xf32> to vector<1x128xf32>
    %31 = vector.broadcast %30 : vector<1x128xf32> to vector<128x128xf32>
    %32 = arith.addf %28, %31 : vector<128x128xf32>
    %33 = vector.shape_cast %18 : vector<128x128xf32> to vector<1x128x128xf32>
    %34 = arith.truncf %33 : vector<1x128x128xf32> to vector<1x128x128xbf16>
    %35 = vector.shape_cast %25 : vector<128x128xf32> to vector<1x128x128xf32>
    %36 = arith.truncf %35 : vector<1x128x128xf32> to vector<1x128x128xbf16>
    %37 = vector.shape_cast %32 : vector<128x128xf32> to vector<1x128x128xf32>
    %38 = arith.truncf %37 : vector<1x128x128xf32> to vector<1x128x128xbf16>
    %c0_27 = arith.constant 0 : index
    %c0_28 = arith.constant 0 : index
    %c0_29 = arith.constant 0 : index
    %39 = vector.load %arg4[%c0_27, %c0_28, %c0_29] : memref<1x1x128xf32, #tpu.memory_space<vmem>>, vector<1x1x128xf32>
    %40 = vector.shape_cast %39 : vector<1x1x128xf32> to vector<1x128xf32>
    %41 = vector.shape_cast %40 : vector<1x128xf32> to vector<1x128xf32>
    %42 = vector.broadcast %41 : vector<1x128xf32> to vector<128x128xf32>
    %43 = vector.extract_strided_slice %34 {offsets = [0, 0, 0], sizes = [1, 128, 16], strides = [1, 1, 1]} : vector<1x128x128xbf16> to vector<1x128x16xbf16>
    %44 = vector.shape_cast %43 : vector<1x128x16xbf16> to vector<128x16xbf16>
    %45 = vector.extract_strided_slice %36 {offsets = [0, 0, 0], sizes = [1, 128, 16], strides = [1, 1, 1]} : vector<1x128x128xbf16> to vector<1x128x16xbf16>
    %46 = vector.shape_cast %45 : vector<1x128x16xbf16> to vector<128x16xbf16>
    %cst_30 = arith.constant dense<0.000000e+00> : vector<128x128xf32>
    %47 = tpu.matmul %44, %46, %cst_30 {dimension_numbers = #tpu.dot_dimension_numbers<[1], [1], [0], [0], [0, 0, 1, 0], [], []>} : vector<128x16xbf16>, vector<128x16xbf16>, vector<128x128xf32> -> vector<128x128xf32>
    %48 = arith.addf %47, %42 : vector<128x128xf32>
    %cst_31 = arith.constant dense<0xFF800000> : vector<128xf32>
    %49 = vector.multi_reduction <maximumf>, %48, %cst_31 [1] : vector<128x128xf32> to vector<128xf32>
    %50 = vector.shape_cast %49 : vector<128xf32> to vector<128x1xf32>
    %51 = vector.broadcast %50 : vector<128x1xf32> to vector<128x128xf32>
    %52 = arith.subf %48, %51 : vector<128x128xf32>
    %53 = math.exp %52 : vector<128x128xf32>
    %cst_32 = arith.constant dense<0.000000e+00> : vector<128xf32>
    %54 = vector.multi_reduction <add>, %53, %cst_32 [1] : vector<128x128xf32> to vector<128xf32>
    %55 = vector.shape_cast %54 : vector<128xf32> to vector<128x1xf32>
    %56 = tpu.reciprocal %55 {approx = true} : vector<128x1xf32> -> vector<128x1xf32>
    %57 = arith.mulf %55, %56 : vector<128x1xf32>
    %cst_33 = arith.constant 2.000000e+00 : f32
    %58 = vector.broadcast %cst_33 : f32 to vector<128x1xf32>
    %59 = arith.subf %58, %57 : vector<128x1xf32>
    %60 = arith.mulf %56, %59 : vector<128x1xf32>
    %61 = vector.broadcast %60 : vector<128x1xf32> to vector<128x128xf32>
    %62 = arith.mulf %53, %61 : vector<128x128xf32>
    %63 = arith.truncf %62 : vector<128x128xf32> to vector<128x128xbf16>
    %64 = vector.extract_strided_slice %38 {offsets = [0, 0, 0], sizes = [1, 128, 16], strides = [1, 1, 1]} : vector<1x128x128xbf16> to vector<1x128x16xbf16>
    %65 = vector.shape_cast %64 : vector<1x128x16xbf16> to vector<128x16xbf16>
    %cst_34 = arith.constant dense<0.000000e+00> : vector<128x16xf32>
    %66 = tpu.matmul %63, %65, %cst_34 {dimension_numbers = #tpu.dot_dimension_numbers<[1], [0], [0], [1], [0, 0, 1, 1], [], []>} : vector<128x128xbf16>, vector<128x16xbf16>, vector<128x16xf32> -> vector<128x16xf32>
    %c0_35 = arith.constant 0 : index
    %c0_36 = arith.constant 0 : index
    %c0_37 = arith.constant 0 : index
    %67 = vector.load %arg22[%c0_35, %c0_36, %c0_37] : memref<1x128x128xf32, #tpu.memory_space<vmem>>, vector<1x128x16xf32>
    %68 = vector.shape_cast %67 : vector<1x128x16xf32> to vector<128x16xf32>
    %69 = vector.shape_cast %66 : vector<128x16xf32> to vector<1x128x16xf32>
    tpu.vector_store %arg22[%c0_35, %c0_36, %c0_37], %69 {strides = array<i32>} : memref<1x128x128xf32, #tpu.memory_space<vmem>>, vector<1x128x16xf32>,
    %70 = vector.extract_strided_slice %34 {offsets = [0, 0, 16], sizes = [1, 128, 16], strides = [1, 1, 1]} : vector<1x128x128xbf16> to vector<1x128x16xbf16>
    %71 = vector.shape_cast %70 : vector<1x128x16xbf16> to vector<128x16xbf16>
    %72 = vector.extract_strided_slice %36 {offsets = [0, 0, 16], sizes = [1, 128, 16], strides = [1, 1, 1]} : vector<1x128x128xbf16> to vector<1x128x16xbf16>
    %73 = vector.shape_cast %72 : vector<1x128x16xbf16> to vector<128x16xbf16>
    %cst_38 = arith.constant dense<0.000000e+00> : vector<128x128xf32>
    %74 = tpu.matmul %71, %73, %cst_38 {dimension_numbers = #tpu.dot_dimension_numbers<[1], [1], [0], [0], [0, 0, 1, 0], [], []>} : vector<128x16xbf16>, vector<128x16xbf16>, vector<128x128xf32> -> vector<128x128xf32>
    %75 = arith.addf %74, %42 : vector<128x128xf32>
    %cst_39 = arith.constant dense<0xFF800000> : vector<128xf32>
    %76 = vector.multi_reduction <maximumf>, %75, %cst_39 [1] : vector<128x128xf32> to vector<128xf32>
    %77 = vector.shape_cast %76 : vector<128xf32> to vector<128x1xf32>
    %78 = vector.broadcast %77 : vector<128x1xf32> to vector<128x128xf32>
    %79 = arith.subf %75, %78 : vector<128x128xf32>
    %80 = math.exp %79 : vector<128x128xf32>
    %cst_40 = arith.constant dense<0.000000e+00> : vector<128xf32>
    %81 = vector.multi_reduction <add>, %80, %cst_40 [1] : vector<128x128xf32> to vector<128xf32>
    %82 = vector.shape_cast %81 : vector<128xf32> to vector<128x1xf32>
    %83 = tpu.reciprocal %82 {approx = true} : vector<128x1xf32> -> vector<128x1xf32>
    %84 = arith.mulf %82, %83 : vector<128x1xf32>
    %cst_41 = arith.constant 2.000000e+00 : f32
    %85 = vector.broadcast %cst_41 : f32 to vector<128x1xf32>
    %86 = arith.subf %85, %84 : vector<128x1xf32>
    %87 = arith.mulf %83, %86 : vector<128x1xf32>
    %88 = vector.broadcast %87 : vector<128x1xf32> to vector<128x128xf32>
    %89 = arith.mulf %80, %88 : vector<128x128xf32>
    %90 = arith.truncf %89 : vector<128x128xf32> to vector<128x128xbf16>
    %91 = vector.extract_strided_slice %38 {offsets = [0, 0, 16], sizes = [1, 128, 16], strides = [1, 1, 1]} : vector<1x128x128xbf16> to vector<1x128x16xbf16>
    %92 = vector.shape_cast %91 : vector<1x128x16xbf16> to vector<128x16xbf16>
    %cst_42 = arith.constant dense<0.000000e+00> : vector<128x16xf32>
    %93 = tpu.matmul %90, %92, %cst_42 {dimension_numbers = #tpu.dot_dimension_numbers<[1], [0], [0], [1], [0, 0, 1, 1], [], []>} : vector<128x128xbf16>, vector<128x16xbf16>, vector<128x16xf32> -> vector<128x16xf32>
    %c0_43 = arith.constant 0 : index
    %c0_44 = arith.constant 0 : index
    %c16 = arith.constant 16 : index
    %94 = vector.load %arg22[%c0_43, %c0_44, %c16] : memref<1x128x128xf32, #tpu.memory_space<vmem>>, vector<1x128x16xf32>
    %95 = vector.shape_cast %94 : vector<1x128x16xf32> to vector<128x16xf32>
    %96 = vector.shape_cast %93 : vector<128x16xf32> to vector<1x128x16xf32>
    tpu.vector_store %arg22[%c0_43, %c0_44, %c16], %96 {strides = array<i32>} : memref<1x128x128xf32, #tpu.memory_space<vmem>>, vector<1x128x16xf32>,
    %97 = vector.extract_strided_slice %34 {offsets = [0, 0, 32], sizes = [1, 128, 16], strides = [1, 1, 1]} : vector<1x128x128xbf16> to vector<1x128x16xbf16>
    %98 = vector.shape_cast %97 : vector<1x128x16xbf16> to vector<128x16xbf16>
    %99 = vector.extract_strided_slice %36 {offsets = [0, 0, 32], sizes = [1, 128, 16], strides = [1, 1, 1]} : vector<1x128x128xbf16> to vector<1x128x16xbf16>
    %100 = vector.shape_cast %99 : vector<1x128x16xbf16> to vector<128x16xbf16>
    %cst_45 = arith.constant dense<0.000000e+00> : vector<128x128xf32>
    %101 = tpu.matmul %98, %100, %cst_45 {dimension_numbers = #tpu.dot_dimension_numbers<[1], [1], [0], [0], [0, 0, 1, 0], [], []>} : vector<128x16xbf16>, vector<128x16xbf16>, vector<128x128xf32> -> vector<128x128xf32>
    %102 = arith.addf %101, %42 : vector<128x128xf32>
    %cst_46 = arith.constant dense<0xFF800000> : vector<128xf32>
    %103 = vector.multi_reduction <maximumf>, %102, %cst_46 [1] : vector<128x128xf32> to vector<128xf32>
    %104 = vector.shape_cast %103 : vector<128xf32> to vector<128x1xf32>
    %105 = vector.broadcast %104 : vector<128x1xf32> to vector<128x128xf32>
    %106 = arith.subf %102, %105 : vector<128x128xf32>
    %107 = math.exp %106 : vector<128x128xf32>
    %cst_47 = arith.constant dense<0.000000e+00> : vector<128xf32>
    %108 = vector.multi_reduction <add>, %107, %cst_47 [1] : vector<128x128xf32> to vector<128xf32>
    %109 = vector.shape_cast %108 : vector<128xf32> to vector<128x1xf32>
    %110 = tpu.reciprocal %109 {approx = true} : vector<128x1xf32> -> vector<128x1xf32>
    %111 = arith.mulf %109, %110 : vector<128x1xf32>
    %cst_48 = arith.constant 2.000000e+00 : f32
    %112 = vector.broadcast %cst_48 : f32 to vector<128x1xf32>
    %113 = arith.subf %112, %111 : vector<128x1xf32>
    %114 = arith.mulf %110, %113 : vector<128x1xf32>
    %115 = vector.broadcast %114 : vector<128x1xf32> to vector<128x128xf32>
    %116 = arith.mulf %107, %115 : vector<128x128xf32>
    %117 = arith.truncf %116 : vector<128x128xf32> to vector<128x128xbf16>
    %118 = vector.extract_strided_slice %38 {offsets = [0, 0, 32], sizes = [1, 128, 16], strides = [1, 1, 1]} : vector<1x128x128xbf16> to vector<1x128x16xbf16>
    %119 = vector.shape_cast %118 : vector<1x128x16xbf16> to vector<128x16xbf16>
    %cst_49 = arith.constant dense<0.000000e+00> : vector<128x16xf32>
    %120 = tpu.matmul %117, %119, %cst_49 {dimension_numbers = #tpu.dot_dimension_numbers<[1], [0], [0], [1], [0, 0, 1, 1], [], []>} : vector<128x128xbf16>, vector<128x16xbf16>, vector<128x16xf32> -> vector<128x16xf32>
    %c0_50 = arith.constant 0 : index
    %c0_51 = arith.constant 0 : index
    %c32 = arith.constant 32 : index
    %121 = vector.load %arg22[%c0_50, %c0_51, %c32] : memref<1x128x128xf32, #tpu.memory_space<vmem>>, vector<1x128x16xf32>
    %122 = vector.shape_cast %121 : vector<1x128x16xf32> to vector<128x16xf32>
    %123 = vector.shape_cast %120 : vector<128x16xf32> to vector<1x128x16xf32>
    tpu.vector_store %arg22[%c0_50, %c0_51, %c32], %123 {strides = array<i32>} : memref<1x128x128xf32, #tpu.memory_space<vmem>>, vector<1x128x16xf32>,
    %124 = vector.extract_strided_slice %34 {offsets = [0, 0, 48], sizes = [1, 128, 16], strides = [1, 1, 1]} : vector<1x128x128xbf16> to vector<1x128x16xbf16>
    %125 = vector.shape_cast %124 : vector<1x128x16xbf16> to vector<128x16xbf16>
    %126 = vector.extract_strided_slice %36 {offsets = [0, 0, 48], sizes = [1, 128, 16], strides = [1, 1, 1]} : vector<1x128x128xbf16> to vector<1x128x16xbf16>
    %127 = vector.shape_cast %126 : vector<1x128x16xbf16> to vector<128x16xbf16>
    %cst_52 = arith.constant dense<0.000000e+00> : vector<128x128xf32>
    %128 = tpu.matmul %125, %127, %cst_52 {dimension_numbers = #tpu.dot_dimension_numbers<[1], [1], [0], [0], [0, 0, 1, 0], [], []>} : vector<128x16xbf16>, vector<128x16xbf16>, vector<128x128xf32> -> vector<128x128xf32>
    %129 = arith.addf %128, %42 : vector<128x128xf32>
    %cst_53 = arith.constant dense<0xFF800000> : vector<128xf32>
    %130 = vector.multi_reduction <maximumf>, %129, %cst_53 [1] : vector<128x128xf32> to vector<128xf32>
    %131 = vector.shape_cast %130 : vector<128xf32> to vector<128x1xf32>
    %132 = vector.broadcast %131 : vector<128x1xf32> to vector<128x128xf32>
    %133 = arith.subf %129, %132 : vector<128x128xf32>
    %134 = math.exp %133 : vector<128x128xf32>
    %cst_54 = arith.constant dense<0.000000e+00> : vector<128xf32>
    %135 = vector.multi_reduction <add>, %134, %cst_54 [1] : vector<128x128xf32> to vector<128xf32>
    %136 = vector.shape_cast %135 : vector<128xf32> to vector<128x1xf32>
    %137 = tpu.reciprocal %136 {approx = true} : vector<128x1xf32> -> vector<128x1xf32>
    %138 = arith.mulf %136, %137 : vector<128x1xf32>
    %cst_55 = arith.constant 2.000000e+00 : f32
    %139 = vector.broadcast %cst_55 : f32 to vector<128x1xf32>
    %140 = arith.subf %139, %138 : vector<128x1xf32>
    %141 = arith.mulf %137, %140 : vector<128x1xf32>
    %142 = vector.broadcast %141 : vector<128x1xf32> to vector<128x128xf32>
    %143 = arith.mulf %134, %142 : vector<128x128xf32>
    %144 = arith.truncf %143 : vector<128x128xf32> to vector<128x128xbf16>
    %145 = vector.extract_strided_slice %38 {offsets = [0, 0, 48], sizes = [1, 128, 16], strides = [1, 1, 1]} : vector<1x128x128xbf16> to vector<1x128x16xbf16>
    %146 = vector.shape_cast %145 : vector<1x128x16xbf16> to vector<128x16xbf16>
    %cst_56 = arith.constant dense<0.000000e+00> : vector<128x16xf32>
    %147 = tpu.matmul %144, %146, %cst_56 {dimension_numbers = #tpu.dot_dimension_numbers<[1], [0], [0], [1], [0, 0, 1, 1], [], []>} : vector<128x128xbf16>, vector<128x16xbf16>, vector<128x16xf32> -> vector<128x16xf32>
    %c0_57 = arith.constant 0 : index
    %c0_58 = arith.constant 0 : index
    %c48 = arith.constant 48 : index
    %148 = vector.load %arg22[%c0_57, %c0_58, %c48] : memref<1x128x128xf32, #tpu.memory_space<vmem>>, vector<1x128x16xf32>
    %149 = vector.shape_cast %148 : vector<1x128x16xf32> to vector<128x16xf32>
    %150 = vector.shape_cast %147 : vector<128x16xf32> to vector<1x128x16xf32>
    tpu.vector_store %arg22[%c0_57, %c0_58, %c48], %150 {strides = array<i32>} : memref<1x128x128xf32, #tpu.memory_space<vmem>>, vector<1x128x16xf32>,
    %151 = vector.extract_strided_slice %34 {offsets = [0, 0, 64], sizes = [1, 128, 16], strides = [1, 1, 1]} : vector<1x128x128xbf16> to vector<1x128x16xbf16>
    %152 = vector.shape_cast %151 : vector<1x128x16xbf16> to vector<128x16xbf16>
    %153 = vector.extract_strided_slice %36 {offsets = [0, 0, 64], sizes = [1, 128, 16], strides = [1, 1, 1]} : vector<1x128x128xbf16> to vector<1x128x16xbf16>
    %154 = vector.shape_cast %153 : vector<1x128x16xbf16> to vector<128x16xbf16>
    %cst_59 = arith.constant dense<0.000000e+00> : vector<128x128xf32>
    %155 = tpu.matmul %152, %154, %cst_59 {dimension_numbers = #tpu.dot_dimension_numbers<[1], [1], [0], [0], [0, 0, 1, 0], [], []>} : vector<128x16xbf16>, vector<128x16xbf16>, vector<128x128xf32> -> vector<128x128xf32>
    %156 = arith.addf %155, %42 : vector<128x128xf32>
    %cst_60 = arith.constant dense<0xFF800000> : vector<128xf32>
    %157 = vector.multi_reduction <maximumf>, %156, %cst_60 [1] : vector<128x128xf32> to vector<128xf32>
    %158 = vector.shape_cast %157 : vector<128xf32> to vector<128x1xf32>
    %159 = vector.broadcast %158 : vector<128x1xf32> to vector<128x128xf32>
    %160 = arith.subf %156, %159 : vector<128x128xf32>
    %161 = math.exp %160 : vector<128x128xf32>
    %cst_61 = arith.constant dense<0.000000e+00> : vector<128xf32>
    %162 = vector.multi_reduction <add>, %161, %cst_61 [1] : vector<128x128xf32> to vector<128xf32>
    %163 = vector.shape_cast %162 : vector<128xf32> to vector<128x1xf32>
    %164 = tpu.reciprocal %163 {approx = true} : vector<128x1xf32> -> vector<128x1xf32>
    %165 = arith.mulf %163, %164 : vector<128x1xf32>
    %cst_62 = arith.constant 2.000000e+00 : f32
    %166 = vector.broadcast %cst_62 : f32 to vector<128x1xf32>
    %167 = arith.subf %166, %165 : vector<128x1xf32>
    %168 = arith.mulf %164, %167 : vector<128x1xf32>
    %169 = vector.broadcast %168 : vector<128x1xf32> to vector<128x128xf32>
    %170 = arith.mulf %161, %169 : vector<128x128xf32>
    %171 = arith.truncf %170 : vector<128x128xf32> to vector<128x128xbf16>
    %172 = vector.extract_strided_slice %38 {offsets = [0, 0, 64], sizes = [1, 128, 16], strides = [1, 1, 1]} : vector<1x128x128xbf16> to vector<1x128x16xbf16>
    %173 = vector.shape_cast %172 : vector<1x128x16xbf16> to vector<128x16xbf16>
    %cst_63 = arith.constant dense<0.000000e+00> : vector<128x16xf32>
    %174 = tpu.matmul %171, %173, %cst_63 {dimension_numbers = #tpu.dot_dimension_numbers<[1], [0], [0], [1], [0, 0, 1, 1], [], []>} : vector<128x128xbf16>, vector<128x16xbf16>, vector<128x16xf32> -> vector<128x16xf32>
    %c0_64 = arith.constant 0 : index
    %c0_65 = arith.constant 0 : index
    %c64 = arith.constant 64 : index
    %175 = vector.load %arg22[%c0_64, %c0_65, %c64] : memref<1x128x128xf32, #tpu.memory_space<vmem>>, vector<1x128x16xf32>
    %176 = vector.shape_cast %175 : vector<1x128x16xf32> to vector<128x16xf32>
    %177 = vector.shape_cast %174 : vector<128x16xf32> to vector<1x128x16xf32>
    tpu.vector_store %arg22[%c0_64, %c0_65, %c64], %177 {strides = array<i32>} : memref<1x128x128xf32, #tpu.memory_space<vmem>>, vector<1x128x16xf32>,
    %178 = vector.extract_strided_slice %34 {offsets = [0, 0, 80], sizes = [1, 128, 16], strides = [1, 1, 1]} : vector<1x128x128xbf16> to vector<1x128x16xbf16>
    %179 = vector.shape_cast %178 : vector<1x128x16xbf16> to vector<128x16xbf16>
    %180 = vector.extract_strided_slice %36 {offsets = [0, 0, 80], sizes = [1, 128, 16], strides = [1, 1, 1]} : vector<1x128x128xbf16> to vector<1x128x16xbf16>
    %181 = vector.shape_cast %180 : vector<1x128x16xbf16> to vector<128x16xbf16>
    %cst_66 = arith.constant dense<0.000000e+00> : vector<128x128xf32>
    %182 = tpu.matmul %179, %181, %cst_66 {dimension_numbers = #tpu.dot_dimension_numbers<[1], [1], [0], [0], [0, 0, 1, 0], [], []>} : vector<128x16xbf16>, vector<128x16xbf16>, vector<128x128xf32> -> vector<128x128xf32>
    %183 = arith.addf %182, %42 : vector<128x128xf32>
    %cst_67 = arith.constant dense<0xFF800000> : vector<128xf32>
    %184 = vector.multi_reduction <maximumf>, %183, %cst_67 [1] : vector<128x128xf32> to vector<128xf32>
    %185 = vector.shape_cast %184 : vector<128xf32> to vector<128x1xf32>
    %186 = vector.broadcast %185 : vector<128x1xf32> to vector<128x128xf32>
    %187 = arith.subf %183, %186 : vector<128x128xf32>
    %188 = math.exp %187 : vector<128x128xf32>
    %cst_68 = arith.constant dense<0.000000e+00> : vector<128xf32>
    %189 = vector.multi_reduction <add>, %188, %cst_68 [1] : vector<128x128xf32> to vector<128xf32>
    %190 = vector.shape_cast %189 : vector<128xf32> to vector<128x1xf32>
    %191 = tpu.reciprocal %190 {approx = true} : vector<128x1xf32> -> vector<128x1xf32>
    %192 = arith.mulf %190, %191 : vector<128x1xf32>
    %cst_69 = arith.constant 2.000000e+00 : f32
    %193 = vector.broadcast %cst_69 : f32 to vector<128x1xf32>
    %194 = arith.subf %193, %192 : vector<128x1xf32>
    %195 = arith.mulf %191, %194 : vector<128x1xf32>
    %196 = vector.broadcast %195 : vector<128x1xf32> to vector<128x128xf32>
    %197 = arith.mulf %188, %196 : vector<128x128xf32>
    %198 = arith.truncf %197 : vector<128x128xf32> to vector<128x128xbf16>
    %199 = vector.extract_strided_slice %38 {offsets = [0, 0, 80], sizes = [1, 128, 16], strides = [1, 1, 1]} : vector<1x128x128xbf16> to vector<1x128x16xbf16>
    %200 = vector.shape_cast %199 : vector<1x128x16xbf16> to vector<128x16xbf16>
    %cst_70 = arith.constant dense<0.000000e+00> : vector<128x16xf32>
    %201 = tpu.matmul %198, %200, %cst_70 {dimension_numbers = #tpu.dot_dimension_numbers<[1], [0], [0], [1], [0, 0, 1, 1], [], []>} : vector<128x128xbf16>, vector<128x16xbf16>, vector<128x16xf32> -> vector<128x16xf32>
    %c0_71 = arith.constant 0 : index
    %c0_72 = arith.constant 0 : index
    %c80 = arith.constant 80 : index
    %202 = vector.load %arg22[%c0_71, %c0_72, %c80] : memref<1x128x128xf32, #tpu.memory_space<vmem>>, vector<1x128x16xf32>
    %203 = vector.shape_cast %202 : vector<1x128x16xf32> to vector<128x16xf32>
    %204 = vector.shape_cast %201 : vector<128x16xf32> to vector<1x128x16xf32>
    tpu.vector_store %arg22[%c0_71, %c0_72, %c80], %204 {strides = array<i32>} : memref<1x128x128xf32, #tpu.memory_space<vmem>>, vector<1x128x16xf32>,
    %205 = vector.extract_strided_slice %34 {offsets = [0, 0, 96], sizes = [1, 128, 16], strides = [1, 1, 1]} : vector<1x128x128xbf16> to vector<1x128x16xbf16>
    %206 = vector.shape_cast %205 : vector<1x128x16xbf16> to vector<128x16xbf16>
    %207 = vector.extract_strided_slice %36 {offsets = [0, 0, 96], sizes = [1, 128, 16], strides = [1, 1, 1]} : vector<1x128x128xbf16> to vector<1x128x16xbf16>
    %208 = vector.shape_cast %207 : vector<1x128x16xbf16> to vector<128x16xbf16>
    %cst_73 = arith.constant dense<0.000000e+00> : vector<128x128xf32>
    %209 = tpu.matmul %206, %208, %cst_73 {dimension_numbers = #tpu.dot_dimension_numbers<[1], [1], [0], [0], [0, 0, 1, 0], [], []>} : vector<128x16xbf16>, vector<128x16xbf16>, vector<128x128xf32> -> vector<128x128xf32>
    %210 = arith.addf %209, %42 : vector<128x128xf32>
    %cst_74 = arith.constant dense<0xFF800000> : vector<128xf32>
    %211 = vector.multi_reduction <maximumf>, %210, %cst_74 [1] : vector<128x128xf32> to vector<128xf32>
    %212 = vector.shape_cast %211 : vector<128xf32> to vector<128x1xf32>
    %213 = vector.broadcast %212 : vector<128x1xf32> to vector<128x128xf32>
    %214 = arith.subf %210, %213 : vector<128x128xf32>
    %215 = math.exp %214 : vector<128x128xf32>
    %cst_75 = arith.constant dense<0.000000e+00> : vector<128xf32>
    %216 = vector.multi_reduction <add>, %215, %cst_75 [1] : vector<128x128xf32> to vector<128xf32>
    %217 = vector.shape_cast %216 : vector<128xf32> to vector<128x1xf32>
    %218 = tpu.reciprocal %217 {approx = true} : vector<128x1xf32> -> vector<128x1xf32>
    %219 = arith.mulf %217, %218 : vector<128x1xf32>
    %cst_76 = arith.constant 2.000000e+00 : f32
    %220 = vector.broadcast %cst_76 : f32 to vector<128x1xf32>
    %221 = arith.subf %220, %219 : vector<128x1xf32>
    %222 = arith.mulf %218, %221 : vector<128x1xf32>
    %223 = vector.broadcast %222 : vector<128x1xf32> to vector<128x128xf32>
    %224 = arith.mulf %215, %223 : vector<128x128xf32>
    %225 = arith.truncf %224 : vector<128x128xf32> to vector<128x128xbf16>
    %226 = vector.extract_strided_slice %38 {offsets = [0, 0, 96], sizes = [1, 128, 16], strides = [1, 1, 1]} : vector<1x128x128xbf16> to vector<1x128x16xbf16>
    %227 = vector.shape_cast %226 : vector<1x128x16xbf16> to vector<128x16xbf16>
    %cst_77 = arith.constant dense<0.000000e+00> : vector<128x16xf32>
    %228 = tpu.matmul %225, %227, %cst_77 {dimension_numbers = #tpu.dot_dimension_numbers<[1], [0], [0], [1], [0, 0, 1, 1], [], []>} : vector<128x128xbf16>, vector<128x16xbf16>, vector<128x16xf32> -> vector<128x16xf32>
    %c0_78 = arith.constant 0 : index
    %c0_79 = arith.constant 0 : index
    %c96 = arith.constant 96 : index
    %229 = vector.load %arg22[%c0_78, %c0_79, %c96] : memref<1x128x128xf32, #tpu.memory_space<vmem>>, vector<1x128x16xf32>
    %230 = vector.shape_cast %229 : vector<1x128x16xf32> to vector<128x16xf32>
    %231 = vector.shape_cast %228 : vector<128x16xf32> to vector<1x128x16xf32>
    tpu.vector_store %arg22[%c0_78, %c0_79, %c96], %231 {strides = array<i32>} : memref<1x128x128xf32, #tpu.memory_space<vmem>>, vector<1x128x16xf32>,
    %232 = vector.extract_strided_slice %34 {offsets = [0, 0, 112], sizes = [1, 128, 16], strides = [1, 1, 1]} : vector<1x128x128xbf16> to vector<1x128x16xbf16>
    %233 = vector.shape_cast %232 : vector<1x128x16xbf16> to vector<128x16xbf16>
    %234 = vector.extract_strided_slice %36 {offsets = [0, 0, 112], sizes = [1, 128, 16], strides = [1, 1, 1]} : vector<1x128x128xbf16> to vector<1x128x16xbf16>
    %235 = vector.shape_cast %234 : vector<1x128x16xbf16> to vector<128x16xbf16>
    %cst_80 = arith.constant dense<0.000000e+00> : vector<128x128xf32>
    %236 = tpu.matmul %233, %235, %cst_80 {dimension_numbers = #tpu.dot_dimension_numbers<[1], [1], [0], [0], [0, 0, 1, 0], [], []>} : vector<128x16xbf16>, vector<128x16xbf16>, vector<128x128xf32> -> vector<128x128xf32>
    %237 = arith.addf %236, %42 : vector<128x128xf32>
    %cst_81 = arith.constant dense<0xFF800000> : vector<128xf32>
    %238 = vector.multi_reduction <maximumf>, %237, %cst_81 [1] : vector<128x128xf32> to vector<128xf32>
    %239 = vector.shape_cast %238 : vector<128xf32> to vector<128x1xf32>
    %240 = vector.broadcast %239 : vector<128x1xf32> to vector<128x128xf32>
    %241 = arith.subf %237, %240 : vector<128x128xf32>
    %242 = math.exp %241 : vector<128x128xf32>
    %cst_82 = arith.constant dense<0.000000e+00> : vector<128xf32>
    %243 = vector.multi_reduction <add>, %242, %cst_82 [1] : vector<128x128xf32> to vector<128xf32>
    %244 = vector.shape_cast %243 : vector<128xf32> to vector<128x1xf32>
    %245 = tpu.reciprocal %244 {approx = true} : vector<128x1xf32> -> vector<128x1xf32>
    %246 = arith.mulf %244, %245 : vector<128x1xf32>
    %cst_83 = arith.constant 2.000000e+00 : f32
    %247 = vector.broadcast %cst_83 : f32 to vector<128x1xf32>
    %248 = arith.subf %247, %246 : vector<128x1xf32>
    %249 = arith.mulf %245, %248 : vector<128x1xf32>
    %250 = vector.broadcast %249 : vector<128x1xf32> to vector<128x128xf32>
    %251 = arith.mulf %242, %250 : vector<128x128xf32>
    %252 = arith.truncf %251 : vector<128x128xf32> to vector<128x128xbf16>
    %253 = vector.extract_strided_slice %38 {offsets = [0, 0, 112], sizes = [1, 128, 16], strides = [1, 1, 1]} : vector<1x128x128xbf16> to vector<1x128x16xbf16>
    %254 = vector.shape_cast %253 : vector<1x128x16xbf16> to vector<128x16xbf16>
    %cst_84 = arith.constant dense<0.000000e+00> : vector<128x16xf32>
    %255 = tpu.matmul %252, %254, %cst_84 {dimension_numbers = #tpu.dot_dimension_numbers<[1], [0], [0], [1], [0, 0, 1, 1], [], []>} : vector<128x128xbf16>, vector<128x16xbf16>, vector<128x16xf32> -> vector<128x16xf32>
    %c0_85 = arith.constant 0 : index
    %c0_86 = arith.constant 0 : index
    %c112 = arith.constant 112 : index
    %256 = vector.load %arg22[%c0_85, %c0_86, %c112] : memref<1x128x128xf32, #tpu.memory_space<vmem>>, vector<1x128x16xf32>
    %257 = vector.shape_cast %256 : vector<1x128x16xf32> to vector<128x16xf32>
    %258 = vector.shape_cast %255 : vector<128x16xf32> to vector<1x128x16xf32>
    tpu.vector_store %arg22[%c0_85, %c0_86, %c112], %258 {strides = array<i32>} : memref<1x128x128xf32, #tpu.memory_space<vmem>>, vector<1x128x16xf32>,
    %c0_87 = arith.constant 0 : index
    %c0_88 = arith.constant 0 : index
    %c0_89 = arith.constant 0 : index
    %259 = vector.load %arg22[%c0_87, %c0_88, %c0_89] : memref<1x128x128xf32, #tpu.memory_space<vmem>>, vector<1x128x128xf32>
    %260 = vector.shape_cast %259 : vector<1x128x128xf32> to vector<128x128xf32>
    %261 = arith.truncf %260 : vector<128x128xf32> to vector<128x128xbf16>
    %c0_90 = arith.constant 0 : index
    %c0_91 = arith.constant 0 : index
    %c0_92 = arith.constant 0 : index
    %262 = vector.load %arg11[%c0_90, %c0_91, %c0_92] : memref<1x128x128xbf16, #tpu.memory_space<vmem>>, vector<1x128x128xbf16>
    %263 = vector.shape_cast %262 : vector<1x128x128xbf16> to vector<128x128xbf16>
    %cst_93 = arith.constant dense<0.000000e+00> : vector<128x128xf32>
    %264 = tpu.matmul %261, %263, %cst_93 {dimension_numbers = #tpu.dot_dimension_numbers<[1], [0], [0], [1], [0, 0, 1, 1], [], []>} : vector<128x128xbf16>, vector<128x128xbf16>, vector<128x128xf32> -> vector<128x128xf32>
    %c0_94 = arith.constant 0 : index
    %c0_95 = arith.constant 0 : index
    %c0_96 = arith.constant 0 : index
    %265 = vector.load %arg12[%c0_94, %c0_95, %c0_96] : memref<1x1x128xf32, #tpu.memory_space<vmem>>, vector<1x1x128xf32>
    %266 = vector.shape_cast %265 : vector<1x1x128xf32> to vector<1x128xf32>
    %267 = vector.broadcast %266 : vector<1x128xf32> to vector<128x128xf32>
    %268 = arith.addf %264, %267 : vector<128x128xf32>
    %269 = arith.addf %5, %268 : vector<128x128xf32>
    %c0_97 = arith.constant 0 : index
    %c0_98 = arith.constant 0 : index
    %c0_99 = arith.constant 0 : index
    %270 = vector.load %arg13[%c0_97, %c0_98, %c0_99] : memref<1x1x128xf32, #tpu.memory_space<vmem>>, vector<1x1x128xf32>
    %271 = vector.shape_cast %270 : vector<1x1x128xf32> to vector<1x128xf32>
    %c0_100 = arith.constant 0 : index
    %c0_101 = arith.constant 0 : index
    %c0_102 = arith.constant 0 : index
    %272 = vector.load %arg14[%c0_100, %c0_101, %c0_102] : memref<1x1x128xf32, #tpu.memory_space<vmem>>, vector<1x1x128xf32>
    %273 = vector.shape_cast %272 : vector<1x1x128xf32> to vector<1x128xf32>
    %cst_103 = arith.constant dense<0.000000e+00> : vector<128xf32>
    %274 = vector.multi_reduction <add>, %269, %cst_103 [1] : vector<128x128xf32> to vector<128xf32>
    %275 = vector.shape_cast %274 : vector<128xf32> to vector<128x1xf32>
    %cst_104 = arith.constant 1.280000e+02 : f32
    %276 = vector.broadcast %cst_104 : f32 to vector<128x1xf32>
    %277 = arith.divf %275, %276 : vector<128x1xf32>
    %278 = vector.broadcast %277 : vector<128x1xf32> to vector<128x128xf32>
    %279 = arith.subf %269, %278 : vector<128x128xf32>
    %280 = arith.mulf %279, %279 : vector<128x128xf32>
    %cst_105 = arith.constant dense<0.000000e+00> : vector<128xf32>
    %281 = vector.multi_reduction <add>, %280, %cst_105 [1] : vector<128x128xf32> to vector<128xf32>
    %282 = vector.shape_cast %281 : vector<128xf32> to vector<128x1xf32>
    %cst_106 = arith.constant 1.280000e+02 : f32
    %283 = vector.broadcast %cst_106 : f32 to vector<128x1xf32>
    %284 = arith.divf %282, %283 : vector<128x1xf32>
    %cst_107 = arith.constant 9.99999974E-6 : f32
    %285 = vector.broadcast %cst_107 : f32 to vector<128x1xf32>
    %286 = arith.addf %284, %285 : vector<128x1xf32>
    %287 = math.rsqrt %286 : vector<128x1xf32>
    %288 = vector.broadcast %287 : vector<128x1xf32> to vector<128x128xf32>
    %289 = arith.mulf %279, %288 : vector<128x128xf32>
    %290 = vector.broadcast %271 : vector<1x128xf32> to vector<128x128xf32>
    %291 = arith.mulf %289, %290 : vector<128x128xf32>
    %292 = vector.broadcast %273 : vector<1x128xf32> to vector<128x128xf32>
    %293 = arith.addf %291, %292 : vector<128x128xf32>
    %294 = arith.truncf %293 : vector<128x128xf32> to vector<128x128xbf16>
    %c0_108 = arith.constant 0 : index
    %c0_109 = arith.constant 0 : index
    %c0_110 = arith.constant 0 : index
    %295 = vector.load %arg15[%c0_108, %c0_109, %c0_110] : memref<1x128x256xbf16, #tpu.memory_space<vmem>>, vector<1x128x256xbf16>
    %296 = vector.shape_cast %295 : vector<1x128x256xbf16> to vector<128x256xbf16>
    %cst_111 = arith.constant dense<0.000000e+00> : vector<128x256xf32>
    %297 = tpu.matmul %294, %296, %cst_111 {dimension_numbers = #tpu.dot_dimension_numbers<[1], [0], [0], [1], [0, 0, 1, 1], [], []>} : vector<128x128xbf16>, vector<128x256xbf16>, vector<128x256xf32> -> vector<128x256xf32>
    %c0_112 = arith.constant 0 : index
    %c0_113 = arith.constant 0 : index
    %c0_114 = arith.constant 0 : index
    %298 = vector.load %arg16[%c0_112, %c0_113, %c0_114] : memref<1x1x256xf32, #tpu.memory_space<vmem>>, vector<1x1x256xf32>
    %299 = vector.shape_cast %298 : vector<1x1x256xf32> to vector<1x256xf32>
    %300 = vector.broadcast %299 : vector<1x256xf32> to vector<128x256xf32>
    %301 = arith.addf %297, %300 : vector<128x256xf32>
    %cst_115 = arith.constant 5.000000e-01 : f32
    %302 = vector.broadcast %cst_115 : f32 to vector<128x256xf32>
    %303 = arith.mulf %302, %301 : vector<128x256xf32>
    %304 = arith.mulf %301, %301 : vector<128x256xf32>
    %305 = arith.mulf %304, %301 : vector<128x256xf32>
    %cst_116 = arith.constant 4.471500e-02 : f32
    %306 = vector.broadcast %cst_116 : f32 to vector<128x256xf32>
    %307 = arith.mulf %306, %305 : vector<128x256xf32>
    %308 = arith.addf %301, %307 : vector<128x256xf32>
    %cst_117 = arith.constant 0.797884583 : f32
    %309 = vector.broadcast %cst_117 : f32 to vector<128x256xf32>
    %310 = arith.mulf %309, %308 : vector<128x256xf32>
    %311 = math.tanh %310 : vector<128x256xf32>
    %cst_118 = arith.constant 1.000000e+00 : f32
    %312 = vector.broadcast %cst_118 : f32 to vector<128x256xf32>
    %313 = arith.addf %312, %311 : vector<128x256xf32>
    %314 = arith.mulf %303, %313 : vector<128x256xf32>
    %315 = arith.truncf %314 : vector<128x256xf32> to vector<128x256xbf16>
    %c0_119 = arith.constant 0 : index
    %c0_120 = arith.constant 0 : index
    %c0_121 = arith.constant 0 : index
    %316 = vector.load %arg17[%c0_119, %c0_120, %c0_121] : memref<1x256x128xbf16, #tpu.memory_space<vmem>>, vector<1x256x128xbf16>
    %317 = vector.shape_cast %316 : vector<1x256x128xbf16> to vector<256x128xbf16>
    %cst_122 = arith.constant dense<0.000000e+00> : vector<128x128xf32>
    %318 = tpu.matmul %315, %317, %cst_122 {dimension_numbers = #tpu.dot_dimension_numbers<[1], [0], [0], [1], [0, 0, 1, 1], [], []>} : vector<128x256xbf16>, vector<256x128xbf16>, vector<128x128xf32> -> vector<128x128xf32>
    %c0_123 = arith.constant 0 : index
    %c0_124 = arith.constant 0 : index
    %c0_125 = arith.constant 0 : index
    %319 = vector.load %arg18[%c0_123, %c0_124, %c0_125] : memref<1x1x128xf32, #tpu.memory_space<vmem>>, vector<1x1x128xf32>
    %320 = vector.shape_cast %319 : vector<1x1x128xf32> to vector<1x128xf32>
    %321 = vector.broadcast %320 : vector<1x128xf32> to vector<128x128xf32>
    %322 = arith.addf %318, %321 : vector<128x128xf32>
    %323 = arith.addf %293, %322 : vector<128x128xf32>
    %c0_126 = arith.constant 0 : index
    %c0_127 = arith.constant 0 : index
    %c0_128 = arith.constant 0 : index
    %324 = vector.load %arg19[%c0_126, %c0_127, %c0_128] : memref<1x1x128xf32, #tpu.memory_space<vmem>>, vector<1x1x128xf32>
    %325 = vector.shape_cast %324 : vector<1x1x128xf32> to vector<1x128xf32>
    %c0_129 = arith.constant 0 : index
    %c0_130 = arith.constant 0 : index
    %c0_131 = arith.constant 0 : index
    %326 = vector.load %arg20[%c0_129, %c0_130, %c0_131] : memref<1x1x128xf32, #tpu.memory_space<vmem>>, vector<1x1x128xf32>
    %327 = vector.shape_cast %326 : vector<1x1x128xf32> to vector<1x128xf32>
    %cst_132 = arith.constant dense<0.000000e+00> : vector<128xf32>
    %328 = vector.multi_reduction <add>, %323, %cst_132 [1] : vector<128x128xf32> to vector<128xf32>
    %329 = vector.shape_cast %328 : vector<128xf32> to vector<128x1xf32>
    %cst_133 = arith.constant 1.280000e+02 : f32
    %330 = vector.broadcast %cst_133 : f32 to vector<128x1xf32>
    %331 = arith.divf %329, %330 : vector<128x1xf32>
    %332 = vector.broadcast %331 : vector<128x1xf32> to vector<128x128xf32>
    %333 = arith.subf %323, %332 : vector<128x128xf32>
    %334 = arith.mulf %333, %333 : vector<128x128xf32>
    %cst_134 = arith.constant dense<0.000000e+00> : vector<128xf32>
    %335 = vector.multi_reduction <add>, %334, %cst_134 [1] : vector<128x128xf32> to vector<128xf32>
    %336 = vector.shape_cast %335 : vector<128xf32> to vector<128x1xf32>
    %cst_135 = arith.constant 1.280000e+02 : f32
    %337 = vector.broadcast %cst_135 : f32 to vector<128x1xf32>
    %338 = arith.divf %336, %337 : vector<128x1xf32>
    %cst_136 = arith.constant 9.99999974E-6 : f32
    %339 = vector.broadcast %cst_136 : f32 to vector<128x1xf32>
    %340 = arith.addf %338, %339 : vector<128x1xf32>
    %341 = math.rsqrt %340 : vector<128x1xf32>
    %342 = vector.broadcast %341 : vector<128x1xf32> to vector<128x128xf32>
    %343 = arith.mulf %333, %342 : vector<128x128xf32>
    %344 = vector.broadcast %325 : vector<1x128xf32> to vector<128x128xf32>
    %345 = arith.mulf %343, %344 : vector<128x128xf32>
    %346 = vector.broadcast %327 : vector<1x128xf32> to vector<128x128xf32>
    %347 = arith.addf %345, %346 : vector<128x128xf32>
    %348 = vector.shape_cast %347 : vector<128x128xf32> to vector<1x128x128xf32>
    %c0_137 = arith.constant 0 : index
    %c0_138 = arith.constant 0 : index
    %c0_139 = arith.constant 0 : index
    %349 = vector.load %arg21[%c0_137, %c0_138, %c0_139] : memref<1x128x128xf32, #tpu.memory_space<vmem>>, vector<1x128x128xf32>
    tpu.vector_store %arg21[%c0_137, %c0_138, %c0_139], %348 {strides = array<i32>} : memref<1x128x128xf32, #tpu.memory_space<vmem>>, vector<1x128x128xf32>,
    return
  }
  func.func @transform_0(%arg0: i32, %arg1: i32) -> (i32, i32, i32) {
    %c0_i32 = arith.constant 0 : i32
    %c0_i32_0 = arith.constant 0 : i32
    %c0_i32_1 = arith.constant 0 : i32
    return %arg0, %c0_i32, %c0_i32_0 : i32, i32, i32
  }
  func.func @transform_1(%arg0: i32, %arg1: i32) -> (i32, i32, i32) {
    %c0_i32 = arith.constant 0 : i32
    %c0_i32_0 = arith.constant 0 : i32
    %c0_i32_1 = arith.constant 0 : i32
    return %arg0, %c0_i32, %c0_i32_0 : i32, i32, i32
  }
  func.func @transform_2(%arg0: i32, %arg1: i32) -> (i32, i32, i32) {
    %c0_i32 = arith.constant 0 : i32
    %c0_i32_0 = arith.constant 0 : i32
    %c0_i32_1 = arith.constant 0 : i32
    return %arg0, %c0_i32, %c0_i32_0 : i32, i32, i32
  }
  func.func @transform_3(%arg0: i32, %arg1: i32) -> (i32, i32, i32) {
    %c0_i32 = arith.constant 0 : i32
    %c0_i32_0 = arith.constant 0 : i32
    %c0_i32_1 = arith.constant 0 : i32
    return %arg1, %c0_i32, %c0_i32_0 : i32, i32, i32
  }
  func.func @transform_4(%arg0: i32, %arg1: i32) -> (i32, i32, i32) {
    %c0_i32 = arith.constant 0 : i32
    %c0_i32_0 = arith.constant 0 : i32
    %c0_i32_1 = arith.constant 0 : i32
    return %arg1, %c0_i32, %c0_i32_0 : i32, i32, i32
  }
  func.func @transform_5(%arg0: i32, %arg1: i32) -> (i32, i32, i32) {
    %c0_i32 = arith.constant 0 : i32
    %c0_i32_0 = arith.constant 0 : i32
    %c0_i32_1 = arith.constant 0 : i32
    return %arg1, %c0_i32, %c0_i32_0 : i32, i32, i32
  }
  func.func @transform_6(%arg0: i32, %arg1: i32) -> (i32, i32, i32) {
    %c0_i32 = arith.constant 0 : i32
    %c0_i32_0 = arith.constant 0 : i32
    %c0_i32_1 = arith.constant 0 : i32
    return %arg1, %c0_i32, %c0_i32_0 : i32, i32, i32
  }
  func.func @transform_7(%arg0: i32, %arg1: i32) -> (i32, i32, i32) {
    %c0_i32 = arith.constant 0 : i32
    %c0_i32_0 = arith.constant 0 : i32
    %c0_i32_1 = arith.constant 0 : i32
    return %arg1, %c0_i32, %c0_i32_0 : i32, i32, i32
  }
  func.func @transform_8(%arg0: i32, %arg1: i32) -> (i32, i32, i32) {
    %c0_i32 = arith.constant 0 : i32
    %c0_i32_0 = arith.constant 0 : i32
    %c0_i32_1 = arith.constant 0 : i32
    return %arg1, %c0_i32, %c0_i32_0 : i32, i32, i32
  }
  func.func @transform_9(%arg0: i32, %arg1: i32) -> (i32, i32, i32) {
    %c0_i32 = arith.constant 0 : i32
    %c0_i32_0 = arith.constant 0 : i32
    %c0_i32_1 = arith.constant 0 : i32
    return %arg1, %c0_i32, %c0_i32_0 : i32, i32, i32
  }
  func.func @transform_10(%arg0: i32, %arg1: i32) -> (i32, i32, i32) {
    %c0_i32 = arith.constant 0 : i32
    %c0_i32_0 = arith.constant 0 : i32
    %c0_i32_1 = arith.constant 0 : i32
    return %arg1, %c0_i32, %c0_i32_0 : i32, i32, i32
  }
  func.func @transform_11(%arg0: i32, %arg1: i32) -> (i32, i32, i32) {
    %c0_i32 = arith.constant 0 : i32
    %c0_i32_0 = arith.constant 0 : i32
    %c0_i32_1 = arith.constant 0 : i32
    return %arg1, %c0_i32, %c0_i32_0 : i32, i32, i32
  }
  func.func @transform_12(%arg0: i32, %arg1: i32) -> (i32, i32, i32) {
    %c0_i32 = arith.constant 0 : i32
    %c0_i32_0 = arith.constant 0 : i32
    %c0_i32_1 = arith.constant 0 : i32
    return %arg1, %c0_i32, %c0_i32_0 : i32, i32, i32
  }
  func.func @transform_13(%arg0: i32, %arg1: i32) -> (i32, i32, i32) {
    %c0_i32 = arith.constant 0 : i32
    %c0_i32_0 = arith.constant 0 : i32
    %c0_i32_1 = arith.constant 0 : i32
    return %arg1, %c0_i32, %c0_i32_0 : i32, i32, i32
  }
  func.func @transform_14(%arg0: i32, %arg1: i32) -> (i32, i32, i32) {
    %c0_i32 = arith.constant 0 : i32
    %c0_i32_0 = arith.constant 0 : i32
    %c0_i32_1 = arith.constant 0 : i32
    return %arg1, %c0_i32, %c0_i32_0 : i32, i32, i32
  }
  func.func @transform_15(%arg0: i32, %arg1: i32) -> (i32, i32, i32) {
    %c0_i32 = arith.constant 0 : i32
    %c0_i32_0 = arith.constant 0 : i32
    %c0_i32_1 = arith.constant 0 : i32
    return %arg1, %c0_i32, %c0_i32_0 : i32, i32, i32
  }
  func.func @transform_16(%arg0: i32, %arg1: i32) -> (i32, i32, i32) {
    %c0_i32 = arith.constant 0 : i32
    %c0_i32_0 = arith.constant 0 : i32
    %c0_i32_1 = arith.constant 0 : i32
    return %arg1, %c0_i32, %c0_i32_0 : i32, i32, i32
  }
  func.func @transform_17(%arg0: i32, %arg1: i32) -> (i32, i32, i32) {
    %c0_i32 = arith.constant 0 : i32
    %c0_i32_0 = arith.constant 0 : i32
    %c0_i32_1 = arith.constant 0 : i32
    return %arg1, %c0_i32, %c0_i32_0 : i32, i32, i32
  }
  func.func @transform_18(%arg0: i32, %arg1: i32) -> (i32, i32, i32) {
    %c0_i32 = arith.constant 0 : i32
    %c0_i32_0 = arith.constant 0 : i32
    %c0_i32_1 = arith.constant 0 : i32
    return %arg1, %c0_i32, %c0_i32_0 : i32, i32, i32
  }
  func.func @transform_19(%arg0: i32, %arg1: i32) -> (i32, i32, i32) {
    %c0_i32 = arith.constant 0 : i32
    %c0_i32_0 = arith.constant 0 : i32
    %c0_i32_1 = arith.constant 0 : i32
    return %arg0, %c0_i32, %c0_i32_0 : i32, i32, i32
  }
}

</mosaic_0001>

<bundles_post_ra>
// kernel: tpu_custom_call.1
= control target key start
LH: loop header
LB: loop body
LE: loop exit
PB: predicated region body
PF: predicated region fallthrough
CT: control target
= control target key end

     0   :  { %s13630_s0 = inlined_call_operand.hbm [shape: f32[2,128,128], index: 0, kind: input, shape index: {}]   ;;  %s13631_s1 = inlined_call_operand.hbm [shape: f32[2,128,128], index: 1, kind: input, shape index: {}]   ;;  %s13632_s2 = inlined_call_operand.hbm [shape: f32[2,1,128], index: 2, kind: input, shape index: {}]   ;;  %s13633_s3 = inlined_call_operand.hbm [shape: bf16[2,128,128], index: 3, kind: input, shape index: {}]   ;;  %s13634_s4 = inlined_call_operand.vmem [shape: f32[2,1,128], index: 4, kind: input, shape index: {}]   ;;  %s13635_s5 = inlined_call_operand.hbm [shape: bf16[2,128,128], index: 5, kind: input, shape index: {}]   ;;  %s13636_s6 = inlined_call_operand.hbm [shape: f32[2,1,128], index: 6, kind: input, shape index: {}]   ;;  %s13637_s7 = inlined_call_operand.hbm [shape: bf16[2,128,128], index: 7, kind: input, shape index: {}]   ;;  %s13638_s8 = inlined_call_operand.hbm [shape: f32[2,1,128], index: 8, kind: input, shape index: {}]   ;;  %s13639_s9 = inlined_call_operand.hbm [shape: bf16[2,128,128], index: 9, kind: input, shape index: {}]   ;;  %s13640_s10 = inlined_call_operand.vmem [shape: f32[2,1,128], index: 10, kind: input, shape index: {}]   ;;  %s13641_s11 = inlined_call_operand.vmem [shape: f32[2,1,128], index: 11, kind: input, shape index: {}]   ;;  %s13642_s12 = inlined_call_operand.hbm [shape: f32[2,1,128], index: 12, kind: input, shape index: {}]   ;;  %s13643_s13 = inlined_call_operand.hbm [shape: bf16[2,128,256], index: 13, kind: input, shape index: {}]   ;;  %s13644_s14 = inlined_call_operand.vmem [shape: f32[2,1,256], index: 14, kind: input, shape index: {}]   ;;  %s13645_s15 = inlined_call_operand.hbm [shape: bf16[2,256,128], index: 15, kind: input, shape index: {}]   ;;  %s13646_s16 = inlined_call_operand.vmem [shape: f32[2,1,128], index: 16, kind: input, shape index: {}]   ;;  %s13647_s17 = inlined_call_operand.vmem [shape: f32[2,1,128], index: 17, kind: input, shape index: {}]   ;;  %s13648_s18 = inlined_call_operand.vmem [shape: f32[2,1,128], index: 18, kind: input, shape index: {}]   ;;  %s13649_s19 = inlined_call_operand.hbm [shape: f32[2,128,128], index: 19, kind: output, shape index: {}]  }
   0x1   :  { %13737 = sst [smem:[#allocation99_spill]] %s13630_s0 }
   0x2   :  { %13738 = sst [smem:[#allocation100_spill]] %s13631_s1 }
   0x3   :  { %13739 = sst [smem:[#allocation101_spill]] %s13632_s2 }
   0x4   :  { %13740 = sst [smem:[#allocation102_spill]] %s13633_s3 }
   0x5   :  { %13741 = sst [smem:[#allocation103_spill]] %s13634_s4 }
   0x6   :  { %13742 = sst [smem:[#allocation104_spill]] %s13635_s5 }
   0x7   :  { %13743 = sst [smem:[#allocation105_spill]] %s13636_s6 }
   0x8   :  { %13744 = sst [smem:[#allocation106_spill]] %s13637_s7 }
   0x9   :  { %13745 = sst [smem:[#allocation107_spill]] %s13638_s8 }
   0xa   :  { %13746 = sst [smem:[#allocation108_spill]] %s13639_s9 }
   0xb   :  { %13747 = sst [smem:[#allocation109_spill]] %s13640_s10 }
   0xc   :  { %13748 = sst [smem:[#allocation110_spill]] %s13641_s11 }
   0xd   :  { %13749 = sst [smem:[#allocation111_spill]] %s13642_s12 }
   0xe   :  { %13750 = sst [smem:[#allocation112_spill]] %s13643_s13 }
   0xf   :  { %13751 = sst [smem:[#allocation113_spill]] %s13644_s14 }
  0x10   :  { %13752 = sst [smem:[#allocation114_spill]] %s13645_s15 }
  0x11   :  { %13753 = sst [smem:[#allocation115_spill]] %s13646_s16 }
  0x12   :  { %13754 = sst [smem:[#allocation116_spill]] %s13647_s17 }
  0x13   :  { %13755 = sst [smem:[#allocation117_spill]] %s13648_s18 }
  0x14   :  { %13756 = sst [smem:[#allocation118_spill]] %s13649_s19 }
  0x15   :  { %24 = vsyncpa [#allocation4], 0 }
  0x16   :  { %26 = vsyncpa [#allocation4 + $0x1], 0 }
  0x17   :  { %27 = vsyncpa [#allocation7], 0 }
  0x18   :  { %29 = vsyncpa [#allocation7 + $0x1], 0 }
  0x19   :  { %30 = vsyncpa [#allocation10], 0 }
  0x1a   :  { %32 = vsyncpa [#allocation10 + $0x1], 0 }
  0x1b   :  { %33 = vsyncpa [#allocation13], 0 }
  0x1c   :  { %35 = vsyncpa [#allocation13 + $0x1], 0 }
  0x1d   :  { %36 = vsyncpa [#allocation16], 0 }
  0x1e   :  { %38 = vsyncpa [#allocation16 + $0x1], 0 }
  0x1f   :  { %39 = vsyncpa [#allocation19], 0 }
  0x20   :  { %41 = vsyncpa [#allocation19 + $0x1], 0 }
  0x21   :  { %42 = vsyncpa [#allocation22], 0 }
  0x22   :  { %44 = vsyncpa [#allocation22 + $0x1], 0 }
  0x23   :  { %45 = vsyncpa [#allocation5], 0 }
  0x24   :  { %47 = vsyncpa [#allocation5 + $0x1], 0  ;;  %s9443_s0 = smov 0   ;;  %s9445_s30 = smov 0  }
  0x25   :  { %s9447_s20 = smov 0   ;;  %s9449_s21 = smov 0  }
  0x26   :  { %s9451_s1 = smov 0   ;;  %s9453_s22 = smov 0  }
  0x27   :  { %s9455_s2 = smov 0   ;;  %s9457_s23 = smov 0  }
  0x28   :  { %s9459_s24 = smov 0   ;;  %s9461_s25 = smov 0  }
  0x29   :  { %s9463_s3 = smov 0  }
  0x2a LB: > { %13757 = sst [smem:[#allocation32_spill]] %s9291_s30  ;;  %s9499_s26 = sadd.s32 4294967295, %s9327_s3   ;;  %s9327_s3 = sphi %s9463_s3, %s53_s3   ;;  %s9323_s25 = sphi %s9461_s25, %s14024_s25   ;;  %s9319_s24 = sphi %s9459_s24, %s14023_s24   ;;  %s9315_s23 = sphi %s9457_s23, %s14022_s23   ;;  %s9311_s2 = sphi %s9455_s2, %s14021_s2   ;;  %s9307_s22 = sphi %s9453_s22, %s14020_s22   ;;  %s9303_s1 = sphi %s9451_s1, %s14019_s1   ;;  %s9299_s21 = sphi %s9449_s21, %s14018_s21   ;;  %s9295_s20 = sphi %s9447_s20, %s14017_s20   ;;  %s9291_s30 = sphi %s9445_s30, %s14016_s30   ;;  %s9287_s0 = sphi %s9443_s0, %s14015_s0  }
  0x2b   : > { %13758 = sst [smem:[#allocation33_spill]] %s9295_s20  ;;  %s7593_s27 = sadd.s32 4294967294, %s9327_s3  }
  0x2c   : > { %13759 = sst [smem:[#allocation34_spill]] %s9299_s21  ;;  %s62_s28 = sadd.s32 1, %s9319_s24 }
  0x2d   : > { %13760 = sst [smem:[#allocation35_spill]] %s9303_s1  ;;  %s65_s29 = sadd.s32 1, %s9323_s25 }
  0x2e   : > { %13761 = sst [smem:[#allocation36_spill]] %s9307_s22  ;;  %p63_p0 = scmp.ge.s32.totalorder %s62_s28, 2 }
  0x2f   : > { %13762 = sst [smem:[#allocation37_spill]] %s9311_s2  ;;  %s72_s19 = sadd.s32 1, %s9307_s22 }
  0x30   : > { %13763 = sst [smem:[#allocation38_spill]] %s9315_s23  ;;  %p79_p1 = scmp.ne.s32.totalorder %s9307_s22, %s9303_s1 }
  0x31   : > { %13764 = sst [smem:[#allocation39_spill]] %s9319_s24  ;;  %p80_p2 = scmp.eq.s32.totalorder %s9327_s3, 0 }
  0x32   : > { %13765 = sst [smem:[#allocation40_spill]] %s9323_s25  ;;  %s14026_s28 = smov (%p63_p0, %s62_s28), 0 }
  0x33   : > { %13766 = sst [smem:[#allocation41_spill]] %s9327_s3  ;;  %s14028_s29 = smov (!%p63_p0, %s65_s29), %s9323_s25 }
  0x34   : > { %13767 = sst [smem:[#allocation42_spill]] %s9499_s26  ;;  %p9516_p3 = por %p80_p2, %p79_p1 }
  0x35   : > { %13768 = sst [smem:[#allocation43_spill]] %s14026_s28  ;;  %p13652_p4 = scmp.ne.s32.totalorder %s9303_s1, %s9299_s21 }
  0x36   : > { %p67_p5 = scmp.ge.s32.totalorder %s14028_s29, 2  ;;  %p86_p6 = scmp.eq.s32.totalorder %s9499_s26, 0 }
  0x37   : > { %s147_s18 = ssub.s32 %s9319_s24, %s14026_s28  ;;  %s150_s17 = sadd.s32 1, %s9295_s20 }
  0x38   : > { %s14030_s29 = smov (%p67_p5, %s14028_s29), 0  ;;  %p9533_p7 = por %p86_p6, %p13652_p4 }
  0x39   : > { %13770 = sst [smem:[#allocation44_spill]] %s14030_s29  ;;  %p148_p8 = scmp.eq.s32.totalorder %s147_s18, 0 }
  0x3a   : > { %s13771_s16 = scalar_select %p9533_p7, 1, 0 }
  0x3b   : > { %s69_s14 = ssub.s32 %s9323_s25, %s14030_s29  ;;  %p157_p9 = scmp.ne.s32.totalorder %s9295_s20, %s9291_s30 }
  0x3c   : > { %13772 = sst [smem:[#allocation45_spill]] %s13771_s16  ;;  %p70_p10 = scmp.eq.s32.totalorder %s69_s14, 0 }
  0x3d   : > { %p163_p11 = scmp.ne.s32.totalorder %s9291_s30, %s9287_s0  ;;  %p9551_p12 = por %p157_p9, %p80_p2 }
  0x3e   : > { %s9544_s11 = scalar_select %p148_p8, %s9295_s20, %s150_s17  }
  0x3f   : > { %s9547_s28 = scalar_select %p70_p10, %s9307_s22, %s72_s19  }
  0x40   : > { %13773 = sst [smem:[#allocation46_spill]] %s9544_s11  ;;  %p9557_p13 = por %p163_p11, %p86_p6 }
  0x41   : > { %13774 = sst [smem:[#allocation47_spill]] %s9547_s28  ;;  %p577_p0 = scmp.eq.s32.totalorder %s9499_s26, 3 }
  0x42   : > { %s13776_s4 = scalar_select %p9557_p13, 1, 0 }
  0x43   : > { %p583_p5 = scmp.eq.s32.totalorder %s7593_s27, 3  ;;  %p9565_p4 = por %p577_p0, %p79_p1 }
  0x44   : > { %13777 = sst [smem:[#allocation48_spill]] %s13776_s4  ;;  %p13780_p8 = scmp.ne.s32.totalorder %s9303_s1, %s9299_s21 }
  0x45   : > { %s13778_s14 = scalar_select %p9565_p4, 1, 0 }
  0x46   : > { %p9572_p10 = por %p583_p5, %p13780_p8  ;;  %p7595_p2 = scmp.ge.s32.totalorder %s9327_s3, 4 }
  0x47   : > { %13779 = sst [smem:[#allocation49_spill]] %s13778_s14  ;;  %s9578_s18 = sand.u32 (!%p7595_p2), 1, %s9307_s22  }
  0x48   : > { %s13781_s17 = scalar_select %p9572_p10, 1, 0 }
  0x49   : > { %599 = sbr.rel (%p7595_p2) target bundleno = 135 (0x87), region = 16  ;;  %s13664_s19 = sshll.u32 (!%p7595_p2), %s9323_s25, 7 }
  0x4a   : > { %13782 = sst [smem:[#allocation50_spill]] %s13781_s17  ;;  %s13663_s0 = sshll.u32 (!%p7595_p2), %s9578_s18, 7 }
  0x4b   : > { %s9583_s27 = sand.u32 (!%p7595_p2), 1, %s9327_s3   ;;  %s13783_s11 = sld [smem:[#allocation100_spill]] (!%p7595_p2) }
  0x4c   : > { %s629_s21 = scalar_lea.vmem (!%p7595_p2), [#allocation6], %s13663_s0  ;;  %s13666_s22 = scalar_lea.sflag (!%p7595_p2), [#allocation7], %s9583_s27 }
  0x4d   : > { %s637_s14 = sshll.u32 (!%p7595_p2), %s629_s21, 4  ;;  %s13667_s4 = smov (!%p7595_p2), 128   ;;  %s638_s14 = int_to_ptr.vmem [resolvable:$true] %s637_s14 }
  0x4e   : > { %s13669_s30 = smov 8   ;;  %s9604_s21 = sshll.u32 %s9319_s24, 6 }
  0x4f   : > { %s13784_s0 = sld [smem:[#allocation102_spill]]  ;;  %s13676_s16 = scalar_lea.sflag [#allocation13], %s9583_s27 }
  0x50   : > { %s13785_s6 = sld [smem:[#allocation105_spill]] }
  0x51   : > { %s634_s17 = scalar_lea.hbm %s13783_s11, %s13664_s19  ;;  %s9601_s11 = sand.u32 1, %s9295_s20  }
  0x52   : > { %s635_s2 = sshll.u32 %s634_s17, 4  ;;  %s9607_s28 = sshll.u32 %s9601_s11, 6  ;;  %s636_s2 = int_to_ptr.hbm [resolvable:$true] %s635_s2 }
  0x53   : > { %8039 = dma.hbm_to_vmem [thread:$0]  (%p9516_p3), %s636_s2, 2048, %s638_s14, %s13666_s22, %s13667_s4, %s13667_s4, %s13669_s30  }
  0x54   : > { %s668_s2 = scalar_lea.vmem [#allocation9], %s9607_s28  ;;  %s13675_s22 = scalar_lea.sflag [#allocation10], %s9583_s27 }
  0x55   : > { %s673_s19 = scalar_lea.hbm %s13784_s0, %s9604_s21  ;;  %s676_s14 = sshll.u32 %s668_s2, 4  ;;  %s677_s14 = int_to_ptr.vmem [resolvable:$true] %s676_s14 }
  0x56   : > { %s674_s26 = sshll.u32 %s673_s19, 4  ;;  %s13678_s4 = smov 64   ;;  %s675_s26 = int_to_ptr.hbm [resolvable:$true] %s674_s26 }
  0x57   : > { %s13680_s30 = smov 4   ;;  %s720_s29 = scalar_lea.hbm %s13785_s6, %s9319_s24 }
  0x58   : > { %8041 = dma.hbm_to_vmem [thread:$0]  (%p9551_p12), %s675_s26, 1024, %s677_s14, %s13675_s22, %s13678_s4, %s13678_s4, %s13680_s30  }
  0x59   : > { %s722_s17 = sshll.u32 %s720_s29, 4  ;;  %s717_s2 = scalar_lea.vmem [#allocation12], %s9601_s11  ;;  %s723_s17 = int_to_ptr.hbm [resolvable:$true] %s722_s17 }
  0x5a   : > { %s724_s20 = sshll.u32 %s717_s2, 4  ;;  %s13786_s8 = sld [smem:[#allocation107_spill]]  ;;  %s725_s20 = int_to_ptr.vmem [resolvable:$true] %s724_s20 }
  0x5b   : > { %8043 = dma.hbm_to_vmem [thread:$0]  (%p9551_p12), %s723_s17, 16, %s725_s20, %s13676_s16  }
  0x5c   : > { %s756_s0 = scalar_lea.vmem [#allocation15], %s9601_s11  ;;  %s13677_s2 = scalar_lea.sflag [#allocation16], %s9583_s27 }
  0x5d   : > { %s763_s19 = sshll.u32 %s756_s0, 4  ;;  %s13787_s12 = sld [smem:[#allocation111_spill]]  ;;  %s764_s19 = int_to_ptr.vmem [resolvable:$true] %s763_s19 }
  0x5e   : > { %s807_s26 = scalar_lea.vmem [#allocation18], %s9601_s11  ;;  %s13788_s0 = sshll.u32 %s9323_s25, 7 }
  0x5f   : > { %s814_s16 = sshll.u32 %s807_s26, 4  ;;  %s13790_s20 = sshll.u32 %s9578_s18, 7  ;;  %s815_s16 = int_to_ptr.vmem [resolvable:$true] %s814_s16 }
  0x60   : > { %s759_s14 = scalar_lea.hbm %s13786_s8, %s9319_s24  ;;  %s604_s26 = scalar_lea.sflag [#allocation4], %s9578_s18 }
  0x61   : > { %s761_s29 = sshll.u32 %s759_s14, 4  ;;  %s13682_s14 = scalar_lea.sflag [#allocation19], %s9583_s27  ;;  %s762_s29 = int_to_ptr.hbm [resolvable:$true] %s761_s29 }
  0x62   : > { %8045 = dma.hbm_to_vmem [thread:$0]  (%p9551_p12), %s762_s29, 16, %s764_s19, %s13677_s2  }
  0x63   : > { %s810_s1 = scalar_lea.hbm %s13787_s12, %s9319_s24  ;;  %s13789_s2 = sld [smem:[#allocation99_spill]] }
  0x64   : > { %s812_s17 = sshll.u32 %s810_s1, 4  ;;  %s607_s1 = scalar_lea.vmem [#allocation3], %s13790_s20  ;;  %s813_s17 = int_to_ptr.hbm [resolvable:$true] %s812_s17 }
  0x65   : > { %8047 = dma.hbm_to_vmem [thread:$0]  (%p9551_p12), %s813_s17, 16, %s815_s16, %s13682_s14  }
  0x66   : > { %s615_s4 = sshll.u32 %s607_s1, 4  ;;  %s13791_s6 = smov 8   ;;  %s616_s4 = int_to_ptr.vmem [resolvable:$true] %s615_s4 }
  0x67   : > { %s13792_s8 = smov 128   ;;  %s13793_s19 = sld [smem:[#allocation101_spill]] }
  0x68   : > { %s13795_s5 = sld [smem:[#allocation104_spill]]  ;;  %s13797_s17 = smov 64  }
  0x69   : > { %s612_s22 = scalar_lea.hbm %s13789_s2, %s13788_s0  ;;  %s650_s0 = scalar_lea.vmem [#allocation8], %s9578_s18 }
  0x6a   : > { %s613_s30 = sshll.u32 %s612_s22, 4  ;;  %s657_s29 = sshll.u32 %s650_s0, 4  ;;  %s614_s30 = int_to_ptr.hbm [resolvable:$true] %s613_s30  ;;  %s658_s29 = int_to_ptr.vmem [resolvable:$true] %s657_s29 }
  0x6b   : > { %8038 = dma.hbm_to_vmem [thread:$0]  (%p9516_p3), %s614_s30, 2048, %s616_s4, %s604_s26, %s13792_s8, %s13792_s8, %s13791_s6  }
  0x6c   : > { %s13794_s22 = scalar_lea.sflag [#allocation7], %s9583_s27  ;;  %s696_s30 = scalar_lea.vmem [#allocation11], %s9607_s28 }
  0x6d   : > { %s653_s2 = scalar_lea.hbm %s13793_s19, %s9323_s25  ;;  %s704_s26 = sshll.u32 %s696_s30, 4  ;;  %s705_s26 = int_to_ptr.vmem [resolvable:$true] %s704_s26 }
  0x6e   : > { %s655_s20 = sshll.u32 %s653_s2, 4  ;;  %s701_s4 = scalar_lea.hbm %s13795_s5, %s9604_s21  ;;  %s656_s20 = int_to_ptr.hbm [resolvable:$true] %s655_s20 }
  0x6f   : > { %8040 = dma.hbm_to_vmem [thread:$0]  (%p9516_p3), %s656_s20, 16, %s658_s29, %s13794_s22  }
  0x70   : > { %s702_s16 = sshll.u32 %s701_s4, 4  ;;  %s13796_s18 = smov 4   ;;  %s703_s16 = int_to_ptr.hbm [resolvable:$true] %s702_s16 }
  0x71   : > { %s13798_s19 = scalar_lea.sflag [#allocation10], %s9583_s27  ;;  %s13799_s7 = sld [smem:[#allocation106_spill]] }
  0x72   : > { %8042 = dma.hbm_to_vmem [thread:$0]  (%p9551_p12), %s703_s16, 1024, %s705_s26, %s13798_s19, %s13797_s17, %s13797_s17, %s13796_s18  }
  0x73   : > { %s735_s0 = scalar_lea.vmem [#allocation14], %s9607_s28  ;;  %s13800_s22 = scalar_lea.sflag [#allocation13], %s9583_s27 }
  0x74   : > { %s743_s29 = sshll.u32 %s735_s0, 4  ;;  %s13801_s9 = sld [smem:[#allocation108_spill]]  ;;  %s744_s29 = int_to_ptr.vmem [resolvable:$true] %s743_s29 }
  0x75   : > { %s774_s26 = scalar_lea.vmem [#allocation17], %s9607_s28  ;;  %s7614_s23 = sshll.u32 %s9601_s11, 7 }
  0x76   : > { %s782_s16 = sshll.u32 %s774_s26, 4  ;;  %s13802_s2 = scalar_lea.sflag [#allocation16], %s9583_s27  ;;  %s783_s16 = int_to_ptr.vmem [resolvable:$true] %s782_s16 }
  0x77   : > { %s740_s14 = scalar_lea.hbm %s13799_s7, %s9604_s21  ;;  %s13803_s13 = sld [smem:[#allocation112_spill]] }
  0x78   : > { %s741_s20 = sshll.u32 %s740_s14, 4  ;;  %s7963_s14 = sshll.u32 %s9319_s24, 7  ;;  %s742_s20 = int_to_ptr.hbm [resolvable:$true] %s741_s20 }
  0x79   : > { %8044 = dma.hbm_to_vmem [thread:$0]  (%p9551_p12), %s742_s20, 1024, %s744_s29, %s13800_s22, %s13797_s17, %s13797_s17, %s13796_s18  }
  0x7a   : > { %s779_s30 = scalar_lea.hbm %s13801_s9, %s9604_s21  ;;  %s825_s21 = scalar_lea.vmem [#allocation20], %s7614_s23 }
  0x7b   : > { %s780_s19 = sshll.u32 %s779_s30, 4  ;;  %s833_s28 = sshll.u32 %s825_s21, 4  ;;  %s781_s19 = int_to_ptr.hbm [resolvable:$true] %s780_s19  ;;  %s834_s28 = int_to_ptr.vmem [resolvable:$true] %s833_s28 }
  0x7c   : > { %8046 = dma.hbm_to_vmem [thread:$0]  (%p9551_p12), %s781_s19, 1024, %s783_s16, %s13802_s2, %s13797_s17, %s13797_s17, %s13796_s18  }
  0x7d   : > { %s830_s20 = scalar_lea.hbm %s13803_s13, %s7963_s14  ;;  %s13804_s1 = scalar_lea.sflag [#allocation19], %s9583_s27 }
  0x7e   : > { %s831_s22 = sshll.u32 %s830_s20, 4  ;;  %s13805_s15 = sld [smem:[#allocation114_spill]]  ;;  %s832_s22 = int_to_ptr.hbm [resolvable:$true] %s831_s22 }
  0x7f   : > { %8048 = dma.hbm_to_vmem [thread:$0]  (%p9551_p12), %s832_s22, 2048, %s834_s28, %s13804_s1, %s13792_s8, %s13792_s8, %s13791_s6  }
  0x80   : > { %s854_s19 = scalar_lea.vmem [#allocation21], %s7614_s23  ;;  %s851_s0 = scalar_lea.sflag [#allocation22], %s9601_s11 }
  0x81   : > { %s862_s2 = sshll.u32 %s854_s19, 4  ;;  %s863_s2 = int_to_ptr.vmem [resolvable:$true] %s862_s2 }
  0x84   : > { %s859_s26 = scalar_lea.hbm %s13805_s15, %s7963_s14 }
  0x85   : > { %s860_s16 = sshll.u32 %s859_s26, 4  ;;  %s861_s16 = int_to_ptr.hbm [resolvable:$true] %s860_s16 }
  0x86   : > { %8049 = dma.hbm_to_vmem [thread:$0]  (%p9551_p12), %s861_s16, 2048, %s863_s2, %s851_s0, %s13797_s17, %s13797_s17, %s13796_s18  }
  0x87 PF: > { %p7620_p1 = scmp.ge.s32.totalorder %s9327_s3, 1  ;;  %p888_p3 = scmp.lt.s32.totalorder %s9327_s3, 5 }
  0x89   : > { %p889_p6 = pnand %p7620_p1, %p888_p3 }
  0x8b   : > { %892 = sbr.rel (%p889_p6) target bundleno = 4050 (0xfd2), region = 96 }
  0x90   : > { %s13806_s6 = sld [smem:[#allocation35_spill]] }
  0x96   : > { %s9734_s27 = sand.u32 1, %s13806_s6  }
  0x97   : > { %13808 = sst [smem:[#allocation51_spill]] %s9734_s27  ;;  %s9737_s23 = sshll.u32 %s9734_s27, 7 }
  0x98   : > { %s895_s10 = scalar_lea.sflag [#allocation4], %s9734_s27  ;;  %s9741_s11 = scalar_lea.vmem [#allocation3], %s9737_s23 }
  0x99   : > { %9254 = dma.done.wait (%p9533_p7), %s895_s10, 2048  }
  0x9a   : > { %9256 = vsyncadd (%p9533_p7), %s895_s10, 4294965248  ;;  %s13809_s18 = sld [smem:[#allocation42_spill]]  ;;  %s9749_s29 = scalar_lea.vmem [#allocation6], %s9737_s23 }
  0xa0   : > { %s904_s17 = sand.u32 1, %s13809_s18  }
  0xa1   : > { %s905_s14 = scalar_lea.sflag [#allocation7], %s904_s17 }
  0xa2   : > { %9258 = dma.done.wait (%p9533_p7), %s905_s14, 2064  }
  0xa3   : > { %9260 = vsyncadd (%p9533_p7), %s905_s14, 4294965232  ;;  %s13810_s20 = sld [smem:[#allocation32_spill]]  ;;  %s9760_s1 = scalar_lea.vmem [#allocation8], %s9734_s27 }
  0xa4   : > { %s924_s4 = scalar_lea.sflag [#allocation10], %s904_s17 }
  0xa9   : > { %s9756_s28 = sand.u32 1, %s13810_s20  }
  0xaa   : > { %s7623_s22 = sshll.u32 %s9756_s28, 6 }
  0xab   : > { %s9762_s30 = scalar_lea.vmem [#allocation9], %s7623_s22 }
  0xac   : > { %9262 = dma.done.wait (%p9557_p13), %s924_s4, 2048  }
  0xad   : > { %9264 = vsyncadd (%p9557_p13), %s924_s4, 4294965248  ;;  %s9768_s26 = scalar_lea.vmem [#allocation11], %s7623_s22  ;;  %s944_s16 = scalar_lea.sflag [#allocation13], %s904_s17 }
  0xae   : > { %9266 = dma.done.wait (%p9557_p13), %s944_s16, 1040  }
  0xaf   : > { %9268 = vsyncadd (%p9557_p13), %s944_s16, 4294966256  ;;  %s9775_s2 = scalar_lea.vmem [#allocation14], %s7623_s22  ;;  %s963_s0 = scalar_lea.sflag [#allocation16], %s904_s17 }
  0xb0   : > { %9270 = dma.done.wait (%p9557_p13), %s963_s0, 1040  }
  0xb1   : > { %9272 = vsyncadd (%p9557_p13), %s963_s0, 4294966256  ;;  %s9782_s8 = scalar_lea.vmem [#allocation17], %s7623_s22  ;;  %s982_s10 = scalar_lea.sflag [#allocation19], %s904_s17 }
  0xb2   : > { %9274 = dma.done.wait (%p9557_p13), %s982_s10, 2064  }
  0xb3   : > { %9276 = vsyncadd (%p9557_p13), %s982_s10, 4294965232  ;;  %s7627_s14 = sshll.u32 %s9756_s28, 7  ;;  %s1001_s4 = scalar_lea.sflag [#allocation22], %s9756_s28 }
  0xb4   : > { %s9790_s20 = scalar_lea.vmem [#allocation20], %s7627_s14  ;;  %s9793_s16 = scalar_lea.vmem [#allocation21], %s7627_s14 }
  0xb5   : > { %13812 = sst [smem:[#allocation52_spill]] %s9790_s20 }
  0xb6   : > { %13813 = sst [smem:[#allocation53_spill]] %s9793_s16 }
  0xb7   : > { %9278 = dma.done.wait (%p9557_p13), %s1001_s4, 2048  }
  0xb8   : > { %9280 = vsyncadd (%p9557_p13), %s1001_s4, 4294965248  ;;  %s13814_s17 = sld [smem:[#allocation37_spill]]  ;;  %s9836_s7 = scalar_lea.vmem [#allocation23], %s9737_s23 }
  0xb9   : > { %s13817_s9 = sld [smem:[#allocation110_spill]] }
  0xba   : > { %s13818_s0 = sld [smem:[#allocation113_spill]] }
  0xbb   : > { %s13819_s27 = sld [smem:[#allocation115_spill]] }
  0xbc   : > { %s13820_s20 = sld [smem:[#allocation116_spill]] }
  0xbd   : > { %s13821_s19 = sld [smem:[#allocation117_spill]] }
  0xbe   : > { %p1133_p7 = scmp.lt.s32.totalorder %s13814_s17, 1  ;;  %p7631_p9 = scmp.ne.s32.totalorder %s13814_s17, 0 }
  0xc0   : > { %s9801_s22 = scalar_select %p1133_p7, %s13814_s17, 1 }
  0xc1   : > { %1158 = sbr.rel (%p7631_p9) target bundleno = 215 (0xd7), region = 148 }
  0xc2   : > { %s9815_s12 = scalar_lea.vmem %s13817_s9, %s9801_s22  ;;  %s7630_s13 = sshll.u32 %s9801_s22, 1 }
  0xc3   : > { %s9821_s10 = scalar_lea.vmem %s13818_s0, %s7630_s13  ;;  %s1148_s16 = scalar_lea.vmem %s13819_s27, %s9801_s22 }
  0xc4   : > { %s1151_s6 = scalar_lea.vmem %s13820_s20, %s9801_s22  ;;  %s1154_s5 = scalar_lea.vmem %s13821_s19, %s9801_s22 }
  0xc6   : > { %v1159_v0 = vld [vmem:[%s9741_s11] sm:$0xff]  ;;  %v1160_v1 = vld [vmem:[%s9741_s11 + $0x8] sm:$0xff]  ;;  %v1161_v2 = vld [vmem:[%s9741_s11 + $0x10] sm:$0xff] }
  0xc7   : > { %1175 = vst [vmem:[%s9836_s7] sm:$0xff] %v1159_v0  ;;  %v1162_v3 = vld [vmem:[%s9741_s11 + $0x18] sm:$0xff]  ;;  %v1163_v4 = vld [vmem:[%s9741_s11 + $0x20] sm:$0xff]  ;;  %v1164_v5 = vld [vmem:[%s9741_s11 + $0x28] sm:$0xff] }
  0xc8   : > { %1176 = vst [vmem:[%s9836_s7 + $0x8] sm:$0xff] %v1160_v1  ;;  %v1165_v6 = vld [vmem:[%s9741_s11 + $0x30] sm:$0xff]  ;;  %v1166_v7 = vld [vmem:[%s9741_s11 + $0x38] sm:$0xff]  ;;  %v1167_v8 = vld [vmem:[%s9741_s11 + $0x40] sm:$0xff] }
  0xc9   : > { %1177 = vst [vmem:[%s9836_s7 + $0x10] sm:$0xff] %v1161_v2  ;;  %v1168_v9 = vld [vmem:[%s9741_s11 + $0x48] sm:$0xff]  ;;  %v1169_v10 = vld [vmem:[%s9741_s11 + $0x50] sm:$0xff]  ;;  %v1170_v11 = vld [vmem:[%s9741_s11 + $0x58] sm:$0xff] }
  0xca   : > { %1178 = vst [vmem:[%s9836_s7 + $0x18] sm:$0xff] %v1162_v3  ;;  %v1171_v12 = vld [vmem:[%s9741_s11 + $0x60] sm:$0xff]  ;;  %v1172_v13 = vld [vmem:[%s9741_s11 + $0x68] sm:$0xff]  ;;  %v1173_v14 = vld [vmem:[%s9741_s11 + $0x70] sm:$0xff] }
  0xcb   : > { %1179 = vst [vmem:[%s9836_s7 + $0x20] sm:$0xff] %v1163_v4  ;;  %v1174_v15 = vld [vmem:[%s9741_s11 + $0x78] sm:$0xff] }
  0xcc   : > { %1180 = vst [vmem:[%s9836_s7 + $0x28] sm:$0xff] %v1164_v5 }
  0xcd   : > { %1181 = vst [vmem:[%s9836_s7 + $0x30] sm:$0xff] %v1165_v6 }
  0xce   : > { %1182 = vst [vmem:[%s9836_s7 + $0x38] sm:$0xff] %v1166_v7 }
  0xcf   : > { %1183 = vst [vmem:[%s9836_s7 + $0x40] sm:$0xff] %v1167_v8 }
  0xd0   : > { %1184 = vst [vmem:[%s9836_s7 + $0x48] sm:$0xff] %v1168_v9 }
  0xd1   : > { %1185 = vst [vmem:[%s9836_s7 + $0x50] sm:$0xff] %v1169_v10 }
  0xd2   : > { %1186 = vst [vmem:[%s9836_s7 + $0x58] sm:$0xff] %v1170_v11 }
  0xd3   : > { %1187 = vst [vmem:[%s9836_s7 + $0x60] sm:$0xff] %v1171_v12 }
  0xd4   : > { %1188 = vst [vmem:[%s9836_s7 + $0x68] sm:$0xff] %v1172_v13 }
  0xd5   : > { %1189 = vst [vmem:[%s9836_s7 + $0x70] sm:$0xff] %v1173_v14 }
  0xd6   : > { %1190 = vst [vmem:[%s9836_s7 + $0x78] sm:$0xff] %v1174_v15 }
  0xd7 PF: > { %v7972_v16 = vld [vmem:[%s9762_s30 + $0x38] sm:$0xff]  ;;  %v7971_v19 = vld [vmem:[%s9762_s30 + $0x30] sm:$0xff]  ;;  %v7970_v22 = vld [vmem:[%s9762_s30 + $0x28] sm:$0xff]  ;;  %s13822_s9 = scalar_lea.vmem [#allocation12], %s9756_s28  ;;  %s13823_s24 = sld [smem:[#allocation103_spill]]  ;;  %vm1754_vm0 = vcmask 130048  }
  0xd8   : > { %v7980_v17 = vld [vmem:[%s9768_s26 + $0x38] sm:$0xff]  ;;  %1323 = vmatpush.bf16.msra.mxu0 %v7972_v16  ;;  %v7979_v20 = vld [vmem:[%s9768_s26 + $0x30] sm:$0xff]  ;;  %v7978_v23 = vld [vmem:[%s9768_s26 + $0x28] sm:$0xff]  ;;  %s13825_s3 = scalar_lea.vmem [#allocation15], %s9756_s28  ;;  %s9333_s27 = smov 64   ;;  %vm2631_vm1 = vcmask 261248  }
  0xd9   : > { %v7988_v18 = vld [vmem:[%s9775_s2 + $0x38] sm:$0xff]  ;;  %1456 = vmatpush.bf16.msra.mxu1 %v7980_v17  ;;  %v7987_v21 = vld [vmem:[%s9775_s2 + $0x30] sm:$0xff]  ;;  %v7986_v24 = vld [vmem:[%s9775_s2 + $0x28] sm:$0xff]  ;;  %s9334_s23 = smov 80   ;;  %s9335_s11 = smov 112   ;;  %vm3114_vm2 = vcmask 392448  }
  0xda   : > { %1573 = vmatpush.bf16.msra.mxu2 %v7988_v18  ;;  %v7969_v25 = vld [vmem:[%s9762_s30 + $0x20] sm:$0xff]  ;;  %v7968_v28 = vld [vmem:[%s9762_s30 + $0x18] sm:$0xff]  ;;  %v7967_v31 = vld [vmem:[%s9762_s30 + $0x10] sm:$0xff]  ;;  %s9339_s19 = smov 16   ;;  %vm3597_vm3 = vcmask 523648   ;;  %vm4080_vm4 = vcmask 654848  }
  0xdb   : > { %v7977_v26 = vld [vmem:[%s9768_s26 + $0x20] sm:$0xff]  ;;  %v7976_v29 = vld [vmem:[%s9768_s26 + $0x18] sm:$0xff]  ;;  %v7975_v32 = vld [vmem:[%s9768_s26 + $0x10] sm:$0xff]  ;;  %vm4563_vm5 = vcmask 786048   ;;  %vm5046_vm6 = vcmask 917248   ;;  %vm5529_vm7 = vcmask 1048448  }
  0xdc   : > { %1324 = vmatpush.bf16.msra.mxu0 %v7971_v19  ;;  %v7985_v27 = vld [vmem:[%s9775_s2 + $0x20] sm:$0xff]  ;;  %v7984_v30 = vld [vmem:[%s9775_s2 + $0x18] sm:$0xff]  ;;  %v7983_v33 = vld [vmem:[%s9775_s2 + $0x10] sm:$0xff]  ;;  %s13998_s17 = sld [smem:[#allocation52_spill]]  ;;  %s13999_s14 = scalar_lea.vmem [#allocation18], %s9756_s28 }
  0xdd   : > { %1457 = vmatpush.bf16.msra.mxu1 %v7979_v20  ;;  %v7966_v34 = vld [vmem:[%s9762_s30 + $0x8] sm:$0xff]  ;;  %v1207_v38 = vld [vmem:[%s9749_s29] sm:$0xff]  ;;  %v1193_v48 = vld [vmem:[%s9836_s7 + $0x10] sm:$0xff]  ;;  %s13824_s25 = scalar_lea.vmem %s13823_s24, %s9801_s22  ;;  %s14000_s0 = sld [smem:[#allocation53_spill]] }
  0xde   : > { %1574 = vmatpush.bf16.msra.mxu2 %v7987_v21  ;;  %v7974_v35 = vld [vmem:[%s9768_s26 + $0x8] sm:$0xff]  ;;  %v7965_v43 = vld [vmem:[%s9762_s30] sm:$0xff]  ;;  %v1210_v51 = vld [vmem:[%s9749_s29 + $0x18] sm:$0xff]  ;;  %s9337_s30 = smov 96  }
  0xdf   : > { %v1191_v36 = vld [vmem:[%s9836_s7] sm:$0xff]  ;;  %v1192_v37 = vld [vmem:[%s9836_s7 + $0x8] sm:$0xff]  ;;  %v1194_v49 = vld [vmem:[%s9836_s7 + $0x18] sm:$0xff] }
  0xe0   : > { %1325 = vmatpush.bf16.msra.mxu0 %v7970_v22  ;;  %v1208_v39 = vld [vmem:[%s9749_s29 + $0x8] sm:$0xff]  ;;  %v1223_v41 = vadd.f32 %v1207_v38, %v1191_v36  ;;  %v1247_v47 = vpack.c.bf16 %v1192_v37, %v1191_v36  ;;  %v1209_v50 = vld [vmem:[%s9749_s29 + $0x10] sm:$0xff]  ;;  %v1226_v53 = vadd.f32 %v1210_v51, %v1194_v49  ;;  %v1248_v55 = vpack.c.bf16 %v1194_v49, %v1193_v48  ;;  %v1211_v58 = vld [vmem:[%s9749_s29 + $0x20] sm:$0xff] }
  0xe1   : > { %1458 = vmatpush.bf16.msra.mxu1 %v7978_v23  ;;  %v7982_v40 = vld [vmem:[%s9775_s2 + $0x8] sm:$0xff]  ;;  %v1224_v42 = vadd.f32 %v1208_v39, %v1192_v37  ;;  %v7973_v44 = vld [vmem:[%s9768_s26] sm:$0xff]  ;;  %v1225_v52 = vadd.f32 %v1209_v50, %v1193_v48  ;;  %v1197_v0 = vld [vmem:[%s9836_s7 + $0x30] sm:$0xff]  ;;  %s9338_s26 = smov 32  }
  0xe2   : > { %1575 = vmatpush.bf16.msra.mxu2 %v7986_v24  ;;  %v7981_v45 = vld [vmem:[%s9775_s2] sm:$0xff]  ;;  %v1196_v57 = vld [vmem:[%s9836_s7 + $0x28] sm:$0xff]  ;;  %v1214_v3 = vld [vmem:[%s9749_s29 + $0x38] sm:$0xff] }
  0xe3   : > { %v1239_v46 = vpack.c.bf16 %v1224_v42, %v1223_v41  ;;  %v1240_v54 = vpack.c.bf16 %v1226_v53, %v1225_v52  ;;  %v1195_v56 = vld [vmem:[%s9836_s7 + $0x20] sm:$0xff]  ;;  %v1198_v1 = vld [vmem:[%s9836_s7 + $0x38] sm:$0xff]  ;;  %v1213_v2 = vld [vmem:[%s9749_s29 + $0x30] sm:$0xff] }
  0xe4   : > { %1326 = vmatpush.bf16.msra.mxu0 %v7969_v25  ;;  %v1212_v59 = vld [vmem:[%s9749_s29 + $0x28] sm:$0xff]  ;;  %v1227_v60 = vadd.f32 %v1211_v58, %v1195_v56  ;;  %v1249_v63 = vpack.c.bf16 %v1196_v57, %v1195_v56  ;;  %v1229_v4 = vadd.f32 %v1213_v2, %v1197_v0  ;;  %v1230_v5 = vadd.f32 %v1214_v3, %v1198_v1  ;;  %v1200_v9 = vld [vmem:[%s9836_s7 + $0x48] sm:$0xff]  ;;  %v1215_v10 = vld [vmem:[%s9749_s29 + $0x40] sm:$0xff] }
  0xe5   : > { %1459 = vmatpush.bf16.msra.mxu1 %v7977_v26  ;;  %v1228_v61 = vadd.f32 %v1212_v59, %v1196_v57  ;;  %v1250_v7 = vpack.c.bf16 %v1198_v1, %v1197_v0  ;;  %v1199_v8 = vld [vmem:[%s9836_s7 + $0x40] sm:$0xff]  ;;  %v1201_v16 = vld [vmem:[%s9836_s7 + $0x50] sm:$0xff]  ;;  %v1202_v17 = vld [vmem:[%s9836_s7 + $0x58] sm:$0xff] }
  0xe6   : > { %1576 = vmatpush.bf16.msra.mxu2 %v7985_v27  ;;  %v1242_v6 = vpack.c.bf16 %v1230_v5, %v1229_v4  ;;  %v1216_v11 = vld [vmem:[%s9749_s29 + $0x48] sm:$0xff]  ;;  %v1231_v12 = vadd.f32 %v1215_v10, %v1199_v8  ;;  %v1251_v15 = vpack.c.bf16 %v1200_v9, %v1199_v8  ;;  %v1217_v18 = vld [vmem:[%s9749_s29 + $0x50] sm:$0xff]  ;;  %v1218_v19 = vld [vmem:[%s9749_s29 + $0x58] sm:$0xff]  ;;  %v1252_v23 = vpack.c.bf16 %v1202_v17, %v1201_v16 }
  0xe7   : > { %v1241_v62 = vpack.c.bf16 %v1228_v61, %v1227_v60  ;;  %v1232_v13 = vadd.f32 %v1216_v11, %v1200_v9  ;;  %v1233_v20 = vadd.f32 %v1217_v18, %v1201_v16  ;;  %v1234_v21 = vadd.f32 %v1218_v19, %v1202_v17  ;;  %v1203_v24 = vld [vmem:[%s9836_s7 + $0x60] sm:$0xff]  ;;  %v1204_v25 = vld [vmem:[%s9836_s7 + $0x68] sm:$0xff]  ;;  %v1219_v26 = vld [vmem:[%s9749_s29 + $0x60] sm:$0xff] }
  0xe8   : > { %1327 = vmatpush.bf16.msra.mxu0 %v7968_v28  ;;  %v1220_v27 = vld [vmem:[%s9749_s29 + $0x68] sm:$0xff]  ;;  %v1235_v28 = vadd.f32 %v1219_v26, %v1203_v24  ;;  %v9929_v42 = vld [vmem:[%s13822_s9] ss:$0 sm:$0xff] }
  0xe9   : > { %1460 = vmatpush.bf16.msra.mxu1 %v7976_v29  ;;  %v1243_v14 = vpack.c.bf16 %v1232_v13, %v1231_v12  ;;  %v1244_v22 = vpack.c.bf16 %v1234_v21, %v1233_v20  ;;  %v1236_v29 = vadd.f32 %v1220_v27, %v1204_v25  ;;  %v9944_v57 = vld [vmem:[%s13825_s3] ss:$0 sm:$0xff]  ;;  %s14009_s3 = sld [smem:[#allocation118_spill]] }
  0xea   : > { %1577 = vmatpush.bf16.msra.mxu2 %v7984_v30 }
  0xeb   : > { %v1245_v30 = vpack.c.bf16 %v1236_v29, %v1235_v28 }
  0xec   : > { %1328 = vmatpush.bf16.msra.mxu0 %v7967_v31  ;;  %v1253_v31 = vpack.c.bf16 %v1204_v25, %v1203_v24 }
  0xed   : > { %1461 = vmatpush.bf16.msra.mxu1 %v7975_v32  ;;  %v1205_v32 = vld [vmem:[%s9836_s7 + $0x70] sm:$0xff] }
  0xee   : > { %1578 = vmatpush.bf16.msra.mxu2 %v7983_v33  ;;  %v1206_v33 = vld [vmem:[%s9836_s7 + $0x78] sm:$0xff] }
  0xef   : > { %v1254_v39 = vpack.c.bf16 %v1206_v33, %v1205_v32 }
  0xf0   : > { %1329 = vmatpush.bf16.msra.mxu0 %v7966_v34  ;;  %v1221_v34 = vld [vmem:[%s9749_s29 + $0x70] sm:$0xff] }
  0xf1   : > { %1462 = vmatpush.bf16.msra.mxu1 %v7974_v35  ;;  %v1222_v35 = vld [vmem:[%s9749_s29 + $0x78] sm:$0xff]  ;;  %v1237_v36 = vadd.f32 %v1221_v34, %v1205_v32  ;;  %s9336_s29 = smov 48  }
  0xf2   : > { %1579 = vmatpush.bf16.msra.mxu2 %v7982_v40  ;;  %v1238_v37 = vadd.f32 %v1222_v35, %v1206_v33 }
  0xf4   : > { %1330 = vmatpush.bf16.msra.mxu0 %v7965_v43  ;;  %v1246_v38 = vpack.c.bf16 %v1238_v37, %v1237_v36  ;;  %v9936_v43 = vld [vmem:[%s13824_s25] ss:$0 sm:$0xff] }
  0xf5   : > { %1463 = vmatpush.bf16.msra.mxu1 %v7973_v44 }
  0xf6   : > { %1580 = vmatpush.bf16.msra.mxu2 %v7981_v45 }
  0xf7   : > { %1331 = vmatmul.bf16.vlgmr.msra.gmra.mxu0 %v1239_v46 }
  0xf8   : > { %1464 = vmatmul.bf16.vlgmr.msra.gmra.mxu1 %v1239_v46 }
  0xf9   : > { %1581 = vmatmul.bf16.vlgmr.msra.gmra.mxu2 %v1247_v47 }
 0x107   : > { %1336 = vmatmul.bf16.gmra.mxu0 %v1240_v54 }
 0x108   : > { %1469 = vmatmul.bf16.gmra.mxu1 %v1240_v54 }
 0x109   : > { %1586 = vmatmul.bf16.gmra.mxu2 %v1248_v55 }
 0x117   : > { %1341 = vmatmul.bf16.gmra.mxu0 %v1241_v62 }
 0x118   : > { %1474 = vmatmul.bf16.gmra.mxu1 %v1241_v62 }
 0x119   : > { %1591 = vmatmul.bf16.gmra.mxu2 %v1249_v63 }
 0x127   : > { %1346 = vmatmul.bf16.gmra.mxu0 %v1242_v6 }
 0x128   : > { %1479 = vmatmul.bf16.gmra.mxu1 %v1242_v6 }
 0x129   : > { %1596 = vmatmul.bf16.gmra.mxu2 %v1250_v7 }
 0x137   : > { %1351 = vmatmul.bf16.gmra.mxu0 %v1243_v14 }
 0x138   : > { %1484 = vmatmul.bf16.gmra.mxu1 %v1243_v14 }
 0x139   : > { %1601 = vmatmul.bf16.gmra.mxu2 %v1251_v15 }
 0x147   : > { %1356 = vmatmul.bf16.gmra.mxu0 %v1244_v22 }
 0x148   : > { %1489 = vmatmul.bf16.gmra.mxu1 %v1244_v22 }
 0x149   : > { %1606 = vmatmul.bf16.gmra.mxu2 %v1252_v23 }
 0x157   : > { %1361 = vmatmul.bf16.gmra.mxu0 %v1245_v30 }
 0x158   : > { %1494 = vmatmul.bf16.gmra.mxu1 %v1245_v30 }
 0x159   : > { %1611 = vmatmul.bf16.gmra.mxu2 %v1253_v31 }
 0x167   : > { %1366 = vmatmul.bf16.gmra.mxu0 %v1246_v38 }
 0x168   : > { %1499 = vmatmul.bf16.gmra.mxu1 %v1246_v38 }
 0x169   : > { %1616 = vmatmul.bf16.gmra.mxu2 %v1254_v39 }
 0x174   : > { %v1332_v40 = vpop.f32.mrf.mxu0 }
 0x175   : > { %v1465_v41 = vpop.f32.mrf.mxu1  ;;  %v1333_v48 = vadd.f32 %v9936_v43, %v1332_v40 }
 0x176   : > { %v1466_v44 = vadd.f32 %v9929_v42, %v1465_v41 }
 0x177   : > { %v1372_v54 = vmul.f32 0.25, %v1333_v48 }
 0x178   : > { %v1638_v49 = vpack.c.bf16 %v1466_v44, %v1466_v44 }
 0x179   : > { %v1622_v63 = vpack.c.bf16 %v1372_v54, %v1372_v54 }
 0x17a   : > { %v1730_v55 = vunpack.c.l.b16 %v1638_v49 }
 0x17b   : > { %v1690_v3 = vunpack.c.l.b16 %v1622_v63 }
 0x17c   : > { %v1582_v45 = vpop.f32.mrf.mxu2  ;;  %v1334_v46 = vpop.f32.mrf.mxu0 }
 0x17d   : > { %v1467_v47 = vpop.f32.mrf.mxu1  ;;  %v1335_v50 = vadd.f32 %v9936_v43, %v1334_v46  ;;  %v1583_v0 = vadd.f32 %v9944_v57, %v1582_v45 }
 0x17e   : > { %v1468_v51 = vadd.f32 %v9929_v42, %v1467_v47 }
 0x17f   : > { %v1373_v52 = vmul.f32 0.25, %v1335_v50  ;;  %v1654_v4 = vpack.c.bf16 %v1583_v0, %v1583_v0 }
 0x180   : > { %v1639_v53 = vpack.c.bf16 %v1468_v51, %v1468_v51 }
 0x181   : > { %v1623_v58 = vpack.c.bf16 %v1373_v52, %v1373_v52  ;;  %v2068_v10 = vunpack.c.l.b16 %v1654_v4 }
 0x182   : > { %v1731_v56 = vunpack.c.l.b16 %v1639_v53 }
 0x183   : > { %v1691_v1 = vunpack.c.l.b16 %v1623_v58 }
 0x184   : > { %v9946_v59 = vpack.c.b16 %v1731_v56, %v1730_v55  ;;  %v1584_v60 = vpop.f32.mrf.mxu2  ;;  %v1337_v62 = vpop.f32.mrf.mxu0 }
 0x185   : > { %v1470_v61 = vpop.f32.mrf.mxu1  ;;  %v1585_v2 = vadd.f32 %v9944_v57, %v1584_v60  ;;  %v9956_v5 = vpack.c.b16 %v1691_v1, %v1690_v3  ;;  %v1338_v14 = vadd.f32 %v9936_v43, %v1337_v62 }
 0x186   : > { %13826 = vst [vmem:[#allocation54_spill] sm:$0xff] %v9946_v59  ;;  %3630 = vrot.lane.b32.xlu1 %v9946_v59, %s9333_s27  ;;  %3147 = vrot.lane.b32.xlu0 %v9946_v59, %s9334_s23  ;;  %v1471_v12 = vadd.f32 %v9929_v42, %v1470_v61 }
 0x187   : > { %2181 = vrot.lane.b32.xlu2 %v9946_v59, %s9335_s11  ;;  %13827 = vst [vmem:[#allocation55_spill] sm:$0xff] %v9956_v5  ;;  %v1655_v6 = vpack.c.bf16 %v1585_v2, %v1585_v2  ;;  %v1374_v21 = vmul.f32 0.25, %v1338_v14 }
 0x188   : > { %v1640_v17 = vpack.c.bf16 %v1471_v12, %v1471_v12 }
 0x189   : > { %v2069_v11 = vunpack.c.l.b16 %v1655_v6  ;;  %v1624_v25 = vpack.c.bf16 %v1374_v21, %v1374_v21 }
 0x18a   : > { %v1732_v23 = vunpack.c.l.b16 %v1640_v17 }
 0x18b   : > { %v9968_v16 = vpack.c.b16 %v2069_v11, %v2068_v10  ;;  %v1692_v31 = vunpack.c.l.b16 %v1624_v25 }
 0x18c   : > { %v1587_v7 = vpop.f32.mrf.mxu2  ;;  %v1339_v9 = vpop.f32.mrf.mxu0 }
 0x18d   : > { %v1472_v8 = vpop.f32.mrf.mxu1  ;;  %v1340_v15 = vadd.f32 %v9936_v43, %v1339_v9  ;;  %13828 = vst [vmem:[#allocation56_spill] sm:$0xff] %v9968_v16  ;;  %v1588_v30 = vadd.f32 %v9944_v57, %v1587_v7 }
 0x18e   : > { %4113 = vrot.lane.b32.xlu0 %v9946_v59, %s9336_s29  ;;  %4097 = vrot.lane.b32.xlu1 %v9956_v5, %s9336_s29  ;;  %v1473_v13 = vadd.f32 %v9929_v42, %v1472_v8 }
 0x18f   : > { %2664 = vrot.lane.b32.xlu2 %v9946_v59, %s9337_s30  ;;  %v1375_v22 = vmul.f32 0.25, %v1340_v15  ;;  %v1656_v34 = vpack.c.bf16 %v1588_v30, %v1588_v30 }
 0x190   : > { %v1641_v18 = vpack.c.bf16 %v1473_v13, %v1473_v13 }
 0x191   : > { %v1625_v26 = vpack.c.bf16 %v1375_v22, %v1375_v22  ;;  %v2070_v39 = vunpack.c.l.b16 %v1656_v34 }
 0x192   : > { %v1733_v24 = vunpack.c.l.b16 %v1641_v18 }
 0x193   : > { %v1693_v33 = vunpack.c.l.b16 %v1625_v26 }
 0x194   : > { %v1589_v19 = vpop.f32.mrf.mxu2  ;;  %v9976_v27 = vpack.c.b16 %v1733_v24, %v1732_v23  ;;  %v1342_v52 = vpop.f32.mrf.mxu0 }
 0x195   : > { %v1475_v20 = vpop.f32.mrf.mxu1  ;;  %v1590_v32 = vadd.f32 %v9944_v57, %v1589_v19  ;;  %v9988_v36 = vpack.c.b16 %v1693_v33, %v1692_v31  ;;  %v1343_v58 = vadd.f32 %v9936_v43, %v1342_v52 }
 0x196   : > { %2494 = vrot.lane.b32.xlu1 %v9968_v16, %s9335_s11  ;;  %2648 = vrot.lane.b32.xlu0 %v9956_v5, %s9337_s30  ;;  %13829 = vst [vmem:[#allocation57_spill] sm:$0xff] %v9976_v27  ;;  %v1476_v41 = vadd.f32 %v9929_v42, %v1475_v20 }
 0x197   : > { %2165 = vrot.lane.b32.xlu2 %v9956_v5, %s9335_s11  ;;  %v1657_v35 = vpack.c.bf16 %v1590_v32, %v1590_v32  ;;  %13830 = vst [vmem:[#allocation58_spill] sm:$0xff] %v9988_v36  ;;  %v1376_v63 = vmul.f32 0.25, %v1343_v58 }
 0x198   : > { %v1642_v46 = vpack.c.bf16 %v1476_v41, %v1476_v41 }
 0x199   : > { %v2071_v40 = vunpack.c.l.b16 %v1657_v35  ;;  %v1626_v1 = vpack.c.bf16 %v1376_v63, %v1376_v63 }
 0x19a   : > { %v1734_v50 = vunpack.c.l.b16 %v1642_v46 }
 0x19b   : > { %v9998_v45 = vpack.c.b16 %v2071_v40, %v2070_v39  ;;  %v1694_v9 = vunpack.c.l.b16 %v1626_v1 }
 0x19c   : > { %v9978_v28 = vpop.f32.mrf.mxu2  ;;  %v1344_v56 = vpop.f32.mrf.mxu0 }
 0x19d   : > { %v1477_v29 = vpop.f32.mrf.mxu1  ;;  %13831 = vst [vmem:[#allocation59_spill] sm:$0xff] %v9998_v45  ;;  %v1345_v60 = vadd.f32 %v9936_v43, %v1344_v56  ;;  %v1593_v19 = vadd.f32 %v9944_v57, %v9978_v28 }
 0x19e   : > { %2183 = vrot.lane.b32.xlu1 %v9976_v27, %s9335_s11  ;;  %2666 = vrot.lane.b32.xlu0 %v9976_v27, %s9337_s30  ;;  %v1478_v44 = vadd.f32 %v9929_v42, %v1477_v29 }
 0x19f   : > { %3131 = vrot.lane.b32.xlu2 %v9956_v5, %s9334_s23  ;;  %v1377_v0 = vmul.f32 0.25, %v1345_v60  ;;  %v1658_v25 = vpack.c.bf16 %v1593_v19, %v1593_v19 }
 0x1a0   : > { %v1643_v47 = vpack.c.bf16 %v1478_v44, %v1478_v44 }
 0x1a1   : > { %v1627_v2 = vpack.c.bf16 %v1377_v0, %v1377_v0  ;;  %v2072_v32 = vunpack.c.l.b16 %v1658_v25 }
 0x1a2   : > { %v1735_v51 = vunpack.c.l.b16 %v1643_v47 }
 0x1a3   : > { %v1695_v10 = vunpack.c.l.b16 %v1627_v2 }
 0x1a4   : > { %v1594_v37 = vpop.f32.mrf.mxu2  ;;  %v10008_v53 = vpack.c.b16 %v1735_v51, %v1734_v50  ;;  %v1347_v6 = vpop.f32.mrf.mxu0 }
 0x1a5   : > { %v1480_v38 = vpop.f32.mrf.mxu1  ;;  %v10042_v13 = vpack.c.b16 %v1695_v10, %v1694_v9  ;;  %v1595_v20 = vadd.f32 %v9944_v57, %v1594_v37  ;;  %v1348_v23 = vadd.f32 %v9936_v43, %v1347_v6 }
 0x1a6   : > { %3149 = vrot.lane.b32.xlu1 %v9976_v27, %s9334_s23  ;;  %2167 = vrot.lane.b32.xlu0 %v9988_v36, %s9335_s11  ;;  %v1481_v7 = vadd.f32 %v9929_v42, %v1480_v38 }
 0x1a7   : > { %3614 = vrot.lane.b32.xlu2 %v9956_v5, %s9333_s27  ;;  %13832 = vst [vmem:[#allocation60_spill] sm:$0xff] %v10042_v13  ;;  %v1659_v26 = vpack.c.bf16 %v1595_v20, %v1595_v20  ;;  %v1378_v31 = vmul.f32 0.25, %v1348_v23 }
 0x1a8   : > { %v1644_v11 = vpack.c.bf16 %v1481_v7, %v1481_v7 }
 0x1a9   : > { %v2073_v33 = vunpack.c.l.b16 %v1659_v26  ;;  %v1628_v34 = vpack.c.bf16 %v1378_v31, %v1378_v31 }
 0x1aa   : > { %v1736_v17 = vunpack.c.l.b16 %v1644_v11 }
 0x1ab   : > { %v10069_v37 = vpack.c.b16 %v2073_v33, %v2072_v32  ;;  %v1696_v40 = vunpack.c.l.b16 %v1628_v34 }
 0x1ac   : > { %v10000_v48 = vpop.f32.mrf.mxu2  ;;  %v1349_v21 = vpop.f32.mrf.mxu0 }
 0x1ad   : > { %v1482_v49 = vpop.f32.mrf.mxu1  ;;  %v1350_v24 = vadd.f32 %v9936_v43, %v1349_v21  ;;  %13833 = vst [vmem:[#allocation61_spill] sm:$0xff] %v10069_v37  ;;  %v1598_v60 = vadd.f32 %v9944_v57, %v10000_v48 }
 0x1ae   : > { %3632 = vrot.lane.b32.xlu1 %v9976_v27, %s9333_s27  ;;  %2496 = vrot.lane.b32.xlu0 %v9998_v45, %s9335_s11  ;;  %v1483_v8 = vadd.f32 %v9929_v42, %v1482_v49 }
 0x1af   : > { %4115 = vrot.lane.b32.xlu2 %v9976_v27, %s9336_s29  ;;  %v1379_v28 = vmul.f32 0.25, %v1350_v24  ;;  %v1660_v2 = vpack.c.bf16 %v1598_v60, %v1598_v60 }
 0x1b0   : > { %v1645_v12 = vpack.c.bf16 %v1483_v8, %v1483_v8 }
 0x1b1   : > { %v1629_v35 = vpack.c.bf16 %v1379_v28, %v1379_v28 }
 0x1b2   : > { %v1737_v18 = vunpack.c.l.b16 %v1645_v12  ;;  %v2074_v12 = vunpack.c.l.b16 %v1660_v2 }
 0x1b3   : > { %v1697_v41 = vunpack.c.l.b16 %v1629_v35 }
 0x1b4   : > { %v10010_v54 = vpop.f32.mrf.mxu2  ;;  %v10057_v22 = vpack.c.b16 %v1737_v18, %v1736_v17  ;;  %v1352_v50 = vpop.f32.mrf.mxu0 }
 0x1b5   : > { %v10012_v55 = vpop.f32.mrf.mxu1  ;;  %v10082_v49 = vpack.c.b16 %v1697_v41, %v1696_v40  ;;  %v1600_v63 = vadd.f32 %v9944_v57, %v10010_v54  ;;  %v1353_v35 = vadd.f32 %v9936_v43, %v1352_v50 }
 0x1b6   : > { %2650 = vrot.lane.b32.xlu1 %v9988_v36, %s9337_s30  ;;  %2185 = vrot.lane.b32.xlu0 %v10008_v53, %s9335_s11  ;;  %v1486_v44 = vadd.f32 %v9929_v42, %v10012_v55 }
 0x1b7   : > { %3133 = vrot.lane.b32.xlu2 %v9988_v36, %s9334_s23  ;;  %13834 = vst [vmem:[#allocation62_spill] sm:$0xff] %v10082_v49  ;;  %v1661_v48 = vpack.c.bf16 %v1600_v63, %v1600_v63  ;;  %v1380_v50 = vmul.f32 0.25, %v1353_v35 }
 0x1b8   : > { %v1646_v51 = vpack.c.bf16 %v1486_v44, %v1486_v44 }
 0x1b9   : > { %v2075_v17 = vunpack.c.l.b16 %v1661_v48 }
 0x1ba   : > { %v1738_v55 = vunpack.c.l.b16 %v1646_v51 }
 0x1bb   : > { %v10113_v31 = vpack.c.b16 %v2075_v17, %v2074_v12 }
 0x1bc   : > { %v10022_v61 = vpop.f32.mrf.mxu2  ;;  %v1354_v11 = vpop.f32.mrf.mxu0 }
 0x1bd   : > { %v1487_v62 = vpop.f32.mrf.mxu1  ;;  %13835 = vst [vmem:[#allocation63_spill] sm:$0xff] %v10113_v31  ;;  %v1355_v44 = vadd.f32 %v9936_v43, %v1354_v11 }
 0x1be   : > { %4099 = vrot.lane.b32.xlu1 %v9988_v36, %s9336_s29  ;;  %2668 = vrot.lane.b32.xlu0 %v10008_v53, %s9337_s30  ;;  %v1488_v46 = vadd.f32 %v9929_v42, %v1487_v62 }
 0x1bf   : > { %3616 = vrot.lane.b32.xlu2 %v9988_v36, %s9333_s27 }
 0x1c0   : > { %v1647_v52 = vpack.c.bf16 %v1488_v46, %v1488_v46 }
 0x1c2   : > { %v1739_v62 = vunpack.c.l.b16 %v1647_v52 }
 0x1c4   : > { %v10030_v3 = vpop.f32.mrf.mxu2  ;;  %v10097_v6 = vpack.c.b16 %v1739_v62, %v1738_v55  ;;  %v1381_v62 = vmul.f32 0.25, %v1355_v44 }
 0x1c5   : > { %v10032_v4 = vpop.f32.mrf.mxu1  ;;  %v1605_v11 = vadd.f32 %v9944_v57, %v10030_v3 }
 0x1c6   : > { %3151 = vrot.lane.b32.xlu1 %v10008_v53, %s9334_s23  ;;  %3634 = vrot.lane.b32.xlu0 %v10008_v53, %s9333_s27  ;;  %v1491_v28 = vadd.f32 %v9929_v42, %v10032_v4 }
 0x1c7   : > { %4117 = vrot.lane.b32.xlu2 %v10008_v53, %s9336_s29 }
 0x1cc   : > { %v10044_v14 = vpop.f32.mrf.mxu2 }
 0x1cd   : > { %v10046_v15 = vpop.f32.mrf.mxu1  ;;  %v1608_v33 = vadd.f32 %v9944_v57, %v10044_v14 }
 0x1ce   : > { %2169 = vrot.lane.b32.xlu1 %v10042_v13, %s9335_s11  ;;  %2652 = vrot.lane.b32.xlu0 %v10042_v13, %s9337_s30  ;;  %v1493_v34 = vadd.f32 %v9929_v42, %v10046_v15  ;;  %v1648_v15 = vpack.c.bf16 %v1491_v28, %v1491_v28 }
 0x1cf   : > { %3135 = vrot.lane.b32.xlu2 %v10042_v13, %s9334_s23 }
 0x1d0   : > { %v1649_v63 = vpack.c.bf16 %v1493_v34, %v1493_v34  ;;  %v1740_v12 = vunpack.c.l.b16 %v1648_v15 }
 0x1d4   : > { %v10061_v29 = vpop.f32.mrf.mxu2 }
 0x1d5   : > { %v1495_v30 = vpop.f32.mrf.mxu1  ;;  %v1610_v4 = vadd.f32 %v9944_v57, %v10061_v29  ;;  %v1664_v29 = vpack.c.bf16 %v1608_v33, %v1608_v33 }
 0x1d6   : > { %4101 = vrot.lane.b32.xlu1 %v10042_v13, %s9336_s29  ;;  %2670 = vrot.lane.b32.xlu0 %v10057_v22, %s9337_s30  ;;  %v1496_v54 = vadd.f32 %v9929_v42, %v1495_v30 }
 0x1d7   : > { %3618 = vrot.lane.b32.xlu2 %v10042_v13, %s9333_s27  ;;  %v1665_v48 = vpack.c.bf16 %v1610_v4, %v1610_v4 }
 0x1d8   : > { %v1650_v20 = vpack.c.bf16 %v1496_v54, %v1496_v54 }
 0x1dc   : > { %v1612_v38 = vpop.f32.mrf.mxu2 }
 0x1dd   : > { %v1497_v39 = vpop.f32.mrf.mxu1  ;;  %v1613_v25 = vadd.f32 %v9944_v57, %v1612_v38 }
 0x1de   : > { %3153 = vrot.lane.b32.xlu1 %v10057_v22, %s9334_s23  ;;  %3636 = vrot.lane.b32.xlu0 %v10057_v22, %s9333_s27  ;;  %v1498_v7 = vadd.f32 %v9929_v42, %v1497_v39  ;;  %v1742_v39 = vunpack.c.l.b16 %v1650_v20  ;;  %v1631_v20 = vpack.c.bf16 %v1381_v62, %v1381_v62 }
 0x1df   : > { %2498 = vrot.lane.b32.xlu2 %v10069_v37, %s9335_s11  ;;  %v1666_v51 = vpack.c.bf16 %v1613_v25, %v1613_v25 }
 0x1e0   : > { %v1651_v21 = vpack.c.bf16 %v1498_v7, %v1498_v7 }
 0x1e1   : > { %v10080_v47 = vpop.permute.xlu2 %2181  ;;  %v2080_v54 = vunpack.c.l.b16 %v1666_v51 }
 0x1e2   : > { %v1743_v40 = vunpack.c.l.b16 %v1651_v21 }
 0x1e4   : > { %v1614_v56 = vpop.f32.mrf.mxu2  ;;  %v10138_v55 = vpack.c.b16 %v1743_v40, %v1742_v39 }
 0x1e5   : > { %v1500_v58 = vpop.f32.mrf.mxu1  ;;  %v1615_v26 = vadd.f32 %v9944_v57, %v1614_v56  ;;  %v10128_v56 = vpop.f32.mrf.mxu0 }
 0x1e6   : > { %4119 = vrot.lane.b32.xlu1 %v10057_v22, %s9336_s29  ;;  %2654 = vrot.lane.b32.xlu0 %v10082_v49, %s9337_s30  ;;  %v1501_v0 = vadd.f32 %v9929_v42, %v1500_v58  ;;  %v1798_v21 = vsel %vm1754_vm0, %v10138_v55, 0  ;;  %v1358_v15 = vadd.f32 %v9936_v43, %v10128_v56 }
 0x1e7   : > { %2187 = vrot.lane.b32.xlu2 %v10057_v22, %s9335_s11  ;;  %v1667_v52 = vpack.c.bf16 %v1615_v26, %v1615_v26 }
 0x1e8   : > { %v1652_v8 = vpack.c.bf16 %v1501_v0, %v1501_v0 }
 0x1e9   : > { %v10095_v1 = vpop.permute.xlu2 %2664  ;;  %v2081_v7 = vunpack.c.l.b16 %v1667_v52 }
 0x1ea   : > { %v1744_v23 = vunpack.c.l.b16 %v1652_v8 }
 0x1eb   : > { %v10154_v25 = vpack.c.b16 %v2081_v7, %v2080_v54 }
 0x1ec   : > { %v1617_v9 = vpop.f32.mrf.mxu2 }
 0x1ed   : > { %v1502_v10 = vpop.f32.mrf.mxu1  ;;  %v1618_v19 = vadd.f32 %v9944_v57, %v1617_v9  ;;  %13838 = vst [vmem:[#allocation66_spill] sm:$0xff] %v10154_v25  ;;  %v1359_v3 = vpop.f32.mrf.mxu0 }
 0x1ee   : > { %v1503_v18 = vadd.f32 %v9929_v42, %v1502_v10  ;;  %2189 = vrot.lane.b32.xlu1 %v10097_v6, %s9335_s11  ;;  %3620 = vrot.lane.b32.xlu0 %v10082_v49, %s9333_s27  ;;  %v1603_v10 = vadd.f32 %v9944_v57, %v10022_v61  ;;  %v1663_v61 = vpack.c.bf16 %v1605_v11, %v1605_v11  ;;  %v1789_v11 = vsel %vm1754_vm0, %v10057_v22, 0 }
 0x1ef   : > { %2171 = vrot.lane.b32.xlu2 %v10082_v49, %s9335_s11  ;;  %v1668_v38 = vpack.c.bf16 %v1618_v19, %v1618_v19  ;;  %v1630_v19 = vpack.c.bf16 %v1380_v50, %v1380_v50  ;;  %v1360_v50 = vadd.f32 %v9936_v43, %v1359_v3 }
 0x1f0   : > { %v1653_v24 = vpack.c.bf16 %v1503_v18, %v1503_v18  ;;  %v1741_v18 = vunpack.c.l.b16 %v1649_v63  ;;  %v2077_v40 = vunpack.c.l.b16 %v1663_v61 }
 0x1f1   : > { %v10111_v30 = vpop.permute.xlu2 %2165  ;;  %v2082_v58 = vunpack.c.l.b16 %v1668_v38  ;;  %v1698_v28 = vunpack.c.l.b16 %v1630_v19 }
 0x1f2   : > { %v1745_v32 = vunpack.c.l.b16 %v1653_v24  ;;  %v2079_v24 = vunpack.c.l.b16 %v1665_v48  ;;  %v10163_v26 = vpack.c.b16 %v1741_v18, %v1740_v12 }
 0x1f4   : > { %v10122_v41 = vpack.c.b16 %v1745_v32, %v1744_v23  ;;  %v1619_v46 = vpop.f32.mrf.mxu2  ;;  %v2078_v23 = vunpack.c.l.b16 %v1664_v29  ;;  %v1699_v32 = vunpack.c.l.b16 %v1631_v20  ;;  %v1383_v29 = vmul.f32 0.25, %v1360_v50 }
 0x1f5   : > { %v1620_v14 = vadd.f32 %v9944_v57, %v1619_v46  ;;  %v1662_v57 = vpack.c.bf16 %v1603_v10, %v1603_v10  ;;  %v1795_v46 = vsel %vm1754_vm0, %v10163_v26, 0 }
 0x1f6   : > { %2672 = vrot.lane.b32.xlu1 %v10097_v6, %s9337_s30  ;;  %2500 = vrot.lane.b32.xlu0 %v10113_v31, %s9335_s11  ;;  %v1801_v42 = vsel %vm1754_vm0, %v10122_v41, 0  ;;  %v10169_v35 = vpack.c.b16 %v2079_v24, %v2078_v23  ;;  %v10174_v44 = vpack.c.b16 %v1699_v32, %v1698_v28  ;;  %v1633_v54 = vpack.c.bf16 %v1383_v29, %v1383_v29 }
 0x1f7   : > { %v1669_v60 = vpack.c.bf16 %v1620_v14, %v1620_v14  ;;  %3137 = vrot.lane.b32.xlu2 %v10082_v49, %s9334_s23  ;;  %1803 = vmatpush.bf16.xpose.msra.mxu3 %v1801_v42  ;;  %v2076_v39 = vunpack.c.l.b16 %v1662_v57  ;;  %v1362_v42 = vpop.f32.mrf.mxu0  ;;  %v1786_v23 = vsel %vm1754_vm0, %v10008_v53, 0  ;;  %v1783_v32 = vsel %vm1754_vm0, %v9976_v27, 0 }
 0x1f8   : > { %v10140_v0 = vpop.permute.xlu1 %3630  ;;  %v10142_v2 = vpop.permute.xlu0 %3147  ;;  %13841 = vst [vmem:[#allocation69_spill] sm:$0xff] %v10169_v35  ;;  %v1701_v10 = vunpack.c.l.b16 %v1633_v54  ;;  %v1363_v3 = vadd.f32 %v9936_v43, %v1362_v42 }
 0x1f9   : > { %v2083_v8 = vunpack.c.l.b16 %v1669_v60  ;;  %v10144_v9 = vpop.permute.xlu2 %3131  ;;  %13843 = vst [vmem:[#allocation71_spill] sm:$0xff] %v10174_v44  ;;  %v10183_v4 = vpack.c.b16 %v2077_v40, %v2076_v39  ;;  %v1792_v60 = vsel %vm1754_vm0, %v10097_v6, 0 }
 0x1fa   : > { %13836 = vst [vmem:[#allocation64_spill] sm:$0xff] %v10144_v9  ;;  %v1384_v40 = vmul.f32 0.25, %v1363_v3 }
 0x1fb   : > { %v10150_v17 = vpack.c.b16 %v2083_v8, %v2082_v58  ;;  %13844 = vst [vmem:[#allocation72_spill] sm:$0xff] %v10183_v4  ;;  %v1382_v58 = vmul.f32 0.25, %v1358_v15 }
 0x1fc   : > { %v1634_v29 = vpack.c.bf16 %v1384_v40, %v1384_v40 }
 0x1fd   : > { %13837 = vst [vmem:[#allocation65_spill] sm:$0xff] %v10150_v17  ;;  %2100 = vmatpush.bf16.msrb.mxu0 %v10150_v17  ;;  %v1632_v48 = vpack.c.bf16 %v1382_v58, %v1382_v58 }
 0x1fe   : > { %4121 = vrot.lane.b32.xlu1 %v10097_v6, %s9336_s29  ;;  %3638 = vrot.lane.b32.xlu0 %v10097_v6, %s9333_s27 }
 0x1ff   : > { %4103 = vrot.lane.b32.xlu2 %v10082_v49, %s9336_s29  ;;  %1804 = vmatpush.bf16.xpose.msra.mxu3 %v1798_v21  ;;  %v1364_v7 = vpop.f32.mrf.mxu0  ;;  %v1700_v8 = vunpack.c.l.b16 %v1632_v48 }
 0x200   : > { %v10165_v33 = vpop.permute.xlu0 %4113  ;;  %v10167_v34 = vpop.permute.xlu1 %4097  ;;  %v1365_v28 = vadd.f32 %v9936_v43, %v1364_v7  ;;  %v1780_v7 = vsel %vm1754_vm0, %v9946_v59, 0 }
 0x201   : > { %13839 = vst [vmem:[#allocation67_spill] sm:$0xff] %v10165_v33  ;;  %2101 = vmatpush.bf16.msrb.mxu0 %v10154_v25  ;;  %v10172_v38 = vpop.permute.xlu2 %3614  ;;  %v10229_v20 = vpack.c.b16 %v1701_v10, %v1700_v8  ;;  %v1702_v10 = vunpack.c.l.b16 %v1634_v29 }
 0x202   : > { %13840 = vst [vmem:[#allocation68_spill] sm:$0xff] %v10167_v34 }
 0x203   : > { %13842 = vst [vmem:[#allocation70_spill] sm:$0xff] %v10172_v38 }
 0x204   : > { %13848 = vst [vmem:[#allocation76_spill] sm:$0xff] %v10229_v20 }
 0x205   : > { %2102 = vmatpush.bf16.msrb.mxu0 %v10169_v35 }
 0x206   : > { %3622 = vrot.lane.b32.xlu1 %v10174_v44, %s9333_s27  ;;  %2173 = vrot.lane.b32.xlu0 %v10174_v44, %s9335_s11 }
 0x207   : > { %3155 = vrot.lane.b32.xlu2 %v10097_v6, %s9334_s23  ;;  %1805 = vmatpush.bf16.xpose.msra.mxu3 %v1795_v46  ;;  %v1367_v21 = vpop.f32.mrf.mxu0  ;;  %v1385_v46 = vmul.f32 0.25, %v1365_v28 }
 0x208   : > { %v10187_v51 = vpop.permute.xlu1 %2494  ;;  %v10189_v52 = vpop.permute.xlu0 %2648  ;;  %v1368_v58 = vadd.f32 %v9936_v43, %v1367_v21 }
 0x209   : > { %2103 = vmatpush.bf16.msrb.mxu0 %v10183_v4  ;;  %v10192_v14 = vpop.permute.xlu2 %4115  ;;  %v1635_v48 = vpack.c.bf16 %v1385_v46, %v1385_v46 }
 0x20a   : > { %13845 = vst [vmem:[#allocation73_spill] sm:$0xff] %v10192_v14  ;;  %v1386_v54 = vmul.f32 0.25, %v1368_v58 }
 0x20c   : > { %v1636_v3 = vpack.c.bf16 %v1386_v54, %v1386_v54 }
 0x20d   : > { %2104 = vmatpush.bf16.msrb.mxu0 %v10113_v31 }
 0x20e   : > { %2502 = vrot.lane.b32.xlu1 %v10183_v4, %s9335_s11  ;;  %3139 = vrot.lane.b32.xlu0 %v10174_v44, %s9334_s23 }
 0x20f   : > { %2656 = vrot.lane.b32.xlu2 %v10174_v44, %s9337_s30  ;;  %1806 = vmatpush.bf16.xpose.msra.mxu3 %v1792_v60  ;;  %v1369_v39 = vpop.f32.mrf.mxu0 }
 0x210   : > { %v10206_v56 = vpop.permute.xlu1 %2183  ;;  %v10208_v63 = vpop.permute.xlu0 %2666  ;;  %v1370_v60 = vadd.f32 %v9936_v43, %v1369_v39  ;;  %v1704_v39 = vunpack.c.l.b16 %v1636_v3 }
 0x211   : > { %2105 = vmatpush.bf16.msrb.mxu0 %v10069_v37  ;;  %v10211_v62 = vpop.permute.xlu2 %3133 }
 0x212   : > { %13846 = vst [vmem:[#allocation74_spill] sm:$0xff] %v10211_v62  ;;  %v1387_v8 = vmul.f32 0.25, %v1370_v60 }
 0x214   : > { %v1637_v28 = vpack.c.bf16 %v1387_v8, %v1387_v8 }
 0x215   : > { %2106 = vmatpush.bf16.msrb.mxu0 %v9998_v45 }
 0x216   : > { %2674 = vrot.lane.b32.xlu1 %v10163_v26, %s9337_s30  ;;  %2191 = vrot.lane.b32.xlu0 %v10163_v26, %s9335_s11  ;;  %v1705_v40 = vunpack.c.l.b16 %v1637_v28 }
 0x217   : > { %3157 = vrot.lane.b32.xlu2 %v10163_v26, %s9334_s23  ;;  %1807 = vmatpush.bf16.xpose.msra.mxu3 %v1789_v11  ;;  %v1703_v11 = vunpack.c.l.b16 %v1635_v48 }
 0x218   : > { %v10222_v12 = vpop.permute.xlu1 %3149  ;;  %v10224_v18 = vpop.permute.xlu0 %2167  ;;  %v10293_v29 = vpack.c.b16 %v1705_v40, %v1704_v39 }
 0x219   : > { %2107 = vmatpush.bf16.msrb.mxu0 %v9968_v16  ;;  %v10227_v19 = vpop.permute.xlu2 %3616 }
 0x21a   : > { %13847 = vst [vmem:[#allocation75_spill] sm:$0xff] %v10227_v19 }
 0x21b   : > { %13854 = vst [vmem:[#allocation82_spill] sm:$0xff] %v10293_v29 }
 0x21e   : > { %3640 = vrot.lane.b32.xlu1 %v10163_v26, %s9333_s27  ;;  %3141 = vrot.lane.b32.xlu0 %v10229_v20, %s9334_s23 }
 0x21f   : > { %2175 = vrot.lane.b32.xlu2 %v10229_v20, %s9335_s11  ;;  %1808 = vmatpush.bf16.xpose.msra.mxu3 %v1786_v23 }
 0x220   : > { %v10239_v24 = vpop.permute.xlu1 %3632  ;;  %v10241_v57 = vpop.permute.xlu0 %2496 }
 0x221   : > { %v10243_v61 = vpop.permute.xlu2 %4117 }
 0x222   : > { %13849 = vst [vmem:[#allocation77_spill] sm:$0xff] %v10243_v61 }
 0x226   : > { %4123 = vrot.lane.b32.xlu1 %v10163_v26, %s9336_s29  ;;  %3642 = vrot.lane.b32.xlu0 %v10138_v55, %s9333_s27 }
 0x227   : > { %2658 = vrot.lane.b32.xlu2 %v10229_v20, %s9337_s30  ;;  %1809 = vmatpush.bf16.xpose.msra.mxu3 %v1783_v32  ;;  %v10277_v32 = vpack.c.b16 %v1703_v11, %v1702_v10 }
 0x228   : > { %v10255_v15 = vpop.permute.xlu1 %2650  ;;  %v10257_v42 = vpop.permute.xlu0 %2185 }
 0x229   : > { %v10259_v50 = vpop.permute.xlu2 %3135  ;;  %13853 = vst [vmem:[#allocation81_spill] sm:$0xff] %v10277_v32 }
 0x22a   : > { %13850 = vst [vmem:[#allocation78_spill] sm:$0xff] %v10259_v50 }
 0x22e   : > { %2676 = vrot.lane.b32.xlu1 %v10138_v55, %s9337_s30  ;;  %2506 = vrot.lane.b32.xlu0 %v10154_v25, %s9335_s11 }
 0x22f   : > { %2504 = vrot.lane.b32.xlu2 %v10169_v35, %s9335_s11  ;;  %1810 = vmatpush.bf16.xpose.msra.mxu3 %v1780_v7 }
 0x230   : > { %v10271_v43 = vpop.permute.xlu1 %4099  ;;  %v10273_v21 = vpop.permute.xlu0 %2668 }
 0x231   : > { %13851 = vst [vmem:[#allocation79_spill] sm:$0xff] %v10271_v43  ;;  %v10275_v23 = vpop.permute.xlu2 %3618 }
 0x232   : > { %13852 = vst [vmem:[#allocation80_spill] sm:$0xff] %v10275_v23 }
 0x236   : > { %2177 = vrot.lane.b32.xlu1 %v10277_v32, %s9335_s11  ;;  %3161 = vrot.lane.b32.xlu0 %v10122_v41, %s9334_s23 }
 0x237   : > { %2193 = vrot.lane.b32.xlu2 %v10138_v55, %s9335_s11  ;;  %7728 = vmatmul.msk.bf16.vlgmr.msra.gmra.mxu3 %vm1754_vm0, %v9956_v5 }
 0x238   : > { %v10287_v46 = vpop.permute.xlu1 %3151  ;;  %v10289_v58 = vpop.permute.xlu0 %3634 }
 0x239   : > { %v10291_v60 = vpop.permute.xlu2 %2498 }
 0x23e   : > { %2660 = vrot.lane.b32.xlu1 %v10277_v32, %s9337_s30  ;;  %2179 = vrot.lane.b32.xlu0 %v10293_v29, %s9335_s11 }
 0x23f   : > { %3159 = vrot.lane.b32.xlu2 %v10138_v55, %s9334_s23 }
 0x240   : > { %v10301_v48 = vpop.permute.xlu1 %2169  ;;  %v10303_v54 = vpop.permute.xlu0 %2652 }
 0x241   : > { %v10305_v7 = vpop.permute.xlu2 %2187 }
 0x246   : > { %2195 = vrot.lane.b32.xlu1 %v10122_v41, %s9335_s11  ;;  %2662 = vrot.lane.b32.xlu0 %v10293_v29, %s9337_s30 }
 0x247   : > { %4125 = vrot.lane.b32.xlu2 %v10138_v55, %s9336_s29  ;;  %7729 = vmatmul.msk.bf16.gmra.mxu3 %vm1754_vm0, %v9988_v36 }
 0x248   : > { %v10315_v8 = vpop.permute.xlu1 %4101  ;;  %v10317_v10 = vpop.permute.xlu0 %2670 }
 0x249   : > { %13855 = vst [vmem:[#allocation83_spill] sm:$0xff] %v10315_v8  ;;  %v10319_v11 = vpop.permute.xlu2 %2171 }
 0x24e   : > { %3644 = vrot.lane.b32.xlu1 %v10122_v41, %s9333_s27  ;;  %3145 = vrot.lane.b32.xlu0 %v10293_v29, %s9334_s23 }
 0x24f   : > { %3143 = vrot.lane.b32.xlu2 %v10277_v32, %s9334_s23 }
 0x250   : > { %v10327_v3 = vpop.permute.xlu1 %3153  ;;  %v10329_v28 = vpop.permute.xlu0 %3636 }
 0x251   : > { %v10331_v39 = vpop.permute.xlu2 %3137 }
 0x252   : > { %13856 = vst [vmem:[#allocation84_spill] sm:$0xff] %v10331_v39 }
 0x256   : > { %4127 = vrot.lane.b32.xlu1 %v10122_v41, %s9336_s29  ;;  %4606 = vrot.lane.b32.xlu0 %v10163_v26, %s9338_s26 }
 0x257   : > { %2678 = vrot.lane.b32.xlu2 %v10122_v41, %s9337_s30  ;;  %7730 = vmatmul.msk.bf16.gmra.mxu3 %vm1754_vm0, %v10042_v13 }
 0x258   : > { %v10341_v40 = vpop.permute.xlu1 %4119  ;;  %v10343_v36 = vpop.permute.xlu0 %2654 }
 0x259   : > { %v10345_v5 = vpop.permute.xlu2 %4103 }
 0x25a   : > { %13857 = vst [vmem:[#allocation85_spill] sm:$0xff] %v10345_v5 }
 0x25e   : > { %2508 = vrot.lane.b32.xlu1 %v10150_v17, %s9335_s11  ;;  %4604 = vrot.lane.b32.xlu0 %v10097_v6, %s9338_s26 }
 0x25f   : > { %4610 = vrot.lane.b32.xlu2 %v10122_v41, %s9338_s26 }
 0x260   : > { %v10353_v16 = vpop.permute.xlu1 %2189  ;;  %v10355_v59 = vpop.permute.xlu0 %3620 }
 0x261   : > { %13858 = vst [vmem:[#allocation86_spill] sm:$0xff] %v10355_v59  ;;  %v10357_v13 = vpop.permute.xlu2 %3155 }
 0x266   : > { %5093 = vrot.lane.b32.xlu1 %v10122_v41, %s9339_s19  ;;  %3474 = vrot.lane.b32.xlu0 %v10150_v17, %s9334_s23 }
 0x267   : > { %4105 = vrot.lane.b32.xlu2 %v10174_v44, %s9336_s29  ;;  %7731 = vmatmul.msk.bf16.gmra.mxu3 %vm1754_vm0, %v10082_v49 }
 0x268   : > { %v10367_v27 = vpop.permute.xlu1 %2672  ;;  %v10369_v5 = vpop.permute.xlu0 %2500 }
 0x269   : > { %v10371_v8 = vpop.permute.xlu2 %2656 }
 0x26e   : > { %5091 = vrot.lane.b32.xlu1 %v10138_v55, %s9339_s19  ;;  %3472 = vrot.lane.b32.xlu0 %v10154_v25, %s9334_s23 }
 0x26f   : > { %4608 = vrot.lane.b32.xlu2 %v10138_v55, %s9338_s26 }
 0x270   : > { %v10379_v41 = vpop.permute.xlu1 %4121  ;;  %v10381_v43 = vpop.permute.xlu0 %3638 }
 0x271   : > { %v10383_v49 = vpop.permute.xlu2 %3157 }
 0x276   : > { %3624 = vrot.lane.b32.xlu1 %v10229_v20, %s9333_s27  ;;  %2991 = vrot.lane.b32.xlu0 %v10150_v17, %s9337_s30 }
 0x277   : > { %5087 = vrot.lane.b32.xlu2 %v10097_v6, %s9339_s19  ;;  %7732 = vmatmul.msk.bf16.gmra.mxu3 %vm1754_vm0, %v10174_v44 }
 0x278   : > { %v10393_v34 = vpop.permute.xlu1 %3622  ;;  %v10395_v55 = vpop.permute.xlu0 %2173 }
 0x279   : > { %13859 = vst [vmem:[#allocation87_spill] sm:$0xff] %v10393_v34  ;;  %v10397_v39 = vpop.permute.xlu2 %2175 }
 0x27e   : > { %4107 = vrot.lane.b32.xlu1 %v10229_v20, %s9336_s29  ;;  %3470 = vrot.lane.b32.xlu0 %v10169_v35, %s9334_s23 }
 0x27f   : > { %2989 = vrot.lane.b32.xlu2 %v10154_v25, %s9337_s30 }
 0x280   : > { %v10405_v17 = vpop.permute.xlu1 %2502  ;;  %v10407_v6 = vpop.permute.xlu0 %3139 }
 0x281   : > { %13860 = vst [vmem:[#allocation88_spill] sm:$0xff] %v10407_v6  ;;  %v10409_v44 = vpop.permute.xlu2 %2658 }
 0x286   : > { %5089 = vrot.lane.b32.xlu1 %v10163_v26, %s9339_s19  ;;  %3466 = vrot.lane.b32.xlu0 %v10113_v31, %s9334_s23 }
 0x287   : > { %3626 = vrot.lane.b32.xlu2 %v10277_v32, %s9333_s27  ;;  %7733 = vmatmul.msk.bf16.gmra.mxu3 %vm1754_vm0, %v10229_v20 }
 0x288   : > { %v2675_v34 = vpop.permute.xlu1 %2674  ;;  %v2192_v25 = vpop.permute.xlu0 %2191 }
 0x289   : > { %v10419_v59 = vpop.permute.xlu2 %2504 }
 0x28e   : > { %4602 = vrot.lane.b32.xlu1 %v10057_v22, %s9338_s26 }
 0x28f   : > { %4109 = vrot.lane.b32.xlu2 %v10277_v32, %s9336_s29 }
 0x290   : > { %v10425_v26 = vpop.permute.xlu1 %3640  ;;  %v10427_v6 = vpop.permute.xlu0 %3141 }
 0x291   : > { %13861 = vst [vmem:[#allocation89_spill] sm:$0xff] %v10427_v6  ;;  %v2194_v50 = vpop.permute.xlu2 %2193 }
 0x296   : > { %2985 = vrot.lane.b32.xlu1 %v10183_v4, %s9337_s30 }
 0x297   : > { %5085 = vrot.lane.b32.xlu2 %v10057_v22, %s9339_s19  ;;  %7734 = vmatmul.msk.bf16.gmra.mxu3 %vm1754_vm0, %v10277_v32 }
 0x298   : > { %v10435_v20 = vpop.permute.xlu1 %4123  ;;  %v10437_v23 = vpop.permute.xlu0 %3642 }
 0x299   : > { %v10439_v62 = vpop.permute.xlu2 %3159 }
 0x29e   : > { %5083 = vrot.lane.b32.xlu1 %v10008_v53, %s9339_s19 }
 0x29f   : > { %3468 = vrot.lane.b32.xlu2 %v10183_v4, %s9334_s23 }
 0x2a0   : > { %v2677_v6 = vpop.permute.xlu1 %2676  ;;  %v2507_v19 = vpop.permute.xlu0 %2506 }
 0x2a1   : > { %v10445_v9 = vpop.permute.xlu2 %4125 }
 0x2a6   : > { %3464 = vrot.lane.b32.xlu1 %v10069_v37, %s9334_s23 }
 0x2a7   : > { %2987 = vrot.lane.b32.xlu2 %v10169_v35, %s9337_s30  ;;  %7735 = vmatmul.msk.bf16.gmra.mxu3 %vm1754_vm0, %v10293_v29  ;;  %v10471_v29 = vld [vmem:[%s9760_s1] ss:$0 sm:$0xff] }
 0x2a8   : > { %v10453_v22 = vpop.permute.xlu1 %2177  ;;  %v10455_v32 = vpop.permute.xlu0 %3161 }
 0x2a9   : > { %13862 = vst [vmem:[#allocation90_spill] sm:$0xff] %v10453_v22  ;;  %v10457_v38 = vpop.permute.xlu2 %3143 }
 0x2aa   : > { %13863 = vst [vmem:[#allocation91_spill] sm:$0xff] %v10457_v38 }
 0x2ae   : > { %3462 = vrot.lane.b32.xlu1 %v9998_v45, %s9334_s23 }
 0x2af   : > { %4600 = vrot.lane.b32.xlu2 %v10008_v53, %s9338_s26 }
 0x2b0   : > { %v10463_v4 = vpop.permute.xlu1 %2660  ;;  %v10465_v37 = vpop.permute.xlu0 %2179 }
 0x2b1   : > { %13864 = vst [vmem:[#allocation92_spill] sm:$0xff] %v10463_v4  ;;  %v2679_v35 = vpop.permute.xlu2 %2678 }
 0x2b2   : > { %13865 = vst [vmem:[#allocation93_spill] sm:$0xff] %v10465_v37  ;;  %v2726_v33 = vsel %vm1754_vm0, %v2679_v35, 0  ;;  %v2723_v37 = vsel %vm1754_vm0, %v2677_v6, 0 }
 0x2b3   : > { %2728 = vmatpush.bf16.xpose.msrb.mxu3 %v2726_v33 }
 0x2b7   : > { %2983 = vrot.lane.b32.xlu2 %v10113_v31, %s9337_s30 }
 0x2b8   : > { %v2196_v38 = vpop.permute.xlu1 %2195  ;;  %v10473_v14 = vpop.permute.xlu0 %2662 }
 0x2b9   : > { %13866 = vst [vmem:[#allocation94_spill] sm:$0xff] %v10473_v14  ;;  %v10475_v45 = vpop.permute.xlu2 %4610  ;;  %v2243_v53 = vsel %vm1754_vm0, %v2196_v38, 0  ;;  %v2240_v14 = vsel %vm1754_vm0, %v2194_v50, 0  ;;  %v2720_v38 = vsel %vm1754_vm0, %v2675_v34, 0 }
 0x2ba   : > { %v1812_v22 = vpop.f32.mrf.mxu3  ;;  %2245 = vmatpush.bf16.xpose.msrb.mxu1 %v2243_v53 }
 0x2bb   : > { %v10480_v61 = vadd.f32 %v10471_v29, %v1812_v22  ;;  %2729 = vmatpush.bf16.xpose.msrb.mxu3 %v2723_v37 }
 0x2bd   : > { %13867 = vst [vmem:[#allocation95_spill] sm:$0xff] %v10480_v61  ;;  %1852 = vmax.xlane.f32.xlu0 %v10480_v61 }
 0x2c0   : > { %v10483_v33 = vpop.permute.xlu1 %3644  ;;  %v10485_v35 = vpop.permute.xlu0 %3145 }
 0x2c1   : > { %13868 = vst [vmem:[#allocation96_spill] sm:$0xff] %v10485_v35  ;;  %v10487_v31 = vpop.permute.xlu2 %4105 }
 0x2c2   : > { %13869 = vst [vmem:[#allocation97_spill] sm:$0xff] %v10487_v31  ;;  %v1814_v4 = vpop.f32.mrf.mxu3  ;;  %2246 = vmatpush.bf16.xpose.msrb.mxu1 %v2240_v14  ;;  %v2237_v31 = vsel %vm1754_vm0, %v2192_v25, 0  ;;  %v2717_v14 = vsel %vm1754_vm0, %v10367_v27, 0  ;;  %v2714_v25 = vsel %vm1754_vm0, %v10317_v10, 0  ;;  %v2711_v10 = vsel %vm1754_vm0, %v10273_v21, 0 }
 0x2c3   : > { %2730 = vmatpush.bf16.xpose.msrb.mxu3 %v2720_v38  ;;  %v10492_v6 = vadd.f32 %v10471_v29, %v1814_v4  ;;  %v2234_v38 = vsel %vm1754_vm0, %v10353_v16, 0  ;;  %v2231_v16 = vsel %vm1754_vm0, %v10305_v7, 0 }
 0x2c5   : > { %1854 = vmax.xlane.f32.xlu0 %v10492_v6 }
 0x2c8   : > { %v10495_v37 = vpop.permute.xlu1 %4127  ;;  %v10497_v22 = vpop.permute.xlu0 %4606 }
 0x2c9   : > { %v10499_v53 = vpop.permute.xlu2 %4608 }
 0x2ca   : > { %v1817_v35 = vpop.f32.mrf.mxu3  ;;  %2247 = vmatpush.bf16.xpose.msrb.mxu1 %v2237_v31 }
 0x2cb   : > { %2731 = vmatpush.bf16.xpose.msrb.mxu3 %v2717_v14  ;;  %v10513_v31 = vadd.f32 %v10471_v29, %v1817_v35 }
 0x2d0   : > { %v2509_v34 = vpop.permute.xlu1 %2508  ;;  %v10504_v50 = vpop.permute.xlu0 %4604 }
 0x2d1   : > { %v10506_v4 = vpop.permute.xlu2 %5087  ;;  %2518 = vmatpush.bf16.msrb.mxu2 %v2509_v34 }
 0x2d2   : > { %13870 = vst [vmem:[#allocation98_spill] sm:$0xff] %v10506_v4  ;;  %v1819_v61 = vpop.f32.mrf.mxu3  ;;  %2248 = vmatpush.bf16.xpose.msrb.mxu1 %v2234_v38 }
 0x2d3   : > { %2732 = vmatpush.bf16.xpose.msrb.mxu3 %v2714_v25  ;;  %v10528_v35 = vadd.f32 %v10471_v29, %v1819_v61  ;;  %v2708_v61 = vsel %vm1754_vm0, %v10208_v63, 0 }
 0x2d5   : > { %2519 = vmatpush.bf16.msrb.mxu2 %v2507_v19 }
 0x2d8   : > { %v10515_v27 = vpop.permute.xlu1 %5093  ;;  %v3475_v14 = vpop.permute.xlu0 %3474  ;;  %1856 = vmax.xlane.f32.xlu1 %v10513_v31 }
 0x2d9   : > { %v2990_v4 = vpop.permute.xlu2 %2989  ;;  %2520 = vmatpush.bf16.msrb.mxu2 %v10419_v59 }
 0x2da   : > { %v1822_v34 = vpop.f32.mrf.mxu3  ;;  %2249 = vmatpush.bf16.xpose.msrb.mxu1 %v2231_v16 }
 0x2db   : > { %2733 = vmatpush.bf16.xpose.msrb.mxu3 %v2711_v10  ;;  %v10525_v19 = vadd.f32 %v10471_v29, %v1822_v34  ;;  %v3692_v10 = vsel %vm1754_vm0, %v10483_v33, 0  ;;  %v3209_v33 = vsel %vm1754_vm0, %v10455_v32, 0 }
 0x2dd   : > { %2521 = vmatpush.bf16.msrb.mxu2 %v10405_v17  ;;  %v2228_v17 = vsel %vm1754_vm0, %v10257_v42, 0  ;;  %v2225_v42 = vsel %vm1754_vm0, %v10206_v56, 0 }
 0x2e0   : > { %1860 = vmax.xlane.f32.xlu2 %v10525_v19  ;;  %v10531_v59 = vpop.permute.xlu1 %5091  ;;  %v3473_v38 = vpop.permute.xlu0 %3472  ;;  %1858 = vmax.xlane.f32.xlu1 %v10528_v35 }
 0x2e1   : > { %v10534_v7 = vpop.permute.xlu2 %3626  ;;  %2522 = vmatpush.bf16.msrb.mxu2 %v10369_v5 }
 0x2e2   : > { %v1824_v21 = vpop.f32.mrf.mxu3  ;;  %2250 = vmatpush.bf16.xpose.msrb.mxu1 %v2228_v17 }
 0x2e3   : > { %2734 = vmatpush.bf16.xpose.msrb.mxu3 %v2708_v61  ;;  %v10543_v25 = vadd.f32 %v10471_v29, %v1824_v21  ;;  %v3686_v61 = vsel %vm1754_vm0, %v10425_v26, 0  ;;  %v3683_v26 = vsel %vm1754_vm0, %v10381_v43, 0  ;;  %v3680_v43 = vsel %vm1754_vm0, %v10329_v28, 0 }
 0x2e5   : > { %2523 = vmatpush.bf16.msrb.mxu2 %v10291_v60  ;;  %v2705_v60 = vsel %vm1754_vm0, %v10095_v1, 0  ;;  %v2222_v1 = vsel %vm1754_vm0, %v10080_v47, 0 }
 0x2e8   : > { %1862 = vmax.xlane.f32.xlu2 %v10543_v25  ;;  %v10546_v16 = vpop.permute.xlu1 %3624  ;;  %v2992_v34 = vpop.permute.xlu0 %2991 }
 0x2e9   : > { %v10548_v5 = vpop.permute.xlu2 %4109  ;;  %2524 = vmatpush.bf16.msrb.mxu2 %v10241_v57  ;;  %3001 = vmatpush.bf16.msra.mxu0 %v2992_v34 }
 0x2ea   : > { %v1827_v63 = vpop.f32.mrf.mxu3  ;;  %2251 = vmatpush.bf16.xpose.msrb.mxu1 %v2225_v42 }
 0x2eb   : > { %v10558_v17 = vadd.f32 %v10471_v29, %v1827_v63  ;;  %2735 = vmatpush.bf16.xpose.msrb.mxu3 %v2705_v60 }
 0x2ed   : > { %1864 = vmax.xlane.f32.xlu0 %v10558_v17  ;;  %2525 = vmatpush.bf16.msrb.mxu2 %v10187_v51  ;;  %v3689_v51 = vsel %vm1754_vm0, %v10437_v23, 0 }
 0x2ee   : > { %3002 = vmatpush.bf16.msra.mxu0 %v2990_v4 }
 0x2f0   : > { %v10562_v56 = vpop.permute.xlu1 %4107 }
 0x2f1   : > { %3484 = vmatpush.bf16.msra.mxu2 %v3475_v14  ;;  %v10564_v57 = vpop.permute.xlu2 %5085  ;;  %v3471_v14 = vpop.permute.xlu0 %3470 }
 0x2f2   : > { %v1829_v21 = vpop.f32.mrf.mxu3  ;;  %7744 = vmatmul.msk.bf16.vlgmr.msrb.gmra.mxu3 %vm1754_vm0, %v10189_v52  ;;  %2252 = vmatpush.bf16.xpose.msrb.mxu1 %v2222_v1 }
 0x2f3   : > { %3694 = vmatpush.bf16.xpose.msra.mxu3 %v3692_v10  ;;  %v10575_v4 = vadd.f32 %v10471_v29, %v1829_v21 }
 0x2f5   : > { %3485 = vmatpush.bf16.msra.mxu2 %v3473_v38  ;;  %1866 = vmax.xlane.f32.xlu1 %v10575_v4  ;;  %v3206_v38 = vsel %vm1754_vm0, %v10439_v62, 0  ;;  %v3203_v62 = vsel %vm1754_vm0, %v10383_v49, 0  ;;  %v3200_v49 = vsel %vm1754_vm0, %v10357_v13, 0  ;;  %v3197_v13 = vsel %vm1754_vm0, %v10327_v3, 0 }
 0x2f8   : > { %v10578_v47 = vpop.permute.xlu1 %5089 }
 0x2f9   : > { %3486 = vmatpush.bf16.msra.mxu2 %v3471_v14  ;;  %v3469_v32 = vpop.permute.xlu2 %3468  ;;  %7736 = vmatmul.msk.bf16.vlgmr.msrb.gmra.mxu1 %vm1754_vm0, %v10111_v30  ;;  %v3467_v34 = vpop.permute.xlu0 %3466 }
 0x2fa   : > { %3211 = vmatpush.bf16.xpose.msra.mxu1 %v3209_v33  ;;  %v1832_v52 = vpop.f32.mrf.mxu3 }
 0x2fb   : > { %3695 = vmatpush.bf16.xpose.msra.mxu3 %v3689_v51  ;;  %v10585_v23 = vadd.f32 %v10471_v29, %v1832_v52  ;;  %v3194_v52 = vsel %vm1754_vm0, %v10287_v46, 0  ;;  %v3671_v46 = vsel %vm1754_vm0, %v10140_v0, 0  ;;  %v4175_v0 = vsel %vm1754_vm0, %v10495_v37, 0 }
 0x2fc   : > { %v4169_v37 = vsel %vm1754_vm0, %v10435_v20, 0  ;;  %v4163_v20 = vsel %vm1754_vm0, %v10341_v40, 0  ;;  %v13875_v40 = vld [vmem:[#allocation94_spill] sm:$0xff] }
 0x2fd   : > { %3487 = vmatpush.bf16.msra.mxu2 %v3469_v32  ;;  %1868 = vmax.xlane.f32.xlu2 %v10585_v23 }
 0x300   : > { %v10590_v42 = vpop.permute.xlu1 %4602 }
 0x301   : > { %3488 = vmatpush.bf16.msra.mxu2 %v3467_v34  ;;  %v2988_v30 = vpop.permute.xlu2 %2987 }
 0x302   : > { %3212 = vmatpush.bf16.xpose.msra.mxu1 %v3206_v38  ;;  %v1834_v63 = vpop.f32.mrf.mxu3  ;;  %7745 = vmatmul.msk.bf16.gmra.mxu3 %vm1754_vm0, %v10255_v15 }
 0x303   : > { %3696 = vmatpush.bf16.xpose.msra.mxu3 %v3686_v61  ;;  %3003 = vmatpush.bf16.msra.mxu0 %v2988_v30  ;;  %v10599_v60 = vadd.f32 %v10471_v29, %v1834_v63  ;;  %v13876_v63 = vld [vmem:[#allocation67_spill] sm:$0xff] }
 0x305   : > { %1870 = vmax.xlane.f32.xlu0 %v10599_v60 }
 0x308   : > { %v2986_v10 = vpop.permute.xlu1 %2985 }
 0x309   : > { %v10602_v1 = vpop.permute.xlu2 %4600  ;;  %7737 = vmatmul.msk.bf16.gmra.mxu1 %vm1754_vm0, %v10224_v18  ;;  %3004 = vmatpush.bf16.msra.mxu0 %v2986_v10  ;;  %v3677_v18 = vsel %vm1754_vm0, %v10289_v58, 0  ;;  %v3674_v58 = vsel %vm1754_vm0, %v10239_v24, 0  ;;  %v4658_v24 = vsel %vm1754_vm0, %v10475_v45, 0  ;;  %v4655_v45 = vsel %vm1754_vm0, %v10499_v53, 0 }
 0x30a   : > { %3213 = vmatpush.bf16.xpose.msra.mxu1 %v3203_v62  ;;  %v1837_v15 = vpop.f32.mrf.mxu3  ;;  %v4649_v53 = vsel %vm1754_vm0, %v10504_v50, 0  ;;  %v13873_v50 = vld [vmem:[#allocation90_spill] sm:$0xff]  ;;  %v4154_v62 = vsel %vm1754_vm0, %v13876_v63, 0 }
 0x30b   : > { %3697 = vmatpush.bf16.xpose.msra.mxu3 %v3683_v26  ;;  %v10609_v33 = vadd.f32 %v10471_v29, %v1837_v15  ;;  %v13877_v26 = vld [vmem:[#allocation93_spill] sm:$0xff]  ;;  %v13885_v63 = vld [vmem:[#allocation78_spill] sm:$0xff] }
 0x30d   : > { %1872 = vmax.xlane.f32.xlu1 %v10609_v33 }
 0x310   : > { %v10614_v21 = vpop.permute.xlu1 %5083 }
 0x311   : > { %v2984_v51 = vpop.permute.xlu2 %2983 }
 0x312   : > { %3214 = vmatpush.bf16.xpose.msra.mxu1 %v3200_v49  ;;  %v1839_v14 = vpop.f32.mrf.mxu3  ;;  %7746 = vmatmul.msk.bf16.gmra.mxu3 %vm1754_vm0, %v10303_v54 }
 0x313   : > { %3698 = vmatpush.bf16.xpose.msra.mxu3 %v3680_v43  ;;  %3005 = vmatpush.bf16.msra.mxu0 %v2984_v51  ;;  %v10623_v28 = vadd.f32 %v10471_v29, %v1839_v14  ;;  %v5141_v14 = vsel %vm1754_vm0, %v10515_v27, 0  ;;  %v5138_v27 = vsel %vm1754_vm0, %v10531_v59, 0  ;;  %v13882_v59 = vld [vmem:[#allocation74_spill] sm:$0xff] }
 0x315   : > { %1874 = vmax.xlane.f32.xlu2 %v10623_v28 }
 0x318   : > { %v3465_v32 = vpop.permute.xlu1 %3464 }
 0x319   : > { %7738 = vmatmul.msk.bf16.gmra.mxu1 %vm1754_vm0, %v10301_v48  ;;  %3489 = vmatpush.bf16.msra.mxu2 %v3465_v32  ;;  %v3191_v48 = vsel %vm1754_vm0, %v10222_v12, 0  ;;  %v3188_v12 = vsel %vm1754_vm0, %v10142_v2, 0  ;;  %v4172_v2 = vsel %vm1754_vm0, %v10445_v9, 0  ;;  %v4166_v9 = vsel %vm1754_vm0, %v10379_v41, 0  ;;  %v13872_v41 = vld [vmem:[#allocation77_spill] sm:$0xff] }
 0x31a   : > { %3215 = vmatpush.bf16.xpose.msra.mxu1 %v3197_v13  ;;  %v1842_v54 = vpop.f32.mrf.mxu3  ;;  %v13879_v13 = vld [vmem:[#allocation64_spill] sm:$0xff] }
 0x31b   : > { %3699 = vmatpush.bf16.xpose.msra.mxu3 %v3677_v18  ;;  %v10631_v3 = vadd.f32 %v10471_v29, %v1842_v54 }
 0x31d   : > { %1876 = vmax.xlane.f32.xlu0 %v10631_v3 }
 0x320   : > { %v3463_v38 = vpop.permute.xlu1 %3462 }
 0x321   : > { %3490 = vmatpush.bf16.msra.mxu2 %v3463_v38 }
 0x322   : > { %3216 = vmatpush.bf16.xpose.msra.mxu1 %v3194_v52  ;;  %v1844_v61 = vpop.f32.mrf.mxu3  ;;  %7747 = vmatmul.msk.bf16.gmra.mxu3 %vm1754_vm0, %v10343_v36 }
 0x323   : > { %3700 = vmatpush.bf16.xpose.msra.mxu3 %v3674_v58  ;;  %v10643_v34 = vadd.f32 %v10471_v29, %v1844_v61  ;;  %v13880_v61 = vld [vmem:[#allocation95_spill] sm:$0xff] }
 0x325   : > { %1878 = vmax.xlane.f32.xlu1 %v10643_v34 }
 0x329   : > { %7739 = vmatmul.msk.bf16.gmra.mxu1 %vm1754_vm0, %v10319_v11  ;;  %v4652_v11 = vsel %vm1754_vm0, %v10497_v22, 0  ;;  %v4160_v22 = vsel %vm1754_vm0, %v13872_v41, 0 }
 0x32a   : > { %3217 = vmatpush.bf16.xpose.msra.mxu1 %v3191_v48  ;;  %v1847_v36 = vpop.f32.mrf.mxu3 }
 0x32b   : > { %3701 = vmatpush.bf16.xpose.msra.mxu3 %v3671_v46  ;;  %v10655_v30 = vadd.f32 %v10471_v29, %v1847_v36  ;;  %v13881_v46 = vld [vmem:[#allocation75_spill] sm:$0xff] }
 0x32d   : > { %1880 = vmax.xlane.f32.xlu2 %v10655_v30 }
 0x330   : > { %v1853_v10 = vpop.xlane.xlu0 %1852 }
 0x331   : > { %v1884_v48 = vsub.f32 %v13880_v61, %v1853_v10 }
 0x332   : > { %3218 = vmatpush.bf16.xpose.msra.mxu1 %v3188_v12  ;;  %7748 = vmatmul.msk.bf16.gmra.mxu3 %vm1754_vm0, %v10371_v8  ;;  %v4646_v8 = vsel %vm1754_vm0, %v10590_v42, 0  ;;  %v13874_v42 = vld [vmem:[#allocation73_spill] sm:$0xff]  ;;  %v1849_v15 = vpop.f32.mrf.mxu3 }
 0x333   : > { %4660 = vmatpush.bf16.xpose.msrb.mxu3 %v4658_v24  ;;  %v10713_v38 = vadd.f32 %v10471_v29, %v1849_v15 }
 0x338   : > { %v1855_v51 = vpop.xlane.xlu0 %1854 }
 0x339   : > { %7740 = vmatmul.msk.bf16.gmra.mxu1 %vm1754_vm0, %v10395_v55  ;;  %v4643_v55 = vsel %vm1754_vm0, %v10602_v1, 0  ;;  %v13878_v1 = vld [vmem:[#allocation70_spill] sm:$0xff]  ;;  %v1885_v18 = vsub.f32 %v10492_v6, %v1855_v51  ;;  %v1900_v6 = vmul.f32 1.442695, %v1884_v48 }
 0x33a   : > { %4177 = vmatpush.bf16.xpose.msrb.mxu1 %v4175_v0 }
 0x33b   : > { %4661 = vmatpush.bf16.xpose.msrb.mxu3 %v4655_v45  ;;  %v1902_v52 = vmul.f32 1.442695, %v1885_v18  ;;  %v5135_v45 = vsel %vm1754_vm0, %v10578_v47, 0 }
 0x33d   : > { %8181 = vpow2.f32 %v1902_v52 }
 0x33e   : > { %8183 = vpow2.f32 %v1900_v6 }
 0x342   : > { %4178 = vmatpush.bf16.xpose.msrb.mxu1 %v4172_v2  ;;  %7749 = vmatmul.msk.bf16.gmra.mxu3 %vm1754_vm0, %v10409_v44  ;;  %v13871_v44 = vld [vmem:[#allocation92_spill] sm:$0xff] }
 0x343   : > { %4662 = vmatpush.bf16.xpose.msrb.mxu3 %v4652_v11  ;;  %v10725_v0 = vpop.eup %8181 }
 0x349   : > { %7741 = vmatmul.msk.bf16.gmra.mxu1 %vm1754_vm0, %v10397_v39  ;;  %v4157_v39 = vsel %vm1754_vm0, %v13874_v42, 0 }
 0x34a   : > { %4179 = vmatpush.bf16.xpose.msrb.mxu1 %v4169_v37 }
 0x34b   : > { %4663 = vmatpush.bf16.xpose.msrb.mxu3 %v4649_v53  ;;  %v1857_v11 = vpop.xlane.xlu1 %1856  ;;  %v10736_v53 = vpop.eup %8183 }
 0x34c   : > { %v1886_v47 = vsub.f32 %v10513_v31, %v1857_v11  ;;  %v5129_v31 = vsel %vm1754_vm0, %v10564_v57, 0 }
 0x352   : > { %4180 = vmatpush.bf16.xpose.msrb.mxu1 %v4166_v9  ;;  %7750 = vmatmul.msk.bf16.gmra.mxu3 %vm1754_vm0, %v13871_v44  ;;  %v1904_v44 = vmul.f32 1.442695, %v1886_v47 }
 0x353   : > { %4664 = vmatpush.bf16.xpose.msrb.mxu3 %v4646_v8  ;;  %v13883_v8 = vld [vmem:[#allocation98_spill] sm:$0xff]  ;;  %v1861_v42 = vpop.xlane.xlu2 %1860 }
 0x354   : > { %8185 = vpow2.f32 %v1904_v44 }
 0x359   : > { %7742 = vmatmul.msk.bf16.gmra.mxu1 %vm1754_vm0, %v13873_v50 }
 0x35a   : > { %4181 = vmatpush.bf16.xpose.msrb.mxu1 %v4163_v20  ;;  %v5132_v20 = vsel %vm1754_vm0, %v13883_v8, 0  ;;  %v10766_v51 = vpop.eup %8185 }
 0x35b   : > { %4665 = vmatpush.bf16.xpose.msrb.mxu3 %v4643_v55  ;;  %v13884_v55 = vld [vmem:[#allocation80_spill] sm:$0xff] }
 0x362   : > { %4182 = vmatpush.bf16.xpose.msrb.mxu1 %v4160_v22  ;;  %7751 = vmatmul.msk.bf16.gmra.mxu3 %vm1754_vm0, %v13875_v40  ;;  %v1859_v40 = vpop.xlane.xlu1 %1858 }
 0x363   : > { %v1887_v10 = vsub.f32 %v10528_v35, %v1859_v40 }
 0x365   : > { %v1906_v57 = vmul.f32 1.442695, %v1887_v10 }
 0x369   : > { %7743 = vmatmul.msk.bf16.gmra.mxu1 %vm1754_vm0, %v13877_v26  ;;  %v1888_v26 = vsub.f32 %v10525_v19, %v1861_v42  ;;  %v13886_v19 = vld [vmem:[#allocation86_spill] sm:$0xff]  ;;  %v13889_v42 = vld [vmem:[#allocation88_spill] sm:$0xff] }
 0x36a   : > { %4183 = vmatpush.bf16.xpose.msrb.mxu1 %v4157_v39 }
 0x36b   : > { %v1908_v15 = vmul.f32 1.442695, %v1888_v26 }
 0x36d   : > { %8187 = vpow2.f32 %v1908_v15 }
 0x36e   : > { %8189 = vpow2.f32 %v1906_v57 }
 0x372   : > { %4184 = vmatpush.bf16.xpose.msrb.mxu1 %v4154_v62  ;;  %7760 = vmatmul.msk.bf16.vlgmr.msra.gmra.mxu3 %vm1754_vm0, %v13878_v1 }
 0x373   : > { %v10781_v52 = vpop.eup %8187 }
 0x375   : > { %v2737_v32 = vpop.f32.mrf.mxu3 }
 0x376   : > { %v2254_v49 = vpop.f32.mrf.mxu1  ;;  %v10752_v39 = vadd.f32 %v10471_v29, %v2737_v32  ;;  %v1863_v32 = vpop.xlane.xlu2 %1862 }
 0x377   : > { %v10701_v43 = vadd.f32 %v10471_v29, %v2254_v49  ;;  %v1889_v61 = vsub.f32 %v10543_v25, %v1863_v32  ;;  %v13888_v25 = vld [vmem:[#allocation87_spill] sm:$0xff] }
 0x379   : > { %7752 = vmatmul.msk.bf16.vlgmr.msra.gmra.mxu1 %vm1754_vm0, %v13879_v13  ;;  %2294 = vmax.xlane.f32.xlu0 %v10701_v43  ;;  %v5126_v13 = vsel %vm1754_vm0, %v10614_v21, 0  ;;  %v13887_v21 = vld [vmem:[#allocation84_spill] sm:$0xff]  ;;  %v1910_v48 = vmul.f32 1.442695, %v1889_v61 }
 0x37a   : > { %5143 = vmatpush.bf16.xpose.msra.mxu1 %v5141_v14 }
 0x37b   : > { %8191 = vpow2.f32 %v1910_v48 }
 0x37d   : > { %v2739_v24 = vpop.f32.mrf.mxu3 }
 0x37e   : > { %v2256_v54 = vpop.f32.mrf.mxu1  ;;  %v10749_v50 = vadd.f32 %v10471_v29, %v2739_v24 }
 0x37f   : > { %v10710_v58 = vadd.f32 %v10471_v29, %v2256_v54 }
 0x381   : > { %2296 = vmax.xlane.f32.xlu2 %v10710_v58  ;;  %1882 = vmax.xlane.f32.xlu0 %v10713_v38 }
 0x382   : > { %7761 = vmatmul.msk.bf16.gmra.mxu3 %vm1754_vm0, %v13881_v46  ;;  %5144 = vmatpush.bf16.xpose.msra.mxu1 %v5138_v27  ;;  %v10786_v27 = vpop.eup %8189 }
 0x385   : > { %v2742_v9 = vpop.f32.mrf.mxu3 }
 0x386   : > { %v2259_v36 = vpop.f32.mrf.mxu1  ;;  %v10769_v14 = vadd.f32 %v10471_v29, %v2742_v9 }
 0x387   : > { %v10723_v12 = vadd.f32 %v10471_v29, %v2259_v36  ;;  %v1865_v36 = vpop.xlane.xlu0 %1864 }
 0x388   : > { %v1890_v11 = vsub.f32 %v10558_v17, %v1865_v36 }
 0x389   : > { %7753 = vmatmul.msk.bf16.gmra.mxu1 %vm1754_vm0, %v13882_v59  ;;  %2298 = vmax.xlane.f32.xlu1 %v10723_v12  ;;  %v1867_v59 = vpop.xlane.xlu1 %1866 }
 0x38a   : > { %5145 = vmatpush.bf16.xpose.msra.mxu1 %v5135_v45  ;;  %1934 = vadd.xlane.f32.xlu2 %v10725_v0  ;;  %v1891_v9 = vsub.f32 %v10575_v4, %v1867_v59 }
 0x38c   : > { %v1914_v44 = vmul.f32 1.442695, %v1891_v9 }
 0x38d   : > { %v2744_v62 = vpop.f32.mrf.mxu3 }
 0x38e   : > { %v2261_v2 = vpop.f32.mrf.mxu1  ;;  %v10779_v54 = vadd.f32 %v10471_v29, %v2744_v62 }
 0x38f   : > { %v10734_v37 = vadd.f32 %v10471_v29, %v2261_v2 }
 0x391   : > { %2300 = vmax.xlane.f32.xlu0 %v10734_v37  ;;  %1932 = vadd.xlane.f32.xlu1 %v10736_v53 }
 0x392   : > { %7762 = vmatmul.msk.bf16.gmra.mxu3 %vm1754_vm0, %v13884_v55  ;;  %5146 = vmatpush.bf16.xpose.msra.mxu1 %v5132_v20  ;;  %v1912_v20 = vmul.f32 1.442695, %v1890_v11  ;;  %v10810_v55 = vpop.eup %8191  ;;  %v13893_v11 = vld [vmem:[#allocation91_spill] sm:$0xff] }
 0x394   : > { %8193 = vpow2.f32 %v1912_v20 }
 0x395   : > { %v2747_v35 = vpop.f32.mrf.mxu3  ;;  %8195 = vpow2.f32 %v1914_v44 }
 0x396   : > { %v2264_v41 = vpop.f32.mrf.mxu1  ;;  %v10795_v45 = vadd.f32 %v10471_v29, %v2747_v35  ;;  %v13891_v35 = vld [vmem:[#allocation89_spill] sm:$0xff] }
 0x397   : > { %v10746_v22 = vadd.f32 %v10471_v29, %v2264_v41 }
 0x399   : > { %7754 = vmatmul.msk.bf16.gmra.mxu1 %vm1754_vm0, %v13885_v63  ;;  %2779 = vmax.xlane.f32.xlu0 %v10749_v50 }
 0x39a   : > { %5147 = vmatpush.bf16.xpose.msra.mxu1 %v5129_v31  ;;  %2777 = vmax.xlane.f32.xlu1 %v10752_v39  ;;  %v10823_v63 = vpop.eup %8193  ;;  %v1873_v31 = vpop.xlane.xlu1 %1872 }
 0x39b   : > { %2302 = vmax.xlane.f32.xlu2 %v10746_v22  ;;  %v10826_v62 = vpop.eup %8195  ;;  %v1894_v26 = vsub.f32 %v10609_v33, %v1873_v31 }
 0x39d   : > { %v2749_v46 = vpop.f32.mrf.mxu3 }
 0x39e   : > { %v2266_v1 = vpop.f32.mrf.mxu1  ;;  %v10799_v2 = vadd.f32 %v10471_v29, %v2749_v46 }
 0x39f   : > { %v10764_v49 = vadd.f32 %v10471_v29, %v2266_v1  ;;  %v1869_v1 = vpop.xlane.xlu2 %1868 }
 0x3a1   : > { %1936 = vadd.xlane.f32.xlu0 %v10766_v51 }
 0x3a2   : > { %7763 = vmatmul.msk.bf16.gmra.mxu3 %vm1754_vm0, %v13886_v19  ;;  %5148 = vmatpush.bf16.xpose.msra.mxu1 %v5126_v13  ;;  %v1871_v13 = vpop.xlane.xlu0 %1870  ;;  %v1920_v19 = vmul.f32 1.442695, %v1894_v26  ;;  %v1879_v59 = vpop.xlane.xlu1 %1878 }
 0x3a3   : > { %2304 = vmax.xlane.f32.xlu1 %v10764_v49  ;;  %2781 = vmax.xlane.f32.xlu2 %v10769_v14 }
 0x3a4   : > { %8197 = vpow2.f32 %v1920_v19  ;;  %v13894_v19 = vld [vmem:[#allocation96_spill] sm:$0xff] }
 0x3a5   : > { %v2752_v17 = vpop.f32.mrf.mxu3 }
 0x3a6   : > { %v2269_v18 = vpop.f32.mrf.mxu1  ;;  %v10821_v40 = vadd.f32 %v10471_v29, %v2752_v17 }
 0x3a7   : > { %v10792_v24 = vadd.f32 %v10471_v29, %v2269_v18  ;;  %v1893_v18 = vsub.f32 %v10599_v60, %v1871_v13 }
 0x3a8   : > { %13890 = vst [vmem:[#allocation92_spill] sm:$0xff] %v10821_v40 }
 0x3a9   : > { %7755 = vmatmul.msk.bf16.gmra.mxu1 %vm1754_vm0, %v13887_v21  ;;  %2783 = vmax.xlane.f32.xlu0 %v10779_v54  ;;  %v1918_v61 = vmul.f32 1.442695, %v1893_v18 }
 0x3ab   : > { %1938 = vadd.xlane.f32.xlu1 %v10786_v27  ;;  %1940 = vadd.xlane.f32.xlu2 %v10781_v52 }
 0x3ad   : > { %v2754_v33 = vpop.f32.mrf.mxu3 }
 0x3ae   : > { %v2271_v6 = vpop.f32.mrf.mxu1  ;;  %v10849_v46 = vadd.f32 %v10471_v29, %v2754_v33 }
 0x3af   : > { %v10813_v41 = vadd.f32 %v10471_v29, %v2271_v6  ;;  %v1875_v6 = vpop.xlane.xlu2 %1874 }
 0x3b0   : > { %13892 = vst [vmem:[#allocation77_spill] sm:$0xff] %v10849_v46  ;;  %v1895_v9 = vsub.f32 %v10623_v28, %v1875_v6 }
 0x3b1   : > { %2306 = vmax.xlane.f32.xlu0 %v10792_v24 }
 0x3b2   : > { %7764 = vmatmul.msk.bf16.gmra.mxu3 %vm1754_vm0, %v13888_v25 }
 0x3b3   : > { %2787 = vmax.xlane.f32.xlu1 %v10799_v2  ;;  %2785 = vmax.xlane.f32.xlu2 %v10795_v45 }
 0x3b6   : > { %v2274_v8 = vpop.f32.mrf.mxu1 }
 0x3b7   : > { %v10808_v47 = vadd.f32 %v10471_v29, %v2274_v8  ;;  %v1922_v8 = vmul.f32 1.442695, %v1895_v9  ;;  %v1881_v26 = vpop.xlane.xlu2 %1880 }
 0x3b9   : > { %7756 = vmatmul.msk.bf16.gmra.mxu1 %vm1754_vm0, %v13889_v42  ;;  %1942 = vadd.xlane.f32.xlu0 %v10810_v55 }
 0x3bb   : > { %2310 = vmax.xlane.f32.xlu1 %v10808_v47  ;;  %2308 = vmax.xlane.f32.xlu2 %v10813_v41 }
 0x3be   : > { %v2276_v4 = vpop.f32.mrf.mxu1 }
 0x3bf   : > { %v10837_v57 = vadd.f32 %v10471_v29, %v2276_v4  ;;  %v1877_v4 = vpop.xlane.xlu0 %1876 }
 0x3c0   : > { %v1896_v28 = vsub.f32 %v10631_v3, %v1877_v4 }
 0x3c1   : > { %2789 = vmax.xlane.f32.xlu0 %v10821_v40 }
 0x3c2   : > { %7765 = vmatmul.msk.bf16.gmra.mxu3 %vm1754_vm0, %v10546_v16  ;;  %v1892_v16 = vsub.f32 %v10585_v23, %v1869_v1  ;;  %v10853_v23 = vpop.eup %8197 }
 0x3c3   : > { %1946 = vadd.xlane.f32.xlu2 %v10826_v62  ;;  %1944 = vadd.xlane.f32.xlu1 %v10823_v63 }
 0x3c4   : > { %v1916_v32 = vmul.f32 1.442695, %v1892_v16 }
 0x3c6   : > { %v2279_v10 = vpop.f32.mrf.mxu1  ;;  %8199 = vpow2.f32 %v1916_v32 }
 0x3c7   : > { %v10834_v15 = vadd.f32 %v10471_v29, %v2279_v10  ;;  %8201 = vpow2.f32 %v1918_v61 }
 0x3c8   : > { %8203 = vpow2.f32 %v1922_v8  ;;  %v13895_v8 = vld [vmem:[#allocation68_spill] sm:$0xff] }
 0x3c9   : > { %7757 = vmatmul.msk.bf16.gmra.mxu1 %vm1754_vm0, %v13891_v35  ;;  %2312 = vmax.xlane.f32.xlu0 %v10837_v57  ;;  %v1898_v35 = vsub.f32 %v10655_v30, %v1881_v26 }
 0x3cb   : > { %2314 = vmax.xlane.f32.xlu2 %v10834_v15  ;;  %v1928_v18 = vmul.f32 1.442695, %v1898_v35 }
 0x3cc   : > { %v10858_v36 = vpop.eup %8199 }
 0x3cd   : > { %v10860_v25 = vpop.eup %8201 }
 0x3ce   : > { %v2281_v21 = vpop.f32.mrf.mxu1  ;;  %v10880_v1 = vpop.eup %8203 }
 0x3cf   : > { %v10846_v48 = vadd.f32 %v10471_v29, %v2281_v21 }
 0x3d1   : > { %2791 = vmax.xlane.f32.xlu0 %v10849_v46  ;;  %2316 = vmax.xlane.f32.xlu1 %v10846_v48 }
 0x3d2   : > { %7766 = vmatmul.msk.bf16.gmra.mxu3 %vm1754_vm0, %v10534_v7  ;;  %v1897_v7 = vsub.f32 %v10643_v34, %v1879_v59  ;;  %v1924_v34 = vmul.f32 1.442695, %v1896_v28 }
 0x3d3   : > { %1952 = vadd.xlane.f32.xlu2 %v10853_v23 }
 0x3d4   : > { %v1926_v44 = vmul.f32 1.442695, %v1897_v7 }
 0x3d6   : > { %v2284_v60 = vpop.f32.mrf.mxu1  ;;  %8205 = vpow2.f32 %v1926_v44 }
 0x3d7   : > { %v10869_v42 = vadd.f32 %v10471_v29, %v2284_v60  ;;  %8207 = vpow2.f32 %v1924_v34 }
 0x3d9   : > { %7758 = vmatmul.msk.bf16.gmra.mxu1 %vm1754_vm0, %v13893_v11  ;;  %1948 = vadd.xlane.f32.xlu0 %v10858_v36 }
 0x3da   : > { %1950 = vadd.xlane.f32.xlu1 %v10860_v25 }
 0x3dc   : > { %v10882_v13 = vpop.eup %8205 }
 0x3dd   : > { %v10894_v61 = vpop.eup %8207 }
 0x3de   : > { %v2286_v20 = vpop.f32.mrf.mxu1 }
 0x3df   : > { %v10872_v17 = vadd.f32 %v10471_v29, %v2286_v20 }
 0x3e1   : > { %2318 = vmax.xlane.f32.xlu0 %v10869_v42  ;;  %2320 = vmax.xlane.f32.xlu2 %v10872_v17 }
 0x3e6   : > { %v2289_v31 = vpop.f32.mrf.mxu1 }
 0x3e7   : > { %v10878_v10 = vadd.f32 %v10471_v29, %v2289_v31 }
 0x3e9   : > { %7759 = vmatmul.msk.bf16.gmra.mxu1 %vm1754_vm0, %v13894_v19  ;;  %1954 = vadd.xlane.f32.xlu0 %v10880_v1 }
 0x3ea   : > { %1958 = vadd.xlane.f32.xlu2 %v10882_v13  ;;  %2322 = vmax.xlane.f32.xlu1 %v10878_v10 }
 0x3ec   : > { %v2295_v3 = vpop.xlane.xlu0 %2294 }
 0x3ed   : > { %v2326_v16 = vsub.f32 %v10701_v43, %v2295_v3 }
 0x3ee   : > { %v2291_v33 = vpop.f32.mrf.mxu1 }
 0x3ef   : > { %v2342_v32 = vmul.f32 1.442695, %v2326_v16  ;;  %v10892_v21 = vadd.f32 %v10471_v29, %v2291_v33 }
 0x3f1   : > { %8209 = vpow2.f32 %v2342_v32  ;;  %2324 = vmax.xlane.f32.xlu0 %v10892_v21 }
 0x3f2   : > { %8211 = vpow2.f32 %v1928_v18  ;;  %1956 = vadd.xlane.f32.xlu1 %v10894_v61 }
 0x3f4   : > { %v2297_v30 = vpop.xlane.xlu2 %2296  ;;  %v1883_v7 = vpop.xlane.xlu0 %1882 }
 0x3f5   : > { %v2327_v60 = vsub.f32 %v10710_v58, %v2297_v30  ;;  %v1899_v58 = vsub.f32 %v10713_v38, %v1883_v7 }
 0x3f6   : > { %v3220_v6 = vpop.f32.mrf.mxu1 }
 0x3f7   : > { %v10899_v59 = vpop.eup %8209  ;;  %v2344_v43 = vmul.f32 1.442695, %v2327_v60  ;;  %v10902_v11 = vadd.f32 %v10471_v29, %v3220_v6  ;;  %v1930_v34 = vmul.f32 1.442695, %v1899_v58  ;;  %v13896_v60 = vld [vmem:[#allocation79_spill] sm:$0xff] }
 0x3f8   : > { %v10904_v9 = vpop.eup %8211  ;;  %2374 = vadd.xlane.f32.xlu2 %v10899_v59 }
 0x3f9   : > { %8213 = vpow2.f32 %v2344_v43  ;;  %7768 = vmatmul.msk.bf16.vlgmr.msrb.gmra.mxu1 %vm1754_vm0, %v13895_v8  ;;  %1960 = vadd.xlane.f32.xlu0 %v10904_v9 }
 0x3fa   : > { %3260 = vmax.xlane.f32.xlu1 %v10902_v11 }
 0x3fc   : > { %v2299_v20 = vpop.xlane.xlu1 %2298 }
 0x3fd   : > { %v2328_v44 = vsub.f32 %v10723_v12, %v2299_v20  ;;  %v1935_v4 = vpop.xlane.xlu2 %1934 }
 0x3fe   : > { %8215 = vrcp.f32 %v1935_v4  ;;  %v3222_v28 = vpop.f32.mrf.mxu1 }
 0x3ff   : > { %v10913_v31 = vpop.eup %8213  ;;  %v2346_v26 = vmul.f32 1.442695, %v2328_v44  ;;  %v10916_v19 = vadd.f32 %v10471_v29, %v3222_v28 }
 0x401   : > { %8217 = vpow2.f32 %v2346_v26  ;;  %3262 = vmax.xlane.f32.xlu0 %v10916_v19 }
 0x402   : > { %2376 = vadd.xlane.f32.xlu1 %v10913_v31  ;;  %8219 = vpow2.f32 %v1930_v34 }
 0x404   : > { %v8216_v38 = vpop.eup %8215  ;;  %v1933_v35 = vpop.xlane.xlu1 %1932 }
 0x405   : > { %v2301_v3 = vpop.xlane.xlu0 %2300  ;;  %8221 = vrcp.f32 %v1933_v35  ;;  %v1981_v16 = vmul.f32 %v8216_v38, %v1935_v4 }
 0x406   : > { %v2329_v12 = vsub.f32 %v10734_v37, %v2301_v3  ;;  %v3225_v18 = vpop.f32.mrf.mxu1 }
 0x407   : > { %v10921_v33 = vpop.eup %8217  ;;  %v1997_v6 = vsub.f32 2.0, %v1981_v16 }
 0x408   : > { %v2348_v32 = vmul.f32 1.442695, %v2329_v12  ;;  %v10923_v30 = vpop.eup %8219 }
 0x409   : > { %7769 = vmatmul.msk.bf16.gmra.mxu1 %vm1754_vm0, %v13896_v60  ;;  %2378 = vadd.xlane.f32.xlu0 %v10921_v33  ;;  %v2013_v20 = vmul.f32 %v8216_v38, %v1997_v6 }
 0x40a   : > { %8223 = vpow2.f32 %v2348_v32  ;;  %1962 = vadd.xlane.f32.xlu1 %v10923_v30  ;;  %v10935_v32 = vadd.f32 %v10471_v29, %v3225_v18 }
 0x40b   : > { %v8222_v43 = vpop.eup %8221 }
 0x40c   : > { %v1980_v7 = vmul.f32 %v8222_v43, %v1933_v35 }
 0x40d   : > { %v2780_v8 = vpop.xlane.xlu0 %2779  ;;  %v2778_v37 = vpop.xlane.xlu1 %2777 }
 0x40e   : > { %v2810_v58 = vsub.f32 %v10749_v50, %v2780_v8  ;;  %v1996_v44 = vsub.f32 2.0, %v1980_v7  ;;  %v2809_v4 = vsub.f32 %v10752_v39, %v2778_v37  ;;  %v2303_v28 = vpop.xlane.xlu2 %2302  ;;  %v3227_v34 = vpop.f32.mrf.mxu1  ;;  %v2029_v39 = vmul.f32 %v10725_v0, %v2013_v20  ;;  %v13899_v0 = vld [vmem:[#allocation83_spill] sm:$0xff] }
 0x40f   : > { %v2330_v3 = vsub.f32 %v10746_v22, %v2303_v28 }
 0x410   : > { %v10931_v26 = vpop.eup %8223  ;;  %v2827_v12 = vmul.f32 1.442695, %v2810_v58  ;;  %v2012_v16 = vmul.f32 %v8222_v43, %v1996_v44  ;;  %v2825_v35 = vmul.f32 1.442695, %v2809_v4 }
 0x411   : > { %2380 = vadd.xlane.f32.xlu2 %v10931_v26  ;;  %v2350_v60 = vmul.f32 1.442695, %v2330_v3 }
 0x412   : > { %8225 = vpow2.f32 %v2827_v12  ;;  %3264 = vmax.xlane.f32.xlu1 %v10935_v32  ;;  %v2028_v50 = vmul.f32 %v10736_v53, %v2012_v16  ;;  %v10961_v12 = vadd.f32 %v10471_v29, %v3227_v34 }
 0x413   : > { %8227 = vpow2.f32 %v2825_v35 }
 0x414   : > { %8229 = vpow2.f32 %v2350_v60  ;;  %v2044_v22 = vpack.c.bf16 %v2029_v39, %v2028_v50 }
 0x415   : > { %v1937_v38 = vpop.xlane.xlu0 %1936 }
 0x416   : > { %v2305_v6 = vpop.xlane.xlu1 %2304  ;;  %v10941_v43 = vpop.xlane.xlu2 %2781  ;;  %2108 = vmatmul.bf16.vlgmr.msrb.gmra.mxu0 %v2044_v22  ;;  %8231 = vrcp.f32 %v1937_v38 }
 0x417   : > { %v3230_v7 = vpop.f32.mrf.mxu1  ;;  %v2331_v53 = vsub.f32 %v10764_v49, %v2305_v6 }
 0x418   : > { %v10943_v18 = vpop.eup %8225  ;;  %v10958_v4 = vadd.f32 %v10471_v29, %v3230_v7 }
 0x419   : > { %13897 = vst [vmem:[#allocation90_spill] sm:$0xff] %v10943_v18  ;;  %v10945_v8 = vpop.eup %8227  ;;  %2859 = vadd.xlane.f32.xlu2 %v10943_v18  ;;  %7770 = vmatmul.msk.bf16.gmra.mxu1 %vm1754_vm0, %v13899_v0  ;;  %v2352_v44 = vmul.f32 1.442695, %v2331_v53 }
 0x41a   : > { %13898 = vst [vmem:[#allocation73_spill] sm:$0xff] %v10945_v8  ;;  %v10948_v37 = vpop.eup %8229  ;;  %2857 = vadd.xlane.f32.xlu0 %v10945_v8 }
 0x41b   : > { %2382 = vadd.xlane.f32.xlu1 %v10948_v37 }
 0x41c   : > { %v8232_v20 = vpop.eup %8231 }
 0x41d   : > { %v10955_v58 = vpop.xlane.xlu0 %2783  ;;  %v1982_v35 = vmul.f32 %v8232_v20, %v1937_v38 }
 0x41e   : > { %v1939_v28 = vpop.xlane.xlu1 %1938  ;;  %v1941_v3 = vpop.xlane.xlu2 %1940 }
 0x41f   : > { %8233 = vrcp.f32 %v1939_v28  ;;  %v3232_v16 = vpop.f32.mrf.mxu1  ;;  %v1998_v49 = vsub.f32 2.0, %v1982_v35 }
 0x420   : > { %8235 = vpow2.f32 %v2352_v44  ;;  %v13900_v44 = vld [vmem:[#allocation85_spill] sm:$0xff] }
 0x421   : > { %3268 = vmax.xlane.f32.xlu2 %v10958_v4  ;;  %8237 = vrcp.f32 %v1941_v3  ;;  %v2014_v53 = vmul.f32 %v8232_v20, %v1998_v49  ;;  %v10982_v49 = vld [vmem:[%s9760_s1] ss:$0 sm:$0xff] }
 0x422   : > { %3266 = vmax.xlane.f32.xlu0 %v10961_v12 }
 0x425   : > { %v2307_v60 = vpop.xlane.xlu0 %2306  ;;  %v8234_v50 = vpop.eup %8233 }
 0x426   : > { %v2332_v39 = vsub.f32 %v10792_v24, %v2307_v60  ;;  %v1983_v22 = vmul.f32 %v8234_v50, %v1939_v28  ;;  %v10966_v6 = vpop.xlane.xlu1 %2787  ;;  %v10968_v7 = vpop.xlane.xlu2 %2785  ;;  %v2030_v60 = vmul.f32 %v10766_v51, %v2014_v53 }
 0x427   : > { %v3235_v34 = vpop.f32.mrf.mxu1  ;;  %v10970_v0 = vpop.eup %8235 }
 0x428   : > { %v2354_v29 = vmul.f32 1.442695, %v2332_v39  ;;  %v1999_v38 = vsub.f32 2.0, %v1983_v22  ;;  %v8238_v24 = vpop.eup %8237  ;;  %v10993_v18 = vadd.f32 %v10982_v49, %v3235_v34 }
 0x429   : > { %7771 = vmatmul.msk.bf16.gmra.mxu1 %vm1754_vm0, %v13900_v44  ;;  %v1984_v39 = vmul.f32 %v8238_v24, %v1941_v3 }
 0x42a   : > { %8239 = vpow2.f32 %v2354_v29  ;;  %2384 = vadd.xlane.f32.xlu0 %v10970_v0  ;;  %v2015_v35 = vmul.f32 %v8234_v50, %v1999_v38  ;;  %v10985_v29 = vadd.f32 %v10982_v49, %v3232_v16 }
 0x42c   : > { %v2031_v40 = vmul.f32 %v10786_v27, %v2015_v35  ;;  %v2000_v27 = vsub.f32 2.0, %v1984_v39  ;;  %v13903_v39 = vld [vmem:[#allocation97_spill] sm:$0xff] }
 0x42d   : > { %v1943_v28 = vpop.xlane.xlu0 %1942 }
 0x42e   : > { %8241 = vrcp.f32 %v1943_v28  ;;  %v10977_v46 = vpop.xlane.xlu1 %2310  ;;  %v2309_v22 = vpop.xlane.xlu2 %2308  ;;  %v2045_v8 = vpack.c.bf16 %v2031_v40, %v2030_v60  ;;  %v2016_v16 = vmul.f32 %v8238_v24, %v2000_v27 }
 0x42f   : > { %v2333_v50 = vsub.f32 %v10813_v41, %v2309_v22  ;;  %v3237_v38 = vpop.f32.mrf.mxu1 }
 0x430   : > { %v10979_v20 = vpop.eup %8239  ;;  %2113 = vmatmul.bf16.gmra.mxu0 %v2045_v8  ;;  %v2032_v24 = vmul.f32 %v10781_v52, %v2016_v16 }
 0x431   : > { %2386 = vadd.xlane.f32.xlu2 %v10979_v20  ;;  %v2356_v51 = vmul.f32 1.442695, %v2333_v50 }
 0x432   : > { %3270 = vmax.xlane.f32.xlu0 %v10985_v29 }
 0x433   : > { %8243 = vpow2.f32 %v2356_v51 }
 0x434   : > { %v8242_v3 = vpop.eup %8241 }
 0x435   : > { %v1985_v40 = vmul.f32 %v8242_v3, %v1943_v28  ;;  %v10990_v53 = vpop.xlane.xlu0 %2789 }
 0x436   : > { %13901 = vst [vmem:[#allocation94_spill] sm:$0xff] %v10990_v53  ;;  %v1947_v35 = vpop.xlane.xlu2 %1946  ;;  %v1945_v60 = vpop.xlane.xlu1 %1944 }
 0x437   : > { %v2001_v44 = vsub.f32 2.0, %v1985_v40  ;;  %8245 = vrcp.f32 %v1947_v35  ;;  %v3240_v41 = vpop.f32.mrf.mxu1 }
 0x438   : > { %8247 = vrcp.f32 %v1945_v60  ;;  %v10996_v8 = vadd.f32 %v10982_v49, %v3240_v41 }
 0x439   : > { %v2017_v22 = vmul.f32 %v8242_v3, %v2001_v44  ;;  %7772 = vmatmul.msk.bf16.gmra.mxu1 %vm1754_vm0, %v13903_v39  ;;  %v11001_v28 = vpop.eup %8243  ;;  %v11009_v39 = vadd.f32 %v10982_v49, %v3237_v38 }
 0x43a   : > { %13902 = vst [vmem:[#allocation67_spill] sm:$0xff] %v10996_v8  ;;  %3272 = vmax.xlane.f32.xlu0 %v10993_v18  ;;  %3276 = vmax.xlane.f32.xlu2 %v10996_v8 }
 0x43b   : > { %v2033_v34 = vmul.f32 %v10810_v55, %v2017_v22  ;;  %2388 = vadd.xlane.f32.xlu1 %v11001_v28 }
 0x43d   : > { %v2313_v50 = vpop.xlane.xlu0 %2312  ;;  %v2046_v51 = vpack.c.bf16 %v2033_v34, %v2032_v24  ;;  %v8246_v27 = vpop.eup %8245 }
 0x43e   : > { %v2335_v3 = vsub.f32 %v10837_v57, %v2313_v50  ;;  %v8248_v40 = vpop.eup %8247  ;;  %v1987_v44 = vmul.f32 %v8246_v27, %v1947_v35  ;;  %v2315_v8 = vpop.xlane.xlu2 %2314 }
 0x43f   : > { %v1986_v41 = vmul.f32 %v8248_v40, %v1945_v60  ;;  %v2336_v55 = vsub.f32 %v10834_v15, %v2315_v8  ;;  %v3242_v57 = vpop.f32.mrf.mxu1 }
 0x440   : > { %v2360_v53 = vmul.f32 1.442695, %v2335_v3  ;;  %2118 = vmatmul.bf16.gmra.mxu0 %v2046_v51  ;;  %v2003_v52 = vsub.f32 2.0, %v1987_v44  ;;  %v11021_v38 = vadd.f32 %v10982_v49, %v3242_v57 }
 0x441   : > { %v2002_v16 = vsub.f32 2.0, %v1986_v41  ;;  %v2362_v50 = vmul.f32 1.442695, %v2336_v55 }
 0x442   : > { %8249 = vpow2.f32 %v2360_v53  ;;  %v2019_v60 = vmul.f32 %v8246_v27, %v2003_v52  ;;  %13905 = vst [vmem:[#allocation70_spill] sm:$0xff] %v11021_v38  ;;  %v13906_v27 = vld [vmem:[#allocation61_spill] sm:$0xff] }
 0x443   : > { %3274 = vmax.xlane.f32.xlu1 %v11009_v39  ;;  %v2018_v35 = vmul.f32 %v8248_v40, %v2002_v16  ;;  %8251 = vpow2.f32 %v2362_v50 }
 0x444   : > { %v11013_v22 = vpop.xlane.xlu1 %2316  ;;  %v2035_v53 = vmul.f32 %v10826_v62, %v2019_v60 }
 0x445   : > { %v11015_v24 = vpop.xlane.xlu0 %2791  ;;  %v2034_v15 = vmul.f32 %v10823_v63, %v2018_v35 }
 0x446   : > { %13904 = vst [vmem:[#allocation93_spill] sm:$0xff] %v11015_v24  ;;  %v1953_v8 = vpop.xlane.xlu2 %1952 }
 0x447   : > { %v2047_v40 = vpack.c.bf16 %v2035_v53, %v2034_v15 }
 0x448   : > { %v11017_v34 = vpop.eup %8249 }
 0x449   : > { %2392 = vadd.xlane.f32.xlu2 %v11017_v34  ;;  %7773 = vmatmul.msk.bf16.gmra.mxu1 %vm1754_vm0, %v10562_v56  ;;  %v11030_v44 = vpop.eup %8251 }
 0x44b   : > { %3278 = vmax.xlane.f32.xlu1 %v11021_v38 }
 0x44d   : > { %v1949_v51 = vpop.xlane.xlu0 %1948  ;;  %v1951_v3 = vpop.xlane.xlu1 %1950 }
 0x44e   : > { %2981 = vrot.lane.b32.xlu0 %v13906_v27, %s9337_s30  ;;  %8253 = vrcp.f32 %v1949_v51 }
 0x44f   : > { %8255 = vrcp.f32 %v1951_v3 }
 0x450   : > { %2123 = vmatmul.bf16.gmra.mxu0 %v2047_v40  ;;  %8257 = vrcp.f32 %v1953_v8 }
 0x453   : > { %2394 = vadd.xlane.f32.xlu1 %v11030_v44 }
 0x454   : > { %v8254_v56 = vpop.eup %8253  ;;  %v2321_v41 = vpop.xlane.xlu2 %2320 }
 0x455   : > { %v8256_v63 = vpop.eup %8255  ;;  %v1988_v62 = vmul.f32 %v8254_v56, %v1949_v51  ;;  %v11033_v52 = vpop.xlane.xlu0 %2318  ;;  %v2339_v55 = vsub.f32 %v10872_v17, %v2321_v41 }
 0x456   : > { %v1989_v16 = vmul.f32 %v8256_v63, %v1951_v3  ;;  %v8258_v40 = vpop.eup %8257 }
 0x457   : > { %v2004_v57 = vsub.f32 2.0, %v1988_v62  ;;  %v2368_v60 = vmul.f32 1.442695, %v2339_v55  ;;  %v1990_v3 = vmul.f32 %v8258_v40, %v1953_v8  ;;  %v2334_v55 = vsub.f32 %v10808_v47, %v10977_v46 }
 0x458   : > { %v2005_v35 = vsub.f32 2.0, %v1989_v16 }
 0x459   : > { %v2020_v50 = vmul.f32 %v8254_v56, %v2004_v57  ;;  %8259 = vpow2.f32 %v2368_v60  ;;  %7774 = vmatmul.msk.bf16.gmra.mxu1 %vm1754_vm0, %v10548_v5  ;;  %v13907_v56 = vld [vmem:[#allocation57_spill] sm:$0xff]  ;;  %v2006_v5 = vsub.f32 2.0, %v1990_v3 }
 0x45a   : > { %v2021_v15 = vmul.f32 %v8256_v63, %v2005_v35 }
 0x45b   : > { %v2036_v53 = vmul.f32 %v10858_v36, %v2020_v50  ;;  %v2358_v50 = vmul.f32 1.442695, %v2334_v55 }
 0x45c   : > { %v2037_v51 = vmul.f32 %v10860_v25, %v2021_v15  ;;  %v2022_v25 = vmul.f32 %v8258_v40, %v2006_v5 }
 0x45d   : > { %v1955_v27 = vpop.xlane.xlu0 %1954  ;;  %v11040_v24 = vpop.xlane.xlu1 %2322 }
 0x45e   : > { %8261 = vrcp.f32 %v1955_v27  ;;  %v2048_v38 = vpack.c.bf16 %v2037_v51, %v2036_v53  ;;  %v1959_v36 = vpop.xlane.xlu2 %1958  ;;  %v2038_v57 = vmul.f32 %v10853_v23, %v2022_v25 }
 0x45f   : > { %v11042_v17 = vpop.eup %8259  ;;  %8263 = vrcp.f32 %v1959_v36 }
 0x460   : > { %2128 = vmatmul.bf16.gmra.mxu0 %v2048_v38  ;;  %2400 = vadd.xlane.f32.xlu1 %v11042_v17 }
 0x461   : > { %5081 = vrot.lane.b32.xlu2 %v13907_v56, %s9339_s19 }
 0x464   : > { %v8262_v63 = vpop.eup %8261 }
 0x465   : > { %v1991_v62 = vmul.f32 %v8262_v63, %v1955_v27  ;;  %v11047_v41 = vpop.xlane.xlu0 %2324  ;;  %v1957_v8 = vpop.xlane.xlu1 %1956 }
 0x466   : > { %8265 = vrcp.f32 %v1957_v8  ;;  %v8264_v60 = vpop.eup %8263 }
 0x467   : > { %v2007_v16 = vsub.f32 2.0, %v1991_v62  ;;  %v1993_v62 = vmul.f32 %v8264_v60, %v1959_v36 }
 0x469   : > { %v2023_v38 = vmul.f32 %v8262_v63, %v2007_v16  ;;  %v2009_v23 = vsub.f32 2.0, %v1993_v62 }
 0x46b   : > { %v2039_v35 = vmul.f32 %v10880_v1, %v2023_v38  ;;  %v2375_v15 = vpop.xlane.xlu2 %2374 }
 0x46c   : > { %v8266_v51 = vpop.eup %8265  ;;  %8267 = vrcp.f32 %v2375_v15 }
 0x46d   : > { %v1961_v53 = vpop.xlane.xlu0 %1960  ;;  %v2049_v27 = vpack.c.bf16 %v2039_v35, %v2038_v57  ;;  %v1992_v3 = vmul.f32 %v8266_v51, %v1957_v8  ;;  %v3261_v40 = vpop.xlane.xlu1 %3260  ;;  %8269 = vpow2.f32 %v2358_v50  ;;  %v2025_v8 = vmul.f32 %v8264_v60, %v2009_v23 }
 0x46e   : > { %v3292_v5 = vsub.f32 %v10902_v11, %v3261_v40  ;;  %v2338_v57 = vsub.f32 %v10869_v42, %v11033_v52  ;;  %v2341_v42 = vsub.f32 %v10892_v21, %v11047_v41 }
 0x46f   : > { %v2008_v46 = vsub.f32 2.0, %v1992_v3 }
 0x470   : > { %2133 = vmatmul.bf16.gmra.mxu0 %v2049_v27  ;;  %v3308_v47 = vmul.f32 1.442695, %v3292_v5 }
 0x471   : > { %v2024_v16 = vmul.f32 %v8266_v51, %v2008_v46  ;;  %v2041_v51 = vmul.f32 %v10882_v13, %v2025_v8 }
 0x472   : > { %8271 = vpow2.f32 %v3308_v47  ;;  %v8268_v1 = vpop.eup %8267 }
 0x473   : > { %v11054_v25 = vpop.eup %8269  ;;  %8273 = vrcp.f32 %v1961_v53  ;;  %v2422_v38 = vmul.f32 %v8268_v1, %v2375_v15  ;;  %v2040_v36 = vmul.f32 %v10894_v61, %v2024_v16  ;;  %v2366_v15 = vmul.f32 1.442695, %v2338_v57 }
 0x475   : > { %v3263_v63 = vpop.xlane.xlu0 %3262  ;;  %v2377_v55 = vpop.xlane.xlu1 %2376  ;;  %v2438_v50 = vsub.f32 2.0, %v2422_v38  ;;  %v2050_v60 = vpack.c.bf16 %v2041_v51, %v2040_v36 }
 0x476   : > { %8275 = vrcp.f32 %v2377_v55 }
 0x477   : > { %v2454_v62 = vmul.f32 %v8268_v1, %v2438_v50 }
 0x478   : > { %2390 = vadd.xlane.f32.xlu0 %v11054_v25  ;;  %v11057_v11 = vpop.eup %8271 }
 0x479   : > { %3340 = vadd.xlane.f32.xlu1 %v11057_v11  ;;  %v8274_v35 = vpop.eup %8273  ;;  %v2470_v13 = vmul.f32 %v10899_v59, %v2454_v62  ;;  %v3293_v59 = vsub.f32 %v10916_v19, %v3263_v63 }
 0x47a   : > { %v1994_v47 = vmul.f32 %v8274_v35, %v1961_v53  ;;  %v2372_v53 = vmul.f32 1.442695, %v2341_v42 }
 0x47c   : > { %v8276_v3 = vpop.eup %8275  ;;  %v2010_v16 = vsub.f32 2.0, %v1994_v47 }
 0x47d   : > { %v2379_v27 = vpop.xlane.xlu0 %2378  ;;  %v2423_v40 = vmul.f32 %v8276_v3, %v2377_v55  ;;  %v1963_v5 = vpop.xlane.xlu1 %1962 }
 0x47e   : > { %8277 = vrcp.f32 %v2379_v27  ;;  %v2026_v57 = vmul.f32 %v8274_v35, %v2010_v16 }
 0x47f   : > { %8279 = vrcp.f32 %v1963_v5  ;;  %v2439_v46 = vsub.f32 2.0, %v2423_v40 }
 0x480   : > { %2138 = vmatmul.bf16.gmra.mxu0 %v2050_v60  ;;  %8281 = vpow2.f32 %v2366_v15  ;;  %v2042_v35 = vmul.f32 %v10904_v9, %v2026_v57  ;;  %v13909_v9 = vld [vmem:[#allocation59_spill] sm:$0xff] }
 0x481   : > { %v2455_v61 = vmul.f32 %v8276_v3, %v2439_v46  ;;  %v3310_v46 = vmul.f32 1.442695, %v3293_v59 }
 0x483   : > { %v2471_v55 = vmul.f32 %v10913_v31, %v2455_v61 }
 0x484   : > { %v8278_v23 = vpop.eup %8277  ;;  %v2381_v52 = vpop.xlane.xlu2 %2380 }
 0x485   : > { %8283 = vrcp.f32 %v2381_v52  ;;  %v8280_v8 = vpop.eup %8279  ;;  %v2424_v36 = vmul.f32 %v8278_v23, %v2379_v27  ;;  %v2486_v1 = vpack.c.bf16 %v2471_v55, %v2470_v13  ;;  %v11068_v51 = vpop.xlane.xlu1 %3264  ;;  %v13908_v27 = vld [vmem:[#allocation82_spill] sm:$0xff] }
 0x486   : > { %v1995_v38 = vmul.f32 %v8280_v8, %v1963_v5  ;;  %v11070_v3 = vpop.eup %8281  ;;  %8285 = vpow2.f32 %v2372_v53 }
 0x487   : > { %2526 = vmatmul.bf16.vlgmr.msrb.gmra.mxu2 %v2486_v1  ;;  %v2440_v40 = vsub.f32 2.0, %v2424_v36  ;;  %8287 = vpow2.f32 %v3310_v46 }
 0x488   : > { %v2011_v50 = vsub.f32 2.0, %v1995_v38  ;;  %v2811_v38 = vsub.f32 %v10769_v14, %v10941_v43 }
 0x489   : > { %v2456_v47 = vmul.f32 %v8278_v23, %v2440_v40 }
 0x48a   : > { %v2027_v41 = vmul.f32 %v8280_v8, %v2011_v50  ;;  %2398 = vadd.xlane.f32.xlu2 %v11070_v3 }
 0x48b   : > { %v8284_v21 = vpop.eup %8283  ;;  %v2472_v16 = vmul.f32 %v10921_v33, %v2456_v47 }
 0x48c   : > { %v2425_v31 = vmul.f32 %v8284_v21, %v2381_v52  ;;  %3628 = vrot.lane.b32.xlu0 %v13908_v27, %s9333_s27  ;;  %v2043_v60 = vmul.f32 %v10923_v30, %v2027_v41  ;;  %v11080_v42 = vpop.eup %8285  ;;  %v11083_v63 = vpop.xlane.xlu2 %2859 }
 0x48d   : > { %v11076_v5 = vpop.xlane.xlu0 %2857  ;;  %v11093_v8 = vpop.eup %8287 }
 0x48e   : > { %v2441_v15 = vsub.f32 2.0, %v2425_v31  ;;  %v2051_v62 = vpack.c.bf16 %v2043_v60, %v2042_v35  ;;  %v2383_v52 = vpop.xlane.xlu1 %2382 }
 0x48f   : > { %8289 = vrcp.f32 %v2383_v52 }
 0x490   : > { %v2457_v61 = vmul.f32 %v8284_v21, %v2441_v15  ;;  %2143 = vmatmul.bf16.gmra.mxu0 %v2051_v62 }
 0x492   : > { %v2473_v19 = vmul.f32 %v10931_v26, %v2457_v61  ;;  %2404 = vadd.xlane.f32.xlu2 %v11080_v42  ;;  %2979 = vrot.lane.b32.xlu1 %v13909_v9, %s9337_s30  ;;  %v2337_v61 = vsub.f32 %v10846_v48, %v11013_v22  ;;  %v2757_v22 = vpop.f32.mrf.mxu3 }
 0x493   : > { %v2109_v30 = vpop.f32.mrf.mxu0 }
 0x494   : > { %4598 = vrot.lane.b32.xlu0 %v13907_v56, %s9338_s26  ;;  %2149 = vst.msk [vmem:[#allocation2] sm:$0xff] %vm1754_vm0, %v2109_v30  ;;  %v2487_v13 = vpack.c.bf16 %v2473_v19, %v2472_v16  ;;  %v11098_v36 = vpop.xlane.xlu2 %3268  ;;  %v2364_v16 = vmul.f32 1.442695, %v2337_v61 }
 0x495   : > { %v3267_v23 = vpop.xlane.xlu0 %3266  ;;  %v8290_v33 = vpop.eup %8289 }
 0x496   : > { %v3295_v26 = vsub.f32 %v10961_v12, %v3267_v23  ;;  %v2426_v53 = vmul.f32 %v8290_v33, %v2383_v52  ;;  %v2829_v12 = vmul.f32 1.442695, %v2811_v38 }
 0x497   : > { %2531 = vmatmul.bf16.gmra.mxu2 %v2487_v13  ;;  %v2812_v13 = vsub.f32 %v10779_v54, %v10955_v58 }
 0x498   : > { %v3314_v55 = vmul.f32 1.442695, %v3295_v26  ;;  %v2442_v50 = vsub.f32 2.0, %v2426_v53 }
 0x499   : > { %v2831_v38 = vmul.f32 1.442695, %v2812_v13 }
 0x49a   : > { %3342 = vadd.xlane.f32.xlu2 %v11093_v8  ;;  %8291 = vpow2.f32 %v3314_v55  ;;  %v2458_v43 = vmul.f32 %v8290_v33, %v2442_v50 }
 0x49b   : > { %v2111_v56 = vpop.f32.mrf.mxu0 }
 0x49c   : > { %2150 = vst.msk [vmem:[#allocation2 + $0x8] sm:$0xff] %vm1754_vm0, %v2111_v56  ;;  %v2474_v35 = vmul.f32 %v10948_v37, %v2458_v43 }
 0x49d   : > { %v2385_v1 = vpop.xlane.xlu0 %2384 }
 0x49e   : > { %8293 = vrcp.f32 %v2385_v1 }
 0x49f   : > { %8295 = vpow2.f32 %v2829_v12 }
 0x4a0   : > { %v11101_v57 = vpop.eup %8291 }
 0x4a2   : > { %3346 = vadd.xlane.f32.xlu2 %v11101_v57 }
 0x4a4   : > { %v8294_v21 = vpop.eup %8293  ;;  %v2387_v40 = vpop.xlane.xlu2 %2386 }
 0x4a5   : > { %v2427_v41 = vmul.f32 %v8294_v21, %v2385_v1  ;;  %8297 = vrcp.f32 %v2387_v40  ;;  %v11104_v31 = vpop.eup %8295  ;;  %v11109_v47 = vpop.xlane.xlu0 %3270  ;;  %v11122_v1 = vadd.f32 %v10982_v49, %v2757_v22 }
 0x4a7   : > { %v2443_v14 = vsub.f32 2.0, %v2427_v41 }
 0x4a9   : > { %v2459_v59 = vmul.f32 %v8294_v21, %v2443_v14 }
 0x4aa   : > { %2861 = vadd.xlane.f32.xlu2 %v11104_v31 }
 0x4ab   : > { %v2475_v60 = vmul.f32 %v10970_v0, %v2459_v59  ;;  %v8298_v62 = vpop.eup %8297 }
 0x4ac   : > { %v2428_v52 = vmul.f32 %v8298_v62, %v2387_v40  ;;  %v13910_v40 = vld [vmem:[#allocation54_spill] sm:$0xff] }
 0x4ad   : > { %v2488_v15 = vpack.c.bf16 %v2475_v60, %v2474_v35  ;;  %v2114_v46 = vpop.f32.mrf.mxu0  ;;  %v11114_v30 = vpop.xlane.xlu2 %3276 }
 0x4ae   : > { %v2389_v19 = vpop.xlane.xlu1 %2388  ;;  %2151 = vst.msk [vmem:[#allocation2 + $0x10] sm:$0xff] %vm1754_vm0, %v2114_v46  ;;  %v2444_v37 = vsub.f32 2.0, %v2428_v52  ;;  %v11119_v48 = vpop.xlane.xlu0 %3272 }
 0x4af   : > { %2536 = vmatmul.bf16.gmra.mxu2 %v2488_v15  ;;  %8299 = vrcp.f32 %v2389_v19  ;;  %v13911_v15 = vld [vmem:[#allocation56_spill] sm:$0xff] }
 0x4b0   : > { %8301 = vpow2.f32 %v2364_v16  ;;  %v2460_v33 = vmul.f32 %v8298_v62, %v2444_v37  ;;  %v11146_v62 = vpop.f32.mrf.mxu1  ;;  %v13912_v37 = vld [vmem:[#allocation55_spill] sm:$0xff] }
 0x4b1   : > { %8303 = vpow2.f32 %v2831_v38 }
 0x4b2   : > { %v2476_v50 = vmul.f32 %v10979_v20, %v2460_v33 }
 0x4b5   : > { %v8300_v23 = vpop.eup %8299  ;;  %v2116_v0 = vpop.f32.mrf.mxu0 }
 0x4b6   : > { %v2429_v26 = vmul.f32 %v8300_v23, %v2389_v19  ;;  %2152 = vst.msk [vmem:[#allocation2 + $0x18] sm:$0xff] %vm1754_vm0, %v2116_v0  ;;  %v11124_v12 = vpop.eup %8301  ;;  %v11142_v60 = vpop.xlane.xlu1 %3274  ;;  %v2813_v19 = vsub.f32 %v10795_v45, %v10968_v7 }
 0x4b7   : > { %v11133_v43 = vpop.eup %8303 }
 0x4b8   : > { %v2445_v55 = vsub.f32 2.0, %v2429_v26  ;;  %v3247_v16 = vpop.f32.mrf.mxu1 }
 0x4b9   : > { %v11159_v13 = vadd.f32 %v10982_v49, %v3247_v16 }
 0x4ba   : > { %v2461_v56 = vmul.f32 %v8300_v23, %v2445_v55  ;;  %v2833_v23 = vmul.f32 1.442695, %v2813_v19 }
 0x4bc   : > { %v2393_v53 = vpop.xlane.xlu2 %2392  ;;  %v2477_v54 = vmul.f32 %v11001_v28, %v2461_v56  ;;  %2793 = vmax.xlane.f32.xlu1 %v11122_v1 }
 0x4bd   : > { %v2119_v58 = vpop.f32.mrf.mxu0  ;;  %8305 = vrcp.f32 %v2393_v53 }
 0x4be   : > { %2396 = vadd.xlane.f32.xlu0 %v11124_v12  ;;  %2153 = vst.msk [vmem:[#allocation2 + $0x20] sm:$0xff] %vm1754_vm0, %v2119_v58  ;;  %v2489_v21 = vpack.c.bf16 %v2477_v54, %v2476_v50  ;;  %v11151_v61 = vpop.xlane.xlu1 %3278  ;;  %v2340_v50 = vsub.f32 %v10878_v10, %v11040_v24  ;;  %v3294_v10 = vsub.f32 %v10935_v32, %v11068_v51 }
 0x4c0   : > { %v2982_v41 = vpop.permute.xlu0 %2981  ;;  %2541 = vmatmul.bf16.gmra.mxu2 %v2489_v21 }
 0x4c1   : > { %3006 = vmatpush.bf16.msra.mxu0 %v2982_v41  ;;  %v3250_v41 = vpop.f32.mrf.mxu1 }
 0x4c2   : > { %4596 = vrot.lane.b32.xlu2 %v13910_v40, %s9338_s26 }
 0x4c3   : > { %v8306_v0 = vpop.eup %8305 }
 0x4c4   : > { %v5082_v14 = vpop.permute.xlu2 %5081  ;;  %2863 = vadd.xlane.f32.xlu1 %v11133_v43  ;;  %v2431_v22 = vmul.f32 %v8306_v0, %v2393_v53 }
 0x4c5   : > { %v5123_v20 = vsel %vm1754_vm0, %v5082_v14, 0  ;;  %v2121_v28 = vpop.f32.mrf.mxu0  ;;  %v2370_v14 = vmul.f32 1.442695, %v2340_v50 }
 0x4c6   : > { %5149 = vmatpush.bf16.xpose.msra.mxu1 %v5123_v20  ;;  %2154 = vst.msk [vmem:[#allocation2 + $0x28] sm:$0xff] %vm1754_vm0, %v2121_v28  ;;  %v11162_v55 = vpop.xlane.xlu1 %2394  ;;  %v2447_v7 = vsub.f32 2.0, %v2431_v22 }
 0x4c8   : > { %v2463_v54 = vmul.f32 %v8306_v0, %v2447_v7  ;;  %v3296_v0 = vsub.f32 %v10958_v4, %v11098_v36 }
 0x4ca   : > { %v2479_v28 = vmul.f32 %v11017_v34, %v2463_v54  ;;  %v3312_v34 = vmul.f32 1.442695, %v3294_v10  ;;  %v3298_v54 = vsub.f32 %v10993_v18, %v11119_v48  ;;  %v3299_v18 = vsub.f32 %v11009_v39, %v11142_v60 }
 0x4cc   : > { %v3320_v36 = vmul.f32 1.442695, %v3298_v54 }
 0x4cd   : > { %v2124_v59 = vpop.f32.mrf.mxu0 }
 0x4ce   : > { %2155 = vst.msk [vmem:[#allocation2 + $0x30] sm:$0xff] %vm1754_vm0, %v2124_v59  ;;  %v11178_v59 = vadd.f32 %v10982_v49, %v3250_v41 }
 0x4d2   : > { %4111 = vrot.lane.b32.xlu0 %v13908_v27, %s9336_s29 }
 0x4d3   : > { %v11172_v53 = vpop.xlane.xlu1 %2400 }
 0x4d5   : > { %v2126_v35 = vpop.f32.mrf.mxu0 }
 0x4d6   : > { %2156 = vst.msk [vmem:[#allocation2 + $0x38] sm:$0xff] %vm1754_vm0, %v2126_v35 }
 0x4da   : > { %3460 = vrot.lane.b32.xlu0 %v13911_v15, %s9334_s23 }
 0x4dd   : > { %v2129_v46 = vpop.f32.mrf.mxu0  ;;  %5079 = vrot.lane.b32.xlu1 %v13910_v40, %s9339_s19 }
 0x4de   : > { %2157 = vst.msk [vmem:[#allocation2 + $0x40] sm:$0xff] %vm1754_vm0, %v2129_v46 }
 0x4e5   : > { %v2131_v52 = vpop.f32.mrf.mxu0  ;;  %4580 = vrot.lane.b32.xlu1 %v13912_v37, %s9338_s26 }
 0x4e6   : > { %2158 = vst.msk [vmem:[#allocation2 + $0x48] sm:$0xff] %vm1754_vm0, %v2131_v52 }
 0x4eb   : > { %v2391_v26 = vpop.xlane.xlu0 %2390  ;;  %3282 = vmax.xlane.f32.xlu2 %v11159_v13 }
 0x4ec   : > { %8307 = vrcp.f32 %v2391_v26  ;;  %v11183_v24 = vpop.xlane.xlu1 %3340 }
 0x4ed   : > { %8309 = vpow2.f32 %v2833_v23  ;;  %v2134_v45 = vpop.f32.mrf.mxu0  ;;  %5063 = vrot.lane.b32.xlu1 %v13912_v37, %s9339_s19 }
 0x4ee   : > { %2159 = vst.msk [vmem:[#allocation2 + $0x50] sm:$0xff] %vm1754_vm0, %v2134_v45  ;;  %8311 = vpow2.f32 %v2370_v14  ;;  %v3316_v45 = vmul.f32 1.442695, %v3296_v0  ;;  %v3322_v14 = vmul.f32 1.442695, %v3299_v18 }
 0x4ef   : > { %8313 = vpow2.f32 %v3312_v34 }
 0x4f0   : > { %8315 = vpow2.f32 %v3316_v45 }
 0x4f1   : > { %8317 = vpow2.f32 %v3320_v36 }
 0x4f2   : > { %v8308_v33 = vpop.eup %8307  ;;  %8319 = vpow2.f32 %v3322_v14 }
 0x4f3   : > { %v11167_v38 = vpop.eup %8309  ;;  %v2430_v56 = vmul.f32 %v8308_v33, %v2391_v26  ;;  %8321 = vrcp.f32 %v11162_v55 }
 0x4f4   : > { %2865 = vadd.xlane.f32.xlu2 %v11167_v38  ;;  %v11189_v52 = vpop.eup %8311 }
 0x4f5   : > { %v2446_v58 = vsub.f32 2.0, %v2430_v56  ;;  %v2136_v21 = vpop.f32.mrf.mxu0  ;;  %v11198_v26 = vpop.eup %8313 }
 0x4f6   : > { %2160 = vst.msk [vmem:[#allocation2 + $0x58] sm:$0xff] %vm1754_vm0, %v2136_v21  ;;  %v11216_v41 = vpop.eup %8315 }
 0x4f7   : > { %v2462_v40 = vmul.f32 %v8308_v33, %v2446_v58  ;;  %v2759_v33 = vpop.f32.mrf.mxu3 }
 0x4f8   : > { %v11205_v50 = vadd.f32 %v10982_v49, %v2759_v33 }
 0x4f9   : > { %v2478_v20 = vmul.f32 %v11054_v25, %v2462_v40  ;;  %v13913_v40 = vld [vmem:[#allocation58_spill] sm:$0xff] }
 0x4fb   : > { %v2490_v35 = vpack.c.bf16 %v2479_v28, %v2478_v20  ;;  %v11225_v28 = vpop.eup %8317 }
 0x4fc   : > { %3284 = vmax.xlane.f32.xlu2 %v11178_v59 }
 0x4fd   : > { %2546 = vmatmul.bf16.gmra.mxu2 %v2490_v35  ;;  %v2139_v46 = vpop.f32.mrf.mxu0  ;;  %v11185_v19 = vpop.xlane.xlu2 %2398 }
 0x4fe   : > { %2161 = vst.msk [vmem:[#allocation2 + $0x60] sm:$0xff] %vm1754_vm0, %v2139_v46  ;;  %v3629_v25 = vpop.permute.xlu0 %3628  ;;  %v11229_v46 = vpop.eup %8319 }
 0x4ff   : > { %7767 = vmatmul.msk.bf16.gmra.mxu3 %vm1754_vm0, %v3629_v25  ;;  %v8322_v60 = vpop.eup %8321 }
 0x504   : > { %2402 = vadd.xlane.f32.xlu0 %v11189_v52  ;;  %v2980_v16 = vpop.permute.xlu1 %2979 }
 0x505   : > { %v2141_v37 = vpop.f32.mrf.mxu0  ;;  %v11193_v32 = vpop.xlane.xlu2 %2404  ;;  %3007 = vmatpush.bf16.msra.mxu0 %v2980_v16  ;;  %v2432_v16 = vmul.f32 %v8322_v60, %v11162_v55 }
 0x506   : > { %2162 = vst.msk [vmem:[#allocation2 + $0x68] sm:$0xff] %vm1754_vm0, %v2141_v37  ;;  %v4599_v51 = vpop.permute.xlu0 %4598 }
 0x507   : > { %v4640_v23 = vsel %vm1754_vm0, %v4599_v51, 0  ;;  %v2448_v37 = vsub.f32 2.0, %v2432_v16 }
 0x508   : > { %4666 = vmatpush.bf16.xpose.msrb.mxu3 %v4640_v23 }
 0x50a   : > { %v2527_v22 = vpop.f32.mrf.mxu2 }
 0x50c   : > { %3344 = vadd.xlane.f32.xlu0 %v11198_v26 }
 0x50d   : > { %v2144_v7 = vpop.f32.mrf.mxu0  ;;  %v11202_v56 = vpop.xlane.xlu2 %3342 }
 0x50e   : > { %2163 = vst.msk [vmem:[#allocation2 + $0x70] sm:$0xff] %vm1754_vm0, %v2144_v7 }
 0x512   : > { %v11209_v4 = vpop.f32.mrf.mxu2 }
 0x514   : > { %2795 = vmax.xlane.f32.xlu0 %v11205_v50  ;;  %2583 = vrot.lane.b32.xlu2 %v2527_v22, %s9339_s19  ;;  %v2464_v22 = vmul.f32 %v8322_v60, %v2448_v37 }
 0x515   : > { %v2146_v58 = vpop.f32.mrf.mxu0  ;;  %v11214_v21 = vpop.xlane.xlu2 %3346 }
 0x516   : > { %2164 = vst.msk [vmem:[#allocation2 + $0x78] sm:$0xff] %vm1754_vm0, %v2146_v58  ;;  %v2480_v36 = vmul.f32 %v11030_v44, %v2464_v22  ;;  %v11260_v22 = vadd.f32 %v10982_v49, %v11146_v62 }
 0x517   : > { %3348 = vadd.xlane.f32.xlu1 %v11216_v41 }
 0x51a   : > { %v2532_v48 = vpop.f32.mrf.mxu2 }
 0x51c   : > { %4582 = vrot.lane.b32.xlu2 %v13913_v40, %s9338_s26 }
 0x51d   : > { %v11223_v20 = vpop.xlane.xlu2 %2861 }
 0x51f   : > { %3352 = vadd.xlane.f32.xlu1 %v11225_v28 }
 0x522   : > { %v2534_v35 = vpop.f32.mrf.mxu2 }
 0x524   : > { %2589 = vrot.lane.b32.xlu2 %v2534_v35, %s9339_s19 }
 0x525   : > { %v4597_v10 = vpop.permute.xlu2 %4596 }
 0x526   : > { %v4637_v39 = vsel %vm1754_vm0, %v4597_v10, 0 }
 0x527   : > { %3354 = vadd.xlane.f32.xlu1 %v11229_v46  ;;  %4667 = vmatpush.bf16.xpose.msrb.mxu3 %v4637_v39 }
 0x528   : > { %2977 = vrot.lane.b32.xlu0 %v13911_v15, %s9337_s30 }
 0x52f   : > { %v11243_v54 = vpop.xlane.xlu1 %2793 }
 0x531   : > { %v2397_v25 = vpop.xlane.xlu0 %2396 }
 0x532   : > { %8323 = vrcp.f32 %v2397_v25  ;;  %v11236_v34 = vpop.f32.mrf.mxu2 }
 0x533   : > { %8325 = vrcp.f32 %v11185_v19 }
 0x534   : > { %8327 = vrcp.f32 %v11172_v53 }
 0x537   : > { %v11252_v16 = vpop.xlane.xlu1 %2863 }
 0x538   : > { %v8324_v51 = vpop.eup %8323 }
 0x539   : > { %v2433_v23 = vmul.f32 %v8324_v51, %v2397_v25  ;;  %v8326_v33 = vpop.eup %8325 }
 0x53a   : > { %v11241_v0 = vpop.f32.mrf.mxu2  ;;  %v8328_v55 = vpop.eup %8327  ;;  %v2434_v18 = vmul.f32 %v8326_v33, %v11185_v19  ;;  %v3297_v19 = vsub.f32 %v10985_v29, %v11109_v47 }
 0x53b   : > { %v2449_v45 = vsub.f32 2.0, %v2433_v23  ;;  %v2435_v35 = vmul.f32 %v8328_v55, %v11172_v53 }
 0x53c   : > { %v2450_v60 = vsub.f32 2.0, %v2434_v18 }
 0x53d   : > { %v2465_v7 = vmul.f32 %v8324_v51, %v2449_v45  ;;  %v2451_v25 = vsub.f32 2.0, %v2435_v35  ;;  %v3318_v51 = vmul.f32 1.442695, %v3297_v19 }
 0x53e   : > { %v2466_v44 = vmul.f32 %v8326_v33, %v2450_v60 }
 0x53f   : > { %v2481_v58 = vmul.f32 %v11124_v12, %v2465_v7  ;;  %v2762_v12 = vpop.f32.mrf.mxu3  ;;  %v2467_v37 = vmul.f32 %v8328_v55, %v2451_v25  ;;  %8329 = vpow2.f32 %v3318_v51  ;;  %v2814_v55 = vsub.f32 %v10799_v2, %v10966_v6  ;;  %v3252_v25 = vpop.f32.mrf.mxu1 }
 0x540   : > { %2587 = vrot.lane.b32.xlu1 %v2532_v48, %s9339_s19  ;;  %v2482_v53 = vmul.f32 %v11070_v3, %v2466_v44 }
 0x541   : > { %v2491_v14 = vpack.c.bf16 %v2481_v58, %v2480_v36  ;;  %v2483_v23 = vmul.f32 %v11042_v17, %v2467_v37  ;;  %v11271_v36 = vadd.f32 %v10982_v49, %v2762_v12  ;;  %v2835_v18 = vmul.f32 1.442695, %v2814_v55 }
 0x542   : > { %v11298_v37 = vadd.f32 %v10982_v49, %v3252_v25 }
 0x543   : > { %2551 = vmatmul.bf16.gmra.mxu2 %v2491_v14  ;;  %v2542_v10 = vpop.f32.mrf.mxu2  ;;  %v2492_v7 = vpack.c.bf16 %v2483_v23, %v2482_v53  ;;  %8331 = vpow2.f32 %v2835_v18 }
 0x544   : > { %v4112_v39 = vpop.permute.xlu0 %4111  ;;  %2595 = vrot.lane.b32.xlu2 %v2542_v10, %s9339_s19  ;;  %8333 = vrcp.f32 %v11193_v32 }
 0x545   : > { %7775 = vmatmul.msk.bf16.gmra.mxu1 %vm1754_vm0, %v4112_v39  ;;  %v11264_v47 = vpop.eup %8329 }
 0x547   : > { %v2764_v29 = vpop.f32.mrf.mxu3 }
 0x548   : > { %v11280_v35 = vadd.f32 %v10982_v49, %v2764_v29 }
 0x549   : > { %v11294_v6 = vpop.eup %8331 }
 0x54a   : > { %v8334_v44 = vpop.eup %8333 }
 0x54b   : > { %v2437_v53 = vmul.f32 %v8334_v44, %v11193_v32 }
 0x54c   : > { %v3461_v48 = vpop.permute.xlu0 %3460 }
 0x54d   : > { %3491 = vmatpush.bf16.msra.mxu2 %v3461_v48  ;;  %v11300_v48 = vpop.f32.mrf.mxu2  ;;  %v2453_v51 = vsub.f32 2.0, %v2437_v53 }
 0x54f   : > { %v5080_v45 = vpop.permute.xlu1 %5079  ;;  %v2767_v17 = vpop.f32.mrf.mxu3 }
 0x550   : > { %v5120_v33 = vsel %vm1754_vm0, %v5080_v45, 0  ;;  %v11283_v39 = vadd.f32 %v10982_v49, %v2767_v17 }
 0x551   : > { %5150 = vmatpush.bf16.xpose.msra.mxu1 %v5120_v33 }
 0x552   : > { %3280 = vmax.xlane.f32.xlu0 %v11260_v22 }
 0x553   : > { %2556 = vmatmul.bf16.gmra.mxu2 %v2492_v7 }
 0x557   : > { %v4581_v3 = vpop.permute.xlu1 %4580  ;;  %v2769_v10 = vpop.f32.mrf.mxu3 }
 0x558   : > { %7776 = vmatmul.msk.bf16.vlgmr.msrb.gmra.mxu3 %vm1754_vm0, %v4581_v3  ;;  %v11287_v60 = vadd.f32 %v10982_v49, %v2769_v10  ;;  %v2469_v49 = vmul.f32 %v8334_v44, %v2453_v51 }
 0x55a   : > { %3350 = vadd.xlane.f32.xlu0 %v11264_v47 }
 0x55e   : > { %v11268_v62 = vpop.xlane.xlu2 %3282 }
 0x55f   : > { %v5064_v58 = vpop.permute.xlu1 %5063 }
 0x560   : > { %7784 = vmatmul.msk.bf16.vlgmr.msra.gmra.mxu1 %vm1754_vm0, %v5064_v58  ;;  %v2485_v58 = vmul.f32 %v11080_v42, %v2469_v49 }
 0x562   : > { %2797 = vmax.xlane.f32.xlu0 %v11271_v36 }
 0x567   : > { %v11277_v14 = vpop.xlane.xlu2 %2865 }
 0x56a   : > { %2799 = vmax.xlane.f32.xlu0 %v11280_v35  ;;  %2801 = vmax.xlane.f32.xlu1 %v11283_v39 }
 0x56d   : > { %2803 = vmax.xlane.f32.xlu2 %v11287_v60 }
 0x56f   : > { %v11291_v2 = vpop.xlane.xlu2 %3284 }
 0x572   : > { %2867 = vadd.xlane.f32.xlu0 %v11294_v6 }
 0x577   : > { %v2584_v12 = vpop.permute.xlu2 %2583  ;;  %v2403_v19 = vpop.xlane.xlu0 %2402 }
 0x578   : > { %2632 = vst.msk [vmem:[#allocation2] sm:$0xff] %vm2631_vm1, %v2584_v12  ;;  %8335 = vrcp.f32 %v2403_v19 }
 0x579   : > { %8337 = vrcp.f32 %v11202_v56 }
 0x57a   : > { %3286 = vmax.xlane.f32.xlu0 %v11298_v37  ;;  %8339 = vrcp.f32 %v11183_v24 }
 0x57b   : > { %8341 = vrcp.f32 %v11083_v63 }
 0x57c   : > { %8343 = vrcp.f32 %v11076_v5 }
 0x57e   : > { %v8336_v23 = vpop.eup %8335 }
 0x57f   : > { %v2436_v45 = vmul.f32 %v8336_v23, %v2403_v19  ;;  %v4583_v7 = vpop.permute.xlu2 %4582  ;;  %v8338_v3 = vpop.eup %8337 }
 0x580   : > { %v2547_v33 = vpop.f32.mrf.mxu2  ;;  %7777 = vmatmul.msk.bf16.gmra.mxu3 %vm1754_vm0, %v4583_v7  ;;  %v8340_v55 = vpop.eup %8339  ;;  %v3389_v18 = vmul.f32 %v8338_v3, %v11202_v56 }
 0x581   : > { %v2452_v29 = vsub.f32 2.0, %v2436_v45  ;;  %v8342_v44 = vpop.eup %8341  ;;  %v3345_v12 = vpop.xlane.xlu0 %3344  ;;  %v3388_v51 = vmul.f32 %v8340_v55, %v11183_v24 }
 0x582   : > { %v8344_v53 = vpop.eup %8343  ;;  %8345 = vrcp.f32 %v3345_v12 }
 0x583   : > { %v2468_v32 = vmul.f32 %v8336_v23, %v2452_v29  ;;  %2593 = vrot.lane.b32.xlu1 %v11241_v0, %s9339_s19  ;;  %v3405_v0 = vsub.f32 2.0, %v3389_v18  ;;  %v2905_v42 = vmul.f32 %v8344_v53, %v11076_v5  ;;  %v3404_v23 = vsub.f32 2.0, %v3388_v51  ;;  %v13915_v18 = vld [vmem:[#allocation73_spill] sm:$0xff] }
 0x584   : > { %8347 = vrcp.f32 %v11214_v21 }
 0x585   : > { %v2484_v17 = vmul.f32 %v11189_v52, %v2468_v32  ;;  %v2906_v52 = vmul.f32 %v8342_v44, %v11083_v63  ;;  %v3421_v56 = vmul.f32 %v8338_v3, %v3405_v0  ;;  %v2921_v7 = vsub.f32 2.0, %v2905_v42 }
 0x586   : > { %v3420_v24 = vmul.f32 %v8340_v55, %v3404_v23  ;;  %8349 = vrcp.f32 %v11252_v16 }
 0x587   : > { %v2590_v10 = vpop.permute.xlu2 %2589  ;;  %v2493_v25 = vpack.c.bf16 %v2485_v58, %v2484_v17  ;;  %v2922_v45 = vsub.f32 2.0, %v2906_v52  ;;  %v3437_v29 = vmul.f32 %v11093_v8, %v3421_v56  ;;  %v2937_v32 = vmul.f32 %v8344_v53, %v2921_v7  ;;  %v13914_v58 = vld [vmem:[#allocation90_spill] sm:$0xff] }
 0x588   : > { %2635 = vst.msk [vmem:[#allocation2 + $0x18] sm:$0xff] %vm2631_vm1, %v2590_v10  ;;  %v2549_v19 = vpop.f32.mrf.mxu2  ;;  %v8346_v5 = vpop.eup %8345  ;;  %8351 = vrcp.f32 %v11223_v20 }
 0x589   : > { %2601 = vrot.lane.b32.xlu2 %v2549_v19, %s9339_s19  ;;  %2561 = vmatmul.bf16.gmra.mxu2 %v2493_v25  ;;  %v11324_v49 = vpop.xlane.xlu0 %2795  ;;  %v2938_v63 = vmul.f32 %v8342_v44, %v2922_v45  ;;  %v3390_v17 = vmul.f32 %v8346_v5, %v3345_v12  ;;  %v2953_v10 = vmul.f32 %v13915_v18, %v2937_v32 }
 0x58a   : > { %v3349_v8 = vpop.xlane.xlu1 %3348 }
 0x58b   : > { %2599 = vrot.lane.b32.xlu1 %v2547_v33, %s9339_s19  ;;  %v3436_v33 = vmul.f32 %v11057_v11, %v3420_v24  ;;  %v2954_v55 = vmul.f32 %v13914_v58, %v2938_v63  ;;  %v3406_v11 = vsub.f32 2.0, %v3390_v17  ;;  %v11353_v58 = vld [vmem:[%s9760_s1] ss:$0 sm:$0xff] }
 0x58d   : > { %v3452_v3 = vpack.c.bf16 %v3437_v29, %v3436_v33  ;;  %v2969_v51 = vpack.c.bf16 %v2954_v55, %v2953_v10  ;;  %v3422_v12 = vmul.f32 %v8346_v5, %v3406_v11  ;;  %v13917_v5 = vld [vmem:[#allocation77_spill] sm:$0xff] }
 0x58e   : > { %2585 = vrot.lane.b32.xlu0 %v11209_v4, %s9339_s19  ;;  %v8348_v4 = vpop.eup %8347 }
 0x58f   : > { %v8350_v25 = vpop.eup %8349  ;;  %v3391_v19 = vmul.f32 %v8348_v4, %v11214_v21  ;;  %v3438_v7 = vmul.f32 %v11198_v26, %v3422_v12 }
 0x590   : > { %v8352_v53 = vpop.eup %8351  ;;  %v2908_v0 = vmul.f32 %v8350_v25, %v11252_v16 }
 0x591   : > { %v3407_v52 = vsub.f32 2.0, %v3391_v19 }
 0x592   : > { %v2924_v23 = vsub.f32 2.0, %v2908_v0  ;;  %v3353_v45 = vpop.xlane.xlu1 %3352 }
 0x593   : > { %v3423_v21 = vmul.f32 %v8348_v4, %v3407_v52 }
 0x594   : > { %v2940_v24 = vmul.f32 %v8350_v25, %v2924_v23 }
 0x595   : > { %v3439_v16 = vmul.f32 %v11101_v57, %v3423_v21 }
 0x596   : > { %5065 = vrot.lane.b32.xlu0 %v13913_v40, %s9339_s19  ;;  %v2907_v40 = vmul.f32 %v8352_v53, %v11223_v20  ;;  %v2956_v32 = vmul.f32 %v11133_v43, %v2940_v24 }
 0x597   : > { %v3453_v20 = vpack.c.bf16 %v3439_v16, %v3438_v7 }
 0x598   : > { %v2923_v56 = vsub.f32 2.0, %v2907_v40 }
 0x599   : > { %3492 = vmatmul.bf16.vlgmr.msra.gmra.mxu2 %v3452_v3 }
 0x59a   : > { %v2978_v44 = vpop.permute.xlu0 %2977  ;;  %v2939_v29 = vmul.f32 %v8352_v53, %v2923_v56  ;;  %v3355_v3 = vpop.xlane.xlu1 %3354 }
 0x59b   : > { %3008 = vmatpush.bf16.msra.mxu0 %v2978_v44 }
 0x59c   : > { %v2955_v33 = vmul.f32 %v11104_v31, %v2939_v29 }
 0x59e   : > { %2591 = vrot.lane.b32.xlu0 %v11236_v34, %s9339_s19  ;;  %3009 = vmatmul.bf16.vlgmr.msra.gmra.mxu0 %v2969_v51  ;;  %v2596_v42 = vpop.permute.xlu2 %2595  ;;  %v13916_v34 = vld [vmem:[#allocation93_spill] sm:$0xff]  ;;  %v2970_v26 = vpack.c.bf16 %v2956_v32, %v2955_v33  ;;  %v13920_v32 = vld [vmem:[#allocation92_spill] sm:$0xff] }
 0x59f   : > { %2638 = vst.msk [vmem:[#allocation2 + $0x30] sm:$0xff] %vm2631_vm1, %v2596_v42  ;;  %v2816_v63 = vsub.f32 %v13917_v5, %v13916_v34  ;;  %v13918_v34 = vld [vmem:[#allocation60_spill] sm:$0xff] }
 0x5a1   : > { %v2839_v4 = vmul.f32 1.442695, %v2816_v63 }
 0x5a3   : > { %8353 = vpow2.f32 %v2839_v4 }
 0x5a4   : > { %8355 = vrcp.f32 %v3349_v8 }
 0x5a6   : > { %2597 = vrot.lane.b32.xlu0 %v11300_v48, %s9339_s19  ;;  %v3255_v48 = vpop.f32.mrf.mxu1 }
 0x5a7   : > { %v11356_v43 = vadd.f32 %v11353_v58, %v3255_v48 }
 0x5a9   : > { %3497 = vmatmul.bf16.gmra.mxu2 %v3453_v20  ;;  %v11349_v17 = vpop.eup %8353 }
 0x5aa   : > { %v8356_v25 = vpop.eup %8355 }
 0x5ab   : > { %v3392_v53 = vmul.f32 %v8356_v25, %v3349_v8 }
 0x5ad   : > { %v3408_v11 = vsub.f32 2.0, %v3392_v53 }
 0x5ae   : > { %3014 = vmatmul.bf16.gmra.mxu0 %v2970_v26  ;;  %v3257_v31 = vpop.f32.mrf.mxu1 }
 0x5af   : > { %v11360_v55 = vadd.f32 %v11353_v58, %v3257_v31  ;;  %v3424_v12 = vmul.f32 %v8356_v25, %v3408_v11  ;;  %v13921_v25 = vld [vmem:[#allocation67_spill] sm:$0xff] }
 0x5b1   : > { %v3440_v56 = vmul.f32 %v11216_v41, %v3424_v12  ;;  %v13919_v41 = vld [vmem:[#allocation94_spill] sm:$0xff] }
 0x5b2   : > { %v2588_v57 = vpop.permute.xlu1 %2587 }
 0x5b3   : > { %2634 = vst.msk [vmem:[#allocation2 + $0x10] sm:$0xff] %vm2631_vm1, %v2588_v57 }
 0x5b5   : > { %2871 = vadd.xlane.f32.xlu1 %v11349_v17 }
 0x5bd   : > { %3288 = vmax.xlane.f32.xlu1 %v11356_v43 }
 0x5c5   : > { %v11362_v18 = vpop.xlane.xlu0 %3280  ;;  %3290 = vmax.xlane.f32.xlu1 %v11360_v55 }
 0x5c6   : > { %v2552_v10 = vpop.f32.mrf.mxu2 }
 0x5c7   : > { %2603 = vrot.lane.b32.xlu0 %v2552_v10, %s9339_s19 }
 0x5cd   : > { %v3351_v19 = vpop.xlane.xlu0 %3350 }
 0x5ce   : > { %8357 = vrcp.f32 %v3351_v19  ;;  %v2554_v44 = vpop.f32.mrf.mxu2 }
 0x5cf   : > { %8359 = vrcp.f32 %v3355_v3 }
 0x5d0   : > { %8361 = vrcp.f32 %v3353_v45 }
 0x5d1   : > { %8363 = vrcp.f32 %v11277_v14 }
 0x5d4   : > { %v8358_v51 = vpop.eup %8357 }
 0x5d5   : > { %v3393_v0 = vmul.f32 %v8358_v51, %v3351_v19  ;;  %v11366_v52 = vpop.xlane.xlu0 %2797  ;;  %v8360_v21 = vpop.eup %8359  ;;  %v3300_v19 = vsub.f32 %v13921_v25, %v11114_v30 }
 0x5d6   : > { %v2557_v40 = vpop.f32.mrf.mxu2  ;;  %v8362_v24 = vpop.eup %8361  ;;  %v3395_v8 = vmul.f32 %v8360_v21, %v3355_v3 }
 0x5d7   : > { %v3409_v42 = vsub.f32 2.0, %v3393_v0  ;;  %2607 = vrot.lane.b32.xlu2 %v2557_v40, %s9339_s19  ;;  %v3394_v20 = vmul.f32 %v8362_v24, %v3353_v45  ;;  %v8364_v4 = vpop.eup %8363  ;;  %v3324_v0 = vmul.f32 1.442695, %v3300_v19 }
 0x5d8   : > { %v3411_v5 = vsub.f32 2.0, %v3395_v8  ;;  %v2909_v45 = vmul.f32 %v8364_v4, %v11277_v14 }
 0x5d9   : > { %v3425_v23 = vmul.f32 %v8358_v51, %v3409_v42  ;;  %v3410_v33 = vsub.f32 2.0, %v3394_v20 }
 0x5da   : > { %v3427_v3 = vmul.f32 %v8360_v21, %v3411_v5  ;;  %v2925_v53 = vsub.f32 2.0, %v2909_v45 }
 0x5db   : > { %v3441_v7 = vmul.f32 %v11264_v47, %v3425_v23  ;;  %v2815_v47 = vsub.f32 %v13920_v32, %v13919_v41  ;;  %v3426_v48 = vmul.f32 %v8362_v24, %v3410_v33  ;;  %v13922_v32 = vld [vmem:[#allocation70_spill] sm:$0xff] }
 0x5dc   : > { %v3443_v10 = vmul.f32 %v11229_v46, %v3427_v3  ;;  %v2941_v42 = vmul.f32 %v8364_v4, %v2925_v53  ;;  %v2817_v4 = vsub.f32 %v11122_v1, %v11243_v54  ;;  %v2772_v3 = vpop.f32.mrf.mxu3  ;;  %v2818_v1 = vsub.f32 %v11205_v50, %v11324_v49 }
 0x5dd   : > { %v11371_v16 = vpop.xlane.xlu0 %2799  ;;  %v3454_v29 = vpack.c.bf16 %v3441_v7, %v3440_v56  ;;  %v2837_v57 = vmul.f32 1.442695, %v2815_v47  ;;  %v11389_v14 = vpop.xlane.xlu1 %2801  ;;  %v3301_v47 = vsub.f32 %v13922_v32, %v11151_v61  ;;  %v3302_v61 = vsub.f32 %v11260_v22, %v11362_v18 }
 0x5de   : > { %2605 = vrot.lane.b32.xlu1 %v2554_v44, %s9339_s19  ;;  %v3442_v44 = vmul.f32 %v11225_v28, %v3426_v48  ;;  %v2957_v23 = vmul.f32 %v11167_v38, %v2941_v42  ;;  %v2559_v38 = vpop.f32.mrf.mxu2  ;;  %v11416_v48 = vadd.f32 %v11353_v58, %v2772_v3 }
 0x5df   : > { %5067 = vrot.lane.b32.xlu2 %v13918_v34, %s9339_s19  ;;  %3502 = vmatmul.bf16.gmra.mxu2 %v3454_v29  ;;  %v3326_v33 = vmul.f32 1.442695, %v3301_v47  ;;  %v3328_v19 = vmul.f32 1.442695, %v3302_v61 }
 0x5e0   : > { %v11377_v63 = vpop.xlane.xlu2 %2803  ;;  %v3455_v51 = vpack.c.bf16 %v3443_v10, %v3442_v44  ;;  %v2843_v44 = vmul.f32 1.442695, %v2818_v1 }
 0x5e4   : > { %v2774_v25 = vpop.f32.mrf.mxu3 }
 0x5e5   : > { %v2868_v26 = vpop.xlane.xlu0 %2867  ;;  %v11431_v22 = vadd.f32 %v11353_v58, %v2774_v25 }
 0x5e6   : > { %8365 = vrcp.f32 %v2868_v26  ;;  %4584 = vrot.lane.b32.xlu1 %v13918_v34, %s9338_s26 }
 0x5e7   : > { %8367 = vpow2.f32 %v2837_v57  ;;  %v2841_v57 = vmul.f32 1.442695, %v2817_v4 }
 0x5e8   : > { %v2602_v31 = vpop.permute.xlu2 %2601  ;;  %8369 = vpow2.f32 %v3324_v0 }
 0x5e9   : > { %2641 = vst.msk [vmem:[#allocation2 + $0x48] sm:$0xff] %vm2631_vm1, %v2602_v31  ;;  %8371 = vpow2.f32 %v3326_v33  ;;  %v2819_v33 = vsub.f32 %v11271_v36, %v11366_v52  ;;  %v3304_v52 = vsub.f32 %v11178_v59, %v11291_v2  ;;  %v2821_v59 = vsub.f32 %v11283_v39, %v11389_v14 }
 0x5ea   : > { %8373 = vpow2.f32 %v2841_v57  ;;  %v3303_v2 = vsub.f32 %v11159_v13, %v11268_v62 }
 0x5eb   : > { %8375 = vpow2.f32 %v3328_v19  ;;  %v3332_v25 = vmul.f32 1.442695, %v3304_v52 }
 0x5ec   : > { %v8366_v11 = vpop.eup %8365  ;;  %8377 = vpow2.f32 %v2843_v44 }
 0x5ed   : > { %v2910_v40 = vmul.f32 %v8366_v11, %v2868_v26  ;;  %v11391_v12 = vpop.eup %8367  ;;  %v11398_v24 = vpop.xlane.xlu0 %3286 }
 0x5ee   : > { %v11396_v7 = vpop.eup %8369 }
 0x5ef   : > { %3507 = vmatmul.bf16.gmra.mxu2 %v3455_v51  ;;  %v2926_v46 = vsub.f32 2.0, %v2910_v40  ;;  %v11418_v45 = vpop.eup %8371  ;;  %v4186_v51 = vpop.f32.mrf.mxu1 }
 0x5f0   : > { %v11428_v53 = vpop.eup %8373  ;;  %v11449_v42 = vadd.f32 %v11353_v58, %v4186_v51 }
 0x5f1   : > { %2869 = vadd.xlane.f32.xlu0 %v11391_v12  ;;  %v2942_v30 = vmul.f32 %v8366_v11, %v2926_v46  ;;  %v11437_v49 = vpop.eup %8375  ;;  %v3703_v11 = vpop.f32.mrf.mxu3  ;;  %v2820_v46 = vsub.f32 %v11280_v35, %v11371_v16 }
 0x5f2   : > { %v11439_v18 = vpop.eup %8377  ;;  %v11446_v40 = vadd.f32 %v11353_v58, %v3703_v11  ;;  %v3305_v11 = vsub.f32 %v11298_v37, %v11398_v24  ;;  %v13924_v37 = vld [vmem:[#allocation71_spill] sm:$0xff]  ;;  %v2849_v24 = vmul.f32 1.442695, %v2821_v59 }
 0x5f3   : > { %v2958_v28 = vmul.f32 %v11294_v6, %v2942_v30  ;;  %v13923_v30 = vld [vmem:[#allocation62_spill] sm:$0xff] }
 0x5f4   : > { %v3334_v51 = vmul.f32 1.442695, %v3305_v11 }
 0x5f5   : > { %v2971_v21 = vpack.c.bf16 %v2958_v28, %v2957_v23  ;;  %v2594_v56 = vpop.permute.xlu1 %2593 }
 0x5f6   : > { %2637 = vst.msk [vmem:[#allocation2 + $0x28] sm:$0xff] %vm2631_vm1, %v2594_v56  ;;  %v2847_v56 = vmul.f32 1.442695, %v2820_v46 }
 0x5f7   : > { %3019 = vmatmul.bf16.gmra.mxu0 %v2971_v21  ;;  %v4188_v28 = vpop.f32.mrf.mxu1 }
 0x5f8   : > { %8379 = vpow2.f32 %v2847_v56 }
 0x5f9   : > { %3356 = vadd.xlane.f32.xlu0 %v11396_v7  ;;  %v3705_v23 = vpop.f32.mrf.mxu3 }
 0x5fd   : > { %v2600_v8 = vpop.permute.xlu1 %2599 }
 0x5fe   : > { %2640 = vst.msk [vmem:[#allocation2 + $0x40] sm:$0xff] %vm2631_vm1, %v2600_v8  ;;  %v11459_v8 = vadd.f32 %v11353_v58, %v3705_v23  ;;  %v11467_v16 = vpop.eup %8379  ;;  %v3330_v23 = vmul.f32 1.442695, %v3303_v2 }
 0x600   : > { %v2586_v29 = vpop.permute.xlu0 %2585 }
 0x601   : > { %2633 = vst.msk [vmem:[#allocation2 + $0x8] sm:$0xff] %vm2631_vm1, %v2586_v29  ;;  %v11462_v29 = vadd.f32 %v11353_v58, %v4188_v28  ;;  %v2822_v28 = vsub.f32 %v11287_v60, %v11377_v63  ;;  %v11517_v56 = vpop.f32.mrf.mxu3 }
 0x608   : > { %v5066_v20 = vpop.permute.xlu0 %5065 }
 0x609   : > { %7785 = vmatmul.msk.bf16.gmra.mxu1 %vm1754_vm0, %v5066_v20 }
 0x60c   : > { %v2562_v6 = vpop.f32.mrf.mxu2 }
 0x60d   : > { %2609 = vrot.lane.b32.xlu0 %v2559_v38, %s9339_s19  ;;  %2611 = vrot.lane.b32.xlu1 %v2562_v6, %s9339_s19  ;;  %v4191_v38 = vpop.f32.mrf.mxu1 }
 0x60e   : > { %v11471_v6 = vadd.f32 %v11353_v58, %v4191_v38 }
 0x610   : > { %v2592_v34 = vpop.permute.xlu0 %2591 }
 0x611   : > { %2636 = vst.msk [vmem:[#allocation2 + $0x20] sm:$0xff] %vm2631_vm1, %v2592_v34 }
 0x614   : > { %v2564_v5 = vpop.f32.mrf.mxu2 }
 0x615   : > { %2613 = vrot.lane.b32.xlu2 %v2564_v5, %s9339_s19 }
 0x618   : > { %v2598_v41 = vpop.permute.xlu0 %2597 }
 0x619   : > { %2639 = vst.msk [vmem:[#allocation2 + $0x38] sm:$0xff] %vm2631_vm1, %v2598_v41  ;;  %v4193_v41 = vpop.f32.mrf.mxu1 }
 0x61a   : > { %v11479_v4 = vadd.f32 %v11353_v58, %v4193_v41 }
 0x621   : > { %v4196_v14 = vpop.f32.mrf.mxu1 }
 0x622   : > { %v11520_v60 = vadd.f32 %v11353_v58, %v4196_v14 }
 0x628   : > { %v2872_v31 = vpop.xlane.xlu1 %2871 }
 0x629   : > { %8381 = vrcp.f32 %v2872_v31  ;;  %v4198_v63 = vpop.f32.mrf.mxu1 }
 0x62f   : > { %v8382_v20 = vpop.eup %8381 }
 0x630   : > { %v11435_v50 = vpop.xlane.xlu1 %3288  ;;  %v2912_v5 = vmul.f32 %v8382_v20, %v2872_v31  ;;  %v2845_v31 = vmul.f32 1.442695, %v2819_v33 }
 0x631   : > { %v2608_v26 = vpop.permute.xlu2 %2607  ;;  %v3306_v38 = vsub.f32 %v11356_v43, %v11435_v50 }
 0x632   : > { %2644 = vst.msk [vmem:[#allocation2 + $0x60] sm:$0xff] %vm2631_vm1, %v2608_v26  ;;  %v2928_v32 = vsub.f32 2.0, %v2912_v5 }
 0x633   : > { %v3336_v41 = vmul.f32 1.442695, %v3306_v38 }
 0x634   : > { %v2944_v26 = vmul.f32 %v8382_v20, %v2928_v32 }
 0x636   : > { %v2960_v36 = vmul.f32 %v11349_v17, %v2944_v26 }
 0x637   : > { %3358 = vadd.xlane.f32.xlu0 %v11418_v45  ;;  %2805 = vmax.xlane.f32.xlu1 %v11416_v48 }
 0x638   : > { %v11443_v0 = vpop.xlane.xlu1 %3290 }
 0x639   : > { %v5068_v54 = vpop.permute.xlu2 %5067  ;;  %v2604_v10 = vpop.permute.xlu0 %2603  ;;  %v3307_v43 = vsub.f32 %v11360_v55, %v11443_v0 }
 0x63a   : > { %2642 = vst.msk [vmem:[#allocation2 + $0x50] sm:$0xff] %vm2631_vm1, %v2604_v10  ;;  %7786 = vmatmul.msk.bf16.gmra.mxu1 %vm1754_vm0, %v5068_v54 }
 0x63e   : > { %2873 = vadd.xlane.f32.xlu2 %v11428_v53 }
 0x63f   : > { %2807 = vmax.xlane.f32.xlu0 %v11431_v22 }
 0x646   : > { %3360 = vadd.xlane.f32.xlu2 %v11437_v49 }
 0x647   : > { %2875 = vadd.xlane.f32.xlu0 %v11439_v18 }
 0x64e   : > { %3743 = vmax.xlane.f32.xlu2 %v11446_v40 }
 0x64f   : > { %4226 = vmax.xlane.f32.xlu0 %v11449_v42 }
 0x650   : > { %5069 = vrot.lane.b32.xlu1 %v13923_v30, %s9339_s19  ;;  %v2606_v21 = vpop.permute.xlu1 %2605 }
 0x651   : > { %2643 = vst.msk [vmem:[#allocation2 + $0x58] sm:$0xff] %vm2631_vm1, %v2606_v21  ;;  %v2851_v21 = vmul.f32 1.442695, %v2822_v28 }
 0x656   : > { %3745 = vmax.xlane.f32.xlu2 %v11459_v8 }
 0x657   : > { %4228 = vmax.xlane.f32.xlu0 %v11462_v29 }
 0x658   : > { %v4585_v35 = vpop.permute.xlu1 %4584 }
 0x659   : > { %7778 = vmatmul.msk.bf16.gmra.mxu3 %vm1754_vm0, %v4585_v35  ;;  %v11524_v35 = vadd.f32 %v11353_v58, %v4198_v63 }
 0x65e   : > { %2879 = vadd.xlane.f32.xlu2 %v11467_v16 }
 0x664   : > { %v2870_v34 = vpop.xlane.xlu0 %2869 }
 0x665   : > { %8383 = vrcp.f32 %v2870_v34 }
 0x666   : > { %4230 = vmax.xlane.f32.xlu2 %v11471_v6  ;;  %8385 = vpow2.f32 %v2845_v31  ;;  %v3338_v31 = vmul.f32 1.442695, %v3307_v43 }
 0x667   : > { %8387 = vpow2.f32 %v3332_v25 }
 0x668   : > { %8389 = vpow2.f32 %v3334_v51 }
 0x669   : > { %8391 = vpow2.f32 %v2849_v24 }
 0x66a   : > { %8393 = vpow2.f32 %v3330_v23  ;;  %v13925_v23 = vld [vmem:[#allocation76_spill] sm:$0xff] }
 0x66b   : > { %v8384_v47 = vpop.eup %8383  ;;  %4586 = vrot.lane.b32.xlu0 %v13923_v30, %s9338_s26  ;;  %8395 = vpow2.f32 %v2851_v21 }
 0x66c   : > { %v2911_v3 = vmul.f32 %v8384_v47, %v2870_v34  ;;  %v3357_v19 = vpop.xlane.xlu0 %3356  ;;  %v11487_v44 = vpop.eup %8385 }
 0x66d   : > { %v11493_v17 = vpop.eup %8387  ;;  %8397 = vrcp.f32 %v3357_v19  ;;  %v3710_v34 = vpop.f32.mrf.mxu3 }
 0x66e   : > { %v2927_v57 = vsub.f32 2.0, %v2911_v3  ;;  %4232 = vmax.xlane.f32.xlu2 %v11479_v4  ;;  %v11503_v30 = vpop.eup %8389 }
 0x66f   : > { %v2614_v61 = vpop.permute.xlu2 %2613  ;;  %v11508_v39 = vpop.eup %8391 }
 0x670   : > { %v2943_v1 = vmul.f32 %v8384_v47, %v2927_v57  ;;  %2647 = vst.msk [vmem:[#allocation2 + $0x78] sm:$0xff] %vm2631_vm1, %v2614_v61  ;;  %v11511_v13 = vpop.eup %8393  ;;  %v11532_v47 = vadd.f32 %v11353_v58, %v3710_v34 }
 0x671   : > { %v11514_v62 = vpop.eup %8395 }
 0x672   : > { %v2959_v54 = vmul.f32 %v11391_v12, %v2943_v1 }
 0x673   : > { %v8398_v20 = vpop.eup %8397 }
 0x674   : > { %v2972_v10 = vpack.c.bf16 %v2960_v36, %v2959_v54  ;;  %v3396_v32 = vmul.f32 %v8398_v20, %v3357_v19 }
 0x676   : > { %3024 = vmatmul.bf16.gmra.mxu0 %v2972_v10  ;;  %v3412_v50 = vsub.f32 2.0, %v3396_v32  ;;  %v13926_v32 = vld [vmem:[#allocation65_spill] sm:$0xff] }
 0x678   : > { %v3428_v61 = vmul.f32 %v8398_v20, %v3412_v50  ;;  %v11570_v50 = vadd.f32 %v11353_v58, %v11517_v56  ;;  %v13927_v56 = vld [vmem:[#allocation66_spill] sm:$0xff] }
 0x67a   : > { %2877 = vadd.xlane.f32.xlu1 %v11487_v44  ;;  %v3444_v52 = vmul.f32 %v11396_v7, %v3428_v61 }
 0x67f   : > { %v2612_v12 = vpop.permute.xlu1 %2611  ;;  %v2610_v46 = vpop.permute.xlu0 %2609 }
 0x680   : > { %2646 = vst.msk [vmem:[#allocation2 + $0x70] sm:$0xff] %vm2631_vm1, %v2612_v12 }
 0x681   : > { %2645 = vst.msk [vmem:[#allocation2 + $0x68] sm:$0xff] %vm2631_vm1, %v2610_v46 }
 0x682   : > { %3364 = vadd.xlane.f32.xlu1 %v11493_v17 }
 0x686   : > { %4588 = vrot.lane.b32.xlu2 %v13924_v37, %s9338_s26 }
 0x68a   : > { %3366 = vadd.xlane.f32.xlu1 %v11503_v30 }
 0x692   : > { %2881 = vadd.xlane.f32.xlu1 %v11508_v39 }
 0x695   : > { %3362 = vadd.xlane.f32.xlu0 %v11511_v13 }
 0x69a   : > { %2883 = vadd.xlane.f32.xlu1 %v11514_v62 }
 0x6a2   : > { %4234 = vmax.xlane.f32.xlu1 %v11520_v60 }
 0x6a9   : > { %5071 = vrot.lane.b32.xlu0 %v13924_v37, %s9339_s19 }
 0x6aa   : > { %4236 = vmax.xlane.f32.xlu1 %v11524_v35  ;;  %v3359_v5 = vpop.xlane.xlu0 %3358  ;;  %v2806_v25 = vpop.xlane.xlu1 %2805 }
 0x6ab   : > { %8399 = vrcp.f32 %v3359_v5  ;;  %v2823_v46 = vsub.f32 %v11416_v48, %v2806_v25 }
 0x6ac   : > { %8401 = vpow2.f32 %v3336_v41 }
 0x6ad   : > { %v2853_v28 = vmul.f32 1.442695, %v2823_v46  ;;  %v4201_v46 = vpop.f32.mrf.mxu1 }
 0x6af   : > { %3749 = vmax.xlane.f32.xlu2 %v11532_v47 }
 0x6b1   : > { %v8400_v33 = vpop.eup %8399  ;;  %v2874_v3 = vpop.xlane.xlu2 %2873 }
 0x6b2   : > { %v3397_v26 = vmul.f32 %v8400_v33, %v3359_v5  ;;  %v2808_v57 = vpop.xlane.xlu0 %2807  ;;  %8403 = vrcp.f32 %v2874_v3  ;;  %v11537_v54 = vpop.eup %8401 }
 0x6b3   : > { %8405 = vpow2.f32 %v3338_v31  ;;  %v2824_v31 = vsub.f32 %v11431_v22, %v2808_v57 }
 0x6b4   : > { %v3413_v1 = vsub.f32 2.0, %v3397_v26 }
 0x6b5   : > { %v2855_v61 = vmul.f32 1.442695, %v2824_v31 }
 0x6b6   : > { %v3429_v36 = vmul.f32 %v8400_v33, %v3413_v1 }
 0x6b7   : > { %3368 = vadd.xlane.f32.xlu2 %v11537_v54 }
 0x6b8   : > { %v3445_v10 = vmul.f32 %v11418_v45, %v3429_v36  ;;  %v8404_v55 = vpop.eup %8403  ;;  %v3713_v45 = vpop.f32.mrf.mxu3 }
 0x6b9   : > { %v11542_v0 = vpop.xlane.xlu2 %3360  ;;  %v2913_v51 = vmul.f32 %v8404_v55, %v2874_v3  ;;  %v11544_v12 = vpop.eup %8405  ;;  %v11554_v63 = vadd.f32 %v11353_v58, %v3713_v45 }
 0x6ba   : > { %v2876_v19 = vpop.xlane.xlu0 %2875  ;;  %v3456_v11 = vpack.c.bf16 %v3445_v10, %v3444_v52 }
 0x6bb   : > { %8407 = vrcp.f32 %v2876_v19  ;;  %v2929_v59 = vsub.f32 2.0, %v2913_v51 }
 0x6bc   : > { %3512 = vmatmul.bf16.gmra.mxu2 %v3456_v11  ;;  %8409 = vpow2.f32 %v2853_v28 }
 0x6bd   : > { %v2945_v21 = vmul.f32 %v8404_v55, %v2929_v59 }
 0x6bf   : > { %3370 = vadd.xlane.f32.xlu2 %v11544_v12  ;;  %v2961_v48 = vmul.f32 %v11428_v53, %v2945_v21 }
 0x6c1   : > { %v8408_v2 = vpop.eup %8407  ;;  %v11548_v7 = vpop.xlane.xlu2 %3743 }
 0x6c2   : > { %v2914_v37 = vmul.f32 %v8408_v2, %v2876_v19  ;;  %v5070_v24 = vpop.permute.xlu1 %5069  ;;  %v11561_v41 = vpop.xlane.xlu0 %4226 }
 0x6c3   : > { %4590 = vrot.lane.b32.xlu1 %v13925_v23, %s9338_s26  ;;  %7787 = vmatmul.msk.bf16.gmra.mxu1 %vm1754_vm0, %v5070_v24  ;;  %v11565_v43 = vpop.eup %8409 }
 0x6c4   : > { %v2930_v14 = vsub.f32 2.0, %v2914_v37 }
 0x6c6   : > { %v2946_v38 = vmul.f32 %v8408_v2, %v2930_v14  ;;  %v11594_v2 = vadd.f32 %v11353_v58, %v4201_v46 }
 0x6c7   : > { %3751 = vmax.xlane.f32.xlu2 %v11554_v63 }
 0x6c8   : > { %v2962_v20 = vmul.f32 %v11439_v18, %v2946_v38 }
 0x6c9   : > { %v11559_v34 = vpop.xlane.xlu2 %3745 }
 0x6ca   : > { %v2973_v5 = vpack.c.bf16 %v2962_v20, %v2961_v48  ;;  %v11573_v18 = vpop.xlane.xlu0 %4228  ;;  %v3715_v20 = vpop.f32.mrf.mxu3 }
 0x6cb   : > { %4440 = vrot.lane.b32.xlu1 %v13926_v32, %s9336_s29 }
 0x6cc   : > { %3029 = vmatmul.bf16.gmra.mxu0 %v2973_v5 }
 0x6cf   : > { %2885 = vadd.xlane.f32.xlu2 %v11565_v43 }
 0x6d1   : > { %v2880_v53 = vpop.xlane.xlu2 %2879 }
 0x6d2   : > { %8411 = vrcp.f32 %v2880_v53 }
 0x6d3   : > { %3747 = vmax.xlane.f32.xlu0 %v11570_v50  ;;  %8413 = vpow2.f32 %v2855_v61 }
 0x6d8   : > { %v8412_v1 = vpop.eup %8411 }
 0x6d9   : > { %v11575_v33 = vpop.xlane.xlu2 %4230  ;;  %v2916_v10 = vmul.f32 %v8412_v1, %v2880_v53  ;;  %v11588_v22 = vpop.eup %8413  ;;  %v11602_v53 = vadd.f32 %v11353_v58, %v3715_v20 }
 0x6db   : > { %v2932_v57 = vsub.f32 2.0, %v2916_v10 }
 0x6dd   : > { %v4587_v3 = vpop.permute.xlu0 %4586  ;;  %v2948_v11 = vmul.f32 %v8412_v1, %v2932_v57 }
 0x6de   : > { %7779 = vmatmul.msk.bf16.gmra.mxu3 %vm1754_vm0, %v4587_v3 }
 0x6df   : > { %v2964_v37 = vmul.f32 %v11467_v16, %v2948_v11 }
 0x6e1   : > { %v11578_v26 = vpop.xlane.xlu2 %4232 }
 0x6e7   : > { %5073 = vrot.lane.b32.xlu0 %v13925_v23, %s9339_s19  ;;  %4438 = vrot.lane.b32.xlu2 %v13927_v56, %s9336_s29 }
 0x6e9   : > { %v4589_v36 = vpop.permute.xlu2 %4588 }
 0x6ed   : > { %v2878_v52 = vpop.xlane.xlu1 %2877 }
 0x6ee   : > { %8415 = vrcp.f32 %v2878_v52  ;;  %7780 = vmatmul.msk.bf16.gmra.mxu3 %vm1754_vm0, %v4589_v36 }
 0x6ef   : > { %3957 = vrot.lane.b32.xlu2 %v13926_v32, %s9333_s27  ;;  %8417 = vrcp.f32 %v11542_v0 }
 0x6f4   : > { %v8416_v55 = vpop.eup %8415 }
 0x6f5   : > { %v2915_v25 = vmul.f32 %v8416_v55, %v2878_v52  ;;  %v3365_v19 = vpop.xlane.xlu1 %3364  ;;  %2887 = vadd.xlane.f32.xlu1 %v11588_v22  ;;  %v8418_v21 = vpop.eup %8417 }
 0x6f6   : > { %v3398_v38 = vmul.f32 %v8418_v21, %v11542_v0 }
 0x6f7   : > { %v2931_v51 = vsub.f32 2.0, %v2915_v25  ;;  %3955 = vrot.lane.b32.xlu2 %v13927_v56, %s9333_s27 }
 0x6f9   : > { %v2947_v59 = vmul.f32 %v8416_v55, %v2931_v51  ;;  %v13928_v55 = vld [vmem:[#allocation81_spill] sm:$0xff] }
 0x6fb   : > { %v2963_v45 = vmul.f32 %v11487_v44, %v2947_v59  ;;  %v3414_v44 = vsub.f32 2.0, %v3398_v38 }
 0x6fd   : > { %v3367_v24 = vpop.xlane.xlu1 %3366  ;;  %4238 = vmax.xlane.f32.xlu1 %v11594_v2  ;;  %v2974_v23 = vpack.c.bf16 %v2964_v37, %v2963_v45  ;;  %v3430_v61 = vmul.f32 %v8418_v21, %v3414_v44  ;;  %v4203_v21 = vpop.f32.mrf.mxu1 }
 0x6ff   : > { %3034 = vmatmul.bf16.gmra.mxu0 %v2974_v23  ;;  %v3446_v25 = vmul.f32 %v11437_v49, %v3430_v61 }
 0x705   : > { %v2882_v28 = vpop.xlane.xlu1 %2881 }
 0x706   : > { %8419 = vrcp.f32 %v2882_v28 }
 0x708   : > { %v3363_v14 = vpop.xlane.xlu0 %3362 }
 0x709   : > { %8421 = vrcp.f32 %v3363_v14 }
 0x70c   : > { %v8420_v48 = vpop.eup %8419 }
 0x70d   : > { %v2884_v5 = vpop.xlane.xlu1 %2883  ;;  %v2917_v3 = vmul.f32 %v8420_v48, %v2882_v28 }
 0x70e   : > { %8423 = vrcp.f32 %v2884_v5 }
 0x70f   : > { %v8422_v16 = vpop.eup %8421  ;;  %8425 = vrcp.f32 %v3367_v24  ;;  %v2933_v36 = vsub.f32 2.0, %v2917_v3 }
 0x710   : > { %v3399_v31 = vmul.f32 %v8422_v16, %v3363_v14  ;;  %8427 = vrcp.f32 %v3365_v19 }
 0x711   : > { %3753 = vmax.xlane.f32.xlu0 %v11602_v53  ;;  %v2949_v46 = vmul.f32 %v8420_v48, %v2933_v36 }
 0x712   : > { %v3415_v1 = vsub.f32 2.0, %v3399_v31 }
 0x713   : > { %v2965_v38 = vmul.f32 %v11508_v39, %v2949_v46 }
 0x714   : > { %v8424_v52 = vpop.eup %8423  ;;  %v3431_v0 = vmul.f32 %v8422_v16, %v3415_v1 }
 0x715   : > { %v8426_v10 = vpop.eup %8425  ;;  %v2918_v57 = vmul.f32 %v8424_v52, %v2884_v5  ;;  %v11618_v3 = vpop.xlane.xlu1 %4234 }
 0x716   : > { %4592 = vrot.lane.b32.xlu1 %v13928_v55, %s9338_s26  ;;  %v3447_v11 = vmul.f32 %v11511_v13, %v3431_v0  ;;  %v8428_v51 = vpop.eup %8427  ;;  %v3401_v45 = vmul.f32 %v8426_v10, %v3367_v24  ;;  %v11613_v13 = vadd.f32 %v11353_v58, %v4203_v21 }
 0x717   : > { %v2934_v59 = vsub.f32 2.0, %v2918_v57  ;;  %v3400_v28 = vmul.f32 %v8428_v51, %v3365_v19  ;;  %v3718_v19 = vpop.f32.mrf.mxu3 }
 0x718   : > { %v3457_v37 = vpack.c.bf16 %v3447_v11, %v3446_v25  ;;  %v3417_v5 = vsub.f32 2.0, %v3401_v45  ;;  %v11624_v31 = vadd.f32 %v11353_v58, %v3718_v19 }
 0x719   : > { %v2950_v23 = vmul.f32 %v8424_v52, %v2934_v59  ;;  %v3416_v48 = vsub.f32 2.0, %v3400_v28 }
 0x71a   : > { %3517 = vmatmul.bf16.gmra.mxu2 %v3457_v37  ;;  %v3433_v24 = vmul.f32 %v8426_v10, %v3417_v5 }
 0x71b   : > { %v5072_v14 = vpop.permute.xlu0 %5071  ;;  %v2966_v20 = vmul.f32 %v11514_v62, %v2950_v23  ;;  %v3432_v44 = vmul.f32 %v8428_v51, %v3416_v48  ;;  %v13929_v62 = vld [vmem:[#allocation69_spill] sm:$0xff]  ;;  %v13930_v51 = vld [vmem:[#allocation72_spill] sm:$0xff] }
 0x71c   : > { %7788 = vmatmul.msk.bf16.gmra.mxu1 %vm1754_vm0, %v5072_v14  ;;  %v3449_v39 = vmul.f32 %v11503_v30, %v3433_v24 }
 0x71d   : > { %v2975_v49 = vpack.c.bf16 %v2966_v20, %v2965_v38  ;;  %v3448_v61 = vmul.f32 %v11493_v17, %v3432_v44  ;;  %v11628_v0 = vpop.xlane.xlu1 %4236  ;;  %v4258_v17 = vsub.f32 %v11449_v42, %v11561_v41  ;;  %v4259_v44 = vsub.f32 %v11462_v29, %v11573_v18 }
 0x71e   : > { %v3776_v29 = vsub.f32 %v11459_v8, %v11559_v34 }
 0x71f   : > { %3039 = vmatmul.bf16.gmra.mxu0 %v2975_v49  ;;  %v3458_v1 = vpack.c.bf16 %v3449_v39, %v3448_v61  ;;  %v3720_v52 = vpop.f32.mrf.mxu3  ;;  %v4274_v11 = vmul.f32 1.442695, %v4258_v17  ;;  %v13931_v49 = vld [vmem:[#allocation63_spill] sm:$0xff]  ;;  %v4276_v39 = vmul.f32 1.442695, %v4259_v44  ;;  %v3775_v61 = vsub.f32 %v11446_v40, %v11548_v7  ;;  %v13932_v40 = vld [vmem:[#allocation61_spill] sm:$0xff] }
 0x720   : > { %4240 = vmax.xlane.f32.xlu2 %v11613_v13  ;;  %v11633_v30 = vadd.f32 %v11353_v58, %v3720_v52 }
 0x721   : > { %v3791_v18 = vmul.f32 1.442695, %v3775_v61 }
 0x722   : > { %v11616_v16 = vpop.xlane.xlu2 %3749 }
 0x725   : > { %4436 = vrot.lane.b32.xlu0 %v13929_v62, %s9336_s29 }
 0x728   : > { %3755 = vmax.xlane.f32.xlu2 %v11624_v31 }
 0x72a   : > { %v3369_v36 = vpop.xlane.xlu2 %3368  ;;  %3522 = vmatmul.bf16.gmra.mxu2 %v3458_v1 }
 0x72b   : > { %8429 = vrcp.f32 %v3369_v36 }
 0x72d   : > { %5075 = vrot.lane.b32.xlu0 %v13928_v55, %s9339_s19 }
 0x730   : > { %3757 = vmax.xlane.f32.xlu2 %v11633_v30 }
 0x731   : > { %v8430_v10 = vpop.eup %8429 }
 0x732   : > { %v3371_v57 = vpop.xlane.xlu2 %3370  ;;  %v3402_v25 = vmul.f32 %v8430_v10, %v3369_v36  ;;  %v3793_v36 = vmul.f32 1.442695, %v3776_v29 }
 0x733   : > { %8431 = vrcp.f32 %v3371_v57 }
 0x734   : > { %v3418_v55 = vsub.f32 2.0, %v3402_v25  ;;  %8433 = vpow2.f32 %v4274_v11 }
 0x735   : > { %4434 = vrot.lane.b32.xlu0 %v13930_v51, %s9336_s29  ;;  %v4591_v46 = vpop.permute.xlu1 %4590  ;;  %8435 = vpow2.f32 %v4276_v39 }
 0x736   : > { %7781 = vmatmul.msk.bf16.gmra.mxu3 %vm1754_vm0, %v4591_v46  ;;  %v3434_v23 = vmul.f32 %v8430_v10, %v3418_v55 }
 0x738   : > { %v3450_v14 = vmul.f32 %v11537_v54, %v3434_v23 }
 0x739   : > { %v8432_v59 = vpop.eup %8431 }
 0x73a   : > { %v3403_v45 = vmul.f32 %v8432_v59, %v3371_v57  ;;  %v11641_v37 = vpop.xlane.xlu2 %3751  ;;  %v11645_v21 = vpop.eup %8433 }
 0x73b   : > { %v11665_v1 = vpop.eup %8435 }
 0x73c   : > { %v3419_v28 = vsub.f32 2.0, %v3403_v45 }
 0x73d   : > { %3953 = vrot.lane.b32.xlu0 %v13929_v62, %s9333_s27  ;;  %v4441_v42 = vpop.permute.xlu1 %4440 }
 0x73e   : > { %v3435_v41 = vmul.f32 %v8432_v59, %v3419_v28  ;;  %4450 = vmatpush.bf16.msrb.mxu2 %v4441_v42  ;;  %v4206_v42 = vpop.f32.mrf.mxu1 }
 0x740   : > { %4306 = vadd.xlane.f32.xlu1 %v11645_v21  ;;  %v3451_v38 = vmul.f32 %v11544_v12, %v3435_v41 }
 0x742   : > { %v2886_v20 = vpop.xlane.xlu2 %2885  ;;  %v3459_v5 = vpack.c.bf16 %v3451_v38, %v3450_v14 }
 0x743   : > { %8437 = vrcp.f32 %v2886_v20 }
 0x744   : > { %3527 = vmatmul.bf16.gmra.mxu2 %v3459_v5  ;;  %8439 = vpow2.f32 %v3791_v18 }
 0x746   : > { %v11652_v24 = vpop.xlane.xlu0 %3747 }
 0x748   : > { %4432 = vrot.lane.b32.xlu2 %v13931_v49, %s9336_s29 }
 0x749   : > { %v8438_v52 = vpop.eup %8437 }
 0x74a   : > { %v4439_v48 = vpop.permute.xlu2 %4438  ;;  %v2919_v7 = vmul.f32 %v8438_v52, %v2886_v20  ;;  %v11670_v17 = vpop.eup %8439 }
 0x74b   : > { %4451 = vmatpush.bf16.msrb.mxu2 %v4439_v48 }
 0x74c   : > { %v2935_v57 = vsub.f32 2.0, %v2919_v7  ;;  %v11722_v7 = vadd.f32 %v11353_v58, %v4206_v42 }
 0x74e   : > { %v2951_v11 = vmul.f32 %v8438_v52, %v2935_v57 }
 0x750   : > { %v2967_v59 = vmul.f32 %v11565_v43, %v2951_v11  ;;  %v4260_v43 = vsub.f32 %v11471_v6, %v11575_v33  ;;  %v4263_v11 = vsub.f32 %v11524_v35, %v11628_v0  ;;  %v3779_v0 = vsub.f32 %v11554_v63, %v11641_v37 }
 0x752   : > { %v3958_v19 = vpop.permute.xlu2 %3957  ;;  %v4278_v38 = vmul.f32 1.442695, %v4260_v43  ;;  %v3799_v43 = vmul.f32 1.442695, %v3779_v0 }
 0x753   : > { %3967 = vmatpush.bf16.msrb.mxu0 %v3958_v19  ;;  %v3723_v19 = vpop.f32.mrf.mxu3 }
 0x759   : > { %3951 = vrot.lane.b32.xlu1 %v13930_v51, %s9333_s27  ;;  %v5074_v54 = vpop.permute.xlu0 %5073 }
 0x75a   : > { %v3956_v12 = vpop.permute.xlu2 %3955  ;;  %7789 = vmatmul.msk.bf16.gmra.mxu1 %vm1754_vm0, %v5074_v54 }
 0x75b   : > { %3968 = vmatpush.bf16.msrb.mxu0 %v3956_v12  ;;  %v3777_v12 = vsub.f32 %v11570_v50, %v11652_v24  ;;  %v3725_v39 = vpop.f32.mrf.mxu3  ;;  %v4261_v50 = vsub.f32 %v11479_v4, %v11578_v26  ;;  %v4284_v26 = vmul.f32 1.442695, %v4263_v11 }
 0x75c   : > { %v11716_v18 = vadd.f32 %v11353_v58, %v3725_v39 }
 0x75d   : > { %v3795_v29 = vmul.f32 1.442695, %v3777_v12  ;;  %v4280_v57 = vmul.f32 1.442695, %v4261_v50 }
 0x761   : > { %3949 = vrot.lane.b32.xlu1 %v13931_v49, %s9333_s27 }
 0x767   : > { %4308 = vadd.xlane.f32.xlu0 %v11665_v1 }
 0x768   : > { %v2888_v10 = vpop.xlane.xlu1 %2887 }
 0x769   : > { %8441 = vrcp.f32 %v2888_v10  ;;  %3947 = vrot.lane.b32.xlu1 %v13932_v40, %s9333_s27 }
 0x76a   : > { %8443 = vpow2.f32 %v3793_v36 }
 0x76b   : > { %8445 = vpow2.f32 %v4278_v38 }
 0x76c   : > { %8447 = vpow2.f32 %v3795_v29 }
 0x76d   : > { %8449 = vpow2.f32 %v4280_v57 }
 0x76f   : > { %v8442_v25 = vpop.eup %8441  ;;  %3823 = vadd.xlane.f32.xlu0 %v11670_v17 }
 0x770   : > { %v11673_v8 = vpop.eup %8443  ;;  %v2920_v34 = vmul.f32 %v8442_v25, %v2888_v10  ;;  %v11678_v28 = vpop.xlane.xlu1 %4238 }
 0x771   : > { %3825 = vadd.xlane.f32.xlu2 %v11673_v8  ;;  %v11701_v6 = vpop.eup %8445 }
 0x772   : > { %v2936_v46 = vsub.f32 2.0, %v2920_v34  ;;  %v11719_v10 = vpop.eup %8447  ;;  %v4262_v34 = vsub.f32 %v11520_v60, %v11618_v3  ;;  %v3728_v60 = vpop.f32.mrf.mxu3 }
 0x774   : > { %v2952_v55 = vmul.f32 %v8442_v25, %v2936_v46  ;;  %v4282_v4 = vmul.f32 1.442695, %v4262_v34 }
 0x776   : > { %v2968_v45 = vmul.f32 %v11588_v22, %v2952_v55  ;;  %v4208_v22 = vpop.f32.mrf.mxu1  ;;  %v11736_v55 = vpop.eup %8449  ;;  %8451 = vpow2.f32 %v4282_v4 }
 0x777   : > { %v11692_v20 = vadd.f32 %v11353_v58, %v4208_v22  ;;  %8453 = vpow2.f32 %v4284_v26 }
 0x778   : > { %v2976_v23 = vpack.c.bf16 %v2968_v45, %v2967_v59  ;;  %v11739_v59 = vld [vmem:[%s9760_s1] ss:$0 sm:$0xff]  ;;  %8455 = vpow2.f32 %v3799_v43 }
 0x779   : > { %v11761_v22 = vadd.f32 %v11739_v59, %v3728_v60 }
 0x77a   : > { %3044 = vmatmul.bf16.gmra.mxu0 %v2976_v23 }
 0x77c   : > { %v11748_v35 = vpop.eup %8451 }
 0x77d   : > { %v11752_v3 = vpop.eup %8453 }
 0x77e   : > { %v4211_v24 = vpop.f32.mrf.mxu1 }
 0x77f   : > { %v11729_v25 = vadd.f32 %v11353_v58, %v4211_v24 }
 0x783   : > { %4430 = vrot.lane.b32.xlu0 %v13932_v40, %s9336_s29 }
 0x784   : > { %v11689_v14 = vpop.xlane.xlu0 %3753 }
 0x785   : > { %v3780_v42 = vsub.f32 %v11602_v53, %v11689_v14  ;;  %v4264_v53 = vsub.f32 %v11594_v2, %v11678_v28 }
 0x786   : > { %v4213_v46 = vpop.f32.mrf.mxu1 }
 0x787   : > { %v11742_v45 = vadd.f32 %v11739_v59, %v4213_v46  ;;  %v3801_v38 = vmul.f32 1.442695, %v3780_v42  ;;  %v4286_v14 = vmul.f32 1.442695, %v4264_v53 }
 0x788   : > { %v4593_v41 = vpop.permute.xlu1 %4592 }
 0x789   : > { %4594 = vrot.lane.b32.xlu2 %v13908_v27, %s9338_s26  ;;  %7782 = vmatmul.msk.bf16.gmra.mxu3 %vm1754_vm0, %v4593_v41  ;;  %v3730_v41 = vpop.f32.mrf.mxu3  ;;  %8457 = vpow2.f32 %v3801_v38 }
 0x78a   : > { %8459 = vpow2.f32 %v4286_v14 }
 0x78b   : > { %4428 = vrot.lane.b32.xlu0 %v13909_v9, %s9336_s29 }
 0x78e   : > { %v4216_v63 = vpop.f32.mrf.mxu1 }
 0x78f   : > { %v11818_v38 = vadd.f32 %v11739_v59, %v4216_v63 }
 0x791   : > { %5077 = vrot.lane.b32.xlu2 %v13908_v27, %s9339_s19  ;;  %v11708_v27 = vadd.f32 %v11353_v58, %v3723_v19  ;;  %v11772_v19 = vpop.eup %8455  ;;  %v3733_v39 = vpop.f32.mrf.mxu3 }
 0x792   : > { %v11792_v57 = vadd.f32 %v11739_v59, %v3733_v39 }
 0x793   : > { %v11696_v5 = vpop.xlane.xlu2 %4240  ;;  %4244 = vmax.xlane.f32.xlu1 %v11692_v20 }
 0x797   : > { %v4437_v48 = vpop.permute.xlu0 %4436 }
 0x798   : > { %4452 = vmatpush.bf16.msrb.mxu2 %v4437_v48  ;;  %v11764_v48 = vadd.f32 %v11739_v59, %v3730_v41 }
 0x799   : > { %3945 = vrot.lane.b32.xlu2 %v13909_v9, %s9333_s27  ;;  %v3735_v50 = vpop.f32.mrf.mxu3 }
 0x79a   : > { %v11795_v34 = vadd.f32 %v11739_v59, %v3735_v50 }
 0x79b   : > { %v11703_v33 = vpop.xlane.xlu2 %3755  ;;  %4310 = vadd.xlane.f32.xlu1 %v11701_v6 }
 0x79f   : > { %v5076_v44 = vpop.permute.xlu0 %5075 }
 0x7a0   : > { %7790 = vmatmul.msk.bf16.gmra.mxu1 %vm1754_vm0, %v5076_v44  ;;  %v11774_v44 = vpop.eup %8457 }
 0x7a1   : > { %v11781_v2 = vpop.eup %8459 }
 0x7a3   : > { %v11710_v54 = vpop.xlane.xlu2 %3757  ;;  %3759 = vmax.xlane.f32.xlu1 %v11708_v27 }
 0x7a4   : > { %v3782_v28 = vsub.f32 %v11633_v30, %v11710_v54  ;;  %v3778_v30 = vsub.f32 %v11532_v47, %v11616_v16 }
 0x7a6   : > { %v3805_v24 = vmul.f32 1.442695, %v3782_v28  ;;  %v3797_v4 = vmul.f32 1.442695, %v3778_v30 }
 0x7a7   : > { %v4435_v61 = vpop.permute.xlu0 %4434 }
 0x7a8   : > { %4453 = vmatpush.bf16.msrb.mxu2 %v4435_v61  ;;  %v4218_v61 = vpop.f32.mrf.mxu1  ;;  %8461 = vpow2.f32 %v3805_v24  ;;  %v3738_v24 = vpop.f32.mrf.mxu3 }
 0x7a9   : > { %v11779_v29 = vadd.f32 %v11739_v59, %v4218_v61  ;;  %8463 = vpow2.f32 %v3797_v4 }
 0x7ab   : > { %v4433_v36 = vpop.permute.xlu2 %4432  ;;  %3761 = vmax.xlane.f32.xlu1 %v11716_v18 }
 0x7ac   : > { %4454 = vmatpush.bf16.msrb.mxu2 %v4433_v36 }
 0x7ae   : > { %v11804_v26 = vpop.eup %8461 }
 0x7af   : > { %v3954_v52 = vpop.permute.xlu0 %3953  ;;  %v11812_v16 = vpop.eup %8463 }
 0x7b0   : > { %3969 = vmatpush.bf16.msrb.mxu0 %v3954_v52  ;;  %v4221_v46 = vpop.f32.mrf.mxu1 }
 0x7b1   : > { %v11807_v60 = vadd.f32 %v11739_v59, %v4221_v46 }
 0x7b3   : > { %3827 = vadd.xlane.f32.xlu1 %v11719_v10  ;;  %v11745_v58 = vpop.xlane.xlu1 %4306 }
 0x7b5   : > { %4242 = vmax.xlane.f32.xlu0 %v11722_v7 }
 0x7bb   : > { %4246 = vmax.xlane.f32.xlu1 %v11729_v25 }
 0x7c2   : > { %4312 = vadd.xlane.f32.xlu2 %v11736_v55 }
 0x7c3   : > { %4248 = vmax.xlane.f32.xlu1 %v11742_v45 }
 0x7c9   : > { %4426 = vrot.lane.b32.xlu0 %v13911_v15, %s9336_s29 }
 0x7ca   : > { %4314 = vadd.xlane.f32.xlu2 %v11748_v35 }
 0x7cb   : > { %v3952_v23 = vpop.permute.xlu1 %3951  ;;  %4316 = vadd.xlane.f32.xlu1 %v11752_v3 }
 0x7cc   : > { %3970 = vmatpush.bf16.msrb.mxu0 %v3952_v23  ;;  %v4265_v23 = vsub.f32 %v11613_v13, %v11696_v5 }
 0x7ce   : > { %v4288_v43 = vmul.f32 1.442695, %v4265_v23 }
 0x7d0   : > { %8465 = vpow2.f32 %v4288_v43 }
 0x7d1   : > { %3943 = vrot.lane.b32.xlu0 %v13911_v15, %s9333_s27 }
 0x7d2   : > { %3763 = vmax.xlane.f32.xlu2 %v11761_v22 }
 0x7d3   : > { %v3950_v37 = vpop.permute.xlu1 %3949  ;;  %3765 = vmax.xlane.f32.xlu1 %v11764_v48 }
 0x7d4   : > { %3971 = vmatpush.bf16.msrb.mxu0 %v3950_v37  ;;  %v3781_v37 = vsub.f32 %v11624_v31, %v11703_v33  ;;  %v4223_v31 = vpop.f32.mrf.mxu1 }
 0x7d5   : > { %v11837_v28 = vadd.f32 %v11739_v59, %v4223_v31 }
 0x7d6   : > { %v11824_v13 = vpop.eup %8465 }
 0x7da   : > { %3831 = vadd.xlane.f32.xlu2 %v11772_v19  ;;  %v11786_v36 = vpop.xlane.xlu0 %4308 }
 0x7db   : > { %v3948_v12 = vpop.permute.xlu1 %3947  ;;  %3833 = vadd.xlane.f32.xlu1 %v11774_v44 }
 0x7dc   : > { %3972 = vmatpush.bf16.msrb.mxu0 %v3948_v12  ;;  %v3803_v12 = vmul.f32 1.442695, %v3781_v37  ;;  %v11839_v30 = vpop.f32.mrf.mxu1 }
 0x7e2   : > { %4252 = vmax.xlane.f32.xlu2 %v11779_v29  ;;  %v11801_v11 = vpop.xlane.xlu0 %3823 }
 0x7e3   : > { %4318 = vadd.xlane.f32.xlu1 %v11781_v2 }
 0x7e4   : > { %v11789_v52 = vpop.xlane.xlu2 %3825  ;;  %v5154_v23 = vpop.f32.mrf.mxu1 }
 0x7ea   : > { %3767 = vmax.xlane.f32.xlu2 %v11792_v57 }
 0x7eb   : > { %3769 = vmax.xlane.f32.xlu1 %v11795_v34 }
 0x7ec   : > { %v4595_v54 = vpop.permute.xlu2 %4594 }
 0x7ed   : > { %7783 = vmatmul.msk.bf16.gmra.mxu3 %vm1754_vm0, %v4595_v54 }
 0x7f2   : > { %3837 = vadd.xlane.f32.xlu2 %v11804_v26 }
 0x7f3   : > { %4254 = vmax.xlane.f32.xlu1 %v11807_v60 }
 0x7f4   : > { %v5078_v0 = vpop.permute.xlu2 %5077 }
 0x7f5   : > { %7791 = vmatmul.msk.bf16.gmra.mxu1 %vm1754_vm0, %v5078_v0  ;;  %v4431_v47 = vpop.permute.xlu0 %4430  ;;  %v11846_v0 = vadd.f32 %v11739_v59, %v3738_v24 }
 0x7f6   : > { %4455 = vmatpush.bf16.msrb.mxu2 %v4431_v47 }
 0x7fb   : > { %3829 = vadd.xlane.f32.xlu0 %v11812_v16 }
 0x7fc   : > { %v3946_v42 = vpop.permute.xlu2 %3945 }
 0x7fd   : > { %3973 = vmatpush.bf16.msrb.mxu0 %v3946_v42  ;;  %v4429_v41 = vpop.permute.xlu0 %4428 }
 0x7fe   : > { %4456 = vmatpush.bf16.msrb.mxu2 %v4429_v41 }
 0x803   : > { %4250 = vmax.xlane.f32.xlu0 %v11818_v38 }
 0x806   : > { %v4245_v53 = vpop.xlane.xlu1 %4244 }
 0x807   : > { %v4267_v14 = vsub.f32 %v11692_v20, %v4245_v53 }
 0x809   : > { %v4292_v39 = vmul.f32 1.442695, %v4267_v14 }
 0x80b   : > { %8467 = vpow2.f32 %v4292_v39  ;;  %4320 = vadd.xlane.f32.xlu0 %v11824_v13 }
 0x80c   : > { %8469 = vpow2.f32 %v3803_v12 }
 0x80e   : > { %v11827_v5 = vpop.xlane.xlu1 %4310 }
 0x811   : > { %v11829_v63 = vpop.eup %8467 }
 0x812   : > { %v11831_v61 = vpop.eup %8469  ;;  %4324 = vadd.xlane.f32.xlu1 %v11829_v63 }
 0x813   : > { %3835 = vadd.xlane.f32.xlu0 %v11831_v61 }
 0x816   : > { %v3760_v20 = vpop.xlane.xlu1 %3759 }
 0x817   : > { %v3783_v33 = vsub.f32 %v11708_v27, %v3760_v20  ;;  %v3740_v27 = vpop.f32.mrf.mxu3 }
 0x819   : > { %v3807_v50 = vmul.f32 1.442695, %v3783_v33 }
 0x81b   : > { %8471 = vpow2.f32 %v3807_v50  ;;  %4256 = vmax.xlane.f32.xlu0 %v11837_v28 }
 0x81e   : > { %v3762_v54 = vpop.xlane.xlu1 %3761 }
 0x81f   : > { %v3784_v46 = vsub.f32 %v11716_v18, %v3762_v54  ;;  %v11855_v18 = vadd.f32 %v11739_v59, %v5154_v23  ;;  %v4669_v39 = vpop.f32.mrf.mxu3 }
 0x820   : > { %v11868_v50 = vadd.f32 %v11739_v59, %v4669_v39 }
 0x821   : > { %v11843_v4 = vpop.eup %8471  ;;  %v3809_v47 = vmul.f32 1.442695, %v3784_v46 }
 0x822   : > { %3839 = vadd.xlane.f32.xlu1 %v11843_v4  ;;  %13933 = vst [vmem:[#allocation64_spill] sm:$0xff] %v11868_v50 }
 0x823   : > { %8473 = vpow2.f32 %v3809_v47  ;;  %3771 = vmax.xlane.f32.xlu0 %v11846_v0 }
 0x824   : > { %8475 = vrcp.f32 %v11786_v36 }
 0x825   : > { %8477 = vrcp.f32 %v11745_v58 }
 0x826   : > { %v11852_v42 = vpop.xlane.xlu1 %3827  ;;  %8479 = vrcp.f32 %v11789_v52 }
 0x828   : > { %v4243_v41 = vpop.xlane.xlu0 %4242 }
 0x829   : > { %v11857_v43 = vpop.eup %8473  ;;  %v4266_v37 = vsub.f32 %v11722_v7, %v4243_v41 }
 0x82a   : > { %v8476_v53 = vpop.eup %8475  ;;  %5194 = vmax.xlane.f32.xlu1 %v11855_v18 }
 0x82b   : > { %v4290_v14 = vmul.f32 1.442695, %v4266_v37  ;;  %3841 = vadd.xlane.f32.xlu0 %v11857_v43  ;;  %v8478_v12 = vpop.eup %8477  ;;  %v4355_v31 = vmul.f32 %v8476_v53, %v11786_v36 }
 0x82c   : > { %v4354_v33 = vmul.f32 %v8478_v12, %v11745_v58  ;;  %v8480_v46 = vpop.eup %8479 }
 0x82d   : > { %8481 = vpow2.f32 %v4290_v14  ;;  %v4371_v24 = vsub.f32 2.0, %v4355_v31  ;;  %v3872_v58 = vmul.f32 %v8480_v46, %v11789_v52 }
 0x82e   : > { %8483 = vrcp.f32 %v11801_v11  ;;  %v4247_v20 = vpop.xlane.xlu1 %4246  ;;  %v4370_v23 = vsub.f32 2.0, %v4354_v33 }
 0x82f   : > { %v4268_v7 = vsub.f32 %v11729_v25, %v4247_v20  ;;  %v4387_v41 = vmul.f32 %v8476_v53, %v4371_v24  ;;  %v3888_v33 = vsub.f32 2.0, %v3872_v58 }
 0x830   : > { %v4386_v14 = vmul.f32 %v8478_v12, %v4370_v23 }
 0x831   : > { %v4294_v54 = vmul.f32 1.442695, %v4268_v7  ;;  %v4403_v20 = vmul.f32 %v11665_v1, %v4387_v41  ;;  %v11881_v7 = vadd.f32 %v11739_v59, %v3740_v27  ;;  %v3904_v23 = vmul.f32 %v8480_v46, %v3888_v33 }
 0x832   : > { %4709 = vmax.xlane.f32.xlu1 %v11868_v50  ;;  %v4402_v52 = vmul.f32 %v11645_v21, %v4386_v14 }
 0x833   : > { %v11871_v47 = vpop.eup %8481  ;;  %8485 = vpow2.f32 %v4294_v54  ;;  %v3920_v14 = vmul.f32 %v11673_v8, %v3904_v23 }
 0x834   : > { %v8484_v36 = vpop.eup %8483  ;;  %4322 = vadd.xlane.f32.xlu2 %v11871_v47  ;;  %8487 = vrcp.f32 %v11827_v5  ;;  %v4418_v12 = vpack.c.bf16 %v4403_v20, %v4402_v52  ;;  %v11894_v20 = vadd.f32 %v11739_v59, %v11839_v30 }
 0x835   : > { %v4313_v25 = vpop.xlane.xlu2 %4312  ;;  %v3871_v39 = vmul.f32 %v8484_v36, %v11801_v11  ;;  %v4671_v11 = vpop.f32.mrf.mxu3 }
 0x836   : > { %8489 = vrcp.f32 %v4313_v25  ;;  %v4249_v37 = vpop.xlane.xlu1 %4248  ;;  %v11889_v21 = vadd.f32 %v11739_v59, %v4671_v11 }
 0x837   : > { %v3887_v24 = vsub.f32 2.0, %v3871_v39  ;;  %v4269_v1 = vsub.f32 %v11742_v45, %v4249_v37 }
 0x839   : > { %v11877_v31 = vpop.eup %8485  ;;  %v3903_v58 = vmul.f32 %v8484_v36, %v3887_v24  ;;  %v4296_v50 = vmul.f32 1.442695, %v4269_v1 }
 0x83a   : > { %4326 = vadd.xlane.f32.xlu0 %v11877_v31  ;;  %v8488_v53 = vpop.eup %8487 }
 0x83b   : > { %v4427_v54 = vpop.permute.xlu0 %4426  ;;  %v4356_v40 = vmul.f32 %v8488_v53, %v11827_v5  ;;  %v3919_v45 = vmul.f32 %v11670_v17, %v3903_v58  ;;  %v5157_v5 = vpop.f32.mrf.mxu1 }
 0x83c   : > { %v8490_v15 = vpop.eup %8489  ;;  %3773 = vmax.xlane.f32.xlu2 %v11881_v7  ;;  %4457 = vmatpush.bf16.msrb.mxu2 %v4427_v54 }
 0x83d   : > { %v4357_v9 = vmul.f32 %v8490_v15, %v4313_v25  ;;  %v4315_v41 = vpop.xlane.xlu2 %4314  ;;  %v4372_v46 = vsub.f32 2.0, %v4356_v40  ;;  %v3935_v25 = vpack.c.bf16 %v3920_v14, %v3919_v45  ;;  %v11902_v40 = vadd.f32 %v11739_v59, %v5157_v5 }
 0x83e   : > { %v4317_v27 = vpop.xlane.xlu1 %4316  ;;  %8491 = vrcp.f32 %v4315_v41 }
 0x83f   : > { %4458 = vmatmul.bf16.vlgmr.msrb.gmra.mxu2 %v4418_v12  ;;  %v4373_v39 = vsub.f32 2.0, %v4357_v9  ;;  %8493 = vrcp.f32 %v4317_v27  ;;  %v4388_v33 = vmul.f32 %v8488_v53, %v4372_v46 }
 0x840   : > { %8495 = vpow2.f32 %v4296_v50 }
 0x841   : > { %v4389_v8 = vmul.f32 %v8490_v15, %v4373_v39 }
 0x842   : > { %4711 = vmax.xlane.f32.xlu0 %v11889_v21 }
 0x843   : > { %v3944_v36 = vpop.permute.xlu0 %3943  ;;  %v4405_v11 = vmul.f32 %v11736_v55, %v4389_v8 }
 0x844   : > { %5192 = vmax.xlane.f32.xlu2 %v11894_v20  ;;  %3974 = vmatpush.bf16.msrb.mxu0 %v3944_v36  ;;  %v8492_v17 = vpop.eup %8491  ;;  %v5159_v36 = vpop.f32.mrf.mxu1 }
 0x845   : > { %v3764_v9 = vpop.xlane.xlu2 %3763  ;;  %v8494_v12 = vpop.eup %8493 }
 0x846   : > { %v3785_v37 = vsub.f32 %v11761_v22, %v3764_v9  ;;  %v3766_v30 = vpop.xlane.xlu1 %3765  ;;  %v11906_v15 = vpop.eup %8495  ;;  %v4404_v22 = vmul.f32 %v11701_v6, %v4388_v33  ;;  %v4359_v50 = vmul.f32 %v8494_v12, %v4317_v27  ;;  %v11926_v9 = vadd.f32 %v11739_v59, %v5159_v36 }
 0x847   : > { %v3786_v52 = vsub.f32 %v11764_v48, %v3766_v30  ;;  %3975 = vmatmul.bf16.vlgmr.msrb.gmra.mxu0 %v3935_v25  ;;  %v4358_v48 = vmul.f32 %v8492_v17, %v4315_v41 }
 0x848   : > { %v3811_v24 = vmul.f32 1.442695, %v3785_v37  ;;  %v4419_v23 = vpack.c.bf16 %v4405_v11, %v4404_v22  ;;  %v4375_v14 = vsub.f32 2.0, %v4359_v50  ;;  %v4674_v37 = vpop.f32.mrf.mxu3 }
 0x849   : > { %v3813_v54 = vmul.f32 1.442695, %v3786_v52  ;;  %v4374_v58 = vsub.f32 2.0, %v4358_v48 }
 0x84a   : > { %5196 = vmax.xlane.f32.xlu0 %v11902_v40  ;;  %v4391_v41 = vmul.f32 %v8494_v12, %v4375_v14 }
 0x84b   : > { %8497 = vpow2.f32 %v3813_v54  ;;  %v4390_v6 = vmul.f32 %v8492_v17, %v4374_v58 }
 0x84c   : > { %4328 = vadd.xlane.f32.xlu2 %v11906_v15  ;;  %8499 = vpow2.f32 %v3811_v24  ;;  %v4407_v8 = vmul.f32 %v11752_v3, %v4391_v41  ;;  %v11935_v3 = vadd.f32 %v11739_v59, %v4674_v37  ;;  %v11937_v11 = vpop.f32.mrf.mxu1 }
 0x84d   : > { %v11910_v53 = vpop.xlane.xlu2 %3831  ;;  %v4406_v25 = vmul.f32 %v11748_v35, %v4390_v6 }
 0x84e   : > { %v11912_v1 = vpop.xlane.xlu1 %3833 }
 0x84f   : > { %4463 = vmatmul.bf16.gmra.mxu2 %v4419_v23  ;;  %v4420_v33 = vpack.c.bf16 %v4407_v8, %v4406_v25 }
 0x850   : > { %v11940_v12 = vpop.f32.mrf.mxu3 }
 0x851   : > { %v11914_v55 = vpop.eup %8497 }
 0x852   : > { %3845 = vadd.xlane.f32.xlu1 %v11914_v55  ;;  %v11917_v39 = vpop.eup %8499 }
 0x854   : > { %3843 = vadd.xlane.f32.xlu2 %v11917_v39  ;;  %v5164_v23 = vpop.f32.mrf.mxu1 }
 0x855   : > { %v4253_v27 = vpop.xlane.xlu2 %4252  ;;  %v11951_v41 = vadd.f32 %v11739_v59, %v5164_v23 }
 0x856   : > { %v4271_v45 = vsub.f32 %v11779_v29, %v4253_v27  ;;  %v11921_v46 = vpop.xlane.xlu1 %4318 }
 0x858   : > { %v4300_v5 = vmul.f32 1.442695, %v4271_v45  ;;  %v4679_v14 = vpop.f32.mrf.mxu3 }
 0x859   : > { %v11961_v8 = vadd.f32 %v11739_v59, %v4679_v14 }
 0x85a   : > { %8501 = vpow2.f32 %v4300_v5 }
 0x85c   : > { %5198 = vmax.xlane.f32.xlu2 %v11926_v9 }
 0x85d   : > { %v3768_v30 = vpop.xlane.xlu2 %3767 }
 0x85e   : > { %v3787_v52 = vsub.f32 %v11792_v57, %v3768_v30  ;;  %v3770_v29 = vpop.xlane.xlu1 %3769 }
 0x85f   : > { %v3788_v17 = vsub.f32 %v11795_v34, %v3770_v29  ;;  %4468 = vmatmul.bf16.gmra.mxu2 %v4420_v33 }
 0x860   : > { %v11931_v24 = vpop.eup %8501  ;;  %v3815_v35 = vmul.f32 1.442695, %v3787_v52  ;;  %v4681_v37 = vpop.f32.mrf.mxu3 }
 0x861   : > { %v3817_v54 = vmul.f32 1.442695, %v3788_v17  ;;  %4332 = vadd.xlane.f32.xlu0 %v11931_v24  ;;  %v11967_v17 = vadd.f32 %v11739_v59, %v4681_v37 }
 0x862   : > { %8503 = vpow2.f32 %v3815_v35 }
 0x863   : > { %8505 = vpow2.f32 %v3817_v54 }
 0x864   : > { %4713 = vmax.xlane.f32.xlu2 %v11935_v3  ;;  %8507 = vrcp.f32 %v11852_v42 }
 0x866   : > { %v4255_v57 = vpop.xlane.xlu1 %4254 }
 0x867   : > { %v4272_v34 = vsub.f32 %v11807_v60, %v4255_v57 }
 0x868   : > { %v11944_v22 = vpop.eup %8503 }
 0x869   : > { %v4302_v48 = vmul.f32 1.442695, %v4272_v34  ;;  %3847 = vadd.xlane.f32.xlu0 %v11944_v22  ;;  %v11947_v50 = vpop.eup %8505 }
 0x86a   : > { %v8508_v58 = vpop.eup %8507 }
 0x86b   : > { %8509 = vpow2.f32 %v4302_v48  ;;  %v3873_v60 = vmul.f32 %v8508_v58, %v11852_v42 }
 0x86c   : > { %3849 = vadd.xlane.f32.xlu2 %v11947_v50 }
 0x86d   : > { %v3889_v45 = vsub.f32 2.0, %v3873_v60 }
 0x86e   : > { %v3830_v6 = vpop.xlane.xlu0 %3829 }
 0x86f   : > { %8511 = vrcp.f32 %v3830_v6  ;;  %v3905_v30 = vmul.f32 %v8508_v58, %v3889_v45 }
 0x870   : > { %8513 = vrcp.f32 %v11910_v53 }
 0x871   : > { %5202 = vmax.xlane.f32.xlu0 %v11951_v41  ;;  %v11955_v27 = vpop.eup %8509  ;;  %8515 = vrcp.f32 %v11912_v1  ;;  %v3921_v57 = vmul.f32 %v11719_v10, %v3905_v30  ;;  %v3838_v10 = vpop.xlane.xlu2 %3837 }
 0x872   : > { %8517 = vrcp.f32 %v11921_v46 }
 0x874   : > { %4334 = vadd.xlane.f32.xlu2 %v11955_v27 }
 0x875   : > { %v8512_v36 = vpop.eup %8511 }
 0x876   : > { %v3874_v5 = vmul.f32 %v8512_v36, %v3830_v6  ;;  %v4251_v25 = vpop.xlane.xlu0 %4250  ;;  %v8514_v29 = vpop.eup %8513 }
 0x877   : > { %v4270_v42 = vsub.f32 %v11818_v38, %v4251_v25  ;;  %v8516_v54 = vpop.eup %8515  ;;  %v3875_v38 = vmul.f32 %v8514_v29, %v11910_v53 }
 0x878   : > { %v3890_v33 = vsub.f32 2.0, %v3874_v5  ;;  %v8518_v48 = vpop.eup %8517  ;;  %v3876_v23 = vmul.f32 %v8516_v54, %v11912_v1 }
 0x879   : > { %v4298_v52 = vmul.f32 1.442695, %v4270_v42  ;;  %4717 = vmax.xlane.f32.xlu0 %v11961_v8  ;;  %v4360_v6 = vmul.f32 %v8518_v48, %v11921_v46  ;;  %v3891_v45 = vsub.f32 2.0, %v3875_v38  ;;  %v11980_v42 = vadd.f32 %v11739_v59, %v11940_v12 }
 0x87a   : > { %v3906_v35 = vmul.f32 %v8512_v36, %v3890_v33  ;;  %v3892_v36 = vsub.f32 2.0, %v3876_v23 }
 0x87b   : > { %8519 = vpow2.f32 %v4298_v52  ;;  %v4376_v5 = vsub.f32 2.0, %v4360_v6  ;;  %v3907_v25 = vmul.f32 %v8514_v29, %v3891_v45  ;;  %v11990_v6 = vadd.f32 %v11739_v59, %v11937_v11 }
 0x87c   : > { %4719 = vmax.xlane.f32.xlu2 %v11967_v17  ;;  %v3922_v34 = vmul.f32 %v11812_v16, %v3906_v35  ;;  %v3908_v37 = vmul.f32 %v8516_v54, %v3892_v36 }
 0x87d   : > { %v4392_v46 = vmul.f32 %v8518_v48, %v4376_v5  ;;  %v3923_v52 = vmul.f32 %v11772_v19, %v3907_v25 }
 0x87e   : > { %v4321_v58 = vpop.xlane.xlu0 %4320  ;;  %v3936_v14 = vpack.c.bf16 %v3922_v34, %v3921_v57  ;;  %v3924_v35 = vmul.f32 %v11774_v44, %v3908_v37 }
 0x87f   : > { %8521 = vrcp.f32 %v4321_v58  ;;  %v4408_v29 = vmul.f32 %v11781_v2, %v4392_v46 }
 0x880   : > { %3980 = vmatmul.bf16.gmra.mxu0 %v3936_v14  ;;  %8523 = vrcp.f32 %v3838_v10  ;;  %v3937_v12 = vpack.c.bf16 %v3924_v35, %v3923_v52 }
 0x881   : > { %v11975_v60 = vpop.eup %8519 }
 0x882   : > { %4330 = vadd.xlane.f32.xlu1 %v11975_v60 }
 0x885   : > { %v8522_v16 = vpop.eup %8521  ;;  %v4325_v38 = vpop.xlane.xlu1 %4324 }
 0x886   : > { %v4361_v53 = vmul.f32 %v8522_v16, %v4321_v58  ;;  %v3836_v1 = vpop.xlane.xlu0 %3835  ;;  %v8524_v57 = vpop.eup %8523 }
 0x887   : > { %8525 = vrcp.f32 %v3836_v1  ;;  %v3878_v19 = vmul.f32 %v8524_v57, %v3838_v10 }
 0x888   : > { %v4377_v30 = vsub.f32 2.0, %v4361_v53 }
 0x889   : > { %v3894_v2 = vsub.f32 2.0, %v3878_v19 }
 0x88a   : > { %v4393_v33 = vmul.f32 %v8522_v16, %v4377_v30  ;;  %4715 = vmax.xlane.f32.xlu1 %v11980_v42 }
 0x88c   : > { %v4409_v54 = vmul.f32 %v11824_v13, %v4393_v33 }
 0x88d   : > { %v8526_v34 = vpop.eup %8525 }
 0x88e   : > { %v3877_v23 = vmul.f32 %v8526_v34, %v3836_v1  ;;  %v4257_v58 = vpop.xlane.xlu0 %4256  ;;  %v4421_v14 = vpack.c.bf16 %v4409_v54, %v4408_v29 }
 0x88f   : > { %v4273_v48 = vsub.f32 %v11837_v28, %v4257_v58  ;;  %v3910_v28 = vmul.f32 %v8524_v57, %v3894_v2  ;;  %v12002_v57 = vpop.f32.mrf.mxu0 }
 0x890   : > { %3985 = vmatmul.bf16.gmra.mxu0 %v3937_v12  ;;  %4473 = vmatmul.bf16.gmra.mxu2 %v4421_v14  ;;  %v3893_v45 = vsub.f32 2.0, %v3877_v23 }
 0x891   : > { %v4304_v44 = vmul.f32 1.442695, %v4273_v48  ;;  %v3926_v37 = vmul.f32 %v11804_v26, %v3910_v28 }
 0x892   : > { %5200 = vmax.xlane.f32.xlu1 %v11990_v6  ;;  %v3909_v36 = vmul.f32 %v8526_v34, %v3893_v45 }
 0x893   : > { %8527 = vpow2.f32 %v4304_v44  ;;  %v12006_v44 = vpop.f32.mrf.mxu2 }
 0x894   : > { %v3925_v10 = vmul.f32 %v11831_v61, %v3909_v36 }
 0x895   : > { %v3840_v13 = vpop.xlane.xlu1 %3839 }
 0x896   : > { %v3772_v5 = vpop.xlane.xlu0 %3771  ;;  %8529 = vrcp.f32 %v3840_v13  ;;  %v3938_v46 = vpack.c.bf16 %v3926_v37, %v3925_v10 }
 0x897   : > { %v3789_v16 = vsub.f32 %v11846_v0, %v3772_v5 }
 0x899   : > { %v11994_v25 = vpop.eup %8527  ;;  %v3819_v11 = vmul.f32 1.442695, %v3789_v16 }
 0x89a   : > { %4336 = vadd.xlane.f32.xlu1 %v11994_v25 }
 0x89b   : > { %8531 = vpow2.f32 %v3819_v11 }
 0x89c   : > { %v8530_v53 = vpop.eup %8529 }
 0x89d   : > { %v3879_v30 = vmul.f32 %v8530_v53, %v3840_v13  ;;  %v12008_v13 = vpop.f32.mrf.mxu0  ;;  %v12011_v28 = vpop.xlane.xlu1 %5194 }
 0x89e   : > { %v3842_v1 = vpop.xlane.xlu0 %3841 }
 0x89f   : > { %8533 = vrcp.f32 %v3842_v1  ;;  %v3895_v0 = vsub.f32 2.0, %v3879_v30 }
 0x8a0   : > { %8535 = vrcp.f32 %v4325_v38  ;;  %3990 = vmatmul.bf16.gmra.mxu0 %v3938_v46 }
 0x8a1   : > { %v11999_v33 = vpop.eup %8531  ;;  %v3911_v54 = vmul.f32 %v8530_v53, %v3895_v0  ;;  %v12021_v53 = vpop.f32.mrf.mxu2 }
 0x8a2   : > { %3851 = vadd.xlane.f32.xlu0 %v11999_v33 }
 0x8a3   : > { %v3927_v58 = vmul.f32 %v11843_v4, %v3911_v54 }
 0x8a5   : > { %v8534_v52 = vpop.eup %8533 }
 0x8a6   : > { %v8536_v35 = vpop.eup %8535  ;;  %v3880_v61 = vmul.f32 %v8534_v52, %v3842_v1 }
 0x8a7   : > { %v4323_v29 = vpop.xlane.xlu2 %4322  ;;  %v4363_v34 = vmul.f32 %v8536_v35, %v4325_v38 }
 0x8a8   : > { %v3896_v26 = vsub.f32 2.0, %v3880_v61  ;;  %8537 = vrcp.f32 %v4323_v29 }
 0x8a9   : > { %v4379_v14 = vsub.f32 2.0, %v4363_v34 }
 0x8aa   : > { %v3912_v23 = vmul.f32 %v8534_v52, %v3896_v26 }
 0x8ab   : > { %v4395_v5 = vmul.f32 %v8536_v35, %v4379_v14 }
 0x8ac   : > { %v3928_v12 = vmul.f32 %v11857_v43, %v3912_v23 }
 0x8ad   : > { %v4327_v43 = vpop.xlane.xlu0 %4326  ;;  %v4411_v10 = vmul.f32 %v11829_v63, %v4395_v5 }
 0x8ae   : > { %v8538_v48 = vpop.eup %8537  ;;  %v3939_v19 = vpack.c.bf16 %v3928_v12, %v3927_v58 }
 0x8af   : > { %v4362_v45 = vmul.f32 %v8538_v48, %v4323_v29  ;;  %v3774_v2 = vpop.xlane.xlu2 %3773  ;;  %v12034_v29 = vpop.f32.mrf.mxu2 }
 0x8b0   : > { %v3790_v36 = vsub.f32 %v11881_v7, %v3774_v2  ;;  %3995 = vmatmul.bf16.gmra.mxu0 %v3939_v19  ;;  %v12040_v2 = vpop.f32.mrf.mxu0 }
 0x8b1   : > { %v4378_v16 = vsub.f32 2.0, %v4362_v45 }
 0x8b2   : > { %v3821_v38 = vmul.f32 1.442695, %v3790_v36 }
 0x8b3   : > { %v4394_v4 = vmul.f32 %v8538_v48, %v4378_v16  ;;  %5406 = vrot.lane.b32.xlu1 %v13926_v32, %s9339_s19 }
 0x8b4   : > { %8539 = vpow2.f32 %v3821_v38 }
 0x8b5   : > { %v4410_v11 = vmul.f32 %v11871_v47, %v4394_v4  ;;  %8541 = vrcp.f32 %v4327_v43  ;;  %v12028_v47 = vpop.xlane.xlu1 %4709  ;;  %v12032_v0 = vpop.xlane.xlu0 %4711 }
 0x8b6   : > { %5404 = vrot.lane.b32.xlu0 %v13927_v56, %s9339_s19 }
 0x8b7   : > { %v12019_v7 = vpop.xlane.xlu2 %5192  ;;  %v4422_v37 = vpack.c.bf16 %v4411_v10, %v4410_v11  ;;  %v12044_v4 = vpop.f32.mrf.mxu2 }
 0x8b9   : > { %4478 = vmatmul.bf16.gmra.mxu2 %v4422_v37 }
 0x8ba   : > { %v12023_v1 = vpop.eup %8539 }
 0x8bb   : > { %3853 = vadd.xlane.f32.xlu2 %v12023_v1  ;;  %5402 = vrot.lane.b32.xlu1 %v13929_v62, %s9339_s19  ;;  %v8542_v63 = vpop.eup %8541 }
 0x8bc   : > { %v4364_v30 = vmul.f32 %v8542_v63, %v4327_v43 }
 0x8bd   : > { %v12036_v14 = vpop.xlane.xlu0 %5196 }
 0x8be   : > { %4921 = vrot.lane.b32.xlu0 %v13927_v56, %s9338_s26  ;;  %v4380_v52 = vsub.f32 2.0, %v4364_v30  ;;  %v12052_v30 = vpop.f32.mrf.mxu0 }
 0x8bf   : > { %v4329_v46 = vpop.xlane.xlu2 %4328 }
 0x8c0   : > { %8543 = vrcp.f32 %v4329_v46  ;;  %v4396_v34 = vmul.f32 %v8542_v63, %v4380_v52  ;;  %v5167_v52 = vpop.f32.mrf.mxu1 }
 0x8c2   : > { %v4412_v48 = vmul.f32 %v11877_v31, %v4396_v34 }
 0x8c5   : > { %v3846_v35 = vpop.xlane.xlu1 %3845 }
 0x8c6   : > { %v8544_v61 = vpop.eup %8543  ;;  %8545 = vrcp.f32 %v3846_v35 }
 0x8c7   : > { %v4365_v54 = vmul.f32 %v8544_v61, %v4329_v46  ;;  %v3844_v26 = vpop.xlane.xlu2 %3843 }
 0x8c8   : > { %8547 = vrcp.f32 %v3844_v26 }
 0x8c9   : > { %v4381_v23 = vsub.f32 2.0, %v4365_v54 }
 0x8cb   : > { %v4397_v58 = vmul.f32 %v8544_v61, %v4381_v23 }
 0x8cc   : > { %v8546_v12 = vpop.eup %8545 }
 0x8cd   : > { %v3882_v56 = vmul.f32 %v8546_v12, %v3846_v35  ;;  %v4413_v19 = vmul.f32 %v11906_v15, %v4397_v58 }
 0x8ce   : > { %v8548_v45 = vpop.eup %8547 }
 0x8cf   : > { %v3898_v36 = vsub.f32 2.0, %v3882_v56  ;;  %v3881_v5 = vmul.f32 %v8548_v45, %v3844_v26  ;;  %v12042_v16 = vpop.xlane.xlu2 %5198  ;;  %v4423_v38 = vpack.c.bf16 %v4413_v19, %v4412_v48  ;;  %v5169_v26 = vpop.f32.mrf.mxu1 }
 0x8d0   : > { %v12065_v58 = vadd.f32 %v11739_v59, %v5169_v26 }
 0x8d1   : > { %v3914_v43 = vmul.f32 %v8546_v12, %v3898_v36  ;;  %v3897_v11 = vsub.f32 2.0, %v3881_v5  ;;  %4483 = vmatmul.bf16.gmra.mxu2 %v4423_v38  ;;  %v4684_v12 = vpop.f32.mrf.mxu3 }
 0x8d2   : > { %v12076_v38 = vadd.f32 %v11739_v59, %v4684_v12 }
 0x8d3   : > { %v3913_v10 = vmul.f32 %v8548_v45, %v3897_v11  ;;  %4923 = vrot.lane.b32.xlu2 %v13926_v32, %s9338_s26  ;;  %v3930_v37 = vmul.f32 %v11914_v55, %v3914_v43  ;;  %v5225_v32 = vsub.f32 %v11855_v18, %v12011_v28  ;;  %v12059_v55 = vadd.f32 %v11739_v59, %v5167_v52  ;;  %v12067_v28 = vpop.f32.mrf.mxu0 }
 0x8d4   : > { %v4333_v31 = vpop.xlane.xlu0 %4332  ;;  %13934 = vst [vmem:[#allocation95_spill] sm:$0xff] %v12067_v28 }
 0x8d5   : > { %v3929_v15 = vmul.f32 %v11917_v39, %v3913_v10  ;;  %v5242_v39 = vmul.f32 1.442695, %v5225_v32  ;;  %v5224_v32 = vsub.f32 %v11894_v20, %v12019_v7 }
 0x8d7   : > { %v12050_v63 = vpop.xlane.xlu2 %4713  ;;  %v3940_v46 = vpack.c.bf16 %v3930_v37, %v3929_v15 }
 0x8d9   : > { %4000 = vmatmul.bf16.gmra.mxu0 %v3940_v46  ;;  %v4686_v11 = vpop.f32.mrf.mxu3 }
 0x8da   : > { %v12082_v15 = vadd.f32 %v11739_v59, %v4686_v11  ;;  %v5240_v59 = vmul.f32 1.442695, %v5224_v32 }
 0x8db   : > { %5400 = vrot.lane.b32.xlu2 %v13930_v51, %s9339_s19  ;;  %v12079_v10 = vpop.f32.mrf.mxu0 }
 0x8dc   : > { %v3848_v35 = vpop.xlane.xlu0 %3847  ;;  %13935 = vst [vmem:[#allocation75_spill] sm:$0xff] %v12079_v10 }
 0x8dd   : > { %8549 = vrcp.f32 %v3848_v35 }
 0x8df   : > { %v3850_v61 = vpop.xlane.xlu2 %3849 }
 0x8e0   : > { %8551 = vrcp.f32 %v3850_v61 }
 0x8e1   : > { %8553 = vpow2.f32 %v5242_v39 }
 0x8e2   : > { %8555 = vrcp.f32 %v4333_v31 }
 0x8e3   : > { %v8550_v54 = vpop.eup %8549  ;;  %4919 = vrot.lane.b32.xlu2 %v13929_v62, %s9338_s26 }
 0x8e4   : > { %v3883_v34 = vmul.f32 %v8550_v54, %v3848_v35  ;;  %v12085_v35 = vpop.f32.mrf.mxu2 }
 0x8e5   : > { %5204 = vmax.xlane.f32.xlu1 %v12059_v55 }
 0x8e6   : > { %v8552_v23 = vpop.eup %8551  ;;  %v3899_v18 = vsub.f32 2.0, %v3883_v34 }
 0x8e7   : > { %v3884_v56 = vmul.f32 %v8552_v23, %v3850_v61  ;;  %v12070_v36 = vpop.eup %8553 }
 0x8e8   : > { %5206 = vmax.xlane.f32.xlu0 %v12065_v58  ;;  %v3915_v48 = vmul.f32 %v8550_v54, %v3899_v18  ;;  %v8556_v37 = vpop.eup %8555 }
 0x8e9   : > { %v3900_v19 = vsub.f32 2.0, %v3884_v56 }
 0x8ea   : > { %v3931_v62 = vmul.f32 %v11944_v22, %v3915_v48  ;;  %v4367_v22 = vmul.f32 %v8556_v37, %v4333_v31  ;;  %v13936_v31 = vld [vmem:[#allocation64_spill] sm:$0xff] }
 0x8eb   : > { %v3916_v45 = vmul.f32 %v8552_v23, %v3900_v19  ;;  %v4335_v23 = vpop.xlane.xlu2 %4334  ;;  %v4741_v56 = vsub.f32 %v13936_v31, %v12028_v47  ;;  %v4742_v47 = vsub.f32 %v11889_v21, %v12032_v0  ;;  %v13940_v0 = vld [vmem:[#allocation59_spill] sm:$0xff] }
 0x8ec   : > { %v12099_v48 = vpop.f32.mrf.mxu2 }
 0x8ed   : > { %5274 = vadd.xlane.f32.xlu1 %v12070_v36  ;;  %v3932_v5 = vmul.f32 %v11947_v50, %v3916_v45  ;;  %v4383_v50 = vsub.f32 2.0, %v4367_v22  ;;  %13937 = vst [vmem:[#allocation74_spill] sm:$0xff] %v12099_v48  ;;  %v4757_v19 = vmul.f32 1.442695, %v4741_v56  ;;  %v4759_v11 = vmul.f32 1.442695, %v4742_v47 }
 0x8ef   : > { %v3941_v43 = vpack.c.bf16 %v3932_v5, %v3931_v62  ;;  %v4399_v54 = vmul.f32 %v8556_v37, %v4383_v50  ;;  %v12108_v5 = vpop.xlane.xlu0 %5202 }
 0x8f0   : > { %4721 = vmax.xlane.f32.xlu0 %v12076_v38 }
 0x8f1   : > { %4005 = vmatmul.bf16.gmra.mxu0 %v3941_v43  ;;  %v4415_v18 = vmul.f32 %v11931_v24, %v4399_v54  ;;  %v13938_v24 = vld [vmem:[#allocation61_spill] sm:$0xff] }
 0x8f3   : > { %v12130_v31 = vpop.xlane.xlu2 %4719 }
 0x8f4   : > { %v12117_v50 = vpop.f32.mrf.mxu2 }
 0x8f5   : > { %v4331_v46 = vpop.xlane.xlu1 %4330  ;;  %4723 = vmax.xlane.f32.xlu1 %v12082_v15  ;;  %13939 = vst [vmem:[#allocation98_spill] sm:$0xff] %v12117_v50 }
 0x8f6   : > { %8557 = vrcp.f32 %v4331_v46 }
 0x8f7   : > { %8559 = vpow2.f32 %v5240_v59  ;;  %v12121_v32 = vpop.xlane.xlu0 %4717 }
 0x8f8   : > { %8561 = vrcp.f32 %v4335_v23 }
 0x8f9   : > { %8563 = vpow2.f32 %v4757_v19 }
 0x8fc   : > { %v8558_v52 = vpop.eup %8557 }
 0x8fd   : > { %v4366_v61 = vmul.f32 %v8558_v52, %v4331_v46  ;;  %v12089_v39 = vpop.xlane.xlu1 %4715  ;;  %v12101_v45 = vpop.eup %8559 }
 0x8ff   : > { %v4382_v26 = vsub.f32 2.0, %v4366_v61 }
 0x901   : > { %v4398_v34 = vmul.f32 %v8558_v52, %v4382_v26 }
 0x903   : > { %v4414_v12 = vmul.f32 %v11975_v60, %v4398_v34  ;;  %v8562_v60 = vpop.eup %8561 }
 0x904   : > { %5398 = vrot.lane.b32.xlu0 %v13931_v49, %s9339_s19  ;;  %v4368_v43 = vmul.f32 %v8562_v60, %v4335_v23  ;;  %v12112_v37 = vpop.eup %8563  ;;  %v12128_v23 = vpop.f32.mrf.mxu2 }
 0x905   : > { %v12097_v20 = vpop.xlane.xlu1 %5200  ;;  %v4424_v7 = vpack.c.bf16 %v4415_v18, %v4414_v12  ;;  %13941 = vst [vmem:[#allocation80_spill] sm:$0xff] %v12128_v23 }
 0x906   : > { %v4384_v46 = vsub.f32 2.0, %v4368_v43 }
 0x907   : > { %4488 = vmatmul.bf16.gmra.mxu2 %v4424_v7 }
 0x908   : > { %v4400_v52 = vmul.f32 %v8562_v60, %v4384_v46 }
 0x90a   : > { %v4416_v26 = vmul.f32 %v11955_v27, %v4400_v52  ;;  %v5172_v27 = vpop.f32.mrf.mxu1  ;;  %v5227_v52 = vsub.f32 %v11926_v9, %v12042_v16 }
 0x90c   : > { %5272 = vadd.xlane.f32.xlu2 %v12101_v45  ;;  %5396 = vrot.lane.b32.xlu0 %v13938_v24, %s9339_s19 }
 0x90d   : > { %v4337_v62 = vpop.xlane.xlu1 %4336 }
 0x90e   : > { %8565 = vrcp.f32 %v4337_v62  ;;  %4917 = vrot.lane.b32.xlu1 %v13930_v51, %s9338_s26 }
 0x90f   : > { %8567 = vpow2.f32 %v4759_v11 }
 0x914   : > { %v8566_v22 = vpop.eup %8565  ;;  %4789 = vadd.xlane.f32.xlu2 %v12112_v37  ;;  %4913 = vrot.lane.b32.xlu0 %v13938_v24, %s9338_s26 }
 0x915   : > { %v4369_v21 = vmul.f32 %v8566_v22, %v4337_v62  ;;  %v12123_v54 = vpop.eup %8567  ;;  %v3852_v12 = vpop.xlane.xlu0 %3851 }
 0x916   : > { %5394 = vrot.lane.b32.xlu1 %v13940_v0, %s9339_s19  ;;  %8569 = vrcp.f32 %v3852_v12  ;;  %v12134_v62 = vpop.f32.mrf.mxu0 }
 0x917   : > { %v4385_v51 = vsub.f32 2.0, %v4369_v21  ;;  %13942 = vst [vmem:[#allocation78_spill] sm:$0xff] %v12134_v62  ;;  %v5174_v21 = vpop.f32.mrf.mxu1 }
 0x919   : > { %v4401_v61 = vmul.f32 %v8566_v22, %v4385_v51 }
 0x91b   : > { %v4417_v59 = vmul.f32 %v11994_v25, %v4401_v61 }
 0x91c   : > { %4791 = vadd.xlane.f32.xlu2 %v12123_v54  ;;  %v8570_v7 = vpop.eup %8569 }
 0x91d   : > { %v4425_v34 = vpack.c.bf16 %v4417_v59, %v4416_v26  ;;  %v3885_v25 = vmul.f32 %v8570_v7, %v3852_v12  ;;  %v12139_v26 = vld [vmem:[%s9760_s1] ss:$0 sm:$0xff] }
 0x91e   : > { %v12142_v59 = vadd.f32 %v12139_v26, %v5174_v21 }
 0x91f   : > { %4493 = vmatmul.bf16.gmra.mxu2 %v4425_v34  ;;  %v3901_v24 = vsub.f32 2.0, %v3885_v25 }
 0x921   : > { %v3917_v46 = vmul.f32 %v8570_v7, %v3901_v24  ;;  %v12152_v7 = vpop.f32.mrf.mxu0 }
 0x922   : > { %13944 = vst [vmem:[#allocation86_spill] sm:$0xff] %v12152_v7 }
 0x923   : > { %v3933_v34 = vmul.f32 %v11999_v33, %v3917_v46  ;;  %v5226_v46 = vsub.f32 %v11902_v40, %v12036_v14 }
 0x925   : > { %v5407_v18 = vpop.permute.xlu1 %5406 }
 0x926   : > { %5416 = vmatpush.bf16.msra.mxu2 %v5407_v18  ;;  %v5246_v18 = vmul.f32 1.442695, %v5227_v52 }
 0x928   : > { %v5405_v56 = vpop.permute.xlu0 %5404 }
 0x92a   : > { %5417 = vmatpush.bf16.msra.mxu2 %v5405_v56  ;;  %v12149_v56 = vadd.f32 %v12139_v26, %v5172_v27  ;;  %v4743_v27 = vsub.f32 %v11935_v3, %v12050_v63  ;;  %v5228_v3 = vsub.f32 %v11990_v6, %v12097_v20  ;;  %v5177_v6 = vpop.f32.mrf.mxu1  ;;  %v4745_v20 = vsub.f32 %v11961_v8, %v12121_v32 }
 0x92b   : > { %v12205_v32 = vadd.f32 %v12139_v26, %v5177_v6 }
 0x92c   : > { %v4761_v24 = vmul.f32 1.442695, %v4743_v27  ;;  %v5248_v63 = vmul.f32 1.442695, %v5228_v3  ;;  %v4765_v14 = vmul.f32 1.442695, %v4745_v20  ;;  %v4746_v3 = vsub.f32 %v11967_v17, %v12130_v31 }
 0x92d   : > { %v5403_v19 = vpop.permute.xlu1 %5402 }
 0x92e   : > { %v3854_v60 = vpop.xlane.xlu2 %3853  ;;  %5418 = vmatpush.bf16.msra.mxu2 %v5403_v19  ;;  %v4689_v19 = vpop.f32.mrf.mxu3 }
 0x92f   : > { %8571 = vrcp.f32 %v3854_v60  ;;  %v12156_v33 = vadd.f32 %v12139_v26, %v4689_v19 }
 0x930   : > { %v4922_v61 = vpop.permute.xlu0 %4921  ;;  %8573 = vpow2.f32 %v5246_v18 }
 0x931   : > { %8575 = vpow2.f32 %v4761_v24 }
 0x932   : > { %v5179_v18 = vpop.f32.mrf.mxu1 }
 0x933   : > { %v12230_v20 = vadd.f32 %v12139_v26, %v5179_v18 }
 0x934   : > { %4915 = vrot.lane.b32.xlu2 %v13931_v49, %s9338_s26  ;;  %v13943_v49 = vld [vmem:[#allocation56_spill] sm:$0xff] }
 0x935   : > { %v8572_v47 = vpop.eup %8571 }
 0x936   : > { %v3886_v43 = vmul.f32 %v8572_v47, %v3854_v60  ;;  %v4924_v11 = vpop.permute.xlu2 %4923  ;;  %v12161_v60 = vpop.eup %8573 }
 0x937   : > { %4933 = vmatpush.bf16.msra.mxu0 %v4924_v11  ;;  %v4691_v25 = vpop.f32.mrf.mxu3  ;;  %v12172_v11 = vpop.eup %8575 }
 0x938   : > { %v3902_v22 = vsub.f32 2.0, %v3886_v43 }
 0x93a   : > { %v3918_v51 = vmul.f32 %v8572_v47, %v3902_v22  ;;  %v12167_v47 = vadd.f32 %v12139_v26, %v4691_v25  ;;  %v5182_v25 = vpop.f32.mrf.mxu1 }
 0x93b   : > { %4934 = vmatpush.bf16.msra.mxu0 %v4922_v61 }
 0x93c   : > { %5392 = vrot.lane.b32.xlu2 %v13943_v49, %s9339_s19  ;;  %v3934_v12 = vmul.f32 %v12023_v1, %v3918_v51 }
 0x93e   : > { %v5401_v9 = vpop.permute.xlu2 %5400  ;;  %5210 = vmax.xlane.f32.xlu0 %v12142_v59  ;;  %v3942_v16 = vpack.c.bf16 %v3934_v12, %v3933_v34 }
 0x93f   : > { %5419 = vmatpush.bf16.msra.mxu2 %v5401_v9  ;;  %v4694_v51 = vpop.f32.mrf.mxu3  ;;  %v12208_v9 = vpop.f32.mrf.mxu2 }
 0x940   : > { %5208 = vmax.xlane.f32.xlu1 %v12149_v56  ;;  %4010 = vmatmul.bf16.gmra.mxu0 %v3942_v16  ;;  %v12195_v61 = vadd.f32 %v12139_v26, %v4694_v51  ;;  %13945 = vst [vmem:[#allocation84_spill] sm:$0xff] %v12208_v9  ;;  %v4767_v51 = vmul.f32 1.442695, %v4746_v3 }
 0x944   : > { %4911 = vrot.lane.b32.xlu2 %v13940_v0, %s9338_s26  ;;  %v4744_v0 = vsub.f32 %v11980_v42, %v12089_v39  ;;  %v5244_v42 = vmul.f32 1.442695, %v5226_v46 }
 0x946   : > { %v4920_v1 = vpop.permute.xlu2 %4919  ;;  %4725 = vmax.xlane.f32.xlu0 %v12156_v33  ;;  %v4763_v43 = vmul.f32 1.442695, %v4744_v0 }
 0x947   : > { %4935 = vmatpush.bf16.msra.mxu0 %v4920_v1  ;;  %v4696_v1 = vpop.f32.mrf.mxu3 }
 0x948   : > { %5278 = vadd.xlane.f32.xlu1 %v12161_v60  ;;  %8577 = vpow2.f32 %v4763_v43  ;;  %v12220_v43 = vadd.f32 %v12139_v26, %v5182_v25 }
 0x949   : > { %8579 = vpow2.f32 %v5248_v63 }
 0x94a   : > { %8581 = vpow2.f32 %v5244_v42  ;;  %v12224_v42 = vpop.f32.mrf.mxu2 }
 0x94b   : > { %8583 = vpow2.f32 %v4765_v14  ;;  %13947 = vst [vmem:[#allocation88_spill] sm:$0xff] %v12224_v42  ;;  %v12233_v14 = vadd.f32 %v12139_v26, %v4696_v1 }
 0x94e   : > { %v12181_v22 = vpop.eup %8577 }
 0x94f   : > { %v12186_v52 = vpop.eup %8579 }
 0x950   : > { %4727 = vmax.xlane.f32.xlu1 %v12167_v47  ;;  %v12191_v40 = vpop.eup %8581 }
 0x951   : > { %v12210_v19 = vpop.eup %8583 }
 0x958   : > { %4793 = vadd.xlane.f32.xlu1 %v12172_v11  ;;  %v5205_v39 = vpop.xlane.xlu1 %5204 }
 0x959   : > { %v5230_v27 = vsub.f32 %v12059_v55, %v5205_v39  ;;  %v4699_v55 = vpop.f32.mrf.mxu3 }
 0x95a   : > { %4909 = vrot.lane.b32.xlu0 %v13943_v49, %s9338_s26  ;;  %v5229_v49 = vsub.f32 %v11951_v41, %v12108_v5  ;;  %v12212_v41 = vpop.f32.mrf.mxu0 }
 0x95b   : > { %v12184_v21 = vpop.xlane.xlu0 %5206  ;;  %13946 = vst [vmem:[#allocation87_spill] sm:$0xff] %v12212_v41  ;;  %v5252_v0 = vmul.f32 1.442695, %v5230_v27  ;;  %v12248_v27 = vadd.f32 %v12139_v26, %v4699_v55 }
 0x95c   : > { %v5250_v8 = vmul.f32 1.442695, %v5229_v49 }
 0x95e   : > { %8585 = vpow2.f32 %v5250_v8  ;;  %v12242_v8 = vpop.f32.mrf.mxu2 }
 0x95f   : > { %8587 = vpow2.f32 %v5252_v0  ;;  %13949 = vst [vmem:[#allocation91_spill] sm:$0xff] %v12242_v8 }
 0x960   : > { %4795 = vadd.xlane.f32.xlu1 %v12181_v22  ;;  %v12199_v34 = vpop.xlane.xlu1 %5274  ;;  %8589 = vpow2.f32 %v4767_v51 }
 0x962   : > { %v12227_v39 = vpop.f32.mrf.mxu0 }
 0x963   : > { %v12201_v12 = vpop.xlane.xlu0 %4721  ;;  %13948 = vst [vmem:[#allocation89_spill] sm:$0xff] %v12227_v39 }
 0x964   : > { %v12216_v24 = vpop.eup %8585 }
 0x965   : > { %v12238_v31 = vpop.eup %8587 }
 0x966   : > { %v12251_v25 = vpop.eup %8589 }
 0x968   : > { %5280 = vadd.xlane.f32.xlu1 %v12186_v52  ;;  %v4724_v5 = vpop.xlane.xlu1 %4723 }
 0x969   : > { %v4748_v17 = vsub.f32 %v12082_v15, %v4724_v5  ;;  %v4701_v15 = vpop.f32.mrf.mxu3  ;;  %v5184_v5 = vpop.f32.mrf.mxu1 }
 0x96a   : > { %v12245_v1 = vpop.f32.mrf.mxu0  ;;  %v12256_v3 = vadd.f32 %v12139_v26, %v4701_v15 }
 0x96b   : > { %13950 = vst [vmem:[#allocation96_spill] sm:$0xff] %v12245_v1 }
 0x96d   : > { %5276 = vadd.xlane.f32.xlu2 %v12191_v40 }
 0x970   : > { %4729 = vmax.xlane.f32.xlu1 %v12195_v61 }
 0x971   : > { %v5187_v8 = vpop.f32.mrf.mxu1 }
 0x975   : > { %5212 = vmax.xlane.f32.xlu2 %v12205_v32 }
 0x976   : > { %v5399_v16 = vpop.permute.xlu0 %5398 }
 0x977   : > { %5420 = vmatpush.bf16.msra.mxu2 %v5399_v16  ;;  %v4771_v16 = vmul.f32 1.442695, %v4748_v17  ;;  %v12263_v17 = vpop.f32.mrf.mxu2 }
 0x978   : > { %4797 = vadd.xlane.f32.xlu1 %v12210_v19  ;;  %13951 = vst [vmem:[#allocation68_spill] sm:$0xff] %v12263_v17 }
 0x97d   : > { %5282 = vadd.xlane.f32.xlu2 %v12216_v24 }
 0x97e   : > { %v5397_v63 = vpop.permute.xlu0 %5396 }
 0x97f   : > { %v5273_v46 = vpop.xlane.xlu2 %5272  ;;  %5421 = vmatpush.bf16.msra.mxu2 %v5397_v63  ;;  %v5231_v63 = vsub.f32 %v12065_v58, %v12184_v21  ;;  %v12272_v58 = vpop.f32.mrf.mxu0 }
 0x980   : > { %v4918_v6 = vpop.permute.xlu1 %4917  ;;  %5216 = vmax.xlane.f32.xlu1 %v12220_v43  ;;  %8591 = vrcp.f32 %v5273_v46  ;;  %13952 = vst [vmem:[#allocation79_spill] sm:$0xff] %v12272_v58 }
 0x981   : > { %4936 = vmatpush.bf16.msra.mxu0 %v4918_v6  ;;  %8593 = vrcp.f32 %v12199_v34 }
 0x982   : > { %8595 = vpow2.f32 %v4771_v16  ;;  %v12268_v16 = vadd.f32 %v12139_v26, %v5184_v5 }
 0x984   : > { %5214 = vmax.xlane.f32.xlu0 %v12230_v20 }
 0x985   : > { %4731 = vmax.xlane.f32.xlu2 %v12233_v14 }
 0x986   : > { %v8592_v0 = vpop.eup %8591  ;;  %v4914_v39 = vpop.permute.xlu0 %4913 }
 0x987   : > { %v12240_v49 = vpop.xlane.xlu2 %4789  ;;  %v8594_v55 = vpop.eup %8593  ;;  %v5320_v51 = vmul.f32 %v8592_v0, %v5273_v46  ;;  %v12276_v46 = vadd.f32 %v12139_v26, %v5187_v8 }
 0x988   : > { %v5395_v18 = vpop.permute.xlu1 %5394  ;;  %5284 = vadd.xlane.f32.xlu1 %v12238_v31  ;;  %v12265_v1 = vpop.eup %8595  ;;  %v5321_v15 = vmul.f32 %v8594_v55, %v12199_v34 }
 0x989   : > { %5422 = vmatpush.bf16.msra.mxu2 %v5395_v18  ;;  %v5254_v18 = vmul.f32 1.442695, %v5231_v63  ;;  %v5336_v21 = vsub.f32 2.0, %v5320_v51  ;;  %v4747_v63 = vsub.f32 %v12076_v38, %v12201_v12  ;;  %v12283_v51 = vpop.f32.mrf.mxu2  ;;  %v12285_v8 = vpop.f32.mrf.mxu0 }
 0x98a   : > { %v5337_v17 = vsub.f32 2.0, %v5321_v15  ;;  %13953 = vst [vmem:[#allocation83_spill] sm:$0xff] %v12283_v51 }
 0x98b   : > { %8597 = vpow2.f32 %v5254_v18  ;;  %v5352_v34 = vmul.f32 %v8592_v0, %v5336_v21  ;;  %v4769_v42 = vmul.f32 1.442695, %v4747_v63  ;;  %13954 = vst [vmem:[#allocation85_spill] sm:$0xff] %v12285_v8  ;;  %v5189_v21 = vpop.f32.mrf.mxu1 }
 0x98c   : > { %4733 = vmax.xlane.f32.xlu0 %v12248_v27  ;;  %v5353_v41 = vmul.f32 %v8594_v55, %v5337_v17 }
 0x98d   : > { %4799 = vadd.xlane.f32.xlu2 %v12251_v25  ;;  %v5368_v18 = vmul.f32 %v12101_v45, %v5352_v34  ;;  %8599 = vpow2.f32 %v4769_v42  ;;  %v12298_v45 = vadd.f32 %v12139_v26, %v5189_v21  ;;  %v4704_v42 = vpop.f32.mrf.mxu3 }
 0x98e   : > { %v5369_v38 = vmul.f32 %v12070_v36, %v5353_v41  ;;  %v12307_v34 = vadd.f32 %v12139_v26, %v4704_v42 }
 0x98f   : > { %v12260_v6 = vpop.xlane.xlu2 %4791 }
 0x990   : > { %4735 = vmax.xlane.f32.xlu1 %v12256_v3  ;;  %v5384_v0 = vpack.c.bf16 %v5369_v38, %v5368_v18  ;;  %8601 = vrcp.f32 %v12260_v6 }
 0x991   : > { %v12281_v58 = vpop.eup %8597  ;;  %v12293_v17 = vpop.f32.mrf.mxu2 }
 0x992   : > { %13955 = vst [vmem:[#allocation97_spill] sm:$0xff] %v12293_v17 }
 0x993   : > { %v12290_v55 = vpop.eup %8599 }
 0x994   : > { %4803 = vadd.xlane.f32.xlu0 %v12265_v1 }
 0x995   : > { %5218 = vmax.xlane.f32.xlu2 %v12268_v16 }
 0x997   : > { %v4916_v5 = vpop.permute.xlu2 %4915 }
 0x998   : > { %5220 = vmax.xlane.f32.xlu1 %v12276_v46  ;;  %4937 = vmatpush.bf16.msra.mxu0 %v4916_v5 }
 0x999   : > { %v12301_v36 = vpop.f32.mrf.mxu2 }
 0x99a   : > { %13957 = vst [vmem:[#allocation82_spill] sm:$0xff] %v12301_v36 }
 0x99c   : > { %4938 = vmatpush.bf16.msra.mxu0 %v4914_v39  ;;  %v12295_v39 = vpop.f32.mrf.mxu0 }
 0x99d   : > { %5286 = vadd.xlane.f32.xlu2 %v12281_v58  ;;  %13956 = vst [vmem:[#allocation57_spill] sm:$0xff] %v12295_v39 }
 0x99f   : > { %v5393_v12 = vpop.permute.xlu2 %5392 }
 0x9a0   : > { %5423 = vmatpush.bf16.msra.mxu2 %v5393_v12 }
 0x9a3   : > { %5424 = vmatmul.bf16.vlgmr.msra.gmra.mxu2 %v5384_v0 }
 0x9a4   : > { %v12303_v41 = vpop.f32.mrf.mxu0 }
 0x9a5   : > { %4801 = vadd.xlane.f32.xlu2 %v12290_v55  ;;  %13958 = vst [vmem:[#allocation54_spill] sm:$0xff] %v12303_v41 }
 0x9a7   : > { %v4912_v15 = vpop.permute.xlu2 %4911 }
 0x9a8   : > { %4939 = vmatpush.bf16.msra.mxu0 %v4912_v15  ;;  %v12313_v15 = vpop.f32.mrf.mxu2 }
 0x9a9   : > { %13959 = vst [vmem:[#allocation55_spill] sm:$0xff] %v12313_v15 }
 0x9ac   : > { %v12315_v21 = vpop.f32.mrf.mxu0 }
 0x9ad   : > { %5222 = vmax.xlane.f32.xlu2 %v12298_v45  ;;  %13960 = vst [vmem:[#allocation58_spill] sm:$0xff] %v12315_v21 }
 0x9b1   : > { %v5211_v63 = vpop.xlane.xlu0 %5210 }
 0x9b2   : > { %v5233_v5 = vsub.f32 %v12142_v59, %v5211_v63  ;;  %v8602_v63 = vpop.eup %8601 }
 0x9b3   : > { %v5209_v18 = vpop.xlane.xlu1 %5208 }
 0x9b4   : > { %v5258_v38 = vmul.f32 1.442695, %v5233_v5  ;;  %v5232_v12 = vsub.f32 %v12149_v56, %v5209_v18 }
 0x9b5   : > { %4737 = vmax.xlane.f32.xlu2 %v12307_v34 }
 0x9b6   : > { %8603 = vpow2.f32 %v5258_v38  ;;  %v5256_v0 = vmul.f32 1.442695, %v5232_v12  ;;  %v4838_v12 = vmul.f32 %v8602_v63, %v12260_v6 }
 0x9b7   : > { %8605 = vrcp.f32 %v12240_v49 }
 0x9b8   : > { %8607 = vpow2.f32 %v5256_v0  ;;  %v12325_v0 = vpop.f32.mrf.mxu2  ;;  %v4854_v41 = vsub.f32 2.0, %v4838_v12 }
 0x9b9   : > { %v4726_v59 = vpop.xlane.xlu0 %4725 }
 0x9ba   : > { %v4749_v42 = vsub.f32 %v12156_v33, %v4726_v59  ;;  %v12328_v33 = vpop.f32.mrf.mxu0  ;;  %v4706_v59 = vpop.f32.mrf.mxu3  ;;  %v4870_v6 = vmul.f32 %v8602_v63, %v4854_v41 }
 0x9bb   : > { %v5279_v5 = vpop.xlane.xlu1 %5278  ;;  %v12334_v8 = vadd.f32 %v12139_v26, %v4706_v59 }
 0x9bc   : > { %v12318_v36 = vpop.eup %8603  ;;  %v4773_v56 = vmul.f32 1.442695, %v4749_v42  ;;  %v4886_v12 = vmul.f32 %v12123_v54, %v4870_v6 }
 0x9bd   : > { %v8606_v18 = vpop.eup %8605  ;;  %5290 = vadd.xlane.f32.xlu1 %v12318_v36 }
 0x9be   : > { %v12321_v38 = vpop.eup %8607  ;;  %8609 = vpow2.f32 %v4773_v56  ;;  %v4837_v15 = vmul.f32 %v8606_v18, %v12240_v49 }
 0x9bf   : > { %5288 = vadd.xlane.f32.xlu0 %v12321_v38 }
 0x9c0   : > { %v4853_v17 = vsub.f32 2.0, %v4837_v15  ;;  %v12338_v39 = vpop.f32.mrf.mxu2 }
 0x9c2   : > { %v4869_v49 = vmul.f32 %v8606_v18, %v4853_v17  ;;  %v12341_v9 = vpop.f32.mrf.mxu0 }
 0x9c3   : > { %v4728_v21 = vpop.xlane.xlu1 %4727 }
 0x9c4   : > { %v12330_v42 = vpop.eup %8609  ;;  %v4750_v51 = vsub.f32 %v12167_v47, %v4728_v21  ;;  %v4885_v47 = vmul.f32 %v12112_v37, %v4869_v49 }
 0x9c5   : > { %4805 = vadd.xlane.f32.xlu1 %v12330_v42 }
 0x9c6   : > { %v4775_v56 = vmul.f32 1.442695, %v4750_v51  ;;  %v4901_v41 = vpack.c.bf16 %v4886_v12, %v4885_v47 }
 0x9c7   : > { %4739 = vmax.xlane.f32.xlu0 %v12334_v8 }
 0x9c8   : > { %8611 = vpow2.f32 %v4775_v56  ;;  %v12349_v18 = vpop.f32.mrf.mxu2 }
 0x9ca   : > { %v12347_v17 = vpop.f32.mrf.mxu0 }
 0x9cb   : > { %v4794_v15 = vpop.xlane.xlu1 %4793 }
 0x9cc   : > { %8613 = vrcp.f32 %v4794_v15  ;;  %v4910_v26 = vpop.permute.xlu0 %4909 }
 0x9cd   : > { %4940 = vmatpush.bf16.msra.mxu0 %v4910_v26 }
 0x9ce   : > { %v12344_v21 = vpop.eup %8611 }
 0x9cf   : > { %4807 = vadd.xlane.f32.xlu2 %v12344_v21 }
 0x9d0   : > { %4941 = vmatmul.bf16.vlgmr.msra.gmra.mxu0 %v4901_v41  ;;  %v12353_v47 = vpop.f32.mrf.mxu2 }
 0x9d2   : > { %v8614_v51 = vpop.eup %8613  ;;  %v12351_v49 = vpop.f32.mrf.mxu0 }
 0x9d3   : > { %v4796_v63 = vpop.xlane.xlu1 %4795  ;;  %v4839_v54 = vmul.f32 %v8614_v51, %v4794_v15 }
 0x9d4   : > { %8615 = vrcp.f32 %v4796_v63 }
 0x9d5   : > { %8617 = vrcp.f32 %v5279_v5  ;;  %v4855_v59 = vsub.f32 2.0, %v4839_v54 }
 0x9d7   : > { %v4871_v26 = vmul.f32 %v8614_v51, %v4855_v59 }
 0x9d9   : > { %v4887_v7 = vmul.f32 %v12172_v11, %v4871_v26 }
 0x9da   : > { %v8616_v37 = vpop.eup %8615  ;;  %v12358_v59 = vpop.f32.mrf.mxu0 }
 0x9db   : > { %v4840_v6 = vmul.f32 %v8616_v37, %v4796_v63  ;;  %v5281_v56 = vpop.xlane.xlu1 %5280  ;;  %v8618_v41 = vpop.eup %8617 }
 0x9dc   : > { %v5323_v15 = vmul.f32 %v8618_v41, %v5279_v5 }
 0x9dd   : > { %v4856_v12 = vsub.f32 2.0, %v4840_v6  ;;  %v12360_v6 = vpop.f32.mrf.mxu2 }
 0x9de   : > { %v5339_v28 = vsub.f32 2.0, %v5323_v15  ;;  %13961 = vst [vmem:[#allocation90_spill] sm:$0xff] %v12360_v6 }
 0x9df   : > { %v4872_v23 = vmul.f32 %v8616_v37, %v4856_v12 }
 0x9e0   : > { %v5277_v62 = vpop.xlane.xlu2 %5276 }
 0x9e1   : > { %8619 = vrcp.f32 %v5277_v62  ;;  %v4888_v50 = vmul.f32 %v12181_v22, %v4872_v23  ;;  %v5355_v23 = vmul.f32 %v8618_v41, %v5339_v28 }
 0x9e3   : > { %v4730_v48 = vpop.xlane.xlu1 %4729  ;;  %v4902_v54 = vpack.c.bf16 %v4888_v50, %v4887_v7  ;;  %v5371_v26 = vmul.f32 %v12161_v60, %v5355_v23 }
 0x9e4   : > { %v4751_v63 = vsub.f32 %v12195_v61, %v4730_v48 }
 0x9e5   : > { %4946 = vmatmul.bf16.gmra.mxu0 %v4902_v54  ;;  %v12368_v54 = vpop.f32.mrf.mxu0  ;;  %v12370_v28 = vpop.f32.mrf.mxu2 }
 0x9e6   : > { %v4777_v10 = vmul.f32 1.442695, %v4751_v63 }
 0x9e7   : > { %v8620_v51 = vpop.eup %8619 }
 0x9e8   : > { %v5322_v37 = vmul.f32 %v8620_v51, %v5277_v62  ;;  %8621 = vpow2.f32 %v4777_v10  ;;  %v5213_v12 = vpop.xlane.xlu2 %5212 }
 0x9e9   : > { %8623 = vrcp.f32 %v5281_v56  ;;  %v5234_v11 = vsub.f32 %v12205_v32, %v5213_v12 }
 0x9ea   : > { %v5338_v22 = vsub.f32 2.0, %v5322_v37 }
 0x9eb   : > { %v5260_v5 = vmul.f32 1.442695, %v5234_v11  ;;  %v4798_v50 = vpop.xlane.xlu1 %4797 }
 0x9ec   : > { %v5354_v7 = vmul.f32 %v8620_v51, %v5338_v22 }
 0x9ed   : > { %8625 = vpow2.f32 %v5260_v5  ;;  %v12377_v22 = vpop.f32.mrf.mxu2 }
 0x9ee   : > { %v12363_v48 = vpop.eup %8621  ;;  %v5370_v61 = vmul.f32 %v12191_v40, %v5354_v7 }
 0x9ef   : > { %v8624_v15 = vpop.eup %8623  ;;  %4809 = vadd.xlane.f32.xlu2 %v12363_v48 }
 0x9f0   : > { %v5283_v10 = vpop.xlane.xlu2 %5282  ;;  %v5385_v62 = vpack.c.bf16 %v5371_v26, %v5370_v61  ;;  %v5324_v32 = vmul.f32 %v8624_v15, %v5281_v56  ;;  %v12379_v61 = vpop.f32.mrf.mxu0 }
 0x9f1   : > { %8627 = vrcp.f32 %v5283_v10 }
 0x9f2   : > { %5429 = vmatmul.bf16.gmra.mxu2 %v5385_v62  ;;  %v5340_v40 = vsub.f32 2.0, %v5324_v32  ;;  %8629 = vrcp.f32 %v4798_v50 }
 0x9f3   : > { %v12372_v41 = vpop.eup %8625  ;;  %v5217_v63 = vpop.xlane.xlu1 %5216 }
 0x9f4   : > { %5292 = vadd.xlane.f32.xlu0 %v12372_v41  ;;  %v5356_v5 = vmul.f32 %v8624_v15, %v5340_v40  ;;  %v5236_v26 = vsub.f32 %v12220_v43, %v5217_v63 }
 0x9f7   : > { %v8628_v51 = vpop.eup %8627  ;;  %v5215_v60 = vpop.xlane.xlu0 %5214 }
 0x9f8   : > { %v5325_v37 = vmul.f32 %v8628_v51, %v5283_v10  ;;  %v5235_v12 = vsub.f32 %v12230_v20, %v5215_v60  ;;  %v4732_v11 = vpop.xlane.xlu2 %4731  ;;  %v5372_v20 = vmul.f32 %v12186_v52, %v5356_v5  ;;  %v8630_v60 = vpop.eup %8629 }
 0x9f9   : > { %v4752_v23 = vsub.f32 %v12233_v14, %v4732_v11  ;;  %v5264_v14 = vmul.f32 1.442695, %v5236_v26  ;;  %v4841_v43 = vmul.f32 %v8630_v60, %v4798_v50 }
 0x9fa   : > { %v5341_v56 = vsub.f32 2.0, %v5325_v37  ;;  %v5262_v7 = vmul.f32 1.442695, %v5235_v12 }
 0x9fb   : > { %v4779_v62 = vmul.f32 1.442695, %v4752_v23  ;;  %v5285_v32 = vpop.xlane.xlu1 %5284 }
 0x9fc   : > { %v5357_v6 = vmul.f32 %v8628_v51, %v5341_v56  ;;  %8631 = vpow2.f32 %v5262_v7 }
 0x9fd   : > { %8633 = vpow2.f32 %v4779_v62 }
 0x9fe   : > { %v5373_v10 = vmul.f32 %v12216_v24, %v5357_v6  ;;  %v12392_v24 = vpop.f32.mrf.mxu2  ;;  %v4857_v6 = vsub.f32 2.0, %v4841_v43 }
 0x9ff   : > { %v4734_v11 = vpop.xlane.xlu0 %4733 }
 0xa00   : > { %v4753_v15 = vsub.f32 %v12248_v27, %v4734_v11  ;;  %v4800_v40 = vpop.xlane.xlu2 %4799  ;;  %v5386_v37 = vpack.c.bf16 %v5373_v10, %v5372_v20  ;;  %v12394_v27 = vpop.f32.mrf.mxu0  ;;  %v4873_v10 = vmul.f32 %v8630_v60, %v4857_v6 }
 0xa01   : > { %8635 = vrcp.f32 %v4800_v40 }
 0xa02   : > { %v12385_v12 = vpop.eup %8631  ;;  %v4781_v63 = vmul.f32 1.442695, %v4753_v15  ;;  %5434 = vmatmul.bf16.gmra.mxu2 %v5386_v37  ;;  %8637 = vpow2.f32 %v5264_v14 }
 0xa03   : > { %v12387_v51 = vpop.eup %8633  ;;  %v4736_v23 = vpop.xlane.xlu1 %4735  ;;  %5294 = vadd.xlane.f32.xlu1 %v12385_v12 }
 0xa04   : > { %8639 = vpow2.f32 %v4781_v63  ;;  %v4754_v52 = vsub.f32 %v12256_v3, %v4736_v23  ;;  %4811 = vadd.xlane.f32.xlu0 %v12387_v51 }
 0xa05   : > { %8641 = vrcp.f32 %v5285_v32 }
 0xa06   : > { %v4783_v56 = vmul.f32 1.442695, %v4754_v52 }
 0xa07   : > { %v8636_v5 = vpop.eup %8635  ;;  %v4804_v37 = vpop.xlane.xlu0 %4803 }
 0xa08   : > { %v4842_v50 = vmul.f32 %v8636_v5, %v4800_v40  ;;  %v5219_v7 = vpop.xlane.xlu2 %5218  ;;  %v12396_v26 = vpop.eup %8637  ;;  %8643 = vpow2.f32 %v4783_v56 }
 0xa09   : > { %v5237_v62 = vsub.f32 %v12268_v16, %v5219_v7  ;;  %v12403_v40 = vpop.f32.mrf.mxu2  ;;  %v4889_v16 = vmul.f32 %v12210_v19, %v4873_v10  ;;  %v12408_v23 = vpop.f32.mrf.mxu0 }
 0xa0a   : > { %v12399_v20 = vpop.eup %8639  ;;  %v4858_v3 = vsub.f32 2.0, %v4842_v50  ;;  %13962 = vst [vmem:[#allocation73_spill] sm:$0xff] %v12403_v40 }
 0xa0b   : > { %v5266_v14 = vmul.f32 1.442695, %v5237_v62  ;;  %v5221_v11 = vpop.xlane.xlu1 %5220  ;;  %5296 = vadd.xlane.f32.xlu1 %v12396_v26  ;;  %v8642_v60 = vpop.eup %8641  ;;  %13963 = vst [vmem:[#allocation93_spill] sm:$0xff] %v12408_v23 }
 0xa0c   : > { %v4874_v15 = vmul.f32 %v8636_v5, %v4858_v3  ;;  %4813 = vadd.xlane.f32.xlu0 %v12399_v20  ;;  %v5238_v43 = vsub.f32 %v12276_v46, %v5221_v11  ;;  %v5326_v56 = vmul.f32 %v8642_v60, %v5285_v32 }
 0xa0d   : > { %8645 = vpow2.f32 %v5266_v14 }
 0xa0e   : > { %v4890_v63 = vmul.f32 %v12251_v25, %v4874_v15  ;;  %8647 = vrcp.f32 %v4804_v37  ;;  %v5268_v5 = vmul.f32 1.442695, %v5238_v43  ;;  %v12410_v50 = vpop.eup %8643  ;;  %v5342_v25 = vsub.f32 2.0, %v5326_v56 }
 0xa10   : > { %v5287_v52 = vpop.xlane.xlu2 %5286  ;;  %v4903_v6 = vpack.c.bf16 %v4890_v63, %v4889_v16  ;;  %v5358_v11 = vmul.f32 %v8642_v60, %v5342_v25 }
 0xa11   : > { %8649 = vrcp.f32 %v5287_v52  ;;  %v12416_v62 = vpop.f32.mrf.mxu2  ;;  %v12418_v14 = vpop.f32.mrf.mxu0 }
 0xa12   : > { %4951 = vmatmul.bf16.gmra.mxu0 %v4903_v6  ;;  %8651 = vpow2.f32 %v5268_v5  ;;  %13964 = vst [vmem:[#allocation77_spill] sm:$0xff] %v12416_v62  ;;  %v5374_v6 = vmul.f32 %v12238_v31, %v5358_v11 }
 0xa13   : > { %v12412_v7 = vpop.eup %8645  ;;  %4815 = vadd.xlane.f32.xlu1 %v12410_v50  ;;  %13965 = vst [vmem:[#allocation60_spill] sm:$0xff] %v12418_v14 }
 0xa14   : > { %5298 = vadd.xlane.f32.xlu2 %v12412_v7  ;;  %v8648_v19 = vpop.eup %8647 }
 0xa15   : > { %v4844_v32 = vmul.f32 %v8648_v19, %v4804_v37 }
 0xa17   : > { %v8650_v46 = vpop.eup %8649  ;;  %v4860_v63 = vsub.f32 2.0, %v4844_v32 }
 0xa18   : > { %v5327_v10 = vmul.f32 %v8650_v46, %v5287_v52  ;;  %v4802_v3 = vpop.xlane.xlu2 %4801  ;;  %v12420_v43 = vpop.eup %8651 }
 0xa19   : > { %8653 = vrcp.f32 %v4802_v3  ;;  %v12425_v40 = vpop.f32.mrf.mxu2  ;;  %v12427_v14 = vpop.f32.mrf.mxu0  ;;  %v4876_v60 = vmul.f32 %v8648_v19, %v4860_v63 }
 0xa1a   : > { %v5343_v15 = vsub.f32 2.0, %v5327_v10 }
 0xa1c   : > { %v5359_v16 = vmul.f32 %v8650_v46, %v5343_v15  ;;  %5300 = vadd.xlane.f32.xlu2 %v12420_v43 }
 0xa1e   : > { %v5375_v5 = vmul.f32 %v12281_v58, %v5359_v16  ;;  %v4892_v58 = vmul.f32 %v12265_v1, %v4876_v60 }
 0xa1f   : > { %v8654_v56 = vpop.eup %8653 }
 0xa20   : > { %v4843_v52 = vmul.f32 %v8654_v56, %v4802_v3  ;;  %v5223_v62 = vpop.xlane.xlu2 %5222  ;;  %v5387_v23 = vpack.c.bf16 %v5375_v5, %v5374_v6 }
 0xa21   : > { %v5239_v37 = vsub.f32 %v12298_v45, %v5223_v62  ;;  %v12432_v15 = vpop.f32.mrf.mxu2  ;;  %v12437_v45 = vpop.f32.mrf.mxu0 }
 0xa22   : > { %v4859_v25 = vsub.f32 2.0, %v4843_v52  ;;  %5439 = vmatmul.bf16.gmra.mxu2 %v5387_v23 }
 0xa23   : > { %v5270_v46 = vmul.f32 1.442695, %v5239_v37 }
 0xa24   : > { %v4875_v10 = vmul.f32 %v8654_v56, %v4859_v25 }
 0xa25   : > { %8655 = vpow2.f32 %v5270_v46 }
 0xa26   : > { %v4891_v31 = vmul.f32 %v12290_v55, %v4875_v10 }
 0xa28   : > { %v4738_v11 = vpop.xlane.xlu2 %4737  ;;  %v4904_v32 = vpack.c.bf16 %v4892_v58, %v4891_v31 }
 0xa29   : > { %v4755_v3 = vsub.f32 %v12307_v34, %v4738_v11  ;;  %v12440_v62 = vpop.f32.mrf.mxu2  ;;  %v12444_v63 = vpop.f32.mrf.mxu0 }
 0xa2a   : > { %4956 = vmatmul.bf16.gmra.mxu0 %v4904_v32  ;;  %13966 = vst [vmem:[#allocation94_spill] sm:$0xff] %v12440_v62 }
 0xa2b   : > { %v12435_v16 = vpop.eup %8655  ;;  %v4785_v19 = vmul.f32 1.442695, %v4755_v3 }
 0xa2c   : > { %5302 = vadd.xlane.f32.xlu0 %v12435_v16 }
 0xa2d   : > { %8657 = vpow2.f32 %v4785_v19 }
 0xa30   : > { %v5291_v23 = vpop.xlane.xlu1 %5290 }
 0xa31   : > { %8659 = vrcp.f32 %v5291_v23  ;;  %v12447_v25 = vpop.f32.mrf.mxu2  ;;  %v12450_v58 = vpop.f32.mrf.mxu0 }
 0xa32   : > { %v5289_v1 = vpop.xlane.xlu0 %5288 }
 0xa33   : > { %v12442_v55 = vpop.eup %8657  ;;  %8661 = vrcp.f32 %v5289_v1 }
 0xa34   : > { %4817 = vadd.xlane.f32.xlu1 %v12442_v55 }
 0xa37   : > { %v8660_v34 = vpop.eup %8659 }
 0xa38   : > { %v5329_v6 = vmul.f32 %v8660_v34, %v5291_v23  ;;  %v4806_v5 = vpop.xlane.xlu1 %4805 }
 0xa39   : > { %v8662_v56 = vpop.eup %8661  ;;  %8663 = vrcp.f32 %v4806_v5  ;;  %v12456_v62 = vpop.f32.mrf.mxu2 }
 0xa3a   : > { %v5345_v52 = vsub.f32 2.0, %v5329_v6  ;;  %v5328_v37 = vmul.f32 %v8662_v56, %v5289_v1  ;;  %v4740_v60 = vpop.xlane.xlu0 %4739 }
 0xa3b   : > { %v4756_v46 = vsub.f32 %v12334_v8, %v4740_v60 }
 0xa3c   : > { %v5361_v10 = vmul.f32 %v8660_v34, %v5345_v52  ;;  %v5344_v31 = vsub.f32 2.0, %v5328_v37  ;;  %v12460_v52 = vpop.f32.mrf.mxu0 }
 0xa3d   : > { %v4787_v11 = vmul.f32 1.442695, %v4756_v46 }
 0xa3e   : > { %v5360_v32 = vmul.f32 %v8662_v56, %v5344_v31  ;;  %v5377_v19 = vmul.f32 %v12318_v36, %v5361_v10 }
 0xa3f   : > { %8665 = vpow2.f32 %v4787_v11  ;;  %v8664_v23 = vpop.eup %8663 }
 0xa40   : > { %3066 = vrot.lane.b32.xlu0 %v12002_v57, %s9338_s26  ;;  %v5376_v3 = vmul.f32 %v12321_v38, %v5360_v32  ;;  %v4845_v8 = vmul.f32 %v8664_v23, %v4806_v5 }
 0xa41   : > { %v12465_v60 = vpop.f32.mrf.mxu2 }
 0xa42   : > { %v4808_v1 = vpop.xlane.xlu2 %4807  ;;  %v5388_v6 = vpack.c.bf16 %v5377_v19, %v5376_v3  ;;  %v4861_v56 = vsub.f32 2.0, %v4845_v8 }
 0xa43   : > { %8667 = vrcp.f32 %v4808_v1 }
 0xa44   : > { %5444 = vmatmul.bf16.gmra.mxu2 %v5388_v6  ;;  %v4877_v38 = vmul.f32 %v8664_v23, %v4861_v56  ;;  %v12469_v46 = vpop.f32.mrf.mxu0 }
 0xa45   : > { %v12458_v34 = vpop.eup %8665 }
 0xa46   : > { %4819 = vadd.xlane.f32.xlu2 %v12458_v34  ;;  %v4893_v10 = vmul.f32 %v12330_v42, %v4877_v38 }
 0xa48   : > { %3551 = vrot.lane.b32.xlu0 %v12021_v53, %s9336_s29 }
 0xa49   : > { %v8668_v57 = vpop.eup %8667  ;;  %v5425_v11 = vpop.f32.mrf.mxu2 }
 0xa4a   : > { %v4846_v36 = vmul.f32 %v8668_v57, %v4808_v1 }
 0xa4c   : > { %v4862_v37 = vsub.f32 2.0, %v4846_v36 }
 0xa4d   : > { %3068 = vrot.lane.b32.xlu1 %v12008_v13, %s9338_s26  ;;  %v4942_v32 = vpop.f32.mrf.mxu0 }
 0xa4e   : > { %v4878_v5 = vmul.f32 %v8668_v57, %v4862_v37 }
 0xa50   : > { %4034 = vrot.lane.b32.xlu0 %v12341_v9, %s9333_s27  ;;  %v4894_v31 = vmul.f32 %v12344_v21, %v4878_v5 }
 0xa51   : > { %v5427_v13 = vpop.f32.mrf.mxu2 }
 0xa52   : > { %v4905_v53 = vpack.c.bf16 %v4894_v31, %v4893_v10 }
 0xa54   : > { %4961 = vmatmul.bf16.gmra.mxu0 %v4905_v53 }
 0xa55   : > { %4032 = vrot.lane.b32.xlu1 %v12328_v33, %s9333_s27  ;;  %v4944_v33 = vpop.f32.mrf.mxu0 }
 0xa58   : > { %4998 = vrot.lane.b32.xlu0 %v4942_v32, %s9337_s30 }
 0xa5d   : > { %4517 = vrot.lane.b32.xlu1 %v12338_v39, %s9334_s23 }
 0xa5e   : > { %3549 = vrot.lane.b32.xlu2 %v12006_v44, %s9336_s29 }
 0xa60   : > { %5483 = vrot.lane.b32.xlu0 %v5427_v13, %s9335_s11 }
 0xa62   : > { %v4810_v42 = vpop.xlane.xlu2 %4809  ;;  %v4947_v21 = vpop.f32.mrf.mxu0 }
 0xa65   : > { %5481 = vrot.lane.b32.xlu1 %v5425_v11, %s9335_s11 }
 0xa66   : > { %4515 = vrot.lane.b32.xlu2 %v12325_v0, %s9334_s23 }
 0xa67   : > { %v5293_v9 = vpop.xlane.xlu0 %5292 }
 0xa68   : > { %3553 = vrot.lane.b32.xlu0 %v12034_v29, %s9336_s29  ;;  %8669 = vrcp.f32 %v5293_v9 }
 0xa69   : > { %8671 = vrcp.f32 %v4810_v42 }
 0xa6d   : > { %3072 = vrot.lane.b32.xlu1 %v12052_v30, %s9338_s26 }
 0xa6e   : > { %5000 = vrot.lane.b32.xlu2 %v4944_v33, %s9337_s30  ;;  %v8670_v44 = vpop.eup %8669 }
 0xa6f   : > { %v8672_v0 = vpop.eup %8671  ;;  %v5330_v3 = vmul.f32 %v8670_v44, %v5293_v9 }
 0xa70   : > { %4038 = vrot.lane.b32.xlu0 %v12351_v49, %s9333_s27  ;;  %v4847_v19 = vmul.f32 %v8672_v0, %v4810_v42 }
 0xa71   : > { %v5346_v23 = vsub.f32 2.0, %v5330_v3 }
 0xa72   : > { %v4863_v1 = vsub.f32 2.0, %v4847_v19 }
 0xa73   : > { %v5362_v36 = vmul.f32 %v8670_v44, %v5346_v23 }
 0xa74   : > { %v4879_v37 = vmul.f32 %v8672_v0, %v4863_v1 }
 0xa75   : > { %v5430_v39 = vpop.f32.mrf.mxu2  ;;  %4036 = vrot.lane.b32.xlu1 %v12347_v17, %s9333_s27 }
 0xa76   : > { %v5295_v29 = vpop.xlane.xlu1 %5294  ;;  %3070 = vrot.lane.b32.xlu2 %v12040_v2, %s9338_s26 }
 0xa77   : > { %8673 = vrcp.f32 %v5295_v29  ;;  %v4812_v30 = vpop.xlane.xlu0 %4811 }
 0xa78   : > { %8675 = vrcp.f32 %v4812_v30  ;;  %5002 = vrot.lane.b32.xlu0 %v4947_v21, %s9337_s30 }
 0xa7d   : > { %v8674_v49 = vpop.eup %8673  ;;  %4521 = vrot.lane.b32.xlu1 %v12353_v47, %s9334_s23  ;;  %v5432_v56 = vpop.f32.mrf.mxu2  ;;  %v5378_v47 = vmul.f32 %v12372_v41, %v5362_v36 }
 0xa7e   : > { %v8676_v17 = vpop.eup %8675  ;;  %v5331_v6 = vmul.f32 %v8674_v49, %v5295_v29  ;;  %v5297_v8 = vpop.xlane.xlu1 %5296  ;;  %3555 = vrot.lane.b32.xlu2 %v12044_v4, %s9336_s29  ;;  %v4895_v4 = vmul.f32 %v12363_v48, %v4879_v37  ;;  %v13967_v29 = vld [vmem:[#allocation75_spill] sm:$0xff] }
 0xa7f   : > { %v4848_v2 = vmul.f32 %v8676_v17, %v4812_v30  ;;  %8677 = vrcp.f32 %v5297_v8  ;;  %v4814_v57 = vpop.xlane.xlu0 %4813 }
 0xa80   : > { %v5347_v38 = vsub.f32 2.0, %v5331_v6  ;;  %8679 = vrcp.f32 %v4814_v57  ;;  %5487 = vrot.lane.b32.xlu0 %v5432_v56, %s9335_s11 }
 0xa81   : > { %v4864_v5 = vsub.f32 2.0, %v4848_v2 }
 0xa82   : > { %v5363_v10 = vmul.f32 %v8674_v49, %v5347_v38 }
 0xa83   : > { %v4880_v31 = vmul.f32 %v8676_v17, %v4864_v5  ;;  %v7996_v17 = vld [vmem:[%s9782_s8 + $0x38] sm:$0xff] }
 0xa84   : > { %v5379_v53 = vmul.f32 %v12385_v12, %v5363_v10  ;;  %5638 = vmatpush.bf16.msra.mxu3 %v7996_v17 }
 0xa85   : > { %v8678_v11 = vpop.eup %8677  ;;  %5485 = vrot.lane.b32.xlu1 %v5430_v39, %s9335_s11  ;;  %v4896_v32 = vmul.f32 %v12387_v51, %v4880_v31  ;;  %v4949_v51 = vpop.f32.mrf.mxu0  ;;  %v7995_v31 = vld [vmem:[%s9782_s8 + $0x30] sm:$0xff] }
 0xa86   : > { %v8680_v13 = vpop.eup %8679  ;;  %v4816_v9 = vpop.xlane.xlu1 %4815  ;;  %4519 = vrot.lane.b32.xlu2 %v12349_v18, %s9334_s23  ;;  %v5389_v33 = vpack.c.bf16 %v5379_v53, %v5378_v47  ;;  %v5332_v41 = vmul.f32 %v8678_v11, %v5297_v8  ;;  %v13970_v53 = vld [vmem:[#allocation90_spill] sm:$0xff] }
 0xa87   : > { %8681 = vrcp.f32 %v4816_v9  ;;  %v5299_v42 = vpop.xlane.xlu2 %5298  ;;  %v4906_v44 = vpack.c.bf16 %v4896_v32, %v4895_v4  ;;  %v4849_v0 = vmul.f32 %v8680_v13, %v4814_v57  ;;  %v5435_v2 = vpop.f32.mrf.mxu2 }
 0xa88   : > { %8683 = vrcp.f32 %v5299_v42  ;;  %3557 = vrot.lane.b32.xlu0 %v12085_v35, %s9336_s29  ;;  %5449 = vmatmul.bf16.gmra.mxu2 %v5389_v33  ;;  %v5348_v39 = vsub.f32 2.0, %v5332_v41  ;;  %v7993_v41 = vld [vmem:[%s9782_s8 + $0x20] sm:$0xff] }
 0xa89   : > { %4966 = vmatmul.bf16.gmra.mxu0 %v4906_v44  ;;  %v4865_v48 = vsub.f32 2.0, %v4849_v0  ;;  %5639 = vmatpush.bf16.msra.mxu3 %v7995_v31  ;;  %v13978_v31 = vld [vmem:[#allocation93_spill] sm:$0xff] }
 0xa8a   : > { %v5364_v35 = vmul.f32 %v8678_v11, %v5348_v39  ;;  %v13971_v11 = vld [vmem:[#allocation98_spill] sm:$0xff] }
 0xa8b   : > { %v4881_v3 = vmul.f32 %v8680_v13, %v4865_v48  ;;  %v13973_v39 = vld [vmem:[#allocation78_spill] sm:$0xff] }
 0xa8c   : > { %v5380_v57 = vmul.f32 %v12396_v26, %v5364_v35  ;;  %v13969_v26 = vld [vmem:[#allocation74_spill] sm:$0xff] }
 0xa8d   : > { %v8682_v12 = vpop.eup %8681  ;;  %3076 = vrot.lane.b32.xlu1 %v13967_v29, %s9338_s26  ;;  %v4897_v6 = vmul.f32 %v12399_v20, %v4881_v3  ;;  %v7991_v29 = vld [vmem:[%s9782_s8 + $0x10] sm:$0xff]  ;;  %v7989_v35 = vld [vmem:[%s9782_s8] sm:$0xff] }
 0xa8e   : > { %v8684_v18 = vpop.eup %8683  ;;  %v4850_v21 = vmul.f32 %v8682_v12, %v4816_v9  ;;  %5004 = vrot.lane.b32.xlu2 %v4949_v51, %s9337_s30  ;;  %v7994_v9 = vld [vmem:[%s9782_s8 + $0x28] sm:$0xff] }
 0xa8f   : > { %v5333_v30 = vmul.f32 %v8684_v18, %v5299_v42  ;;  %v5301_v56 = vpop.xlane.xlu2 %5300  ;;  %v4952_v37 = vpop.f32.mrf.mxu0  ;;  %v13972_v42 = vld [vmem:[#allocation86_spill] sm:$0xff]  ;;  %5640 = vmatpush.bf16.msra.mxu3 %v7994_v9 }
 0xa90   : > { %v4866_v19 = vsub.f32 2.0, %v4850_v21  ;;  %4042 = vrot.lane.b32.xlu0 %v12368_v54, %s9333_s27  ;;  %v13968_v54 = vld [vmem:[#allocation95_spill] sm:$0xff]  ;;  %8685 = vrcp.f32 %v5301_v56  ;;  %v5437_v20 = vpop.f32.mrf.mxu2 }
 0xa91   : > { %v5349_v23 = vsub.f32 2.0, %v5333_v30 }
 0xa92   : > { %v4882_v49 = vmul.f32 %v8682_v12, %v4866_v19  ;;  %v7990_v19 = vld [vmem:[%s9782_s8 + $0x8] sm:$0xff] }
 0xa93   : > { %v5365_v1 = vmul.f32 %v8684_v18, %v5349_v23  ;;  %5641 = vmatpush.bf16.msra.mxu3 %v7993_v41 }
 0xa94   : > { %v4898_v8 = vmul.f32 %v12410_v50, %v4882_v49 }
 0xa95   : > { %4040 = vrot.lane.b32.xlu1 %v12358_v59, %s9333_s27  ;;  %v5381_v36 = vmul.f32 %v12412_v7, %v5365_v1 }
 0xa96   : > { %3074 = vrot.lane.b32.xlu2 %v13968_v54, %s9338_s26  ;;  %v4907_v38 = vpack.c.bf16 %v4898_v8, %v4897_v6  ;;  %v8686_v59 = vpop.eup %8685 }
 0xa97   : > { %v5390_v5 = vpack.c.bf16 %v5381_v36, %v5380_v57  ;;  %v5334_v7 = vmul.f32 %v8686_v59, %v5301_v56  ;;  %v4954_v33 = vpop.f32.mrf.mxu0 }
 0xa98   : > { %5006 = vrot.lane.b32.xlu0 %v4952_v37, %s9337_s30  ;;  %v13975_v37 = vld [vmem:[#allocation84_spill] sm:$0xff] }
 0xa99   : > { %4971 = vmatmul.bf16.gmra.mxu0 %v4907_v38  ;;  %5454 = vmatmul.bf16.gmra.mxu2 %v5390_v5  ;;  %v5350_v10 = vsub.f32 2.0, %v5334_v7 }
 0xa9b   : > { %v5366_v4 = vmul.f32 %v8686_v59, %v5350_v10 }
 0xa9d   : > { %4525 = vrot.lane.b32.xlu1 %v12370_v28, %s9334_s23  ;;  %v5382_v44 = vmul.f32 %v12420_v43, %v5366_v4  ;;  %v7992_v43 = vld [vmem:[%s9782_s8 + $0x18] sm:$0xff]  ;;  %s13996_s8 = sld [smem:[#allocation109_spill]] }
 0xa9e   : > { %3559 = vrot.lane.b32.xlu2 %v13969_v26, %s9336_s29  ;;  %5642 = vmatpush.bf16.msra.mxu3 %v7992_v43  ;;  %v13983_v43 = vld [vmem:[#allocation91_spill] sm:$0xff] }
 0xa9f   : > { %v5303_v50 = vpop.xlane.xlu0 %5302 }
 0xaa0   : > { %8687 = vrcp.f32 %v5303_v50  ;;  %5491 = vrot.lane.b32.xlu0 %v5437_v20, %s9335_s11  ;;  %v13976_v20 = vld [vmem:[#allocation89_spill] sm:$0xff] }
 0xaa2   : > { %5643 = vmatpush.bf16.msra.mxu3 %v7991_v29 }
 0xaa3   : > { %s13997_s20 = scalar_lea.vmem %s13996_s8, %s9801_s22  ;;  %s14007_s22 = sld [smem:[#allocation38_spill]] }
 0xaa5   : > { %5489 = vrot.lane.b32.xlu1 %v5435_v2, %s9335_s11 }
 0xaa6   : > { %v8688_v47 = vpop.eup %8687  ;;  %4523 = vrot.lane.b32.xlu2 %v13970_v53, %s9334_s23  ;;  %5644 = vmatpush.bf16.msra.mxu3 %v7990_v19 }
 0xaa7   : > { %v5335_v28 = vmul.f32 %v8688_v47, %v5303_v50  ;;  %v4818_v48 = vpop.xlane.xlu1 %4817 }
 0xaa8   : > { %3561 = vrot.lane.b32.xlu0 %v13971_v11, %s9336_s29  ;;  %8689 = vrcp.f32 %v4818_v48 }
 0xaa9   : > { %v5351_v32 = vsub.f32 2.0, %v5335_v28 }
 0xaaa   : > { %5645 = vmatpush.bf16.msra.mxu3 %v7989_v35 }
 0xaab   : > { %v5367_v13 = vmul.f32 %v8688_v47, %v5351_v32  ;;  %v13979_v47 = vld [vmem:[#allocation87_spill] sm:$0xff]  ;;  %v13980_v32 = vld [vmem:[#allocation77_spill] sm:$0xff] }
 0xaad   : > { %3080 = vrot.lane.b32.xlu1 %v13972_v42, %s9338_s26  ;;  %v5383_v0 = vmul.f32 %v12435_v16, %v5367_v13  ;;  %v5440_v16 = vpop.f32.mrf.mxu2  ;;  %v13981_v13 = vld [vmem:[#allocation88_spill] sm:$0xff] }
 0xaae   : > { %5008 = vrot.lane.b32.xlu2 %v4954_v33, %s9337_s30  ;;  %v8690_v18 = vpop.eup %8689 }
 0xaaf   : > { %v5391_v12 = vpack.c.bf16 %v5383_v0, %v5382_v44  ;;  %v4851_v3 = vmul.f32 %v8690_v18, %v4818_v48 }
 0xab0   : > { %4046 = vrot.lane.b32.xlu0 %v12394_v27, %s9333_s27  ;;  %v4957_v27 = vpop.f32.mrf.mxu0 }
 0xab1   : > { %5459 = vmatmul.bf16.gmra.mxu2 %v5391_v12  ;;  %v4867_v23 = vsub.f32 2.0, %v4851_v3  ;;  %v13982_v12 = vld [vmem:[#allocation73_spill] sm:$0xff]  ;;  %v13985_v3 = vld [vmem:[#allocation96_spill] sm:$0xff] }
 0xab2   : > { %v3067_v51 = vpop.permute.xlu0 %3066 }
 0xab3   : > { %3115 = vst.msk [vmem:[#allocation2] sm:$0xff] %vm3114_vm2, %v3067_v51  ;;  %v4883_v2 = vmul.f32 %v8690_v18, %v4867_v23 }
 0xab5   : > { %4044 = vrot.lane.b32.xlu1 %v12379_v61, %s9333_s27  ;;  %v13974_v61 = vld [vmem:[#allocation80_spill] sm:$0xff]  ;;  %v5442_v49 = vpop.f32.mrf.mxu2  ;;  %v4899_v54 = vmul.f32 %v12442_v55, %v4883_v2 }
 0xab6   : > { %3078 = vrot.lane.b32.xlu2 %v13973_v39, %s9338_s26 }
 0xab8   : > { %5010 = vrot.lane.b32.xlu0 %v4957_v27, %s9337_s30  ;;  %v13984_v27 = vld [vmem:[#allocation79_spill] sm:$0xff] }
 0xab9   : > { %v4820_v21 = vpop.xlane.xlu2 %4819 }
 0xaba   : > { %8691 = vrcp.f32 %v4820_v21  ;;  %v3552_v30 = vpop.permute.xlu0 %3551 }
 0xabd   : > { %4529 = vrot.lane.b32.xlu1 %v12392_v24, %s9334_s23 }
 0xabe   : > { %3563 = vrot.lane.b32.xlu2 %v13974_v61, %s9336_s29 }
 0xabf   : > { %v3069_v1 = vpop.permute.xlu1 %3068 }
 0xac0   : > { %v8692_v17 = vpop.eup %8691  ;;  %3116 = vst.msk [vmem:[#allocation2 + $0x8] sm:$0xff] %vm3114_vm2, %v3069_v1  ;;  %5495 = vrot.lane.b32.xlu0 %v5442_v49, %s9335_s11 }
 0xac1   : > { %v4852_v6 = vmul.f32 %v8692_v17, %v4820_v21  ;;  %v3550_v8 = vpop.permute.xlu2 %3549  ;;  %3599 = vst.msk [vmem:[#allocation2 + $0x8] sm:$0xff] %vm3597_vm3, %v3552_v30 }
 0xac2   : > { %3598 = vst.msk [vmem:[#allocation2] sm:$0xff] %vm3597_vm3, %v3550_v8  ;;  %v4035_v24 = vpop.permute.xlu0 %4034 }
 0xac3   : > { %v4868_v56 = vsub.f32 2.0, %v4852_v6  ;;  %4082 = vst.msk [vmem:[#allocation2 + $0x8] sm:$0xff] %vm4080_vm4, %v4035_v24 }
 0xac5   : > { %v4884_v57 = vmul.f32 %v8692_v17, %v4868_v56  ;;  %5493 = vrot.lane.b32.xlu1 %v5440_v16, %s9335_s11 }
 0xac6   : > { %4527 = vrot.lane.b32.xlu2 %v12377_v22, %s9334_s23  ;;  %v4959_v22 = vpop.f32.mrf.mxu0 }
 0xac7   : > { %v4033_v36 = vpop.permute.xlu1 %4032  ;;  %v4900_v38 = vmul.f32 %v12458_v34, %v4884_v57  ;;  %v13977_v34 = vld [vmem:[#allocation60_spill] sm:$0xff]  ;;  %v5445_v10 = vpop.f32.mrf.mxu2 }
 0xac8   : > { %4081 = vst.msk [vmem:[#allocation2] sm:$0xff] %vm4080_vm4, %v4033_v36  ;;  %3565 = vrot.lane.b32.xlu0 %v13975_v37, %s9336_s29  ;;  %v13987_v37 = vld [vmem:[#allocation57_spill] sm:$0xff] }
 0xac9   : > { %v4516_v5 = vpop.permute.xlu2 %4515  ;;  %v4908_v59 = vpack.c.bf16 %v4900_v38, %v4899_v54 }
 0xaca   : > { %4564 = vst.msk [vmem:[#allocation2] sm:$0xff] %vm4563_vm5, %v4516_v5  ;;  %v4999_v26 = vpop.permute.xlu0 %4998 }
 0xacb   : > { %5047 = vst.msk [vmem:[#allocation2] sm:$0xff] %vm5046_vm6, %v4999_v26  ;;  %4976 = vmatmul.bf16.gmra.mxu0 %v4908_v59  ;;  %v13988_v59 = vld [vmem:[#allocation85_spill] sm:$0xff] }
 0xacd   : > { %3084 = vrot.lane.b32.xlu1 %v13976_v20, %s9338_s26  ;;  %v13989_v20 = vld [vmem:[#allocation83_spill] sm:$0xff] }
 0xace   : > { %5012 = vrot.lane.b32.xlu2 %v4959_v22, %s9337_s30 }
 0xacf   : > { %v4518_v55 = vpop.permute.xlu1 %4517  ;;  %v5447_v9 = vpop.f32.mrf.mxu2 }
 0xad0   : > { %4565 = vst.msk [vmem:[#allocation2 + $0x8] sm:$0xff] %vm4563_vm5, %v4518_v55  ;;  %4050 = vrot.lane.b32.xlu0 %v13977_v34, %s9333_s27  ;;  %v13990_v34 = vld [vmem:[#allocation97_spill] sm:$0xff] }
 0xad1   : > { %v5001_v50 = vpop.permute.xlu2 %5000  ;;  %v4962_v53 = vpop.f32.mrf.mxu0 }
 0xad2   : > { %5048 = vst.msk [vmem:[#allocation2 + $0x8] sm:$0xff] %vm5046_vm6, %v5001_v50  ;;  %v5484_v7 = vpop.permute.xlu0 %5483 }
 0xad3   : > { %5531 = vst.msk [vmem:[#allocation2 + $0x8] sm:$0xff] %vm5529_vm7, %v5484_v7 }
 0xad5   : > { %4048 = vrot.lane.b32.xlu1 %v13978_v31, %s9333_s27 }
 0xad6   : > { %3082 = vrot.lane.b32.xlu2 %v13979_v47, %s9338_s26 }
 0xad7   : > { %v5482_v28 = vpop.permute.xlu1 %5481 }
 0xad8   : > { %5530 = vst.msk [vmem:[#allocation2] sm:$0xff] %vm5529_vm7, %v5482_v28  ;;  %5014 = vrot.lane.b32.xlu0 %v4962_v53, %s9337_s30  ;;  %v13991_v28 = vld [vmem:[#allocation94_spill] sm:$0xff] }
 0xad9   : > { %v3071_v11 = vpop.permute.xlu2 %3070  ;;  %v4964_v29 = vpop.f32.mrf.mxu0 }
 0xada   : > { %3117 = vst.msk [vmem:[#allocation2 + $0x10] sm:$0xff] %vm3114_vm2, %v3071_v11  ;;  %v3554_v4 = vpop.permute.xlu0 %3553  ;;  %v5547_v44 = vld [vmem:[#allocation2 + $0x8] sm:$0xff] }
 0xadb   : > { %3600 = vst.msk [vmem:[#allocation2 + $0x10] sm:$0xff] %vm3597_vm3, %v3554_v4 }
 0xadd   : > { %4533 = vrot.lane.b32.xlu1 %v13980_v32, %s9334_s23 }
 0xade   : > { %3567 = vrot.lane.b32.xlu2 %v13981_v13, %s9336_s29 }
 0xadf   : > { %v3073_v33 = vpop.permute.xlu1 %3072  ;;  %v5546_v42 = vld [vmem:[#allocation2] sm:$0xff] }
 0xae0   : > { %3118 = vst.msk [vmem:[#allocation2 + $0x18] sm:$0xff] %vm3114_vm2, %v3073_v33  ;;  %5499 = vrot.lane.b32.xlu0 %v5447_v9, %s9335_s11  ;;  %v5562_v0 = vpack.c.bf16 %v5547_v44, %v5546_v42  ;;  %v13992_v42 = vld [vmem:[#allocation58_spill] sm:$0xff] }
 0xae1   : > { %v3556_v41 = vpop.permute.xlu2 %3555 }
 0xae2   : > { %3601 = vst.msk [vmem:[#allocation2 + $0x18] sm:$0xff] %vm3597_vm3, %v3556_v41  ;;  %5646 = vmatmul.bf16.vlgmr.msra.gmra.mxu3 %v5562_v0  ;;  %v4039_v48 = vpop.permute.xlu0 %4038  ;;  %v13993_v0 = vld [vmem:[#allocation54_spill] sm:$0xff] }
 0xae3   : > { %4084 = vst.msk [vmem:[#allocation2 + $0x18] sm:$0xff] %vm4080_vm4, %v4039_v48 }
 0xae5   : > { %5497 = vrot.lane.b32.xlu1 %v5445_v10, %s9335_s11 }
 0xae6   : > { %4531 = vrot.lane.b32.xlu2 %v13982_v12, %s9334_s23  ;;  %v13994_v12 = vld [vmem:[#allocation82_spill] sm:$0xff] }
 0xae7   : > { %v4037_v51 = vpop.permute.xlu1 %4036 }
 0xae8   : > { %4083 = vst.msk [vmem:[#allocation2 + $0x10] sm:$0xff] %vm4080_vm4, %v4037_v51  ;;  %3569 = vrot.lane.b32.xlu0 %v13983_v43, %s9336_s29  ;;  %v13995_v43 = vld [vmem:[#allocation55_spill] sm:$0xff] }
 0xae9   : > { %v4520_v16 = vpop.permute.xlu2 %4519 }
 0xaea   : > { %4566 = vst.msk [vmem:[#allocation2 + $0x10] sm:$0xff] %vm4563_vm5, %v4520_v16  ;;  %v5003_v39 = vpop.permute.xlu0 %5002 }
 0xaeb   : > { %5049 = vst.msk [vmem:[#allocation2 + $0x10] sm:$0xff] %vm5046_vm6, %v5003_v39 }
 0xaed   : > { %3088 = vrot.lane.b32.xlu1 %v13984_v27, %s9338_s26 }
 0xaee   : > { %5016 = vrot.lane.b32.xlu2 %v4964_v29, %s9337_s30 }
 0xaef   : > { %v4522_v18 = vpop.permute.xlu1 %4521 }
 0xaf0   : > { %4567 = vst.msk [vmem:[#allocation2 + $0x18] sm:$0xff] %vm4563_vm5, %v4522_v18  ;;  %4054 = vrot.lane.b32.xlu0 %v12437_v45, %s9333_s27  ;;  %v13986_v45 = vld [vmem:[#allocation68_spill] sm:$0xff] }
 0xaf1   : > { %v5005_v21 = vpop.permute.xlu2 %5004 }
 0xaf2   : > { %5050 = vst.msk [vmem:[#allocation2 + $0x18] sm:$0xff] %vm5046_vm6, %v5005_v21  ;;  %v5488_v30 = vpop.permute.xlu0 %5487 }
 0xaf3   : > { %5533 = vst.msk [vmem:[#allocation2 + $0x18] sm:$0xff] %vm5529_vm7, %v5488_v30 }
 0xaf5   : > { %4052 = vrot.lane.b32.xlu1 %v12427_v14, %s9333_s27 }
 0xaf6   : > { %3086 = vrot.lane.b32.xlu2 %v13985_v3, %s9338_s26 }
 0xaf7   : > { %v5486_v19 = vpop.permute.xlu1 %5485 }
 0xaf8   : > { %5532 = vst.msk [vmem:[#allocation2 + $0x10] sm:$0xff] %vm5529_vm7, %v5486_v19 }
 0xaf9   : > { %v3075_v61 = vpop.permute.xlu2 %3074 }
 0xafa   : > { %3119 = vst.msk [vmem:[#allocation2 + $0x20] sm:$0xff] %vm3114_vm2, %v3075_v61  ;;  %v3558_v35 = vpop.permute.xlu0 %3557  ;;  %v5549_v49 = vld [vmem:[#allocation2 + $0x18] sm:$0xff] }
 0xafb   : > { %3602 = vst.msk [vmem:[#allocation2 + $0x20] sm:$0xff] %vm3597_vm3, %v3558_v35 }
 0xafd   : > { %4537 = vrot.lane.b32.xlu1 %v12432_v15, %s9334_s23 }
 0xafe   : > { %3571 = vrot.lane.b32.xlu2 %v13986_v45, %s9336_s29 }
 0xaff   : > { %v3077_v23 = vpop.permute.xlu1 %3076  ;;  %v5548_v14 = vld [vmem:[#allocation2 + $0x10] sm:$0xff] }
 0xb00   : > { %3120 = vst.msk [vmem:[#allocation2 + $0x28] sm:$0xff] %vm3114_vm2, %v3077_v23  ;;  %v5563_v1 = vpack.c.bf16 %v5549_v49, %v5548_v14 }
 0xb01   : > { %v3560_v17 = vpop.permute.xlu2 %3559 }
 0xb02   : > { %3603 = vst.msk [vmem:[#allocation2 + $0x28] sm:$0xff] %vm3597_vm3, %v3560_v17  ;;  %5651 = vmatmul.bf16.gmra.mxu3 %v5563_v1  ;;  %v4043_v6 = vpop.permute.xlu0 %4042 }
 0xb03   : > { %4086 = vst.msk [vmem:[#allocation2 + $0x28] sm:$0xff] %vm4080_vm4, %v4043_v6 }
 0xb06   : > { %4535 = vrot.lane.b32.xlu2 %v12425_v40, %s9334_s23  ;;  %v4967_v15 = vpop.f32.mrf.mxu0 }
 0xb07   : > { %v4041_v8 = vpop.permute.xlu1 %4040  ;;  %5018 = vrot.lane.b32.xlu0 %v4967_v15, %s9337_s30 }
 0xb08   : > { %4085 = vst.msk [vmem:[#allocation2 + $0x20] sm:$0xff] %vm4080_vm4, %v4041_v8 }
 0xb09   : > { %v4524_v24 = vpop.permute.xlu2 %4523 }
 0xb0a   : > { %4568 = vst.msk [vmem:[#allocation2 + $0x20] sm:$0xff] %vm4563_vm5, %v4524_v24  ;;  %v5007_v2 = vpop.permute.xlu0 %5006 }
 0xb0b   : > { %5051 = vst.msk [vmem:[#allocation2 + $0x20] sm:$0xff] %vm5046_vm6, %v5007_v2  ;;  %v5450_v56 = vpop.f32.mrf.mxu2 }
 0xb0c   : > { %5501 = vrot.lane.b32.xlu1 %v5450_v56, %s9335_s11 }
 0xb0e   : > { %v4969_v57 = vpop.f32.mrf.mxu0 }
 0xb0f   : > { %v4526_v36 = vpop.permute.xlu1 %4525  ;;  %5020 = vrot.lane.b32.xlu2 %v4969_v57, %s9337_s30 }
 0xb10   : > { %4569 = vst.msk [vmem:[#allocation2 + $0x28] sm:$0xff] %vm4563_vm5, %v4526_v36  ;;  %v12719_v36 = vld [vmem:[%s13997_s20] ss:$0 sm:$0xff] }
 0xb11   : > { %v5009_v40 = vpop.permute.xlu2 %5008 }
 0xb12   : > { %5052 = vst.msk [vmem:[#allocation2 + $0x28] sm:$0xff] %vm5046_vm6, %v5009_v40  ;;  %v5492_v54 = vpop.permute.xlu0 %5491 }
 0xb13   : > { %5535 = vst.msk [vmem:[#allocation2 + $0x28] sm:$0xff] %vm5529_vm7, %v5492_v54  ;;  %v5452_v38 = vpop.f32.mrf.mxu2 }
 0xb14   : > { %3092 = vrot.lane.b32.xlu1 %v13987_v37, %s9338_s26  ;;  %5503 = vrot.lane.b32.xlu0 %v5452_v38, %s9335_s11 }
 0xb17   : > { %v5490_v5 = vpop.permute.xlu1 %5489  ;;  %3090 = vrot.lane.b32.xlu2 %v13988_v59, %s9338_s26 }
 0xb18   : > { %5534 = vst.msk [vmem:[#allocation2 + $0x20] sm:$0xff] %vm5529_vm7, %v5490_v5  ;;  %v8827_v5 = vld [vmem:[%s9836_s7 + $0x8] sm:$0xff] }
 0xb19   : > { %v3079_v26 = vpop.permute.xlu2 %3078 }
 0xb1a   : > { %3121 = vst.msk [vmem:[#allocation2 + $0x30] sm:$0xff] %vm3114_vm2, %v3079_v26  ;;  %v3562_v22 = vpop.permute.xlu0 %3561  ;;  %v5551_v7 = vld [vmem:[#allocation2 + $0x28] sm:$0xff] }
 0xb1b   : > { %3604 = vst.msk [vmem:[#allocation2 + $0x30] sm:$0xff] %vm3597_vm3, %v3562_v22  ;;  %v8828_v26 = vld [vmem:[%s9836_s7] sm:$0xff] }
 0xb1c   : > { %4056 = vrot.lane.b32.xlu1 %v12444_v63, %s9333_s27  ;;  %3573 = vrot.lane.b32.xlu0 %v13989_v20, %s9336_s29  ;;  %v4972_v63 = vpop.f32.mrf.mxu0  ;;  %v5455_v11 = vpop.f32.mrf.mxu2 }
 0xb1f   : > { %v3081_v55 = vpop.permute.xlu1 %3080  ;;  %3575 = vrot.lane.b32.xlu2 %v13990_v34, %s9336_s29  ;;  %v5550_v50 = vld [vmem:[#allocation2 + $0x20] sm:$0xff] }
 0xb20   : > { %3122 = vst.msk [vmem:[#allocation2 + $0x38] sm:$0xff] %vm3114_vm2, %v3081_v55  ;;  %v5564_v10 = vpack.c.bf16 %v5551_v7, %v5550_v50 }
 0xb21   : > { %v3564_v31 = vpop.permute.xlu2 %3563 }
 0xb22   : > { %3605 = vst.msk [vmem:[#allocation2 + $0x38] sm:$0xff] %vm3597_vm3, %v3564_v31  ;;  %5656 = vmatmul.bf16.gmra.mxu3 %v5564_v10  ;;  %v4047_v47 = vpop.permute.xlu0 %4046 }
 0xb23   : > { %4088 = vst.msk [vmem:[#allocation2 + $0x38] sm:$0xff] %vm4080_vm4, %v4047_v47 }
 0xb24   : > { %4541 = vrot.lane.b32.xlu1 %v12447_v25, %s9334_s23  ;;  %4058 = vrot.lane.b32.xlu0 %v12450_v58, %s9333_s27  ;;  %v4974_v25 = vpop.f32.mrf.mxu0  ;;  %v5457_v33 = vpop.f32.mrf.mxu2 }
 0xb27   : > { %v4045_v53 = vpop.permute.xlu1 %4044  ;;  %4539 = vrot.lane.b32.xlu2 %v13991_v28, %s9334_s23 }
 0xb28   : > { %4087 = vst.msk [vmem:[#allocation2 + $0x30] sm:$0xff] %vm4080_vm4, %v4045_v53 }
 0xb29   : > { %v4528_v4 = vpop.permute.xlu2 %4527 }
 0xb2a   : > { %4570 = vst.msk [vmem:[#allocation2 + $0x30] sm:$0xff] %vm4563_vm5, %v4528_v4  ;;  %v5011_v32 = vpop.permute.xlu0 %5010 }
 0xb2b   : > { %5053 = vst.msk [vmem:[#allocation2 + $0x30] sm:$0xff] %vm5046_vm6, %v5011_v32 }
 0xb2c   : > { %5505 = vrot.lane.b32.xlu1 %v5455_v11, %s9335_s11  ;;  %5022 = vrot.lane.b32.xlu0 %v4972_v63, %s9337_s30  ;;  %v8829_v63 = vld [vmem:[%s9836_s7 + $0x10] sm:$0xff] }
 0xb2f   : > { %v4530_v13 = vpop.permute.xlu1 %4529  ;;  %5024 = vrot.lane.b32.xlu2 %v4974_v25, %s9337_s30 }
 0xb30   : > { %4571 = vst.msk [vmem:[#allocation2 + $0x38] sm:$0xff] %vm4563_vm5, %v4530_v13  ;;  %v8830_v13 = vld [vmem:[%s9836_s7 + $0x18] sm:$0xff] }
 0xb31   : > { %v5013_v58 = vpop.permute.xlu2 %5012 }
 0xb32   : > { %5054 = vst.msk [vmem:[#allocation2 + $0x38] sm:$0xff] %vm5046_vm6, %v5013_v58  ;;  %v5496_v9 = vpop.permute.xlu0 %5495 }
 0xb33   : > { %5537 = vst.msk [vmem:[#allocation2 + $0x38] sm:$0xff] %vm5529_vm7, %v5496_v9 }
 0xb34   : > { %3096 = vrot.lane.b32.xlu1 %v13992_v42, %s9338_s26  ;;  %5507 = vrot.lane.b32.xlu0 %v5457_v33, %s9335_s11  ;;  %v5460_v30 = vpop.f32.mrf.mxu2 }
 0xb37   : > { %v5494_v44 = vpop.permute.xlu1 %5493  ;;  %3094 = vrot.lane.b32.xlu2 %v13993_v0, %s9338_s26 }
 0xb38   : > { %5536 = vst.msk [vmem:[#allocation2 + $0x30] sm:$0xff] %vm5529_vm7, %v5494_v44 }
 0xb39   : > { %v3083_v41 = vpop.permute.xlu2 %3082 }
 0xb3a   : > { %3123 = vst.msk [vmem:[#allocation2 + $0x40] sm:$0xff] %vm3114_vm2, %v3083_v41  ;;  %v3566_v48 = vpop.permute.xlu0 %3565  ;;  %v5553_v39 = vld [vmem:[#allocation2 + $0x38] sm:$0xff] }
 0xb3b   : > { %3606 = vst.msk [vmem:[#allocation2 + $0x40] sm:$0xff] %vm3597_vm3, %v3566_v48 }
 0xb3c   : > { %4060 = vrot.lane.b32.xlu1 %v12460_v52, %s9333_s27  ;;  %3577 = vrot.lane.b32.xlu0 %v13994_v12, %s9336_s29  ;;  %v5462_v35 = vpop.f32.mrf.mxu2 }
 0xb3f   : > { %v3085_v51 = vpop.permute.xlu1 %3084  ;;  %3579 = vrot.lane.b32.xlu2 %v13995_v43, %s9336_s29  ;;  %v5552_v16 = vld [vmem:[#allocation2 + $0x30] sm:$0xff]  ;;  %s7217_s29 = sshll.u32 %s9836_s7, 4  ;;  %s7218_s29 = int_to_ptr.vmem [resolvable:$true] %s7217_s29 }
 0xb40   : > { %3124 = vst.msk [vmem:[#allocation2 + $0x48] sm:$0xff] %vm3114_vm2, %v3085_v51  ;;  %v5565_v29 = vpack.c.bf16 %v5553_v39, %v5552_v16 }
 0xb41   : > { %v3568_v27 = vpop.permute.xlu2 %3567 }
 0xb42   : > { %3607 = vst.msk [vmem:[#allocation2 + $0x48] sm:$0xff] %vm3597_vm3, %v3568_v27  ;;  %5661 = vmatmul.bf16.gmra.mxu3 %v5565_v29  ;;  %v4051_v18 = vpop.permute.xlu0 %4050 }
 0xb43   : > { %4090 = vst.msk [vmem:[#allocation2 + $0x48] sm:$0xff] %vm4080_vm4, %v4051_v18  ;;  %v8831_v18 = vld [vmem:[%s9836_s7 + $0x20] sm:$0xff] }
 0xb44   : > { %4545 = vrot.lane.b32.xlu1 %v12465_v60, %s9334_s23  ;;  %4062 = vrot.lane.b32.xlu0 %v12469_v46, %s9333_s27  ;;  %s14010_s27 = smov %s14009_s3 }
 0xb45   : > { %s9201_s20 = scalar_lea.hbm %s14010_s27, 256 }
 0xb47   : > { %v4049_v52 = vpop.permute.xlu1 %4048  ;;  %4543 = vrot.lane.b32.xlu2 %v12456_v62, %s9334_s23 }
 0xb48   : > { %4089 = vst.msk [vmem:[#allocation2 + $0x40] sm:$0xff] %vm4080_vm4, %v4049_v52  ;;  %v4977_v21 = vpop.f32.mrf.mxu0 }
 0xb49   : > { %v4532_v3 = vpop.permute.xlu2 %4531 }
 0xb4a   : > { %4572 = vst.msk [vmem:[#allocation2 + $0x40] sm:$0xff] %vm4563_vm5, %v4532_v3  ;;  %v5015_v19 = vpop.permute.xlu0 %5014 }
 0xb4b   : > { %5055 = vst.msk [vmem:[#allocation2 + $0x40] sm:$0xff] %vm5046_vm6, %v5015_v19 }
 0xb4c   : > { %5026 = vrot.lane.b32.xlu0 %v4977_v21, %s9337_s30  ;;  %5509 = vrot.lane.b32.xlu1 %v5460_v30, %s9335_s11 }
 0xb4f   : > { %v4534_v60 = vpop.permute.xlu1 %4533 }
 0xb50   : > { %4573 = vst.msk [vmem:[#allocation2 + $0x48] sm:$0xff] %vm4563_vm5, %v4534_v60  ;;  %v4979_v46 = vpop.f32.mrf.mxu0 }
 0xb51   : > { %v5017_v61 = vpop.permute.xlu2 %5016  ;;  %5028 = vrot.lane.b32.xlu2 %v4979_v46, %s9337_s30  ;;  %v8832_v46 = vld [vmem:[%s9836_s7 + $0x28] sm:$0xff] }
 0xb52   : > { %5056 = vst.msk [vmem:[#allocation2 + $0x48] sm:$0xff] %vm5046_vm6, %v5017_v61  ;;  %v5500_v62 = vpop.permute.xlu0 %5499 }
 0xb53   : > { %5539 = vst.msk [vmem:[#allocation2 + $0x48] sm:$0xff] %vm5529_vm7, %v5500_v62 }
 0xb54   : > { %5511 = vrot.lane.b32.xlu0 %v5462_v35, %s9335_s11 }
 0xb57   : > { %v5498_v45 = vpop.permute.xlu1 %5497 }
 0xb58   : > { %5538 = vst.msk [vmem:[#allocation2 + $0x40] sm:$0xff] %vm5529_vm7, %v5498_v45 }
 0xb59   : > { %v3087_v23 = vpop.permute.xlu2 %3086 }
 0xb5a   : > { %3125 = vst.msk [vmem:[#allocation2 + $0x50] sm:$0xff] %vm3114_vm2, %v3087_v23  ;;  %v3570_v14 = vpop.permute.xlu0 %3569  ;;  %v5555_v17 = vld [vmem:[#allocation2 + $0x48] sm:$0xff] }
 0xb5b   : > { %3608 = vst.msk [vmem:[#allocation2 + $0x50] sm:$0xff] %vm3597_vm3, %v3570_v14 }
 0xb5f   : > { %v3089_v49 = vpop.permute.xlu1 %3088  ;;  %v5554_v1 = vld [vmem:[#allocation2 + $0x40] sm:$0xff] }
 0xb60   : > { %3126 = vst.msk [vmem:[#allocation2 + $0x58] sm:$0xff] %vm3114_vm2, %v3089_v49  ;;  %v5566_v6 = vpack.c.bf16 %v5555_v17, %v5554_v1 }
 0xb61   : > { %v3572_v15 = vpop.permute.xlu2 %3571 }
 0xb62   : > { %3609 = vst.msk [vmem:[#allocation2 + $0x58] sm:$0xff] %vm3597_vm3, %v3572_v15  ;;  %5666 = vmatmul.bf16.gmra.mxu3 %v5566_v6  ;;  %v4055_v8 = vpop.permute.xlu0 %4054 }
 0xb63   : > { %4092 = vst.msk [vmem:[#allocation2 + $0x58] sm:$0xff] %vm4080_vm4, %v4055_v8 }
 0xb65   : > { %v5647_v24 = vpop.f32.mrf.mxu3 }
 0xb66   : > { %v5648_v37 = vadd.f32 %v12719_v36, %v5647_v24  ;;  %v8833_v24 = vld [vmem:[%s9836_s7 + $0x30] sm:$0xff] }
 0xb67   : > { %v4053_v2 = vpop.permute.xlu1 %4052 }
 0xb68   : > { %4091 = vst.msk [vmem:[#allocation2 + $0x50] sm:$0xff] %vm4080_vm4, %v4053_v2  ;;  %v12730_v22 = vadd.f32 %v8828_v26, %v5648_v37 }
 0xb69   : > { %v4536_v56 = vpop.permute.xlu2 %4535 }
 0xb6a   : > { %4574 = vst.msk [vmem:[#allocation2 + $0x50] sm:$0xff] %vm4563_vm5, %v4536_v56 }
 0xb6d   : > { %v5649_v57 = vpop.f32.mrf.mxu3 }
 0xb6e   : > { %v5650_v54 = vadd.f32 %v12719_v36, %v5649_v57 }
 0xb6f   : > { %v4538_v40 = vpop.permute.xlu1 %4537 }
 0xb70   : > { %4575 = vst.msk [vmem:[#allocation2 + $0x58] sm:$0xff] %vm4563_vm5, %v4538_v40  ;;  %v12726_v59 = vadd.f32 %v8827_v5, %v5650_v54  ;;  %v9340_v40 = vmov 128.0  }
 0xb71   : > { %v5021_v38 = vpop.permute.xlu2 %5020  ;;  %8693 = vrcp.f32 %v9340_v40  ;;  %v7882_v40 = vld [vmem:[%s13998_s17 + $0x70] sm:$0xf] }
 0xb72   : > { %5058 = vst.msk [vmem:[#allocation2 + $0x58] sm:$0xff] %vm5046_vm6, %v5021_v38 }
 0xb76   : > { %5707 = vadd.xlane.f32.xlu1 %v12726_v59 }
 0xb77   : > { %v8694_v38 = vpop.eup %8693 }
 0xb78   : > { %v5738_v37 = vmul.f32 128.0, %v8694_v38  ;;  %vm5742_vm8 = vweird.f32 %v8694_v38 }
 0xb79   : > { %v3091_v20 = vpop.permute.xlu2 %3090  ;;  %v5019_v55 = vpop.permute.xlu0 %5018 }
 0xb7a   : > { %3127 = vst.msk [vmem:[#allocation2 + $0x60] sm:$0xff] %vm3114_vm2, %v3091_v20  ;;  %5705 = vadd.xlane.f32.xlu2 %v12730_v22  ;;  %v5739_v5 = vsub.f32 1.0, %v5738_v37 }
 0xb7b   : > { %5057 = vst.msk [vmem:[#allocation2 + $0x50] sm:$0xff] %vm5046_vm6, %v5019_v55 }
 0xb7c   : > { %v5740_v26 = vmul.f32 %v8694_v38, %v5739_v5  ;;  %v7884_v5 = vld [vmem:[%s13998_s17 + $0x78] sm:$0xf0] }
 0xb7e   : > { %v5502_v34 = vpop.permute.xlu1 %5501  ;;  %v5741_v20 = vadd.f32 %v8694_v38, %v5740_v26 }
 0xb7f   : > { %5540 = vst.msk [vmem:[#allocation2 + $0x50] sm:$0xff] %vm5529_vm7, %v5502_v34 }
 0xb80   : > { %v12785_v55 = vsel %vm5742_vm8, %v8694_v38, %v5741_v20  ;;  %v8011_v38 = vld [vmem:[%s13998_s17 + $0x74] sm:$0xf] }
 0xb81   : > { %v3576_v50 = vpop.permute.xlu2 %3575  ;;  %v7887_v26 = vor.u32 %v8011_v38, %v7884_v5  ;;  %v7828_v5 = vld [vmem:[%s13998_s17 + $0x8] sm:$0xf0] }
 0xb83   : > { %6229 = vmatpush.bf16.msrb.mxu1 %v7887_v26 }
 0xb85   : > { %v5652_v7 = vpop.f32.mrf.mxu3 }
 0xb86   : > { %v5653_v10 = vadd.f32 %v12719_v36, %v5652_v7  ;;  %v3093_v31 = vpop.permute.xlu1 %3092  ;;  %v5504_v47 = vpop.permute.xlu0 %5503  ;;  %v5556_v9 = vld [vmem:[#allocation2 + $0x50] sm:$0xff] }
 0xb87   : > { %3128 = vst.msk [vmem:[#allocation2 + $0x68] sm:$0xff] %vm3114_vm2, %v3093_v31 }
 0xb88   : > { %v12739_v53 = vadd.f32 %v8829_v63, %v5653_v10  ;;  %3611 = vst.msk [vmem:[#allocation2 + $0x68] sm:$0xff] %vm3597_vm3, %v3576_v50 }
 0xb89   : > { %5541 = vst.msk [vmem:[#allocation2 + $0x58] sm:$0xff] %vm5529_vm7, %v5504_v47  ;;  %v4540_v28 = vpop.permute.xlu2 %4539 }
 0xb8a   : > { %5709 = vadd.xlane.f32.xlu0 %v12739_v53 }
 0xb8d   : > { %v5654_v11 = vpop.f32.mrf.mxu3 }
 0xb8e   : > { %v5655_v4 = vadd.f32 %v12719_v36, %v5654_v11  ;;  %v4057_v32 = vpop.permute.xlu1 %4056  ;;  %v3574_v25 = vpop.permute.xlu0 %3573 }
 0xb8f   : > { %3610 = vst.msk [vmem:[#allocation2 + $0x60] sm:$0xff] %vm3597_vm3, %v3574_v25 }
 0xb90   : > { %v12747_v58 = vadd.f32 %v8830_v13, %v5655_v4  ;;  %4093 = vst.msk [vmem:[#allocation2 + $0x60] sm:$0xff] %vm4080_vm4, %v4057_v32  ;;  %v5557_v33 = vld [vmem:[#allocation2 + $0x58] sm:$0xff]  ;;  %v8834_v32 = vld [vmem:[%s9836_s7 + $0x38] sm:$0xff] }
 0xb91   : > { %4576 = vst.msk [vmem:[#allocation2 + $0x60] sm:$0xff] %vm4563_vm5, %v4540_v28  ;;  %v5025_v42 = vpop.permute.xlu2 %5024  ;;  %v5567_v44 = vpack.c.bf16 %v5557_v33, %v5556_v9 }
 0xb92   : > { %5711 = vadd.xlane.f32.xlu2 %v12747_v58 }
 0xb93   : > { %5671 = vmatmul.bf16.gmra.mxu3 %v5567_v44 }
 0xb96   : > { %v4542_v0 = vpop.permute.xlu1 %4541  ;;  %v4059_v41 = vpop.permute.xlu0 %4058 }
 0xb97   : > { %4094 = vst.msk [vmem:[#allocation2 + $0x68] sm:$0xff] %vm4080_vm4, %v4059_v41 }
 0xb98   : > { %4577 = vst.msk [vmem:[#allocation2 + $0x68] sm:$0xff] %vm4563_vm5, %v4542_v0 }
 0xb99   : > { %5060 = vst.msk [vmem:[#allocation2 + $0x68] sm:$0xff] %vm5046_vm6, %v5025_v42  ;;  %v3095_v48 = vpop.permute.xlu2 %3094  ;;  %v8835_v42 = vld [vmem:[%s9836_s7 + $0x40] sm:$0xff] }
 0xb9a   : > { %3129 = vst.msk [vmem:[#allocation2 + $0x70] sm:$0xff] %vm3114_vm2, %v3095_v48 }
 0xb9e   : > { %v5506_v12 = vpop.permute.xlu1 %5505  ;;  %v5023_v51 = vpop.permute.xlu0 %5022 }
 0xb9f   : > { %5059 = vst.msk [vmem:[#allocation2 + $0x60] sm:$0xff] %vm5046_vm6, %v5023_v51 }
 0xba0   : > { %5542 = vst.msk [vmem:[#allocation2 + $0x60] sm:$0xff] %vm5529_vm7, %v5506_v12 }
 0xba1   : > { %v3580_v43 = vpop.permute.xlu2 %3579 }
 0xba5   : > { %v5657_v16 = vpop.f32.mrf.mxu3 }
 0xba6   : > { %v5658_v39 = vadd.f32 %v12719_v36, %v5657_v16  ;;  %v3097_v29 = vpop.permute.xlu1 %3096  ;;  %v5508_v27 = vpop.permute.xlu0 %5507 }
 0xba7   : > { %3130 = vst.msk [vmem:[#allocation2 + $0x78] sm:$0xff] %vm3114_vm2, %v3097_v29  ;;  %v5558_v62 = vld [vmem:[#allocation2 + $0x60] sm:$0xff] }
 0xba8   : > { %v12761_v52 = vadd.f32 %v8831_v18, %v5658_v39  ;;  %3613 = vst.msk [vmem:[#allocation2 + $0x78] sm:$0xff] %vm3597_vm3, %v3580_v43  ;;  %v8837_v18 = vld [vmem:[%s9836_s7 + $0x50] sm:$0xff] }
 0xba9   : > { %5543 = vst.msk [vmem:[#allocation2 + $0x68] sm:$0xff] %vm5529_vm7, %v5508_v27  ;;  %v4544_v21 = vpop.permute.xlu2 %4543 }
 0xbaa   : > { %5713 = vadd.xlane.f32.xlu1 %v12761_v52 }
 0xbad   : > { %v5659_v30 = vpop.f32.mrf.mxu3 }
 0xbae   : > { %v5660_v3 = vadd.f32 %v12719_v36, %v5659_v30  ;;  %v4061_v19 = vpop.permute.xlu1 %4060  ;;  %v3578_v60 = vpop.permute.xlu0 %3577 }
 0xbaf   : > { %3612 = vst.msk [vmem:[#allocation2 + $0x70] sm:$0xff] %vm3597_vm3, %v3578_v60 }
 0xbb0   : > { %v12769_v61 = vadd.f32 %v8832_v46, %v5660_v3  ;;  %4095 = vst.msk [vmem:[#allocation2 + $0x70] sm:$0xff] %vm4080_vm4, %v4061_v19  ;;  %v5559_v35 = vld [vmem:[#allocation2 + $0x68] sm:$0xff] }
 0xbb1   : > { %4578 = vst.msk [vmem:[#allocation2 + $0x70] sm:$0xff] %vm4563_vm5, %v4544_v21  ;;  %v5568_v45 = vpack.c.bf16 %v5559_v35, %v5558_v62  ;;  %v5029_v49 = vpop.permute.xlu2 %5028 }
 0xbb2   : > { %5715 = vadd.xlane.f32.xlu2 %v12769_v61 }
 0xbb3   : > { %5676 = vmatmul.bf16.gmra.mxu3 %v5568_v45 }
 0xbb6   : > { %v4546_v23 = vpop.permute.xlu1 %4545  ;;  %v4063_v14 = vpop.permute.xlu0 %4062 }
 0xbb7   : > { %4096 = vst.msk [vmem:[#allocation2 + $0x78] sm:$0xff] %vm4080_vm4, %v4063_v14 }
 0xbb8   : > { %4579 = vst.msk [vmem:[#allocation2 + $0x78] sm:$0xff] %vm4563_vm5, %v4546_v23  ;;  %v8838_v23 = vld [vmem:[%s9836_s7 + $0x58] sm:$0xff] }
 0xbb9   : > { %5062 = vst.msk [vmem:[#allocation2 + $0x78] sm:$0xff] %vm5046_vm6, %v5029_v49 }
 0xbbe   : > { %v5510_v1 = vpop.permute.xlu1 %5509  ;;  %v5027_v17 = vpop.permute.xlu0 %5026 }
 0xbbf   : > { %5061 = vst.msk [vmem:[#allocation2 + $0x70] sm:$0xff] %vm5046_vm6, %v5027_v17  ;;  %v8839_v17 = vld [vmem:[%s9836_s7 + $0x60] sm:$0xff] }
 0xbc0   : > { %5544 = vst.msk [vmem:[#allocation2 + $0x70] sm:$0xff] %vm5529_vm7, %v5510_v1 }
 0xbc5   : > { %v5662_v6 = vpop.f32.mrf.mxu3 }
 0xbc6   : > { %v5663_v15 = vadd.f32 %v12719_v36, %v5662_v6  ;;  %v5512_v8 = vpop.permute.xlu0 %5511 }
 0xbc7   : > { %5545 = vst.msk [vmem:[#allocation2 + $0x78] sm:$0xff] %vm5529_vm7, %v5512_v8  ;;  %v5560_v56 = vld [vmem:[#allocation2 + $0x70] sm:$0xff] }
 0xbc8   : > { %v12782_v2 = vadd.f32 %v8833_v24, %v5663_v15 }
 0xbca   : > { %5717 = vadd.xlane.f32.xlu2 %v12782_v2 }
 0xbcd   : > { %v5664_v28 = vpop.f32.mrf.mxu3 }
 0xbce   : > { %v5561_v57 = vld [vmem:[#allocation2 + $0x78] sm:$0xff]  ;;  %v5665_v4 = vadd.f32 %v12719_v36, %v5664_v28 }
 0xbcf   : > { %v5569_v54 = vpack.c.bf16 %v5561_v57, %v5560_v56 }
 0xbd0   : > { %v12801_v25 = vadd.f32 %v8834_v32, %v5665_v4  ;;  %v8008_v4 = vld [vmem:[%s13998_s17 + $0x54] sm:$0xf0] }
 0xbd1   : > { %5681 = vmatmul.bf16.gmra.mxu3 %v5569_v54  ;;  %v8012_v54 = vld [vmem:[%s13998_s17 + $0x74] sm:$0xf0] }
 0xbd2   : > { %v7883_v37 = vor.u32 %v8012_v54, %v7882_v40  ;;  %v7998_v40 = vld [vmem:[%s13998_s17 + $0x4] sm:$0xf0]  ;;  %v7997_v54 = vld [vmem:[%s13998_s17 + $0x4] sm:$0xf] }
 0xbd4   : > { %6180 = vmatpush.bf16.msrb.mxu0 %v7883_v37 }
 0xbe9   : > { %v5708_v34 = vpop.xlane.xlu1 %5707 }
 0xbea   : > { %v5745_v50 = vmul.f32 %v12785_v55, %v5708_v34  ;;  %v7874_v34 = vld [vmem:[%s13998_s17 + $0x60] sm:$0xf] }
 0xbec   : > { %v12789_v7 = vsub.f32 %v12726_v59, %v5745_v50  ;;  %v5667_v59 = vpop.f32.mrf.mxu3  ;;  %v8010_v50 = vld [vmem:[%s13998_s17 + $0x64] sm:$0xf0] }
 0xbed   : > { %v5706_v10 = vpop.xlane.xlu2 %5705  ;;  %v5668_v9 = vadd.f32 %v12719_v36, %v5667_v59  ;;  %v8007_v59 = vld [vmem:[%s13998_s17 + $0x54] sm:$0xf] }
 0xbee   : > { %v5744_v31 = vmul.f32 %v12785_v55, %v5706_v10  ;;  %v5777_v47 = vmul.f32 %v12789_v7, %v12789_v7  ;;  %v8009_v10 = vld [vmem:[%s13998_s17 + $0x64] sm:$0xf] }
 0xbef   : > { %v12810_v44 = vadd.f32 %v8835_v42, %v5668_v9  ;;  %v8006_v42 = vld [vmem:[%s13998_s17 + $0x44] sm:$0xf0] }
 0xbf0   : > { %v12795_v63 = vsub.f32 %v12730_v22, %v5744_v31  ;;  %5794 = vadd.xlane.f32.xlu1 %v5777_v47  ;;  %v7875_v31 = vor.u32 %v8010_v50, %v7874_v34  ;;  %v7876_v47 = vld [vmem:[%s13998_s17 + $0x68] sm:$0xf0] }
 0xbf1   : > { %v7879_v28 = vor.u32 %v8009_v10, %v7876_v47 }
 0xbf2   : > { %v5776_v11 = vmul.f32 %v12795_v63, %v12795_v63  ;;  %6181 = vmatpush.bf16.msrb.mxu0 %v7875_v31 }
 0xbf3   : > { %6230 = vmatpush.bf16.msrb.mxu1 %v7879_v28 }
 0xbf4   : > { %5792 = vadd.xlane.f32.xlu0 %v5776_v11  ;;  %v5669_v41 = vpop.f32.mrf.mxu3  ;;  %v7866_v11 = vld [vmem:[%s13998_s17 + $0x50] sm:$0xf] }
 0xbf5   : > { %v5670_v12 = vadd.f32 %v12719_v36, %v5669_v41  ;;  %v7867_v32 = vor.u32 %v8008_v4, %v7866_v11 }
 0xbf7   : > { %6182 = vmatpush.bf16.msrb.mxu0 %v7867_v32 }
 0xbfc   : > { %5719 = vadd.xlane.f32.xlu0 %v12801_v25 }
 0xbfd   : > { %v5710_v13 = vpop.xlane.xlu0 %5709 }
 0xbfe   : > { %v5746_v22 = vmul.f32 %v12785_v55, %v5710_v13  ;;  %v7868_v13 = vld [vmem:[%s13998_s17 + $0x58] sm:$0xf0] }
 0xbff   : > { %v7871_v9 = vor.u32 %v8007_v59, %v7868_v13 }
 0xc00   : > { %v12807_v33 = vsub.f32 %v12739_v53, %v5746_v22  ;;  %v8836_v53 = vld [vmem:[%s9836_s7 + $0x48] sm:$0xff]  ;;  %v7858_v22 = vld [vmem:[%s13998_s17 + $0x40] sm:$0xf] }
 0xc01   : > { %v12821_v16 = vadd.f32 %v8836_v53, %v5670_v12  ;;  %6231 = vmatpush.bf16.msrb.mxu1 %v7871_v9  ;;  %v7859_v41 = vor.u32 %v8006_v42, %v7858_v22 }
 0xc02   : > { %v5778_v0 = vmul.f32 %v12807_v33, %v12807_v33 }
 0xc03   : > { %6183 = vmatpush.bf16.msrb.mxu0 %v7859_v41 }
 0xc04   : > { %5721 = vadd.xlane.f32.xlu0 %v12810_v44  ;;  %5796 = vadd.xlane.f32.xlu1 %v5778_v0  ;;  %v8005_v0 = vld [vmem:[%s13998_s17 + $0x44] sm:$0xf] }
 0xc05   : > { %v5712_v48 = vpop.xlane.xlu2 %5711 }
 0xc06   : > { %v5747_v51 = vmul.f32 %v12785_v55, %v5712_v48  ;;  %v7860_v48 = vld [vmem:[%s13998_s17 + $0x48] sm:$0xf0] }
 0xc08   : > { %v12818_v43 = vsub.f32 %v12747_v58, %v5747_v51  ;;  %v7863_v51 = vor.u32 %v8005_v0, %v7860_v48 }
 0xc0a   : > { %v5779_v39 = vmul.f32 %v12818_v43, %v12818_v43  ;;  %6232 = vmatpush.bf16.msrb.mxu1 %v7863_v51 }
 0xc0c   : > { %5798 = vadd.xlane.f32.xlu2 %v5779_v39  ;;  %5723 = vadd.xlane.f32.xlu1 %v12821_v16  ;;  %v7850_v39 = vld [vmem:[%s13998_s17 + $0x30] sm:$0xf] }
 0xc16   : > { %v5672_v29 = vpop.f32.mrf.mxu3 }
 0xc17   : > { %v5673_v27 = vadd.f32 %v12719_v36, %v5672_v29  ;;  %v8004_v29 = vld [vmem:[%s13998_s17 + $0x34] sm:$0xf0] }
 0xc19   : > { %v12828_v21 = vadd.f32 %v8837_v18, %v5673_v27  ;;  %v8003_v27 = vld [vmem:[%s13998_s17 + $0x34] sm:$0xf]  ;;  %v8841_v18 = vld [vmem:[%s9836_s7 + $0x70] sm:$0xff] }
 0xc1b   : > { %5725 = vadd.xlane.f32.xlu1 %v12828_v21 }
 0xc1d   : > { %v5714_v58 = vpop.xlane.xlu1 %5713 }
 0xc1e   : > { %v5748_v30 = vmul.f32 %v12785_v55, %v5714_v58  ;;  %v5674_v60 = vpop.f32.mrf.mxu3 }
 0xc1f   : > { %v5675_v62 = vadd.f32 %v12719_v36, %v5674_v60 }
 0xc20   : > { %v12833_v3 = vsub.f32 %v12761_v52, %v5748_v30  ;;  %v7851_v30 = vor.u32 %v8004_v29, %v7850_v39 }
 0xc21   : > { %v12843_v14 = vadd.f32 %v8838_v23, %v5675_v62  ;;  %v8002_v62 = vld [vmem:[%s13998_s17 + $0x24] sm:$0xf0] }
 0xc22   : > { %v5780_v19 = vmul.f32 %v12833_v3, %v12833_v3  ;;  %6184 = vmatpush.bf16.msrb.mxu0 %v7851_v30 }
 0xc24   : > { %5800 = vadd.xlane.f32.xlu2 %v5780_v19  ;;  %v7852_v19 = vld [vmem:[%s13998_s17 + $0x38] sm:$0xf0] }
 0xc25   : > { %v5716_v46 = vpop.xlane.xlu2 %5715  ;;  %v7855_v60 = vor.u32 %v8003_v27, %v7852_v19 }
 0xc26   : > { %v5749_v35 = vmul.f32 %v12785_v55, %v5716_v46  ;;  %v7842_v46 = vld [vmem:[%s13998_s17 + $0x20] sm:$0xf] }
 0xc27   : > { %6233 = vmatpush.bf16.msrb.mxu1 %v7855_v60  ;;  %v7843_v23 = vor.u32 %v8002_v62, %v7842_v46 }
 0xc28   : > { %v12840_v45 = vsub.f32 %v12769_v61, %v5749_v35  ;;  %v8001_v35 = vld [vmem:[%s13998_s17 + $0x24] sm:$0xf] }
 0xc29   : > { %6185 = vmatpush.bf16.msrb.mxu0 %v7843_v23 }
 0xc2a   : > { %v5781_v52 = vmul.f32 %v12840_v45, %v12840_v45 }
 0xc2c   : > { %5802 = vadd.xlane.f32.xlu0 %v5781_v52  ;;  %5727 = vadd.xlane.f32.xlu2 %v12843_v14  ;;  %v7844_v52 = vld [vmem:[%s13998_s17 + $0x28] sm:$0xf0] }
 0xc36   : > { %v5677_v49 = vpop.f32.mrf.mxu3 }
 0xc37   : > { %v5678_v1 = vadd.f32 %v12719_v36, %v5677_v49  ;;  %v7847_v49 = vor.u32 %v8001_v35, %v7844_v52  ;;  %v12922_v52 = vld [vmem:[%s13999_s14] ss:$0 sm:$0xff] }
 0xc39   : > { %v12850_v6 = vadd.f32 %v8839_v17, %v5678_v1  ;;  %6234 = vmatpush.bf16.msrb.mxu1 %v7847_v49  ;;  %v7834_v1 = vld [vmem:[%s13998_s17 + $0x10] sm:$0xf]  ;;  %v8000_v17 = vld [vmem:[%s13998_s17 + $0x14] sm:$0xf0] }
 0xc3b   : > { %5729 = vadd.xlane.f32.xlu2 %v12850_v6 }
 0xc3d   : > { %v5718_v61 = vpop.xlane.xlu2 %5717 }
 0xc3e   : > { %v5750_v15 = vmul.f32 %v12785_v55, %v5718_v61  ;;  %v5679_v56 = vpop.f32.mrf.mxu3  ;;  %v7999_v61 = vld [vmem:[%s13998_s17 + $0x14] sm:$0xf] }
 0xc3f   : > { %v5680_v57 = vadd.f32 %v12719_v36, %v5679_v56 }
 0xc40   : > { %v12855_v8 = vsub.f32 %v12782_v2, %v5750_v15  ;;  %v8840_v2 = vld [vmem:[%s9836_s7 + $0x68] sm:$0xff]  ;;  %v7835_v15 = vor.u32 %v8000_v17, %v7834_v1 }
 0xc41   : > { %v12865_v20 = vadd.f32 %v8840_v2, %v5680_v57  ;;  %v7826_v57 = vld [vmem:[%s13998_s17] sm:$0xf]  ;;  %v7831_v2 = vor.u32 %v7997_v54, %v7828_v5 }
 0xc42   : > { %v5782_v24 = vmul.f32 %v12855_v8, %v12855_v8  ;;  %6186 = vmatpush.bf16.msrb.mxu0 %v7835_v15  ;;  %v7827_v37 = vor.u32 %v7998_v40, %v7826_v57 }
 0xc44   : > { %5804 = vadd.xlane.f32.xlu0 %v5782_v24  ;;  %v7836_v24 = vld [vmem:[%s13998_s17 + $0x18] sm:$0xf0] }
 0xc45   : > { %v7839_v56 = vor.u32 %v7999_v61, %v7836_v24 }
 0xc46   : > { %6187 = vmatpush.bf16.msrb.mxu0 %v7827_v37 }
 0xc47   : > { %6235 = vmatpush.bf16.msrb.mxu1 %v7839_v56 }
 0xc4b   : > { %6236 = vmatpush.bf16.msrb.mxu1 %v7831_v2 }
 0xc4c   : > { %5731 = vadd.xlane.f32.xlu0 %v12865_v20 }
 0xc54   : > { %v5682_v12 = vpop.f32.mrf.mxu3 }
 0xc55   : > { %v5683_v53 = vadd.f32 %v12719_v36, %v5682_v12 }
 0xc57   : > { %v12885_v58 = vadd.f32 %v8841_v18, %v5683_v53  ;;  %v12912_v18 = vld [vmem:[%s9815_s12] ss:$0 sm:$0xff] }
 0xc59   : > { %5733 = vadd.xlane.f32.xlu0 %v12885_v58 }
 0xc5c   : > { %v5684_v23 = vpop.f32.mrf.mxu3 }
 0xc5d   : > { %v5685_v24 = vadd.f32 %v12719_v36, %v5684_v23  ;;  %v8842_v36 = vld [vmem:[%s9836_s7 + $0x78] sm:$0xff] }
 0xc63   : > { %v5795_v38 = vpop.xlane.xlu1 %5794 }
 0xc64   : > { %v5825_v26 = vmul.f32 %v5795_v38, %v12785_v55 }
 0xc66   : > { %v5841_v34 = vadd.f32 1e-05, %v5825_v26  ;;  %v12944_v26 = vadd.f32 %v8842_v36, %v5685_v24 }
 0xc67   : > { %v5793_v50 = vpop.xlane.xlu0 %5792 }
 0xc68   : > { %8695 = vrsqrt.f32 %v5841_v34  ;;  %v5824_v10 = vmul.f32 %v5793_v50, %v12785_v55  ;;  %vm5872_vm10 = vweird.f32 %v5841_v34 }
 0xc6a   : > { %v5840_v31 = vadd.f32 1e-05, %v5824_v10 }
 0xc6c   : > { %8697 = vrsqrt.f32 %v5840_v31  ;;  %vm5862_vm13 = vweird.f32 %v5840_v31 }
 0xc6e   : > { %v8696_v47 = vpop.eup %8695 }
 0xc6f   : > { %v5867_v28 = vmul.f32 %v8696_v47, %v5841_v34  ;;  %v5720_v11 = vpop.xlane.xlu0 %5719  ;;  %vm5873_vm9 = vweird.f32 %v8696_v47 }
 0xc70   : > { %v5751_v4 = vmul.f32 %v12785_v55, %v5720_v11  ;;  %vm5874_vm11 = vmor %vm5872_vm10, %vm5873_vm9 }
 0xc71   : > { %v5868_v59 = vmul.f32 %v8696_v47, %v5867_v28 }
 0xc72   : > { %v8698_v32 = vpop.eup %8697  ;;  %v12905_v13 = vsub.f32 %v12801_v25, %v5751_v4 }
 0xc73   : > { %v5869_v9 = vmul.f32 0.5, %v5868_v59  ;;  %v5857_v22 = vmul.f32 %v8698_v32, %v5840_v31  ;;  %vm5863_vm12 = vweird.f32 %v8698_v32 }
 0xc74   : > { %v5783_v42 = vmul.f32 %v12905_v13, %v12905_v13  ;;  %vm5864_vm14 = vmor %vm5862_vm13, %vm5863_vm12 }
 0xc75   : > { %v5870_v0 = vsub.f32 1.5, %v5869_v9  ;;  %v5858_v41 = vmul.f32 %v8698_v32, %v5857_v22 }
 0xc76   : > { %5806 = vadd.xlane.f32.xlu1 %v5783_v42 }
 0xc77   : > { %v5871_v48 = vmul.f32 %v8696_v47, %v5870_v0  ;;  %v5859_v12 = vmul.f32 0.5, %v5858_v41  ;;  %v5797_v51 = vpop.xlane.xlu1 %5796  ;;  %v5722_v53 = vpop.xlane.xlu0 %5721 }
 0xc78   : > { %v5826_v39 = vmul.f32 %v5797_v51, %v12785_v55  ;;  %v5752_v25 = vmul.f32 %v12785_v55, %v5722_v53 }
 0xc79   : > { %v5875_v29 = vsel %vm5874_vm11, %v8696_v47, %v5871_v48  ;;  %v5860_v27 = vsub.f32 1.5, %v5859_v12 }
 0xc7a   : > { %v6017_v30 = vmul.f32 %v5875_v29, %v12789_v7  ;;  %v5842_v19 = vadd.f32 1e-05, %v5826_v39  ;;  %v12916_v60 = vsub.f32 %v12810_v44, %v5752_v25 }
 0xc7b   : > { %v5861_v46 = vmul.f32 %v8698_v32, %v5860_v27 }
 0xc7c   : > { %8699 = vrsqrt.f32 %v5842_v19  ;;  %v5784_v62 = vmul.f32 %v12916_v60, %v12916_v60  ;;  %v6036_v49 = vmul.f32 %v12912_v18, %v6017_v30  ;;  %vm5882_vm0 = vweird.f32 %v5842_v19 }
 0xc7d   : > { %v5865_v35 = vsel %vm5864_vm14, %v8698_v32, %v5861_v46 }
 0xc7e   : > { %v6016_v7 = vmul.f32 %v5865_v35, %v12795_v63  ;;  %5808 = vadd.xlane.f32.xlu1 %v5784_v62  ;;  %v12931_v57 = vadd.f32 %v12922_v52, %v6036_v49 }
 0xc7f   : > { %v5799_v44 = vpop.xlane.xlu2 %5798  ;;  %v5724_v1 = vpop.xlane.xlu1 %5723 }
 0xc80   : > { %v6035_v17 = vmul.f32 %v12912_v18, %v6016_v7  ;;  %v5827_v61 = vmul.f32 %v5799_v44, %v12785_v55  ;;  %v5753_v15 = vmul.f32 %v12785_v55, %v5724_v1 }
 0xc82   : > { %v8700_v56 = vpop.eup %8699  ;;  %v12934_v40 = vadd.f32 %v12922_v52, %v6035_v17  ;;  %v5843_v63 = vadd.f32 1e-05, %v5827_v61  ;;  %v12937_v54 = vsub.f32 %v12821_v16, %v5753_v15 }
 0xc83   : > { %v5877_v38 = vmul.f32 %v8700_v56, %v5842_v19  ;;  %vm5883_vm15 = vweird.f32 %v8700_v56 }
 0xc84   : > { %8701 = vrsqrt.f32 %v5843_v63  ;;  %v5785_v37 = vmul.f32 %v12937_v54, %v12937_v54  ;;  %v6070_v5 = vpack.c.bf16 %v12931_v57, %v12934_v40  ;;  %vm5884_vm1 = vmor %vm5882_vm0, %vm5883_vm15  ;;  %vm5892_vm3 = vweird.f32 %v5843_v63 }
 0xc85   : > { %v5878_v2 = vmul.f32 %v8700_v56, %v5877_v38 }
 0xc86   : > { %5810 = vadd.xlane.f32.xlu2 %v5785_v37  ;;  %6188 = vmatmul.bf16.vlgmr.msrb.gmra.mxu0 %v6070_v5 }
 0xc87   : > { %v5879_v34 = vmul.f32 0.5, %v5878_v2  ;;  %6237 = vmatmul.bf16.vlgmr.msrb.gmra.mxu1 %v6070_v5  ;;  %5735 = vadd.xlane.f32.xlu1 %v12944_v26 }
 0xc89   : > { %v5880_v16 = vsub.f32 1.5, %v5879_v34 }
 0xc8a   : > { %v8702_v50 = vpop.eup %8701 }
 0xc8b   : > { %v5881_v10 = vmul.f32 %v8700_v56, %v5880_v16  ;;  %v5887_v31 = vmul.f32 %v8702_v50, %v5843_v63  ;;  %vm5893_vm2 = vweird.f32 %v8702_v50 }
 0xc8c   : > { %vm5894_vm4 = vmor %vm5892_vm3, %vm5893_vm2 }
 0xc8d   : > { %v5888_v47 = vmul.f32 %v8702_v50, %v5887_v31  ;;  %v5885_v11 = vsel %vm5884_vm1, %v8700_v56, %v5881_v10 }
 0xc8e   : > { %v5726_v28 = vpop.xlane.xlu1 %5725  ;;  %v6018_v22 = vmul.f32 %v5885_v11, %v12807_v33 }
 0xc8f   : > { %v5889_v4 = vmul.f32 0.5, %v5888_v47  ;;  %v5754_v59 = vmul.f32 %v12785_v55, %v5726_v28 }
 0xc90   : > { %v6037_v12 = vmul.f32 %v12912_v18, %v6018_v22 }
 0xc91   : > { %v5890_v32 = vsub.f32 1.5, %v5889_v4  ;;  %v12949_v9 = vsub.f32 %v12828_v21, %v5754_v59 }
 0xc92   : > { %v12959_v33 = vadd.f32 %v12922_v52, %v6037_v12 }
 0xc93   : > { %v5891_v42 = vmul.f32 %v8702_v50, %v5890_v32  ;;  %v5786_v0 = vmul.f32 %v12949_v9, %v12949_v9 }
 0xc95   : > { %v5895_v41 = vsel %vm5894_vm4, %v8702_v50, %v5891_v42  ;;  %5812 = vadd.xlane.f32.xlu2 %v5786_v0 }
 0xc96   : > { %v6019_v48 = vmul.f32 %v5895_v41, %v12818_v43 }
 0xc97   : > { %v5801_v51 = vpop.xlane.xlu2 %5800 }
 0xc98   : > { %v5828_v53 = vmul.f32 %v5801_v51, %v12785_v55  ;;  %v6038_v21 = vmul.f32 %v12912_v18, %v6019_v48  ;;  %v8020_v51 = vld [vmem:[%s14000_s0 + $0x38] sm:$0xff] }
 0xc99   : > { %6714 = vmatpush.bf16.msrb.mxu2 %v8020_v51  ;;  %v8027_v51 = vld [vmem:[%s14000_s0 + $0x70] sm:$0xff] }
 0xc9a   : > { %v5844_v39 = vadd.f32 1e-05, %v5828_v53  ;;  %v12962_v25 = vadd.f32 %v12922_v52, %v6038_v21 }
 0xc9c   : > { %8703 = vrsqrt.f32 %v5844_v39  ;;  %v6071_v29 = vpack.c.bf16 %v12962_v25, %v12959_v33  ;;  %vm5902_vm6 = vweird.f32 %v5844_v39 }
 0xc9e   : > { %6193 = vmatmul.bf16.gmra.mxu0 %v6071_v29  ;;  %6242 = vmatmul.bf16.gmra.mxu1 %v6071_v29 }
 0xc9f   : > { %v5728_v43 = vpop.xlane.xlu2 %5727  ;;  %v5803_v27 = vpop.xlane.xlu0 %5802 }
 0xca0   : > { %v5755_v30 = vmul.f32 %v12785_v55, %v5728_v43  ;;  %v5829_v19 = vmul.f32 %v5803_v27, %v12785_v55  ;;  %v8018_v27 = vld [vmem:[%s14000_s0 + $0x28] sm:$0xff] }
 0xca2   : > { %v8704_v46 = vpop.eup %8703  ;;  %v12969_v62 = vsub.f32 %v12843_v14, %v5755_v30  ;;  %v5845_v35 = vadd.f32 1e-05, %v5829_v19 }
 0xca3   : > { %v5897_v23 = vmul.f32 %v8704_v46, %v5844_v39  ;;  %vm5903_vm5 = vweird.f32 %v8704_v46 }
 0xca4   : > { %8705 = vrsqrt.f32 %v5845_v35  ;;  %v5787_v49 = vmul.f32 %v12969_v62, %v12969_v62  ;;  %vm5904_vm7 = vmor %vm5902_vm6, %vm5903_vm5  ;;  %vm5912_vm9 = vweird.f32 %v5845_v35 }
 0xca5   : > { %v5898_v7 = vmul.f32 %v8704_v46, %v5897_v23 }
 0xca6   : > { %5814 = vadd.xlane.f32.xlu0 %v5787_v49 }
 0xca7   : > { %v5899_v44 = vmul.f32 0.5, %v5898_v7 }
 0xca9   : > { %v5900_v1 = vsub.f32 1.5, %v5899_v44 }
 0xcaa   : > { %v8706_v17 = vpop.eup %8705 }
 0xcab   : > { %v5901_v61 = vmul.f32 %v8704_v46, %v5900_v1  ;;  %v5907_v15 = vmul.f32 %v8706_v17, %v5845_v35  ;;  %vm5913_vm8 = vweird.f32 %v8706_v17  ;;  %v8017_v35 = vld [vmem:[%s14000_s0 + $0x20] sm:$0xff] }
 0xcac   : > { %vm5914_vm10 = vmor %vm5912_vm9, %vm5913_vm8 }
 0xcad   : > { %v5908_v24 = vmul.f32 %v8706_v17, %v5907_v15  ;;  %v5905_v14 = vsel %vm5904_vm7, %v8704_v46, %v5901_v61 }
 0xcae   : > { %v5730_v56 = vpop.xlane.xlu2 %5729  ;;  %v6020_v36 = vmul.f32 %v5905_v14, %v12833_v3 }
 0xcaf   : > { %v5909_v63 = vmul.f32 0.5, %v5908_v24  ;;  %v5756_v38 = vmul.f32 %v12785_v55, %v5730_v56 }
 0xcb0   : > { %v6039_v10 = vmul.f32 %v12912_v18, %v6020_v36 }
 0xcb1   : > { %v5910_v37 = vsub.f32 1.5, %v5909_v63  ;;  %v12975_v5 = vsub.f32 %v12850_v6, %v5756_v38 }
 0xcb2   : > { %v12984_v6 = vadd.f32 %v12922_v52, %v6039_v10 }
 0xcb3   : > { %v5911_v2 = vmul.f32 %v8706_v17, %v5910_v37  ;;  %v5788_v34 = vmul.f32 %v12975_v5, %v12975_v5  ;;  %v8015_v37 = vld [vmem:[%s14000_s0 + $0x10] sm:$0xff] }
 0xcb5   : > { %v5915_v16 = vsel %vm5914_vm10, %v8706_v17, %v5911_v2  ;;  %5816 = vadd.xlane.f32.xlu1 %v5788_v34  ;;  %v8016_v17 = vld [vmem:[%s14000_s0 + $0x18] sm:$0xff] }
 0xcb6   : > { %v6021_v50 = vmul.f32 %v5915_v16, %v12840_v45 }
 0xcb7   : > { %v5805_v31 = vpop.xlane.xlu0 %5804 }
 0xcb8   : > { %v6040_v47 = vmul.f32 %v12912_v18, %v6021_v50  ;;  %v5830_v41 = vmul.f32 %v5805_v31, %v12785_v55  ;;  %v6094_v31 = vld [vmem:[%s9821_s10] sm:$0x3]  ;;  %s14003_s10 = smov %s13999_s14 }
 0xcba   : > { %v12987_v3 = vadd.f32 %v12922_v52, %v6040_v47 }
 0xcbc   : > { %v6072_v28 = vpack.c.bf16 %v12987_v3, %v12984_v6 }
 0xcbe   : > { %6198 = vmatmul.bf16.gmra.mxu0 %v6072_v28  ;;  %6247 = vmatmul.bf16.gmra.mxu1 %v6072_v28 }
 0xcbf   : > { %v5732_v11 = vpop.xlane.xlu0 %5731 }
 0xcc0   : > { %v5757_v45 = vmul.f32 %v12785_v55, %v5732_v11  ;;  %v8014_v11 = vld [vmem:[%s14000_s0 + $0x8] sm:$0xff] }
 0xcc2   : > { %v12993_v4 = vsub.f32 %v12865_v20, %v5757_v45  ;;  %v5846_v20 = vadd.f32 1e-05, %v5830_v41  ;;  %v8028_v45 = vld [vmem:[%s14000_s0 + $0x78] sm:$0xff] }
 0xcc3   : > { %8030 = vmatpush.bf16.msrb.mxu3 %v8028_v45  ;;  %6763 = vmatpush.bf16.msra.mxu0 %v8028_v45 }
 0xcc4   : > { %v5789_v59 = vmul.f32 %v12993_v4, %v12993_v4  ;;  %8707 = vrsqrt.f32 %v5846_v20  ;;  %vm5922_vm12 = vweird.f32 %v5846_v20 }
 0xcc6   : > { %5818 = vadd.xlane.f32.xlu2 %v5789_v59 }
 0xcc7   : > { %8031 = vmatpush.bf16.msrb.mxu3 %v8027_v51  ;;  %6764 = vmatpush.bf16.msra.mxu0 %v8027_v51 }
 0xcca   : > { %v8708_v48 = vpop.eup %8707 }
 0xccb   : > { %v5917_v12 = vmul.f32 %v8708_v48, %v5846_v20  ;;  %vm5923_vm11 = vweird.f32 %v8708_v48 }
 0xccc   : > { %v5734_v32 = vpop.xlane.xlu0 %5733  ;;  %vm5924_vm13 = vmor %vm5922_vm12, %vm5923_vm11 }
 0xccd   : > { %v5758_v22 = vmul.f32 %v12785_v55, %v5734_v32  ;;  %v5918_v53 = vmul.f32 %v8708_v48, %v5917_v12  ;;  %v13035_v32 = vperm.slane %v6094_v31, 0  ;;  %v8013_v12 = vld [vmem:[%s14000_s0] sm:$0xff] }
 0xccf   : > { %v12999_v42 = vsub.f32 %v12885_v58, %v5758_v22  ;;  %v8019_v58 = vld [vmem:[%s14000_s0 + $0x30] sm:$0xff]  ;;  %v5919_v43 = vmul.f32 0.5, %v5918_v53 }
 0xcd0   : > { %6715 = vmatpush.bf16.msrb.mxu2 %v8019_v58 }
 0xcd1   : > { %v5790_v0 = vmul.f32 %v12999_v42, %v12999_v42  ;;  %v5920_v30 = vsub.f32 1.5, %v5919_v43 }
 0xcd3   : > { %5820 = vadd.xlane.f32.xlu0 %v5790_v0  ;;  %v5921_v7 = vmul.f32 %v8708_v48, %v5920_v30  ;;  %v13038_v0 = vperm.slane %v6094_v31, 1 }
 0xcd4   : > { %6716 = vmatpush.bf16.msrb.mxu2 %v8018_v27 }
 0xcd5   : > { %v5925_v61 = vsel %vm5924_vm13, %v8708_v48, %v5921_v7 }
 0xcd6   : > { %v6022_v2 = vmul.f32 %v5925_v61, %v12855_v8 }
 0xcd8   : > { %6717 = vmatpush.bf16.msrb.mxu2 %v8017_v35 }
 0xcdc   : > { %6718 = vmatpush.bf16.msrb.mxu2 %v8016_v17 }
 0xce0   : > { %6719 = vmatpush.bf16.msrb.mxu2 %v8015_v37  ;;  %v8025_v37 = vld [vmem:[%s14000_s0 + $0x60] sm:$0xff] }
 0xce4   : > { %6720 = vmatpush.bf16.msrb.mxu2 %v8014_v11  ;;  %v8024_v11 = vld [vmem:[%s14000_s0 + $0x58] sm:$0xff] }
 0xce8   : > { %6721 = vmatpush.bf16.msrb.mxu2 %v8013_v12 }
 0xce9   : > { %v5807_v21 = vpop.xlane.xlu1 %5806 }
 0xcea   : > { %v5831_v39 = vmul.f32 %v5807_v21, %v12785_v55 }
 0xcec   : > { %v5847_v29 = vadd.f32 1e-05, %v5831_v39 }
 0xcee   : > { %8709 = vrsqrt.f32 %v5847_v29  ;;  %vm5932_vm15 = vweird.f32 %v5847_v29 }
 0xcf1   : > { %v5809_v19 = vpop.xlane.xlu1 %5808 }
 0xcf2   : > { %v5832_v46 = vmul.f32 %v5809_v19, %v12785_v55 }
 0xcf4   : > { %v8710_v23 = vpop.eup %8709  ;;  %v13010_v49 = vadd.f32 1e-05, %v5832_v46 }
 0xcf5   : > { %v5927_v44 = vmul.f32 %v8710_v23, %v5847_v29  ;;  %vm5933_vm14 = vweird.f32 %v8710_v23 }
 0xcf6   : > { %8711 = vrsqrt.f32 %v13010_v49  ;;  %vm5934_vm0 = vmor %vm5932_vm15, %vm5933_vm14  ;;  %vm5942_vm2 = vweird.f32 %v13010_v49 }
 0xcf7   : > { %v5928_v1 = vmul.f32 %v8710_v23, %v5927_v44 }
 0xcf9   : > { %v5929_v15 = vmul.f32 0.5, %v5928_v1  ;;  %v5811_v24 = vpop.xlane.xlu2 %5810 }
 0xcfa   : > { %v5833_v56 = vmul.f32 %v5811_v24, %v12785_v55  ;;  %v5736_v14 = vpop.xlane.xlu1 %5735 }
 0xcfb   : > { %v5930_v63 = vsub.f32 1.5, %v5929_v15  ;;  %v5759_v38 = vmul.f32 %v12785_v55, %v5736_v14 }
 0xcfc   : > { %v13017_v36 = vpop.eup %8711  ;;  %v13020_v34 = vadd.f32 1e-05, %v5833_v56 }
 0xcfd   : > { %v5931_v16 = vmul.f32 %v8710_v23, %v5930_v63  ;;  %v5937_v50 = vmul.f32 %v13017_v36, %v13010_v49  ;;  %v13025_v10 = vsub.f32 %v12944_v26, %v5759_v38  ;;  %v6041_v26 = vmul.f32 %v12912_v18, %v6022_v2 }
 0xcfe   : > { %8713 = vrsqrt.f32 %v13020_v34  ;;  %vm5943_vm1 = vweird.f32 %v13017_v36  ;;  %vm5952_vm5 = vweird.f32 %v13020_v34 }
 0xcff   : > { %v5935_v47 = vsel %vm5934_vm0, %v8710_v23, %v5931_v16  ;;  %v5938_v28 = vmul.f32 %v13017_v36, %v5937_v50  ;;  %v5791_v8 = vmul.f32 %v13025_v10, %v13025_v10  ;;  %v13047_v39 = vadd.f32 %v12922_v52, %v6041_v26  ;;  %v8026_v23 = vld [vmem:[%s14000_s0 + $0x68] sm:$0xff]  ;;  %vm13066_vm3 = vmor %vm5942_vm2, %vm5943_vm1 }
 0xd00   : > { %v6023_v59 = vmul.f32 %v5935_v47, %v12905_v13  ;;  %8032 = vmatpush.bf16.msrb.mxu3 %v8026_v23  ;;  %6765 = vmatpush.bf16.msra.mxu0 %v8026_v23  ;;  %v8022_v23 = vld [vmem:[%s14000_s0 + $0x48] sm:$0xff] }
 0xd01   : > { %v5939_v22 = vmul.f32 0.5, %v5938_v28  ;;  %5822 = vadd.xlane.f32.xlu1 %v5791_v8 }
 0xd02   : > { %v6042_v41 = vmul.f32 %v12912_v18, %v6023_v59 }
 0xd03   : > { %v5940_v20 = vsub.f32 1.5, %v5939_v22  ;;  %v6189_v48 = vpop.f32.mrf.mxu0 }
 0xd04   : > { %v8714_v53 = vpop.eup %8713  ;;  %v13044_v13 = vadd.f32 %v6189_v48, %v13035_v32  ;;  %v6238_v21 = vpop.f32.mrf.mxu1  ;;  %v13050_v58 = vadd.f32 %v12922_v52, %v6042_v41  ;;  %8033 = vmatpush.bf16.msrb.mxu3 %v8025_v37  ;;  %6766 = vmatpush.bf16.msra.mxu0 %v8025_v37 }
 0xd05   : > { %v5941_v29 = vmul.f32 %v13017_v36, %v5940_v20  ;;  %v5947_v43 = vmul.f32 %v8714_v53, %v13020_v34  ;;  %v13056_v27 = vadd.f32 %v6238_v21, %v13038_v0  ;;  %vm5953_vm4 = vweird.f32 %v8714_v53 }
 0xd06   : > { %v6310_v30 = vmul.f32 %v13044_v13, %v13044_v13  ;;  %v6073_v19 = vpack.c.bf16 %v13050_v58, %v13047_v39  ;;  %vm5954_vm6 = vmor %vm5952_vm5, %vm5953_vm4 }
 0xd07   : > { %v5948_v46 = vmul.f32 %v8714_v53, %v5947_v43  ;;  %v6311_v35 = vmul.f32 %v13056_v27, %v13056_v27  ;;  %v5945_v17 = vsel %vm13066_vm3, %v13017_v36, %v5941_v29 }
 0xd08   : > { %v6342_v44 = vmul.f32 %v6310_v30, %v13044_v13  ;;  %v5813_v1 = vpop.xlane.xlu2 %5812  ;;  %6203 = vmatmul.bf16.gmra.mxu0 %v6073_v19  ;;  %6252 = vmatmul.bf16.gmra.mxu1 %v6073_v19  ;;  %v6024_v2 = vmul.f32 %v5945_v17, %v12916_v60 }
 0xd09   : > { %v5949_v49 = vmul.f32 0.5, %v5948_v46  ;;  %v6343_v61 = vmul.f32 %v6311_v35, %v13056_v27  ;;  %v5834_v15 = vmul.f32 %v5813_v1, %v12785_v55  ;;  %8034 = vmatpush.bf16.msrb.mxu3 %v8024_v11  ;;  %6767 = vmatpush.bf16.msra.mxu0 %v8024_v11 }
 0xd0a   : > { %v6374_v24 = vmul.f32 0.044715, %v6342_v44  ;;  %v6043_v26 = vmul.f32 %v12912_v18, %v6024_v2 }
 0xd0b   : > { %v5950_v56 = vsub.f32 1.5, %v5949_v49  ;;  %v6375_v14 = vmul.f32 0.044715, %v6343_v61  ;;  %v13076_v63 = vadd.f32 1e-05, %v5834_v15  ;;  %v6191_v38 = vpop.f32.mrf.mxu0 }
 0xd0c   : > { %v6406_v36 = vadd.f32 %v6374_v24, %v13044_v13  ;;  %v13082_v16 = vadd.f32 %v6191_v38, %v13035_v32  ;;  %v6240_v50 = vpop.f32.mrf.mxu1  ;;  %v13105_v21 = vadd.f32 %v12922_v52, %v6043_v26  ;;  %v8021_v24 = vld [vmem:[%s14000_s0 + $0x40] sm:$0xff] }
 0xd0d   : > { %v5951_v31 = vmul.f32 %v8714_v53, %v5950_v56  ;;  %8715 = vrsqrt.f32 %v13076_v63  ;;  %v13089_v28 = vadd.f32 %v6240_v50, %v13038_v0  ;;  %v6407_v8 = vadd.f32 %v6375_v14, %v13056_v27 }
 0xd0e   : > { %v6312_v47 = vmul.f32 %v13082_v16, %v13082_v16  ;;  %v6438_v59 = vmul.f32 0.7978846, %v6406_v36  ;;  %vm5962_vm8 = vweird.f32 %v13076_v63 }
 0xd0f   : > { %v5955_v60 = vsel %vm5954_vm6, %v8714_v53, %v5951_v31  ;;  %v6313_v22 = vmul.f32 %v13089_v28, %v13089_v28  ;;  %v6439_v12 = vmul.f32 0.7978846, %v6407_v8 }
 0xd10   : > { %v6025_v45 = vmul.f32 %v5955_v60, %v12937_v54  ;;  %v6344_v34 = vmul.f32 %v6312_v47, %v13082_v16  ;;  %v8023_v54 = vld [vmem:[%s14000_s0 + $0x50] sm:$0xff]  ;;  %8717 = vtanh.f32 %v6438_v59  ;;  %v6278_v47 = vmul.f32 0.5, %v13044_v13 }
 0xd11   : > { %v6345_v51 = vmul.f32 %v6313_v22, %v13089_v28  ;;  %8035 = vmatpush.bf16.msrb.mxu3 %v8023_v54  ;;  %6768 = vmatpush.bf16.msra.mxu0 %v8023_v54  ;;  %8719 = vtanh.f32 %v6439_v12  ;;  %v6280_v60 = vmul.f32 0.5, %v13082_v16  ;;  %v6281_v12 = vmul.f32 0.5, %v13089_v28 }
 0xd12   : > { %v6376_v41 = vmul.f32 0.044715, %v6344_v34  ;;  %v6044_v20 = vmul.f32 %v12912_v18, %v6025_v45  ;;  %v6279_v13 = vmul.f32 0.5, %v13056_v27 }
 0xd13   : > { %v13099_v48 = vpop.eup %8715  ;;  %v6377_v30 = vmul.f32 0.044715, %v6345_v51 }
 0xd14   : > { %v6408_v53 = vadd.f32 %v6376_v41, %v13082_v16  ;;  %v13108_v29 = vadd.f32 %v12922_v52, %v6044_v20  ;;  %v5957_v43 = vmul.f32 %v13099_v48, %v13076_v63  ;;  %vm5963_vm7 = vweird.f32 %v13099_v48 }
 0xd15   : > { %v6409_v35 = vadd.f32 %v6377_v30, %v13089_v28  ;;  %8036 = vmatpush.bf16.msrb.mxu3 %v8022_v23  ;;  %6769 = vmatpush.bf16.msra.mxu0 %v8022_v23  ;;  %vm5964_vm9 = vmor %vm5962_vm8, %vm5963_vm7 }
 0xd16   : > { %v6440_v19 = vmul.f32 0.7978846, %v6408_v53  ;;  %v6074_v46 = vpack.c.bf16 %v13108_v29, %v13105_v21  ;;  %v5958_v7 = vmul.f32 %v13099_v48, %v5957_v43  ;;  %v8718_v17 = vpop.eup %8717 }
 0xd17   : > { %v6441_v44 = vmul.f32 0.7978846, %v6409_v35  ;;  %v8720_v37 = vpop.eup %8719  ;;  %v6502_v2 = vadd.f32 1.0, %v8718_v17 }
 0xd18   : > { %8721 = vtanh.f32 %v6440_v19  ;;  %6208 = vmatmul.bf16.gmra.mxu0 %v6074_v46  ;;  %6257 = vmatmul.bf16.gmra.mxu1 %v6074_v46  ;;  %v5959_v36 = vmul.f32 0.5, %v5958_v7  ;;  %v6503_v45 = vadd.f32 1.0, %v8720_v37 }
 0xd19   : > { %v5815_v1 = vpop.xlane.xlu0 %5814  ;;  %8723 = vtanh.f32 %v6441_v44  ;;  %8037 = vmatpush.bf16.msrb.mxu3 %v8021_v24  ;;  %6770 = vmatpush.bf16.msra.mxu0 %v8021_v24  ;;  %v6534_v26 = vmul.f32 %v6502_v2, %v6278_v47 }
 0xd1a   : > { %v5835_v49 = vmul.f32 %v5815_v1, %v12785_v55  ;;  %v5960_v22 = vsub.f32 1.5, %v5959_v36  ;;  %v13143_v44 = vmul.f32 %v6503_v45, %v6279_v13 }
 0xd1b   : > { %v6194_v61 = vpop.f32.mrf.mxu0  ;;  %v6243_v15 = vpop.f32.mrf.mxu1 }
 0xd1c   : > { %v13119_v56 = vadd.f32 1e-05, %v5835_v49  ;;  %v13122_v14 = vadd.f32 %v6194_v61, %v13035_v32  ;;  %v13125_v38 = vadd.f32 %v6243_v15, %v13038_v0  ;;  %v5961_v28 = vmul.f32 %v13099_v48, %v5960_v22 }
 0xd1e   : > { %v8722_v50 = vpop.eup %8721  ;;  %8725 = vrsqrt.f32 %v13119_v56  ;;  %v6314_v31 = vmul.f32 %v13122_v14, %v13122_v14  ;;  %v6315_v11 = vmul.f32 %v13125_v38, %v13125_v38  ;;  %vm5972_vm11 = vweird.f32 %v13119_v56 }
 0xd1f   : > { %v6504_v8 = vadd.f32 1.0, %v8722_v50  ;;  %v8724_v34 = vpop.eup %8723  ;;  %v5965_v50 = vsel %vm5964_vm9, %v13099_v48, %v5961_v28 }
 0xd20   : > { %v6346_v59 = vmul.f32 %v6314_v31, %v13122_v14  ;;  %v6347_v20 = vmul.f32 %v6315_v11, %v13125_v38  ;;  %v6505_v51 = vadd.f32 1.0, %v8724_v34 }
 0xd21   : > { %v6536_v41 = vmul.f32 %v6504_v8, %v6280_v60 }
 0xd22   : > { %v6378_v54 = vmul.f32 0.044715, %v6346_v59  ;;  %v6379_v16 = vmul.f32 0.044715, %v6347_v20  ;;  %v13138_v46 = vmul.f32 %v6505_v51, %v6281_v12  ;;  %v6026_v59 = vmul.f32 %v5965_v50, %v12949_v9 }
 0xd23   : > { %v6196_v53 = vpop.f32.mrf.mxu0  ;;  %v6245_v43 = vpop.f32.mrf.mxu1  ;;  %v6566_v30 = vpack.c.bf16 %v6536_v41, %v6534_v26 }
 0xd24   : > { %v8726_v19 = vpop.eup %8725  ;;  %v6410_v35 = vadd.f32 %v6378_v54, %v13122_v14  ;;  %v6197_v23 = vadd.f32 %v6196_v53, %v13035_v32  ;;  %v6246_v7 = vadd.f32 %v6245_v43, %v13038_v0  ;;  %v6411_v1 = vadd.f32 %v6379_v16, %v13125_v38 }
 0xd25   : > { %v5967_v27 = vmul.f32 %v8726_v19, %v13119_v56  ;;  %6722 = vmatmul.bf16.vlgmr.msrb.gmra.mxu2 %v6566_v30  ;;  %v6567_v15 = vpack.c.bf16 %v13138_v46, %v13143_v44  ;;  %vm5973_vm10 = vweird.f32 %v8726_v19  ;;  %v6045_v51 = vmul.f32 %v12912_v18, %v6026_v59 }
 0xd26   : > { %v6316_v17 = vmul.f32 %v6197_v23, %v6197_v23  ;;  %v6317_v49 = vmul.f32 %v6246_v7, %v6246_v7  ;;  %v6442_v24 = vmul.f32 0.7978846, %v6410_v35  ;;  %v6443_v60 = vmul.f32 0.7978846, %v6411_v1  ;;  %vm5974_vm12 = vmor %vm5972_vm11, %vm5973_vm10 }
 0xd27   : > { %v5968_v61 = vmul.f32 %v8726_v19, %v5967_v27  ;;  %v13165_v56 = vadd.f32 %v12922_v52, %v6045_v51  ;;  %v6282_v27 = vmul.f32 0.5, %v13122_v14  ;;  %v6284_v1 = vmul.f32 0.5, %v6197_v23 }
 0xd28   : > { %v6348_v37 = vmul.f32 %v6316_v17, %v6197_v23  ;;  %v6349_v2 = vmul.f32 %v6317_v49, %v6246_v7  ;;  %v5817_v36 = vpop.xlane.xlu1 %5816  ;;  %8727 = vtanh.f32 %v6442_v24  ;;  %v6285_v49 = vmul.f32 0.5, %v6246_v7 }
 0xd29   : > { %v5969_v31 = vmul.f32 0.5, %v5968_v61  ;;  %v5836_v47 = vmul.f32 %v5817_v36, %v12785_v55  ;;  %v6283_v24 = vmul.f32 0.5, %v13125_v38 }
 0xd2a   : > { %v6380_v8 = vmul.f32 0.044715, %v6348_v37  ;;  %v6381_v11 = vmul.f32 0.044715, %v6349_v2 }
 0xd2b   : > { %v5970_v45 = vsub.f32 1.5, %v5969_v31  ;;  %v13154_v63 = vadd.f32 1e-05, %v5836_v47 }
 0xd2c   : > { %v6412_v34 = vadd.f32 %v6380_v8, %v6197_v23  ;;  %v6413_v26 = vadd.f32 %v6381_v11, %v6246_v7 }
 0xd2d   : > { %v5971_v22 = vmul.f32 %v8726_v19, %v5970_v45  ;;  %8729 = vrsqrt.f32 %v13154_v63  ;;  %vm5982_vm14 = vweird.f32 %v13154_v63 }
 0xd2e   : > { %8731 = vtanh.f32 %v6443_v60  ;;  %v6444_v48 = vmul.f32 0.7978846, %v6412_v34  ;;  %v6445_v41 = vmul.f32 0.7978846, %v6413_v26  ;;  %v8728_v9 = vpop.eup %8727 }
 0xd2f   : > { %v5975_v20 = vsel %vm5974_vm12, %v8726_v19, %v5971_v22 }
 0xd30   : > { %v6027_v12 = vmul.f32 %v5975_v20, %v12969_v62  ;;  %8733 = vtanh.f32 %v6444_v48  ;;  %v6506_v62 = vadd.f32 1.0, %v8728_v9 }
 0xd31   : > { %8735 = vtanh.f32 %v6445_v41 }
 0xd32   : > { %v6046_v54 = vmul.f32 %v12912_v18, %v6027_v12  ;;  %v6538_v36 = vmul.f32 %v6506_v62, %v6282_v27 }
 0xd33   : > { %v13162_v13 = vpop.eup %8729 }
 0xd34   : > { %v8732_v16 = vpop.eup %8731  ;;  %v13168_v53 = vadd.f32 %v12922_v52, %v6046_v54  ;;  %v5977_v43 = vmul.f32 %v13162_v13, %v13154_v63  ;;  %vm5983_vm13 = vweird.f32 %v13162_v13 }
 0xd35   : > { %v6507_v28 = vadd.f32 1.0, %v8732_v16  ;;  %vm5984_vm15 = vmor %vm5982_vm14, %vm5983_vm13 }
 0xd36   : > { %v8734_v30 = vpop.eup %8733  ;;  %v6075_v19 = vpack.c.bf16 %v13168_v53, %v13165_v56  ;;  %v5978_v37 = vmul.f32 %v13162_v13, %v5977_v43 }
 0xd37   : > { %v8736_v35 = vpop.eup %8735  ;;  %v6508_v17 = vadd.f32 1.0, %v8734_v30  ;;  %v6539_v60 = vmul.f32 %v6507_v28, %v6283_v24 }
 0xd38   : > { %v6509_v61 = vadd.f32 1.0, %v8736_v35  ;;  %6213 = vmatmul.bf16.gmra.mxu0 %v6075_v19  ;;  %6262 = vmatmul.bf16.gmra.mxu1 %v6075_v19  ;;  %v5979_v38 = vmul.f32 0.5, %v5978_v37 }
 0xd39   : > { %v5819_v2 = vpop.xlane.xlu2 %5818  ;;  %v6540_v50 = vmul.f32 %v6508_v17, %v6284_v1 }
 0xd3a   : > { %v6541_v31 = vmul.f32 %v6509_v61, %v6285_v49  ;;  %v5837_v47 = vmul.f32 %v5819_v2, %v12785_v55  ;;  %v5980_v48 = vsub.f32 1.5, %v5979_v38 }
 0xd3b   : > { %v6199_v8 = vpop.f32.mrf.mxu0  ;;  %v6248_v11 = vpop.f32.mrf.mxu1  ;;  %v6568_v14 = vpack.c.bf16 %v6540_v50, %v6538_v36 }
 0xd3c   : > { %v5853_v23 = vadd.f32 1e-05, %v5837_v47  ;;  %v13179_v7 = vadd.f32 %v6199_v8, %v13035_v32  ;;  %v13182_v45 = vadd.f32 %v6248_v11, %v13038_v0  ;;  %v6569_v59 = vpack.c.bf16 %v6541_v31, %v6539_v60 }
 0xd3d   : > { %6727 = vmatmul.bf16.gmra.mxu2 %v6568_v14  ;;  %v5981_v30 = vmul.f32 %v13162_v13, %v5980_v48 }
 0xd3e   : > { %8737 = vrsqrt.f32 %v5853_v23  ;;  %v6318_v34 = vmul.f32 %v13179_v7, %v13179_v7  ;;  %v6319_v26 = vmul.f32 %v13182_v45, %v13182_v45  ;;  %6776 = vmatmul.bf16.vlgmr.msrb.gmra.mxu3 %v6569_v59  ;;  %vm5992_vm1 = vweird.f32 %v5853_v23 }
 0xd3f   : > { %v5985_v24 = vsel %vm5984_vm15, %v13162_v13, %v5981_v30 }
 0xd40   : > { %v6350_v22 = vmul.f32 %v6318_v34, %v13179_v7  ;;  %v6351_v41 = vmul.f32 %v6319_v26, %v13182_v45  ;;  %v6028_v47 = vmul.f32 %v5985_v24, %v12975_v5 }
 0xd42   : > { %v6382_v20 = vmul.f32 0.044715, %v6350_v22  ;;  %v6383_v12 = vmul.f32 0.044715, %v6351_v41  ;;  %v6047_v59 = vmul.f32 %v12912_v18, %v6028_v47 }
 0xd43   : > { %v6201_v51 = vpop.f32.mrf.mxu0  ;;  %v6250_v9 = vpop.f32.mrf.mxu1 }
 0xd44   : > { %v8738_v54 = vpop.eup %8737  ;;  %v6414_v16 = vadd.f32 %v6382_v20, %v13179_v7  ;;  %v6202_v43 = vadd.f32 %v6201_v51, %v13035_v32  ;;  %v6251_v62 = vadd.f32 %v6250_v9, %v13038_v0  ;;  %v6415_v35 = vadd.f32 %v6383_v12, %v13182_v45 }
 0xd45   : > { %v5987_v19 = vmul.f32 %v8738_v54, %v5853_v23  ;;  %vm5993_vm0 = vweird.f32 %v8738_v54  ;;  %v13203_v22 = vadd.f32 %v12922_v52, %v6047_v59  ;;  %v6286_v51 = vmul.f32 0.5, %v13179_v7 }
 0xd46   : > { %v6320_v28 = vmul.f32 %v6202_v43, %v6202_v43  ;;  %v6321_v27 = vmul.f32 %v6251_v62, %v6251_v62  ;;  %v6446_v17 = vmul.f32 0.7978846, %v6414_v16  ;;  %v6447_v2 = vmul.f32 0.7978846, %v6415_v35  ;;  %vm5994_vm2 = vmor %vm5992_vm1, %vm5993_vm0 }
 0xd47   : > { %v5988_v1 = vmul.f32 %v8738_v54, %v5987_v19  ;;  %v6288_v9 = vmul.f32 0.5, %v6202_v43  ;;  %v6289_v16 = vmul.f32 0.5, %v6251_v62 }
 0xd48   : > { %v6352_v49 = vmul.f32 %v6320_v28, %v6202_v43  ;;  %v6353_v61 = vmul.f32 %v6321_v27, %v6251_v62  ;;  %8739 = vtanh.f32 %v6446_v17 }
 0xd49   : > { %v5989_v37 = vmul.f32 0.5, %v5988_v1  ;;  %8741 = vtanh.f32 %v6447_v2  ;;  %v5821_v1 = vpop.xlane.xlu0 %5820 }
 0xd4a   : > { %v6384_v36 = vmul.f32 0.044715, %v6352_v49  ;;  %v6385_v50 = vmul.f32 0.044715, %v6353_v61  ;;  %v5838_v49 = vmul.f32 %v5821_v1, %v12785_v55 }
 0xd4b   : > { %v5990_v31 = vsub.f32 1.5, %v5989_v37 }
 0xd4c   : > { %v6416_v60 = vadd.f32 %v6384_v36, %v6202_v43  ;;  %v6417_v8 = vadd.f32 %v6385_v50, %v6251_v62  ;;  %v5854_v7 = vadd.f32 1e-05, %v5838_v49 }
 0xd4d   : > { %v5991_v11 = vmul.f32 %v8738_v54, %v5990_v31 }
 0xd4e   : > { %v6448_v63 = vmul.f32 0.7978846, %v6416_v60  ;;  %v6449_v14 = vmul.f32 0.7978846, %v6417_v8  ;;  %v8740_v34 = vpop.eup %8739  ;;  %vm6002_vm4 = vweird.f32 %v5854_v7 }
 0xd4f   : > { %v5995_v38 = vsel %vm5994_vm2, %v8738_v54, %v5991_v11  ;;  %v8742_v5 = vpop.eup %8741  ;;  %v6510_v48 = vadd.f32 1.0, %v8740_v34 }
 0xd50   : > { %v6029_v13 = vmul.f32 %v5995_v38, %v12993_v4  ;;  %8743 = vtanh.f32 %v6448_v63  ;;  %v6511_v4 = vadd.f32 1.0, %v8742_v5 }
 0xd51   : > { %8745 = vtanh.f32 %v6449_v14  ;;  %v6542_v19 = vmul.f32 %v6510_v48, %v6286_v51  ;;  %v8843_v51 = vld [vmem:[%s9815_s12] ss:$0 sm:$0xff] }
 0xd52   : > { %v6048_v26 = vmul.f32 %v12912_v18, %v6029_v13  ;;  %v6287_v18 = vmul.f32 0.5, %v13182_v45  ;;  %8747 = vrsqrt.f32 %v5854_v7 }
 0xd54   : > { %v13206_v23 = vadd.f32 %v12922_v52, %v6048_v26  ;;  %v6543_v35 = vmul.f32 %v6511_v4, %v6287_v18 }
 0xd56   : > { %v8744_v41 = vpop.eup %8743  ;;  %v6076_v20 = vpack.c.bf16 %v13206_v23, %v13203_v22 }
 0xd57   : > { %v8746_v12 = vpop.eup %8745  ;;  %v6512_v54 = vadd.f32 1.0, %v8744_v41 }
 0xd58   : > { %6218 = vmatmul.bf16.gmra.mxu0 %v6076_v20  ;;  %6267 = vmatmul.bf16.gmra.mxu1 %v6076_v20  ;;  %v6513_v30 = vadd.f32 1.0, %v8746_v12  ;;  %v8748_v43 = vpop.eup %8747 }
 0xd59   : > { %v6544_v52 = vmul.f32 %v6512_v54, %v6288_v9  ;;  %v5997_v61 = vmul.f32 %v8748_v43, %v5854_v7  ;;  %vm6003_vm3 = vweird.f32 %v8748_v43 }
 0xd5a   : > { %v6545_v28 = vmul.f32 %v6513_v30, %v6289_v16  ;;  %vm6004_vm5 = vmor %vm6002_vm4, %vm6003_vm3 }
 0xd5b   : > { %v6570_v27 = vpack.c.bf16 %v6544_v52, %v6542_v19  ;;  %v5998_v24 = vmul.f32 %v8748_v43, %v5997_v61 }
 0xd5c   : > { %v6571_v17 = vpack.c.bf16 %v6545_v28, %v6543_v35 }
 0xd5d   : > { %6732 = vmatmul.bf16.gmra.mxu2 %v6570_v27  ;;  %v5999_v2 = vmul.f32 0.5, %v5998_v24  ;;  %v8844_v27 = vld [vmem:[%s14003_s10] ss:$0 sm:$0xff] }
 0xd5e   : > { %6781 = vmatmul.bf16.gmra.mxu3 %v6571_v17 }
 0xd5f   : > { %v6000_v36 = vsub.f32 1.5, %v5999_v2 }
 0xd61   : > { %v6001_v31 = vmul.f32 %v8748_v43, %v6000_v36 }
 0xd63   : > { %v6005_v8 = vsel %vm6004_vm5, %v8748_v43, %v6001_v31 }
 0xd64   : > { %v6030_v34 = vmul.f32 %v6005_v8, %v12999_v42 }
 0xd66   : > { %v6049_v9 = vmul.f32 %v8843_v51, %v6030_v34 }
 0xd68   : > { %v13235_v1 = vadd.f32 %v8844_v27, %v6049_v9 }
 0xd74   : > { %v5823_v37 = vpop.xlane.xlu1 %5822 }
 0xd75   : > { %v5839_v45 = vmul.f32 %v5823_v37, %v12785_v55 }
 0xd77   : > { %v5855_v62 = vadd.f32 1e-05, %v5839_v45 }
 0xd79   : > { %8749 = vrsqrt.f32 %v5855_v62  ;;  %vm6012_vm7 = vweird.f32 %v5855_v62 }
 0xd7f   : > { %v8750_v50 = vpop.eup %8749 }
 0xd80   : > { %v6007_v47 = vmul.f32 %v8750_v50, %v5855_v62  ;;  %vm6013_vm6 = vweird.f32 %v8750_v50 }
 0xd81   : > { %vm6014_vm8 = vmor %vm6012_vm7, %vm6013_vm6 }
 0xd82   : > { %v6008_v60 = vmul.f32 %v8750_v50, %v6007_v47 }
 0xd84   : > { %v6009_v11 = vmul.f32 0.5, %v6008_v60 }
 0xd85   : > { %v6204_v63 = vpop.f32.mrf.mxu0  ;;  %v6253_v14 = vpop.f32.mrf.mxu1 }
 0xd86   : > { %v6010_v38 = vsub.f32 1.5, %v6009_v11  ;;  %v13215_v13 = vadd.f32 %v6204_v63, %v13035_v32  ;;  %v13218_v59 = vadd.f32 %v6253_v14, %v13038_v0 }
 0xd88   : > { %v6011_v26 = vmul.f32 %v8750_v50, %v6010_v38  ;;  %v6322_v5 = vmul.f32 %v13215_v13, %v13215_v13  ;;  %v6323_v48 = vmul.f32 %v13218_v59, %v13218_v59 }
 0xd8a   : > { %v6015_v41 = vsel %vm6014_vm8, %v8750_v50, %v6011_v26  ;;  %v6354_v20 = vmul.f32 %v6322_v5, %v13215_v13  ;;  %v6355_v4 = vmul.f32 %v6323_v48, %v13218_v59 }
 0xd8b   : > { %v6031_v12 = vmul.f32 %v6015_v41, %v13025_v10 }
 0xd8c   : > { %v6386_v42 = vmul.f32 0.044715, %v6354_v20  ;;  %v6387_v54 = vmul.f32 0.044715, %v6355_v4 }
 0xd8d   : > { %v6206_v18 = vpop.f32.mrf.mxu0  ;;  %v6255_v16 = vpop.f32.mrf.mxu1  ;;  %v6050_v30 = vmul.f32 %v8843_v51, %v6031_v12 }
 0xd8e   : > { %v6418_v19 = vadd.f32 %v6386_v42, %v13215_v13  ;;  %v6207_v52 = vadd.f32 %v6206_v18, %v13035_v32  ;;  %v6256_v35 = vadd.f32 %v6255_v16, %v13038_v0  ;;  %v6419_v28 = vadd.f32 %v6387_v54, %v13218_v59 }
 0xd8f   : > { %v13237_v10 = vadd.f32 %v8844_v27, %v6050_v30 }
 0xd90   : > { %v6324_v17 = vmul.f32 %v6207_v52, %v6207_v52  ;;  %v6325_v49 = vmul.f32 %v6256_v35, %v6256_v35  ;;  %v6450_v7 = vmul.f32 0.7978846, %v6418_v19  ;;  %v6451_v37 = vmul.f32 0.7978846, %v6419_v28 }
 0xd91   : > { %v6077_v43 = vpack.c.bf16 %v13237_v10, %v13235_v1  ;;  %v6290_v19 = vmul.f32 0.5, %v13215_v13 }
 0xd92   : > { %v6356_v61 = vmul.f32 %v6324_v17, %v6207_v52  ;;  %v6357_v24 = vmul.f32 %v6325_v49, %v6256_v35  ;;  %8751 = vtanh.f32 %v6450_v7  ;;  %v6292_v17 = vmul.f32 0.5, %v6207_v52 }
 0xd93   : > { %6223 = vmatmul.bf16.gmra.mxu0 %v6077_v43  ;;  %6272 = vmatmul.bf16.gmra.mxu1 %v6077_v43  ;;  %8753 = vtanh.f32 %v6451_v37  ;;  %v6291_v7 = vmul.f32 0.5, %v13218_v59  ;;  %v6293_v43 = vmul.f32 0.5, %v6256_v35 }
 0xd94   : > { %v6388_v45 = vmul.f32 0.044715, %v6356_v61  ;;  %v6389_v62 = vmul.f32 0.044715, %v6357_v24 }
 0xd95   : > { %v6209_v2 = vpop.f32.mrf.mxu0  ;;  %v6258_v36 = vpop.f32.mrf.mxu1 }
 0xd96   : > { %v6420_v50 = vadd.f32 %v6388_v45, %v6207_v52  ;;  %v6421_v31 = vadd.f32 %v6389_v62, %v6256_v35  ;;  %v6210_v47 = vadd.f32 %v6209_v2, %v13035_v32  ;;  %v13243_v60 = vadd.f32 %v6258_v36, %v13038_v0 }
 0xd98   : > { %v6452_v8 = vmul.f32 0.7978846, %v6420_v50  ;;  %v6453_v11 = vmul.f32 0.7978846, %v6421_v31  ;;  %v6326_v63 = vmul.f32 %v6210_v47, %v6210_v47  ;;  %v6327_v14 = vmul.f32 %v13243_v60, %v13243_v60  ;;  %v8752_v26 = vpop.eup %8751 }
 0xd99   : > { %v8754_v41 = vpop.eup %8753  ;;  %v6514_v54 = vadd.f32 1.0, %v8752_v26 }
 0xd9a   : > { %8755 = vtanh.f32 %v6452_v8  ;;  %v6358_v38 = vmul.f32 %v6326_v63, %v6210_v47  ;;  %v6359_v34 = vmul.f32 %v6327_v14, %v13243_v60  ;;  %v6515_v28 = vadd.f32 1.0, %v8754_v41 }
 0xd9b   : > { %8757 = vtanh.f32 %v6453_v11  ;;  %v6546_v2 = vmul.f32 %v6514_v54, %v6290_v19 }
 0xd9c   : > { %v6390_v5 = vmul.f32 0.044715, %v6358_v38  ;;  %v6391_v48 = vmul.f32 0.044715, %v6359_v34  ;;  %v6547_v31 = vmul.f32 %v6515_v28, %v6291_v7 }
 0xd9d   : > { %v6211_v20 = vpop.f32.mrf.mxu0  ;;  %v6260_v4 = vpop.f32.mrf.mxu1 }
 0xd9e   : > { %v6422_v12 = vadd.f32 %v6390_v5, %v6210_v47  ;;  %v6212_v51 = vadd.f32 %v6211_v20, %v13035_v32  ;;  %v6261_v9 = vadd.f32 %v6260_v4, %v13038_v0  ;;  %v6423_v42 = vadd.f32 %v6391_v48, %v13243_v60 }
 0xd9f   : > { %v6294_v48 = vmul.f32 0.5, %v6210_v47  ;;  %v6295_v4 = vmul.f32 0.5, %v13243_v60 }
 0xda0   : > { %v8756_v18 = vpop.eup %8755  ;;  %v6328_v16 = vmul.f32 %v6212_v51, %v6212_v51  ;;  %v6329_v30 = vmul.f32 %v6261_v9, %v6261_v9  ;;  %v6454_v61 = vmul.f32 0.7978846, %v6422_v12  ;;  %v6455_v62 = vmul.f32 0.7978846, %v6423_v42 }
 0xda1   : > { %v8758_v27 = vpop.eup %8757  ;;  %v6516_v49 = vadd.f32 1.0, %v8756_v18  ;;  %v6296_v41 = vmul.f32 0.5, %v6212_v51  ;;  %v6297_v12 = vmul.f32 0.5, %v6261_v9 }
 0xda2   : > { %v6360_v24 = vmul.f32 %v6328_v16, %v6212_v51  ;;  %v6361_v37 = vmul.f32 %v6329_v30, %v6261_v9  ;;  %v6517_v45 = vadd.f32 1.0, %v8758_v27  ;;  %8759 = vtanh.f32 %v6454_v61 }
 0xda3   : > { %6771 = vmatmul.bf16.vlgmr.msra.gmra.mxu0 %v6567_v15  ;;  %v6548_v36 = vmul.f32 %v6516_v49, %v6292_v17  ;;  %8761 = vtanh.f32 %v6455_v62 }
 0xda4   : > { %v6392_v50 = vmul.f32 0.044715, %v6360_v24  ;;  %v6393_v13 = vmul.f32 0.044715, %v6361_v37  ;;  %v6549_v8 = vmul.f32 %v6517_v45, %v6293_v43 }
 0xda5   : > { %v6572_v52 = vpack.c.bf16 %v6548_v36, %v6546_v2 }
 0xda6   : > { %v6424_v11 = vadd.f32 %v6392_v50, %v6212_v51  ;;  %v6425_v59 = vadd.f32 %v6393_v13, %v6261_v9  ;;  %v6573_v35 = vpack.c.bf16 %v6549_v8, %v6547_v31  ;;  %v13270_v50 = vld [vmem:[%s1148_s16] ss:$0 sm:$0xff] }
 0xda7   : > { %6737 = vmatmul.bf16.gmra.mxu2 %v6572_v52 }
 0xda8   : > { %v6456_v63 = vmul.f32 0.7978846, %v6424_v11  ;;  %v6457_v14 = vmul.f32 0.7978846, %v6425_v59  ;;  %6786 = vmatmul.bf16.gmra.mxu3 %v6573_v35  ;;  %v8760_v46 = vpop.eup %8759  ;;  %v13256_v15 = vpop.f32.mrf.mxu2 }
 0xda9   : > { %v8762_v44 = vpop.eup %8761  ;;  %v6518_v38 = vadd.f32 1.0, %v8760_v46 }
 0xdaa   : > { %8763 = vtanh.f32 %v6456_v63  ;;  %v6519_v26 = vadd.f32 1.0, %v8762_v44 }
 0xdab   : > { %8765 = vtanh.f32 %v6457_v14  ;;  %v6550_v54 = vmul.f32 %v6518_v38, %v6294_v48 }
 0xdac   : > { %v6551_v16 = vmul.f32 %v6519_v26, %v6295_v4 }
 0xdb0   : > { %v8764_v34 = vpop.eup %8763  ;;  %v13261_v47 = vpop.f32.mrf.mxu2 }
 0xdb1   : > { %v8766_v5 = vpop.eup %8765  ;;  %v6520_v20 = vadd.f32 1.0, %v8764_v34 }
 0xdb2   : > { %v6521_v42 = vadd.f32 1.0, %v8766_v5 }
 0xdb3   : > { %v6552_v18 = vmul.f32 %v6520_v20, %v6296_v41 }
 0xdb4   : > { %v6553_v30 = vmul.f32 %v6521_v42, %v6297_v12 }
 0xdb5   : > { %v6214_v19 = vpop.f32.mrf.mxu0  ;;  %v6263_v28 = vpop.f32.mrf.mxu1  ;;  %v6574_v27 = vpack.c.bf16 %v6552_v18, %v6550_v54 }
 0xdb6   : > { %v6215_v17 = vadd.f32 %v6214_v19, %v13035_v32  ;;  %v6264_v49 = vadd.f32 %v6263_v28, %v13038_v0  ;;  %v6575_v7 = vpack.c.bf16 %v6553_v30, %v6551_v16 }
 0xdb7   : > { %6742 = vmatmul.bf16.gmra.mxu2 %v6574_v27 }
 0xdb8   : > { %v6330_v51 = vmul.f32 %v6215_v17, %v6215_v17  ;;  %v6331_v60 = vmul.f32 %v6264_v49, %v6264_v49  ;;  %6791 = vmatmul.bf16.gmra.mxu3 %v6575_v7  ;;  %v6298_v27 = vmul.f32 0.5, %v6215_v17 }
 0xdba   : > { %v6362_v9 = vmul.f32 %v6330_v51, %v6215_v17  ;;  %v6363_v43 = vmul.f32 %v6331_v60, %v6264_v49  ;;  %v6299_v60 = vmul.f32 0.5, %v6264_v49 }
 0xdbc   : > { %v6394_v61 = vmul.f32 0.044715, %v6362_v9  ;;  %v6395_v24 = vmul.f32 0.044715, %v6363_v43 }
 0xdbd   : > { %v6216_v37 = vpop.f32.mrf.mxu0  ;;  %v6265_v45 = vpop.f32.mrf.mxu1 }
 0xdbe   : > { %v6426_v62 = vadd.f32 %v6394_v61, %v6215_v17  ;;  %v6217_v2 = vadd.f32 %v6216_v37, %v13035_v32  ;;  %v6266_v36 = vadd.f32 %v6265_v45, %v13038_v0  ;;  %v6427_v13 = vadd.f32 %v6395_v24, %v6264_v49 }
 0xdc0   : > { %v6332_v31 = vmul.f32 %v6217_v2, %v6217_v2  ;;  %v6333_v8 = vmul.f32 %v6266_v36, %v6266_v36  ;;  %v6728_v52 = vpop.f32.mrf.mxu2  ;;  %v6458_v59 = vmul.f32 0.7978846, %v6426_v62  ;;  %v6459_v46 = vmul.f32 0.7978846, %v6427_v13 }
 0xdc1   : > { %v6729_v11 = vadd.f32 %v13270_v50, %v6728_v52  ;;  %v6777_v14 = vpop.f32.mrf.mxu3  ;;  %v6300_v7 = vmul.f32 0.5, %v6217_v2  ;;  %v6301_v9 = vmul.f32 0.5, %v6266_v36 }
 0xdc2   : > { %v6364_v35 = vmul.f32 %v6332_v31, %v6217_v2  ;;  %v6365_v63 = vmul.f32 %v6333_v8, %v6266_v36  ;;  %8767 = vtanh.f32 %v6458_v59 }
 0xdc3   : > { %v6778_v44 = vadd.f32 %v6777_v14, %v6729_v11  ;;  %8769 = vtanh.f32 %v6459_v46 }
 0xdc4   : > { %v6396_v38 = vmul.f32 0.044715, %v6364_v35  ;;  %v6397_v34 = vmul.f32 0.044715, %v6365_v63 }
 0xdc5   : > { %v13274_v26 = vadd.f32 %v6778_v44, %v12959_v33 }
 0xdc6   : > { %v6428_v5 = vadd.f32 %v6396_v38, %v6217_v2  ;;  %v6429_v48 = vadd.f32 %v6397_v34, %v6266_v36 }
 0xdc7   : > { %6834 = vadd.xlane.f32.xlu1 %v13274_v26 }
 0xdc8   : > { %v6460_v41 = vmul.f32 0.7978846, %v6428_v5  ;;  %v6461_v20 = vmul.f32 0.7978846, %v6429_v48  ;;  %v6730_v4 = vpop.f32.mrf.mxu2  ;;  %v8768_v18 = vpop.eup %8767 }
 0xdc9   : > { %v6731_v12 = vadd.f32 %v13270_v50, %v6730_v4  ;;  %v6779_v42 = vpop.f32.mrf.mxu3  ;;  %v8770_v16 = vpop.eup %8769  ;;  %v6522_v33 = vadd.f32 1.0, %v8768_v18 }
 0xdca   : > { %8771 = vtanh.f32 %v6460_v41  ;;  %v6523_v19 = vadd.f32 1.0, %v8770_v16 }
 0xdcb   : > { %8773 = vtanh.f32 %v6461_v20  ;;  %v13278_v54 = vadd.f32 %v6779_v42, %v6731_v12  ;;  %v6554_v61 = vmul.f32 %v6522_v33, %v6298_v27 }
 0xdcc   : > { %v6555_v37 = vmul.f32 %v6523_v19, %v6299_v60 }
 0xdd0   : > { %v8772_v30 = vpop.eup %8771 }
 0xdd1   : > { %v8774_v28 = vpop.eup %8773  ;;  %v6524_v51 = vadd.f32 1.0, %v8772_v30 }
 0xdd2   : > { %v6525_v43 = vadd.f32 1.0, %v8774_v28 }
 0xdd3   : > { %v6556_v24 = vmul.f32 %v6524_v51, %v6300_v7 }
 0xdd4   : > { %v6557_v45 = vmul.f32 %v6525_v43, %v6301_v9 }
 0xdd5   : > { %v6219_v62 = vpop.f32.mrf.mxu0  ;;  %v6268_v13 = vpop.f32.mrf.mxu1  ;;  %v6576_v31 = vpack.c.bf16 %v6556_v24, %v6554_v61 }
 0xdd6   : > { %v6220_v8 = vadd.f32 %v6219_v62, %v13035_v32  ;;  %v6269_v52 = vadd.f32 %v6268_v13, %v13038_v0  ;;  %v6577_v11 = vpack.c.bf16 %v6557_v45, %v6555_v37 }
 0xdd7   : > { %6747 = vmatmul.bf16.gmra.mxu2 %v6576_v31 }
 0xdd8   : > { %v6334_v59 = vmul.f32 %v6220_v8, %v6220_v8  ;;  %v6335_v17 = vmul.f32 %v6269_v52, %v6269_v52  ;;  %6796 = vmatmul.bf16.gmra.mxu3 %v6577_v11 }
 0xdda   : > { %v6366_v2 = vmul.f32 %v6334_v59, %v6220_v8  ;;  %v6367_v49 = vmul.f32 %v6335_v17, %v6269_v52  ;;  %v6302_v59 = vmul.f32 0.5, %v6220_v8 }
 0xddc   : > { %v6398_v36 = vmul.f32 0.044715, %v6366_v2  ;;  %v6399_v35 = vmul.f32 0.044715, %v6367_v49  ;;  %v6303_v49 = vmul.f32 0.5, %v6269_v52 }
 0xddd   : > { %v6221_v63 = vpop.f32.mrf.mxu0  ;;  %v6270_v14 = vpop.f32.mrf.mxu1 }
 0xdde   : > { %v6430_v46 = vadd.f32 %v6398_v36, %v6220_v8  ;;  %v6222_v44 = vadd.f32 %v6221_v63, %v13035_v32  ;;  %v6271_v38 = vadd.f32 %v6270_v14, %v13038_v0  ;;  %v6431_v34 = vadd.f32 %v6399_v35, %v6269_v52 }
 0xde0   : > { %v6336_v5 = vmul.f32 %v6222_v44, %v6222_v44  ;;  %v6337_v48 = vmul.f32 %v6271_v38, %v6271_v38  ;;  %v6733_v41 = vpop.f32.mrf.mxu2  ;;  %v6462_v12 = vmul.f32 0.7978846, %v6430_v46  ;;  %v6463_v16 = vmul.f32 0.7978846, %v6431_v34 }
 0xde1   : > { %v6734_v20 = vadd.f32 %v13270_v50, %v6733_v41  ;;  %v6782_v4 = vpop.f32.mrf.mxu3  ;;  %v6304_v17 = vmul.f32 0.5, %v6222_v44  ;;  %v6305_v36 = vmul.f32 0.5, %v6271_v38 }
 0xde2   : > { %v6368_v42 = vmul.f32 %v6336_v5, %v6222_v44  ;;  %v6369_v18 = vmul.f32 %v6337_v48, %v6271_v38  ;;  %8775 = vtanh.f32 %v6462_v12 }
 0xde3   : > { %v13285_v33 = vadd.f32 %v6782_v4, %v6734_v20  ;;  %8777 = vtanh.f32 %v6463_v16 }
 0xde4   : > { %v6400_v30 = vmul.f32 0.044715, %v6368_v42  ;;  %v6401_v19 = vmul.f32 0.044715, %v6369_v18 }
 0xde6   : > { %v6432_v28 = vadd.f32 %v6400_v30, %v6222_v44  ;;  %v6433_v27 = vadd.f32 %v6401_v19, %v6271_v38 }
 0xde8   : > { %v6464_v7 = vmul.f32 0.7978846, %v6432_v28  ;;  %v6465_v51 = vmul.f32 0.7978846, %v6433_v27  ;;  %v6735_v60 = vpop.f32.mrf.mxu2  ;;  %v8776_v24 = vpop.eup %8775 }
 0xde9   : > { %v6736_v9 = vadd.f32 %v13270_v50, %v6735_v60  ;;  %v6784_v43 = vpop.f32.mrf.mxu3  ;;  %v8778_v37 = vpop.eup %8777  ;;  %v6526_v62 = vadd.f32 1.0, %v8776_v24  ;;  %v6724_v24 = vadd.f32 %v13270_v50, %v13256_v15  ;;  %v6726_v15 = vadd.f32 %v13270_v50, %v13261_v47 }
 0xdea   : > { %8779 = vtanh.f32 %v6464_v7  ;;  %v6527_v31 = vadd.f32 1.0, %v8778_v37 }
 0xdeb   : > { %8781 = vtanh.f32 %v6465_v51  ;;  %v6785_v61 = vadd.f32 %v6784_v43, %v6736_v9  ;;  %v6558_v63 = vmul.f32 %v6526_v62, %v6302_v59 }
 0xdec   : > { %v6559_v46 = vmul.f32 %v6527_v31, %v6303_v49 }
 0xded   : > { %v13289_v45 = vadd.f32 %v6785_v61, %v12987_v3 }
 0xdef   : > { %6840 = vadd.xlane.f32.xlu1 %v13289_v45 }
 0xdf0   : > { %v8780_v13 = vpop.eup %8779 }
 0xdf1   : > { %v8782_v11 = vpop.eup %8781  ;;  %v6528_v2 = vadd.f32 1.0, %v8780_v13 }
 0xdf2   : > { %v6529_v35 = vadd.f32 1.0, %v8782_v11 }
 0xdf3   : > { %v6560_v14 = vmul.f32 %v6528_v2, %v6304_v17 }
 0xdf4   : > { %v6561_v34 = vmul.f32 %v6529_v35, %v6305_v36 }
 0xdf5   : > { %v6578_v5 = vpack.c.bf16 %v6560_v14, %v6558_v63 }
 0xdf6   : > { %v6579_v48 = vpack.c.bf16 %v6561_v34, %v6559_v46  ;;  %v13306_v34 = vadd.f32 %v13278_v54, %v12962_v25 }
 0xdf7   : > { %6752 = vmatmul.bf16.gmra.mxu2 %v6578_v5 }
 0xdf8   : > { %6801 = vmatmul.bf16.gmra.mxu3 %v6579_v48 }
 0xe10   : > { %v6224_v3 = vpop.f32.mrf.mxu0  ;;  %v6273_v41 = vpop.f32.mrf.mxu1 }
 0xe11   : > { %v6225_v20 = vadd.f32 %v6224_v3, %v13035_v32  ;;  %v6274_v4 = vadd.f32 %v6273_v41, %v13038_v0 }
 0xe13   : > { %v6338_v8 = vmul.f32 %v6225_v20, %v6225_v20  ;;  %v6339_v44 = vmul.f32 %v6274_v4, %v6274_v4 }
 0xe15   : > { %v6370_v12 = vmul.f32 %v6338_v8, %v6225_v20  ;;  %v6371_v52 = vmul.f32 %v6339_v44, %v6274_v4  ;;  %v6306_v8 = vmul.f32 0.5, %v6225_v20 }
 0xe17   : > { %v6402_v38 = vmul.f32 0.044715, %v6370_v12  ;;  %v6403_v42 = vmul.f32 0.044715, %v6371_v52  ;;  %v6307_v12 = vmul.f32 0.5, %v6274_v4 }
 0xe18   : > { %v6226_v18 = vpop.f32.mrf.mxu0  ;;  %v6275_v16 = vpop.f32.mrf.mxu1 }
 0xe19   : > { %v6434_v30 = vadd.f32 %v6402_v38, %v6225_v20  ;;  %v6227_v19 = vadd.f32 %v6226_v18, %v13035_v32  ;;  %v6276_v28 = vadd.f32 %v6275_v16, %v13038_v0  ;;  %v6435_v27 = vadd.f32 %v6403_v42, %v6274_v4 }
 0xe1a   : > { %v13316_v20 = vadd.f32 %v13285_v33, %v12984_v6 }
 0xe1b   : > { %v6340_v7 = vmul.f32 %v6227_v19, %v6227_v19  ;;  %v6341_v51 = vmul.f32 %v6276_v28, %v6276_v28  ;;  %v6466_v60 = vmul.f32 0.7978846, %v6434_v30  ;;  %v6467_v61 = vmul.f32 0.7978846, %v6435_v27 }
 0xe1c   : > { %v6308_v47 = vmul.f32 0.5, %v6227_v19  ;;  %v6309_v52 = vmul.f32 0.5, %v6276_v28 }
 0xe1d   : > { %v6372_v9 = vmul.f32 %v6340_v7, %v6227_v19  ;;  %v6373_v43 = vmul.f32 %v6341_v51, %v6276_v28  ;;  %8783 = vtanh.f32 %v6466_v60 }
 0xe1e   : > { %8785 = vtanh.f32 %v6467_v61 }
 0xe1f   : > { %v6404_v37 = vmul.f32 0.044715, %v6372_v9  ;;  %v6405_v62 = vmul.f32 0.044715, %v6373_v43 }
 0xe20   : > { %v6772_v13 = vpop.f32.mrf.mxu0 }
 0xe21   : > { %v6436_v31 = vadd.f32 %v6404_v37, %v6227_v19  ;;  %v6437_v11 = vadd.f32 %v6405_v62, %v6276_v28  ;;  %v6773_v59 = vadd.f32 %v6772_v13, %v6724_v24 }
 0xe23   : > { %v6468_v32 = vmul.f32 0.7978846, %v6436_v31  ;;  %v6469_v0 = vmul.f32 0.7978846, %v6437_v11  ;;  %v13299_v17 = vadd.f32 %v6773_v59, %v12934_v40  ;;  %v8784_v2 = vpop.eup %8783 }
 0xe24   : > { %v8786_v49 = vpop.eup %8785  ;;  %v6530_v14 = vadd.f32 1.0, %v8784_v2 }
 0xe25   : > { %8787 = vtanh.f32 %v6468_v32  ;;  %6830 = vadd.xlane.f32.xlu2 %v13299_v17  ;;  %v6531_v3 = vadd.f32 1.0, %v8786_v49 }
 0xe26   : > { %8789 = vtanh.f32 %v6469_v0  ;;  %v6562_v25 = vmul.f32 %v6530_v14, %v6306_v8 }
 0xe28   : > { %v6774_v36 = vpop.f32.mrf.mxu0 }
 0xe29   : > { %v6775_v35 = vadd.f32 %v6774_v36, %v6726_v15 }
 0xe2a   : > { %v6738_v63 = vpop.f32.mrf.mxu2 }
 0xe2b   : > { %v8788_v46 = vpop.eup %8787  ;;  %v13309_v40 = vadd.f32 %v6775_v35, %v12931_v57  ;;  %v6739_v5 = vadd.f32 %v13270_v50, %v6738_v63  ;;  %v6787_v48 = vpop.f32.mrf.mxu3  ;;  %v6563_v57 = vmul.f32 %v6531_v3, %v6307_v12 }
 0xe2c   : > { %v8790_v41 = vpop.eup %8789  ;;  %v6532_v44 = vadd.f32 1.0, %v8788_v46 }
 0xe2d   : > { %6832 = vadd.xlane.f32.xlu0 %v13309_v40  ;;  %6836 = vadd.xlane.f32.xlu2 %v13306_v34  ;;  %v6533_v38 = vadd.f32 1.0, %v8790_v41  ;;  %v6788_v42 = vadd.f32 %v6787_v48, %v6739_v5 }
 0xe2e   : > { %v6564_v54 = vmul.f32 %v6532_v44, %v6308_v47 }
 0xe2f   : > { %v6565_v18 = vmul.f32 %v6533_v38, %v6309_v52  ;;  %v6818_v19 = vadd.f32 %v6788_v42, %v13047_v39 }
 0xe30   : > { %v6580_v16 = vpack.c.bf16 %v6564_v54, %v6562_v25 }
 0xe31   : > { %v6581_v30 = vpack.c.bf16 %v6565_v18, %v6563_v57 }
 0xe32   : > { %6757 = vmatmul.bf16.gmra.mxu2 %v6580_v16  ;;  %v6740_v27 = vpop.f32.mrf.mxu2 }
 0xe33   : > { %6806 = vmatmul.bf16.gmra.mxu3 %v6581_v30  ;;  %v6741_v4 = vadd.f32 %v13270_v50, %v6740_v27  ;;  %v6789_v28 = vpop.f32.mrf.mxu3 }
 0xe35   : > { %6838 = vadd.xlane.f32.xlu0 %v13316_v20  ;;  %6842 = vadd.xlane.f32.xlu2 %v6818_v19  ;;  %v6790_v7 = vadd.f32 %v6789_v28, %v6741_v4 }
 0xe37   : > { %v13322_v60 = vadd.f32 %v6790_v7, %v13050_v58 }
 0xe3a   : > { %v6743_v51 = vpop.f32.mrf.mxu2 }
 0xe3b   : > { %v6744_v9 = vadd.f32 %v13270_v50, %v6743_v51  ;;  %v6792_v43 = vpop.f32.mrf.mxu3  ;;  %v6835_v51 = vpop.xlane.xlu1 %6834 }
 0xe3d   : > { %v6793_v61 = vadd.f32 %v6792_v43, %v6744_v9  ;;  %6844 = vadd.xlane.f32.xlu0 %v13322_v60 }
 0xe3f   : > { %v13327_v6 = vadd.f32 %v6793_v61, %v13105_v21 }
 0xe41   : > { %6846 = vadd.xlane.f32.xlu1 %v13327_v6 }
 0xe42   : > { %v6745_v39 = vpop.f32.mrf.mxu2 }
 0xe43   : > { %v6746_v33 = vadd.f32 %v13270_v50, %v6745_v39  ;;  %v6794_v24 = vpop.f32.mrf.mxu3  ;;  %v6864_v39 = vmul.f32 %v6835_v51, %v12785_v55  ;;  %v13452_v51 = vld [vmem:[%s1151_s6] ss:$0 sm:$0xff]  ;;  %s8029_s6 = sshll.u32 %s14007_s22, 7 }
 0xe44   : > { %s7216_s23 = scalar_lea.hbm %s14009_s3, %s8029_s6 }
 0xe45   : > { %v6795_v37 = vadd.f32 %v6794_v24, %v6746_v33  ;;  %s7219_s30 = sshll.u32 %s7216_s23, 4  ;;  %s7220_s30 = int_to_ptr.hbm [resolvable:$true] %s7219_s30 }
 0xe46   : > { %s9195_s19 = sshra.s32 %s7220_s30, 4  ;;  %s9196_s19 = int_to_ptr.hbm [resolvable:$true] %s9195_s19 }
 0xe47   : > { %v6821_v62 = vadd.f32 %v6795_v37, %v13108_v29  ;;  %s9197_s1 = scalar_lea.hbm %s9196_s19, 128  ;;  %p9202_p0 = scmp.lt.s32.totalorder %s9196_s19, %s14010_s27 }
 0xe48   : > { %p9198_p11 = scmp.ne.s32.totalorder %s9196_s19, %s9197_s1  ;;  %p9203_p5 = scmp.lt.s32.totalorder %s9201_s20, %s9197_s1 }
 0xe49   : > { %6848 = vadd.xlane.f32.xlu2 %v6821_v62 }
 0xe4a   : > { %p9199_p12 = pnand %p9198_p11, %p9565_p4  ;;  %p9204_p8 = por %p9203_p5, %p9202_p0 }
 0xe4c   : > { %p9200_p13 = pneg %p9199_p12 }
 0xe4e   : > { %p9205_p2 = pnand %p9204_p8, %p9200_p13 }
 0xe5a   : > { %v6748_v58 = vpop.f32.mrf.mxu2 }
 0xe5b   : > { %v6749_v13 = vadd.f32 %v13270_v50, %v6748_v58  ;;  %v6797_v31 = vpop.f32.mrf.mxu3 }
 0xe5d   : > { %v6798_v11 = vadd.f32 %v6797_v31, %v6749_v13 }
 0xe5f   : > { %v13334_v59 = vadd.f32 %v6798_v11, %v13165_v56 }
 0xe61   : > { %6850 = vadd.xlane.f32.xlu0 %v13334_v59 }
 0xe62   : > { %v6750_v21 = vpop.f32.mrf.mxu2 }
 0xe63   : > { %v6751_v32 = vadd.f32 %v13270_v50, %v6750_v21  ;;  %v6799_v0 = vpop.f32.mrf.mxu3 }
 0xe65   : > { %v6800_v2 = vadd.f32 %v6799_v0, %v6751_v32 }
 0xe67   : > { %v13339_v15 = vadd.f32 %v6800_v2, %v13168_v53 }
 0xe69   : > { %6852 = vadd.xlane.f32.xlu1 %v13339_v15 }
 0xe7a   : > { %v6753_v29 = vpop.f32.mrf.mxu2 }
 0xe7b   : > { %v6754_v49 = vadd.f32 %v13270_v50, %v6753_v29  ;;  %v6802_v36 = vpop.f32.mrf.mxu3 }
 0xe7d   : > { %v6803_v35 = vadd.f32 %v6802_v36, %v6754_v49 }
 0xe7f   : > { %v13344_v56 = vadd.f32 %v6803_v35, %v13203_v22 }
 0xe81   : > { %6854 = vadd.xlane.f32.xlu2 %v13344_v56 }
 0xe82   : > { %v6755_v63 = vpop.f32.mrf.mxu2 }
 0xe83   : > { %v6756_v14 = vadd.f32 %v13270_v50, %v6755_v63  ;;  %v6804_v46 = vpop.f32.mrf.mxu3 }
 0xe85   : > { %v6805_v5 = vadd.f32 %v6804_v46, %v6756_v14 }
 0xe87   : > { %v13349_v53 = vadd.f32 %v6805_v5, %v13206_v23 }
 0xe89   : > { %6856 = vadd.xlane.f32.xlu0 %v13349_v53 }
 0xe98   : > { %v6831_v48 = vpop.xlane.xlu2 %6830 }
 0xe99   : > { %v6862_v3 = vmul.f32 %v6831_v48, %v12785_v55 }
 0xe9b   : > { %v13354_v41 = vsub.f32 %v13299_v17, %v6862_v3 }
 0xe9d   : > { %v6894_v22 = vmul.f32 %v13354_v41, %v13354_v41 }
 0xe9f   : > { %6910 = vadd.xlane.f32.xlu0 %v6894_v22 }
 0xea0   : > { %v6837_v8 = vpop.xlane.xlu2 %6836  ;;  %v6833_v25 = vpop.xlane.xlu0 %6832 }
 0xea1   : > { %v6865_v47 = vmul.f32 %v6837_v8, %v12785_v55  ;;  %v6863_v18 = vmul.f32 %v6833_v25, %v12785_v55 }
 0xea3   : > { %v13360_v44 = vsub.f32 %v13306_v34, %v6865_v47  ;;  %v13377_v28 = vsub.f32 %v13309_v40, %v6863_v18 }
 0xea5   : > { %v6897_v23 = vmul.f32 %v13360_v44, %v13360_v44  ;;  %v6895_v40 = vmul.f32 %v13377_v28, %v13377_v28 }
 0xea7   : > { %6916 = vadd.xlane.f32.xlu0 %v6897_v23 }
 0xea8   : > { %v6843_v12 = vpop.xlane.xlu2 %6842  ;;  %v6839_v27 = vpop.xlane.xlu0 %6838 }
 0xea9   : > { %v6868_v52 = vmul.f32 %v6843_v12, %v12785_v55  ;;  %v6866_v33 = vmul.f32 %v6839_v27, %v12785_v55 }
 0xeab   : > { %v13365_v38 = vsub.f32 %v6818_v19, %v6868_v52  ;;  %v13396_v37 = vsub.f32 %v13316_v20, %v6866_v33 }
 0xead   : > { %v6900_v17 = vmul.f32 %v13365_v38, %v13365_v38  ;;  %v6898_v11 = vmul.f32 %v13396_v37, %v13396_v37 }
 0xeaf   : > { %6922 = vadd.xlane.f32.xlu0 %v6900_v17 }
 0xeb0   : > { %v6845_v58 = vpop.xlane.xlu0 %6844 }
 0xeb5   : > { %v6758_v54 = vpop.f32.mrf.mxu2 }
 0xeb6   : > { %v6759_v42 = vadd.f32 %v13270_v50, %v6758_v54  ;;  %v6807_v57 = vpop.f32.mrf.mxu3 }
 0xeb8   : > { %v6808_v34 = vadd.f32 %v6807_v57, %v6759_v42 }
 0xeba   : > { %v13372_v16 = vadd.f32 %v6808_v34, %v13235_v1 }
 0xebc   : > { %6858 = vadd.xlane.f32.xlu1 %v13372_v16  ;;  %v6849_v30 = vpop.xlane.xlu2 %6848 }
 0xebd   : > { %v6871_v19 = vmul.f32 %v6849_v30, %v12785_v55  ;;  %v6760_v4 = vpop.f32.mrf.mxu2 }
 0xebe   : > { %v6761_v7 = vadd.f32 %v13270_v50, %v6760_v4  ;;  %v6809_v9 = vpop.f32.mrf.mxu3  ;;  %v13393_v50 = vsub.f32 %v13274_v26, %v6864_v39 }
 0xebf   : > { %v13380_v43 = vsub.f32 %v6821_v62, %v6871_v19  ;;  %v6841_v62 = vpop.xlane.xlu1 %6840 }
 0xec0   : > { %v6810_v61 = vadd.f32 %v6809_v9, %v6761_v7  ;;  %v6867_v13 = vmul.f32 %v6841_v62, %v12785_v55  ;;  %v6896_v31 = vmul.f32 %v13393_v50, %v13393_v50 }
 0xec1   : > { %v6903_v1 = vmul.f32 %v13380_v43, %v13380_v43 }
 0xec2   : > { %v13387_v24 = vadd.f32 %v6810_v61, %v13237_v10  ;;  %v6869_v10 = vmul.f32 %v6845_v58, %v12785_v55  ;;  %v13405_v26 = vsub.f32 %v13289_v45, %v6867_v13 }
 0xec3   : > { %6928 = vadd.xlane.f32.xlu0 %v6903_v1  ;;  %v13459_v1 = vld [vmem:[%s1154_s5] ss:$0 sm:$0xff]  ;;  %s14008_s5 = sld [smem:[#allocation51_spill]] }
 0xec4   : > { %6860 = vadd.xlane.f32.xlu2 %v13387_v24  ;;  %6912 = vadd.xlane.f32.xlu1 %v6895_v40  ;;  %v13408_v20 = vsub.f32 %v13322_v60, %v6869_v10  ;;  %v6899_v0 = vmul.f32 %v13405_v26, %v13405_v26 }
 0xec6   : > { %v6901_v2 = vmul.f32 %v13408_v20, %v13408_v20 }
 0xec7   : > { %v6847_v21 = vpop.xlane.xlu1 %6846 }
 0xec8   : > { %v6870_v32 = vmul.f32 %v6847_v21, %v12785_v55 }
 0xec9   : > { %s7205_s26 = scalar_lea.sflag [#allocation5], %s14008_s5 }
 0xeca   : > { %v13417_v45 = vsub.f32 %v13327_v6, %v6870_v32 }
 0xecc   : > { %6914 = vadd.xlane.f32.xlu2 %v6896_v31  ;;  %6918 = vadd.xlane.f32.xlu1 %v6898_v11  ;;  %v6902_v35 = vmul.f32 %v13417_v45, %v13417_v45 }
 0xed4   : > { %6920 = vadd.xlane.f32.xlu2 %v6899_v0  ;;  %6924 = vadd.xlane.f32.xlu1 %v6901_v2  ;;  %v6851_v29 = vpop.xlane.xlu0 %6850 }
 0xed5   : > { %v6872_v49 = vmul.f32 %v6851_v29, %v12785_v55 }
 0xed7   : > { %v13420_v60 = vsub.f32 %v13334_v59, %v6872_v49 }
 0xed9   : > { %v6904_v36 = vmul.f32 %v13420_v60, %v13420_v60 }
 0xedc   : > { %6926 = vadd.xlane.f32.xlu2 %v6902_v35  ;;  %6930 = vadd.xlane.f32.xlu1 %v6904_v36  ;;  %v6853_v63 = vpop.xlane.xlu1 %6852 }
 0xedd   : > { %v6873_v14 = vmul.f32 %v6853_v63, %v12785_v55 }
 0xedf   : > { %v13428_v46 = vsub.f32 %v13339_v15, %v6873_v14 }
 0xee1   : > { %v6905_v6 = vmul.f32 %v13428_v46, %v13428_v46 }
 0xee4   : > { %6932 = vadd.xlane.f32.xlu2 %v6905_v6 }
 0xef4   : > { %v6855_v59 = vpop.xlane.xlu2 %6854 }
 0xef5   : > { %v6874_v5 = vmul.f32 %v6855_v59, %v12785_v55 }
 0xef7   : > { %v13434_v48 = vsub.f32 %v13344_v56, %v6874_v5 }
 0xef9   : > { %v6906_v3 = vmul.f32 %v13434_v48, %v13434_v48 }
 0xefb   : > { %6934 = vadd.xlane.f32.xlu0 %v6906_v3 }
 0xefc   : > { %v6857_v22 = vpop.xlane.xlu0 %6856 }
 0xefd   : > { %v6875_v8 = vmul.f32 %v6857_v22, %v12785_v55 }
 0xeff   : > { %v13440_v15 = vsub.f32 %v13349_v53, %v6875_v8 }
 0xf01   : > { %v6907_v47 = vmul.f32 %v13440_v15, %v13440_v15 }
 0xf03   : > { %6936 = vadd.xlane.f32.xlu1 %v6907_v47 }
 0xf12   : > { %v6911_v23 = vpop.xlane.xlu0 %6910 }
 0xf13   : > { %v6942_v12 = vmul.f32 %v6911_v23, %v12785_v55 }
 0xf15   : > { %v6958_v52 = vadd.f32 1e-05, %v6942_v12 }
 0xf17   : > { %8791 = vrsqrt.f32 %v6958_v52  ;;  %vm6980_vm10 = vweird.f32 %v6958_v52 }
 0xf1a   : > { %v6917_v56 = vpop.xlane.xlu0 %6916 }
 0xf1b   : > { %v6945_v17 = vmul.f32 %v6917_v56, %v12785_v55 }
 0xf1d   : > { %v8792_v25 = vpop.eup %8791  ;;  %v6961_v54 = vadd.f32 1e-05, %v6945_v17 }
 0xf1e   : > { %v6975_v42 = vmul.f32 %v8792_v25, %v6958_v52  ;;  %vm6981_vm9 = vweird.f32 %v8792_v25 }
 0xf1f   : > { %8793 = vrsqrt.f32 %v6961_v54  ;;  %vm6982_vm11 = vmor %vm6980_vm10, %vm6981_vm9  ;;  %vm7010_vm13 = vweird.f32 %v6961_v54 }
 0xf20   : > { %v6976_v57 = vmul.f32 %v8792_v25, %v6975_v42 }
 0xf22   : > { %v6977_v53 = vmul.f32 0.5, %v6976_v57  ;;  %v6923_v34 = vpop.xlane.xlu0 %6922 }
 0xf23   : > { %v6948_v18 = vmul.f32 %v6923_v34, %v12785_v55 }
 0xf24   : > { %v6978_v30 = vsub.f32 1.5, %v6977_v53 }
 0xf25   : > { %v8794_v27 = vpop.eup %8793  ;;  %v6964_v19 = vadd.f32 1e-05, %v6948_v18 }
 0xf26   : > { %v6979_v4 = vmul.f32 %v8792_v25, %v6978_v30  ;;  %v7005_v7 = vmul.f32 %v8794_v27, %v6961_v54  ;;  %vm7011_vm12 = vweird.f32 %v8794_v27 }
 0xf27   : > { %8795 = vrsqrt.f32 %v6964_v19  ;;  %vm7012_vm14 = vmor %vm7010_vm13, %vm7011_vm12  ;;  %vm7040_vm0 = vweird.f32 %v6964_v19 }
 0xf28   : > { %v6983_v9 = vsel %vm6982_vm11, %v8792_v25, %v6979_v4  ;;  %v7006_v61 = vmul.f32 %v8794_v27, %v7005_v7 }
 0xf29   : > { %v7134_v39 = vmul.f32 %v6983_v9, %v13354_v41 }
 0xf2a   : > { %v7007_v33 = vmul.f32 0.5, %v7006_v61 }
 0xf2b   : > { %v7153_v40 = vmul.f32 %v13452_v51, %v7134_v39 }
 0xf2c   : > { %v7008_v62 = vsub.f32 1.5, %v7007_v33 }
 0xf2d   : > { %v8796_v58 = vpop.eup %8795  ;;  %v7172_v13 = vadd.f32 %v13459_v1, %v7153_v40 }
 0xf2e   : > { %v7009_v10 = vmul.f32 %v8794_v27, %v7008_v62  ;;  %v7035_v31 = vmul.f32 %v8796_v58, %v6964_v19  ;;  %vm7041_vm15 = vweird.f32 %v8796_v58 }
 0xf2f   : > { %7188 = vst [vmem:[%s9836_s7] sm:$0xff] %v7172_v13  ;;  %v6859_v11 = vpop.xlane.xlu1 %6858  ;;  %vm7042_vm1 = vmor %vm7040_vm0, %vm7041_vm15 }
 0xf30   : > { %v7013_v21 = vsel %vm7012_vm14, %v8794_v27, %v7009_v10  ;;  %v7036_v32 = vmul.f32 %v8796_v58, %v7035_v31  ;;  %v6876_v0 = vmul.f32 %v6859_v11, %v12785_v55 }
 0xf31   : > { %v7137_v41 = vmul.f32 %v7013_v21, %v13360_v44 }
 0xf32   : > { %v7037_v2 = vmul.f32 0.5, %v7036_v32  ;;  %v13468_v29 = vsub.f32 %v13372_v16, %v6876_v0 }
 0xf33   : > { %v7156_v49 = vmul.f32 %v13452_v51, %v7137_v41 }
 0xf34   : > { %v7038_v36 = vsub.f32 1.5, %v7037_v2  ;;  %v6908_v35 = vmul.f32 %v13468_v29, %v13468_v29 }
 0xf35   : > { %v7175_v63 = vadd.f32 %v13459_v1, %v7156_v49 }
 0xf36   : > { %v7039_v14 = vmul.f32 %v8796_v58, %v7038_v36  ;;  %6938 = vadd.xlane.f32.xlu2 %v6908_v35  ;;  %v6929_v6 = vpop.xlane.xlu0 %6928 }
 0xf37   : > { %7191 = vst [vmem:[%s9836_s7 + $0x18] sm:$0xff] %v7175_v63  ;;  %v6951_v44 = vmul.f32 %v6929_v6, %v12785_v55  ;;  %v6861_v16 = vpop.xlane.xlu2 %6860  ;;  %v6913_v59 = vpop.xlane.xlu1 %6912 }
 0xf38   : > { %v7043_v5 = vsel %vm7042_vm1, %v8796_v58, %v7039_v14  ;;  %v6877_v3 = vmul.f32 %v6861_v16, %v12785_v55  ;;  %v6943_v22 = vmul.f32 %v6913_v59, %v12785_v55 }
 0xf39   : > { %v7140_v8 = vmul.f32 %v7043_v5, %v13365_v38  ;;  %v6967_v47 = vadd.f32 1e-05, %v6951_v44 }
 0xf3a   : > { %v13480_v23 = vsub.f32 %v13387_v24, %v6877_v3  ;;  %v6959_v12 = vadd.f32 1e-05, %v6943_v22 }
 0xf3b   : > { %v7159_v52 = vmul.f32 %v13452_v51, %v7140_v8  ;;  %8797 = vrsqrt.f32 %v6967_v47  ;;  %vm7070_vm4 = vweird.f32 %v6967_v47 }
 0xf3c   : > { %8799 = vrsqrt.f32 %v6959_v12  ;;  %v6909_v56 = vmul.f32 %v13480_v23, %v13480_v23  ;;  %vm6990_vm6 = vweird.f32 %v6959_v12 }
 0xf3d   : > { %v7178_v17 = vadd.f32 %v13459_v1, %v7159_v52 }
 0xf3e   : > { %6940 = vadd.xlane.f32.xlu0 %v6909_v56 }
 0xf3f   : > { %7194 = vst [vmem:[%s9836_s7 + $0x30] sm:$0xff] %v7178_v17  ;;  %v6915_v25 = vpop.xlane.xlu2 %6914  ;;  %v6919_v54 = vpop.xlane.xlu1 %6918 }
 0xf40   : > { %v6944_v38 = vmul.f32 %v6915_v25, %v12785_v55  ;;  %v6946_v42 = vmul.f32 %v6919_v54, %v12785_v55 }
 0xf41   : > { %v8798_v24 = vpop.eup %8797 }
 0xf42   : > { %v8800_v57 = vpop.eup %8799  ;;  %v7065_v53 = vmul.f32 %v8798_v24, %v6967_v47  ;;  %v6960_v34 = vadd.f32 1e-05, %v6944_v38  ;;  %v13489_v18 = vadd.f32 1e-05, %v6946_v42  ;;  %vm7071_vm2 = vweird.f32 %v8798_v24 }
 0xf43   : > { %v6985_v30 = vmul.f32 %v8800_v57, %v6959_v12  ;;  %vm6991_vm3 = vweird.f32 %v8800_v57  ;;  %vm7072_vm5 = vmor %vm7070_vm4, %vm7071_vm2 }
 0xf44   : > { %v7066_v27 = vmul.f32 %v8798_v24, %v7065_v53  ;;  %8801 = vrsqrt.f32 %v6960_v34  ;;  %vm6992_vm7 = vmor %vm6990_vm6, %vm6991_vm3  ;;  %vm7000_vm10 = vweird.f32 %v6960_v34  ;;  %vm7020_vm12 = vweird.f32 %v13489_v18 }
 0xf45   : > { %v6986_v19 = vmul.f32 %v8800_v57, %v6985_v30  ;;  %8803 = vrsqrt.f32 %v13489_v18 }
 0xf46   : > { %v7067_v4 = vmul.f32 0.5, %v7066_v27 }
 0xf47   : > { %v6987_v7 = vmul.f32 0.5, %v6986_v19  ;;  %v6921_v9 = vpop.xlane.xlu2 %6920  ;;  %v6925_v61 = vpop.xlane.xlu1 %6924 }
 0xf48   : > { %v7068_v39 = vsub.f32 1.5, %v7067_v4  ;;  %v6947_v33 = vmul.f32 %v6921_v9, %v12785_v55  ;;  %v6949_v40 = vmul.f32 %v6925_v61, %v12785_v55 }
 0xf49   : > { %v6988_v62 = vsub.f32 1.5, %v6987_v7 }
 0xf4a   : > { %v8802_v58 = vpop.eup %8801  ;;  %v7069_v13 = vmul.f32 %v8798_v24, %v7068_v39  ;;  %v13494_v10 = vadd.f32 1e-05, %v6947_v33  ;;  %v13496_v31 = vadd.f32 1e-05, %v6949_v40 }
 0xf4b   : > { %v8804_v11 = vpop.eup %8803  ;;  %v6989_v21 = vmul.f32 %v8800_v57, %v6988_v62  ;;  %v6995_v32 = vmul.f32 %v8802_v58, %v6960_v34  ;;  %vm7001_vm8 = vweird.f32 %v8802_v58 }
 0xf4c   : > { %v7073_v0 = vsel %vm7072_vm5, %v8798_v24, %v7069_v13  ;;  %v7015_v41 = vmul.f32 %v8804_v11, %v13489_v18  ;;  %8805 = vrsqrt.f32 %v13494_v10  ;;  %vm7021_vm9 = vweird.f32 %v8804_v11  ;;  %vm7002_vm11 = vmor %vm7000_vm10, %vm7001_vm8 }
 0xf4d   : > { %v7143_v2 = vmul.f32 %v7073_v0, %v13380_v43  ;;  %v6993_v49 = vsel %vm6992_vm7, %v8800_v57, %v6989_v21  ;;  %v6996_v36 = vmul.f32 %v8802_v58, %v6995_v32  ;;  %8807 = vrsqrt.f32 %v13496_v31  ;;  %vm7022_vm13 = vmor %vm7020_vm12, %vm7021_vm9 }
 0xf4e   : > { %v7135_v35 = vmul.f32 %v6993_v49, %v13377_v28  ;;  %v7016_v63 = vmul.f32 %v8804_v11, %v7015_v41  ;;  %vm7030_vm15 = vweird.f32 %v13494_v10  ;;  %vm7050_vm2 = vweird.f32 %v13496_v31 }
 0xf4f   : > { %v7162_v14 = vmul.f32 %v13452_v51, %v7143_v2  ;;  %v6997_v6 = vmul.f32 0.5, %v6996_v36  ;;  %v6927_v44 = vpop.xlane.xlu2 %6926  ;;  %v6931_v16 = vpop.xlane.xlu1 %6930 }
 0xf50   : > { %v7154_v59 = vmul.f32 %v13452_v51, %v7135_v35  ;;  %v7017_v5 = vmul.f32 0.5, %v7016_v63  ;;  %v6950_v3 = vmul.f32 %v6927_v44, %v12785_v55  ;;  %v6952_v43 = vmul.f32 %v6931_v16, %v12785_v55 }
 0xf51   : > { %v7181_v22 = vadd.f32 %v13459_v1, %v7162_v14  ;;  %v6998_v28 = vsub.f32 1.5, %v6997_v6 }
 0xf52   : > { %v8806_v8 = vpop.eup %8805  ;;  %v7173_v47 = vadd.f32 %v13459_v1, %v7154_v59  ;;  %v7018_v12 = vsub.f32 1.5, %v7017_v5  ;;  %v13509_v52 = vadd.f32 1e-05, %v6950_v3  ;;  %v13511_v56 = vadd.f32 1e-05, %v6952_v43 }
 0xf53   : > { %7197 = vst [vmem:[%s9836_s7 + $0x48] sm:$0xff] %v7181_v22  ;;  %v6999_v17 = vmul.f32 %v8802_v58, %v6998_v28  ;;  %v7025_v25 = vmul.f32 %v8806_v8, %v13494_v10  ;;  %v8808_v54 = vpop.eup %8807  ;;  %vm7031_vm14 = vweird.f32 %v8806_v8 }
 0xf54   : > { %7189 = vst [vmem:[%s9836_s7 + $0x8] sm:$0xff] %v7173_v47  ;;  %v7019_v38 = vmul.f32 %v8804_v11, %v7018_v12  ;;  %8809 = vrsqrt.f32 %v13509_v52  ;;  %v7045_v57 = vmul.f32 %v8808_v54, %v13496_v31  ;;  %vm7051_vm0 = vweird.f32 %v8808_v54  ;;  %vm7032_vm1 = vmor %vm7030_vm15, %vm7031_vm14 }
 0xf55   : > { %v7003_v42 = vsel %vm7002_vm11, %v8802_v58, %v6999_v17  ;;  %v7026_v24 = vmul.f32 %v8806_v8, %v7025_v25  ;;  %8811 = vrsqrt.f32 %v13511_v56  ;;  %vm7052_vm3 = vmor %vm7050_vm2, %vm7051_vm0  ;;  %vm7060_vm5 = vweird.f32 %v13509_v52 }
 0xf56   : > { %v7136_v53 = vmul.f32 %v7003_v42, %v13393_v50  ;;  %v7023_v30 = vsel %vm7022_vm13, %v8804_v11, %v7019_v38  ;;  %v7046_v19 = vmul.f32 %v8808_v54, %v7045_v57  ;;  %vm7080_vm8 = vweird.f32 %v13511_v56 }
 0xf57   : > { %v7138_v34 = vmul.f32 %v7023_v30, %v13396_v37  ;;  %v7027_v27 = vmul.f32 0.5, %v7026_v24  ;;  %v6933_v4 = vpop.xlane.xlu2 %6932 }
 0xf58   : > { %v7155_v18 = vmul.f32 %v13452_v51, %v7136_v53  ;;  %v6953_v7 = vmul.f32 %v6933_v4, %v12785_v55  ;;  %v7047_v39 = vmul.f32 0.5, %v7046_v19 }
 0xf59   : > { %v7157_v9 = vmul.f32 %v13452_v51, %v7138_v34  ;;  %v7028_v61 = vsub.f32 1.5, %v7027_v27 }
 0xf5a   : > { %v8810_v50 = vpop.eup %8809  ;;  %v7174_v33 = vadd.f32 %v13459_v1, %v7155_v18  ;;  %v6969_v37 = vadd.f32 1e-05, %v6953_v7  ;;  %v7048_v58 = vsub.f32 1.5, %v7047_v39 }
 0xf5b   : > { %v7176_v40 = vadd.f32 %v13459_v1, %v7157_v9  ;;  %v7029_v62 = vmul.f32 %v8806_v8, %v7028_v61  ;;  %v7055_v13 = vmul.f32 %v8810_v50, %v13509_v52  ;;  %v8812_v11 = vpop.eup %8811  ;;  %vm7061_vm4 = vweird.f32 %v8810_v50 }
 0xf5c   : > { %7190 = vst [vmem:[%s9836_s7 + $0x10] sm:$0xff] %v7174_v33  ;;  %8813 = vrsqrt.f32 %v6969_v37  ;;  %v7049_v32 = vmul.f32 %v8808_v54, %v7048_v58  ;;  %v7075_v10 = vmul.f32 %v8812_v11, %v13511_v56  ;;  %vm7081_vm6 = vweird.f32 %v8812_v11  ;;  %vm7062_vm7 = vmor %vm7060_vm5, %vm7061_vm4 }
 0xf5d   : > { %7192 = vst [vmem:[%s9836_s7 + $0x20] sm:$0xff] %v7176_v40  ;;  %v7033_v21 = vsel %vm7032_vm1, %v8806_v8, %v7029_v62  ;;  %v7056_v0 = vmul.f32 %v8810_v50, %v7055_v13  ;;  %vm7082_vm9 = vmor %vm7080_vm8, %vm7081_vm6  ;;  %vm7090_vm11 = vweird.f32 %v6969_v37 }
 0xf5e   : > { %v7139_v41 = vmul.f32 %v7033_v21, %v13405_v26  ;;  %v7053_v2 = vsel %vm7052_vm3, %v8808_v54, %v7049_v32  ;;  %v7076_v36 = vmul.f32 %v8812_v11, %v7075_v10 }
 0xf5f   : > { %v7057_v49 = vmul.f32 0.5, %v7056_v0  ;;  %v7141_v63 = vmul.f32 %v7053_v2, %v13408_v20 }
 0xf60   : > { %v7158_v35 = vmul.f32 %v13452_v51, %v7139_v41  ;;  %v7077_v14 = vmul.f32 0.5, %v7076_v36 }
 0xf61   : > { %v7058_v31 = vsub.f32 1.5, %v7057_v49  ;;  %v7160_v16 = vmul.f32 %v13452_v51, %v7141_v63 }
 0xf62   : > { %v8814_v6 = vpop.eup %8813  ;;  %v7177_v44 = vadd.f32 %v13459_v1, %v7158_v35  ;;  %v7078_v59 = vsub.f32 1.5, %v7077_v14 }
 0xf63   : > { %v7059_v26 = vmul.f32 %v8810_v50, %v7058_v31  ;;  %v7085_v5 = vmul.f32 %v8814_v6, %v6969_v37  ;;  %v7179_v3 = vadd.f32 %v13459_v1, %v7160_v16  ;;  %vm7091_vm10 = vweird.f32 %v8814_v6 }
 0xf64   : > { %7193 = vst [vmem:[%s9836_s7 + $0x28] sm:$0xff] %v7177_v44  ;;  %v7079_v43 = vmul.f32 %v8812_v11, %v7078_v59  ;;  %vm7092_vm12 = vmor %vm7090_vm11, %vm7091_vm10 }
 0xf65   : > { %v7063_v20 = vsel %vm7062_vm7, %v8810_v50, %v7059_v26  ;;  %v7086_v22 = vmul.f32 %v8814_v6, %v7085_v5  ;;  %7195 = vst [vmem:[%s9836_s7 + $0x38] sm:$0xff] %v7179_v3 }
 0xf66   : > { %v7142_v28 = vmul.f32 %v7063_v20, %v13417_v45  ;;  %v7083_v8 = vsel %vm7082_vm9, %v8812_v11, %v7079_v43 }
 0xf67   : > { %v7087_v47 = vmul.f32 0.5, %v7086_v22  ;;  %v7144_v52 = vmul.f32 %v7083_v8, %v13420_v60 }
 0xf68   : > { %v7161_v12 = vmul.f32 %v13452_v51, %v7142_v28 }
 0xf69   : > { %v7088_v17 = vsub.f32 1.5, %v7087_v47  ;;  %v7163_v54 = vmul.f32 %v13452_v51, %v7144_v52 }
 0xf6a   : > { %v7180_v25 = vadd.f32 %v13459_v1, %v7161_v12 }
 0xf6b   : > { %v7089_v56 = vmul.f32 %v8814_v6, %v7088_v17  ;;  %v7182_v45 = vadd.f32 %v13459_v1, %v7163_v54 }
 0xf6c   : > { %7196 = vst [vmem:[%s9836_s7 + $0x40] sm:$0xff] %v7180_v25 }
 0xf6d   : > { %v7093_v38 = vsel %vm7092_vm12, %v8814_v6, %v7089_v56  ;;  %7198 = vst [vmem:[%s9836_s7 + $0x50] sm:$0xff] %v7182_v45 }
 0xf6e   : > { %v7145_v42 = vmul.f32 %v7093_v38, %v13428_v46  ;;  %v6935_v24 = vpop.xlane.xlu0 %6934 }
 0xf6f   : > { %v6954_v60 = vmul.f32 %v6935_v24, %v12785_v55 }
 0xf70   : > { %v7164_v57 = vmul.f32 %v13452_v51, %v7145_v42 }
 0xf71   : > { %v6970_v53 = vadd.f32 1e-05, %v6954_v60 }
 0xf72   : > { %v7183_v30 = vadd.f32 %v13459_v1, %v7164_v57 }
 0xf73   : > { %8815 = vrsqrt.f32 %v6970_v53  ;;  %vm7100_vm14 = vweird.f32 %v6970_v53 }
 0xf74   : > { %7199 = vst [vmem:[%s9836_s7 + $0x58] sm:$0xff] %v7183_v30 }
 0xf76   : > { %v6937_v34 = vpop.xlane.xlu1 %6936 }
 0xf77   : > { %v6955_v27 = vmul.f32 %v6937_v34, %v12785_v55 }
 0xf79   : > { %v8816_v19 = vpop.eup %8815  ;;  %v6971_v4 = vadd.f32 1e-05, %v6955_v27 }
 0xf7a   : > { %v7095_v18 = vmul.f32 %v8816_v19, %v6970_v53  ;;  %vm7101_vm13 = vweird.f32 %v8816_v19 }
 0xf7b   : > { %8817 = vrsqrt.f32 %v6971_v4  ;;  %vm7102_vm15 = vmor %vm7100_vm14, %vm7101_vm13  ;;  %vm7110_vm1 = vweird.f32 %v6971_v4 }
 0xf7c   : > { %v7096_v7 = vmul.f32 %v8816_v19, %v7095_v18 }
 0xf7e   : > { %v7097_v9 = vmul.f32 0.5, %v7096_v7 }
 0xf80   : > { %v7098_v46 = vsub.f32 1.5, %v7097_v9 }
 0xf81   : > { %v8818_v61 = vpop.eup %8817 }
 0xf82   : > { %v7099_v39 = vmul.f32 %v8816_v19, %v7098_v46  ;;  %v7105_v50 = vmul.f32 %v8818_v61, %v6971_v4  ;;  %vm7111_vm0 = vweird.f32 %v8818_v61 }
 0xf83   : > { %vm7112_vm2 = vmor %vm7110_vm1, %vm7111_vm0 }
 0xf84   : > { %v7103_v33 = vsel %vm7102_vm15, %v8816_v19, %v7099_v39  ;;  %v7106_v37 = vmul.f32 %v8818_v61, %v7105_v50 }
 0xf85   : > { %v7146_v40 = vmul.f32 %v7103_v33, %v13434_v48 }
 0xf86   : > { %v7107_v62 = vmul.f32 0.5, %v7106_v37 }
 0xf87   : > { %v7165_v58 = vmul.f32 %v13452_v51, %v7146_v40 }
 0xf88   : > { %v7108_v13 = vsub.f32 1.5, %v7107_v62 }
 0xf89   : > { %v7184_v11 = vadd.f32 %v13459_v1, %v7165_v58 }
 0xf8a   : > { %v7109_v21 = vmul.f32 %v8818_v61, %v7108_v13 }
 0xf8b   : > { %7200 = vst [vmem:[%s9836_s7 + $0x60] sm:$0xff] %v7184_v11 }
 0xf8c   : > { %v7113_v32 = vsel %vm7112_vm2, %v8818_v61, %v7109_v21 }
 0xf8d   : > { %v7147_v0 = vmul.f32 %v7113_v32, %v13440_v15 }
 0xf8f   : > { %v7166_v10 = vmul.f32 %v13452_v51, %v7147_v0 }
 0xf91   : > { %v7185_v41 = vadd.f32 %v13459_v1, %v7166_v10 }
 0xf93   : > { %7201 = vst [vmem:[%s9836_s7 + $0x68] sm:$0xff] %v7185_v41 }
 0xfa9   : > { %v6939_v48 = vpop.xlane.xlu2 %6938 }
 0xfaa   : > { %v6956_v2 = vmul.f32 %v6939_v48, %v12785_v55 }
 0xfac   : > { %v6972_v49 = vadd.f32 1e-05, %v6956_v2 }
 0xfae   : > { %8819 = vrsqrt.f32 %v6972_v49  ;;  %vm7120_vm4 = vweird.f32 %v6972_v49 }
 0xfb1   : > { %v6941_v36 = vpop.xlane.xlu0 %6940 }
 0xfb2   : > { %v6957_v35 = vmul.f32 %v6941_v36, %v12785_v55 }
 0xfb4   : > { %v8820_v63 = vpop.eup %8819  ;;  %v6973_v31 = vadd.f32 1e-05, %v6957_v35 }
 0xfb5   : > { %v7115_v14 = vmul.f32 %v8820_v63, %v6972_v49  ;;  %vm7121_vm3 = vweird.f32 %v8820_v63 }
 0xfb6   : > { %8821 = vrsqrt.f32 %v6973_v31  ;;  %vm7122_vm5 = vmor %vm7120_vm4, %vm7121_vm3  ;;  %vm7130_vm7 = vweird.f32 %v6973_v31 }
 0xfb7   : > { %v7116_v6 = vmul.f32 %v8820_v63, %v7115_v14 }
 0xfb9   : > { %v7117_v15 = vmul.f32 0.5, %v7116_v6 }
 0xfbb   : > { %v7118_v44 = vsub.f32 1.5, %v7117_v15 }
 0xfbc   : > { %v8822_v16 = vpop.eup %8821 }
 0xfbd   : > { %v7119_v26 = vmul.f32 %v8820_v63, %v7118_v44  ;;  %v7125_v59 = vmul.f32 %v8822_v16, %v6973_v31  ;;  %vm7131_vm6 = vweird.f32 %v8822_v16 }
 0xfbe   : > { %vm7132_vm8 = vmor %vm7130_vm7, %vm7131_vm6 }
 0xfbf   : > { %v7123_v5 = vsel %vm7122_vm5, %v8820_v63, %v7119_v26  ;;  %v7126_v3 = vmul.f32 %v8822_v16, %v7125_v59 }
 0xfc0   : > { %v7148_v55 = vmul.f32 %v7123_v5, %v13468_v29 }
 0xfc1   : > { %v7127_v20 = vmul.f32 0.5, %v7126_v3 }
 0xfc2   : > { %v7167_v43 = vmul.f32 %v13452_v51, %v7148_v55 }
 0xfc3   : > { %v7128_v22 = vsub.f32 1.5, %v7127_v20 }
 0xfc4   : > { %v7186_v28 = vadd.f32 %v13459_v1, %v7167_v43 }
 0xfc5   : > { %v7129_v8 = vmul.f32 %v8822_v16, %v7128_v22 }
 0xfc6   : > { %7202 = vst [vmem:[%s9836_s7 + $0x70] sm:$0xff] %v7186_v28 }
 0xfc7   : > { %v7133_v29 = vsel %vm7132_vm8, %v8822_v16, %v7129_v8 }
 0xfc8   : > { %v7149_v47 = vmul.f32 %v7133_v29, %v13480_v23 }
 0xfca   : > { %v7168_v12 = vmul.f32 %v13452_v51, %v7149_v47 }
 0xfcc   : > { %v7187_v52 = vadd.f32 %v13459_v1, %v7168_v12 }
 0xfce   : > { %7203 = vst [vmem:[%s9836_s7 + $0x78] sm:$0xff] %v7187_v52 }
 0xfcf   : > { %9208 = shalt.err (!%p9205_p2)
}
 0xfd0   : > { %s9341_s7 = smov 128   ;;  %s9342_s0 = smov 8  }
 0xfd1   : > { %8062 = dma.vmem_to_hbm [thread:$0]  (%p9565_p4), %s7218_s29, 2048, %s7220_s30, %s7205_s26, %s9341_s7, %s9341_s7, %s9342_s0  }
 0xfd2 PF: > { %s14012_s10 = sld [smem:[#allocation41_spill]] }
 0xfd3   : > { %s14013_s12 = sld [smem:[#allocation34_spill]] }
 0xfd8   : > { %p8068_p1 = scmp.ge.s32.totalorder %s14012_s10, 2 }
 0xfd9   : > { %s7234_s18 = sand.u32 1, %s14013_s12  }
 0xfda   : > { %p8065_p3 = pnand %p8068_p1, %p9572_p10  ;;  %s7235_s16 = scalar_lea.sflag [#allocation5], %s7234_s18 }
 0xfdc   : > { %p8066_p6 = pneg %p8065_p3 }
 0xfde   : > { %9282 = dma.done.wait (%p8066_p6), %s7235_s16, 2048  }
 0xfdf   : > { %9284 = vsyncadd (%p8066_p6), %s7235_s16, 4294965248  ;;  %s53_s3 = sadd.s32 1, %s14012_s10   ;;  %s14015_s0 = sld [smem:[#allocation32_spill]] }
 0xfe0   : > { %p50_p7 = scmp.ge.s32.totalorder %s53_s3, 6   ;;  %s14016_s30 = sld [smem:[#allocation33_spill]] }
 0xfe1   : > { %s14017_s20 = sld [smem:[#allocation46_spill]] }
 0xfe2   : > { %s14018_s21 = sld [smem:[#allocation35_spill]] }
 0xfe3   : > { %s14019_s1 = sld [smem:[#allocation36_spill]] }
 0xfe4   : > { %s14020_s22 = sld [smem:[#allocation47_spill]]  ;;  %52 = sbr.rel (!%p50_p7) target bundleno = 42 (0x2a), region = 299 }
 0xfe5   : > { %s14021_s2 = sld [smem:[#allocation39_spill]] }
 0xfe6   : > { %s14022_s23 = sld [smem:[#allocation40_spill]] }
 0xfe7   : > { %s14023_s24 = sld [smem:[#allocation43_spill]] }
 0xfe8   : > { %s14024_s25 = sld [smem:[#allocation44_spill]] }
 0xfe9   :  { %7241 = vsyncpa [#allocation4], 1 }
 0xfea   :  { %7243 = vsyncpa [#allocation4 + $0x1], 1 }
 0xfeb   :  { %7244 = vsyncpa [#allocation7], 1 }
 0xfec   :  { %7246 = vsyncpa [#allocation7 + $0x1], 1 }
 0xfed   :  { %7247 = vsyncpa [#allocation10], 1 }
 0xfee   :  { %7249 = vsyncpa [#allocation10 + $0x1], 1 }
 0xfef   :  { %7250 = vsyncpa [#allocation13], 1 }
 0xff0   :  { %7252 = vsyncpa [#allocation13 + $0x1], 1 }
 0xff1   :  { %7253 = vsyncpa [#allocation16], 1 }
 0xff2   :  { %7255 = vsyncpa [#allocation16 + $0x1], 1 }
 0xff3   :  { %7256 = vsyncpa [#allocation19], 1 }
 0xff4   :  { %7258 = vsyncpa [#allocation19 + $0x1], 1 }
 0xff5   :  { %7259 = vsyncpa [#allocation22], 1 }
 0xff6   :  { %7261 = vsyncpa [#allocation22 + $0x1], 1 }
 0xff7   :  { %7262 = vsyncpa [#allocation5], 1 }
 0xff8   :  { %7264 = vsyncpa [#allocation5 + $0x1], 1 }

</bundles_post_ra>
